<compile_context>
chip_gen: v7x
topology: tpu7x:2x2x1
jax: 0.10.0
libtpu: 0.0.40
codegen_flags: <defaults>
</compile_context>

<pallas_src>
import functools

import jax
import jax.numpy as jnp
from jax.experimental import pallas as pl
from jax.experimental.pallas import tpu as pltpu

EPS = 1e-5
_LANES = 128


def _round_up(x, m):
    return (x + m - 1) // m * m


def _double_conv_kernel(xcol_ref, w1_ref, w2_ref, g1_ref, b1_ref, g2_ref,
                        b2_ref, o_ref, h1pad_ref, patch_ref, *, n, h, w, cout,
                        mask1_col, rows1p, inv_m):
    """Fused DoubleConv.

    xcol_ref  : (N*ROWS1P, K1)  bf16  conv1 joint-K im2col over the zero-padded
                                      (H+2, W+2) frame; col `mask1_col` is the
                                      interior indicator, halo/slack rows are 0.
    w1_ref    : (K1, 128)       bf16  conv1 weights, 9-way lane-replicated.
    w2_ref    : (K2, 128)       bf16  conv2 weights, joint-K (tap-major).
    g*/b*_ref : (1, 128)        f32   BN affine params (replicated / padded).
    o_ref     : (N*H*(W+2), 128) f32  padded-width output (garbage cols dropped
                                      by the wrapper).
    h1pad_ref : (N*ROWS1P, 128) f32   scratch: padded BN1+ReLU activations,
                                      lane `9*cout` = validity indicator.
    patch_ref : (N*H*(W+2), K2) bf16  scratch: conv2 joint-K im2col patches.
    """
    wp = w + 2
    rpb = h * wp                 # conv2 rows per batch (padded-width frame)
    ind = 9 * cout               # indicator lane / patch column
    cl = o_ref.shape[-1]

    def bn_relu(acc, g, b, row_mask=None):
        # Training-mode BatchNorm (batch stats, biased variance) + ReLU, in one
        # sweep over the hot f32 accumulator.  Rows excluded from the batch
        # (halo / garbage columns) are either exactly zero or masked out.
        am = acc if row_mask is None else acc * row_mask
        s = jnp.sum(am, axis=0, keepdims=True)
        sq = jnp.sum(am * acc, axis=0, keepdims=True)
        mean = s * inv_m
        var = sq * inv_m - mean * mean
        scale = g * jax.lax.rsqrt(var + EPS)
        shift = b - mean * scale
        return jnp.maximum(acc * scale + shift, 0.0)

    # ---------------- conv1: one (R1, K1) x (K1, 128) bf16 MXU matmul --------
    # Halo / slack rows of xcol are all-zero, so they contribute nothing to the
    # BN1 sums; divide by the true population M = N*H*W.
    acc1 = jnp.dot(xcol_ref[...], w1_ref[...],
                   preferred_element_type=jnp.float32)
    h1 = bn_relu(acc1, g1_ref[...], b1_ref[...])
    # Re-zero halo/slack rows (the BN shift made them nonzero).  The interior
    # indicator rides along as an extra zero-weight column of xcol; BN params
    # are rigged (gamma=0, beta=1) so lane `ind` of h1 becomes that indicator.
    m1 = xcol_ref[:, mask1_col:mask1_col + 1].astype(jnp.float32)
    h1pad_ref[...] = h1 * m1

    # ---------------- conv2 im2col: joint-K patches ---------------------------
    # Every tap is a contiguous sublane-offset slab copy with MATCHING
    # source/destination lane ranges (conv1's channels are 9-way replicated
    # along lanes), so there is no lane rotation and no strided reshape.
    patch_ref[:, ind + 1:] = jnp.zeros(
        (patch_ref.shape[0], cl - ind - 1), patch_ref.dtype)
    for bi in range(n):
        src0 = bi * rows1p
        dst0 = bi * rpb
        for t in range(9):
            off = (t // 3) * wp + (t % 3)
            lo = t * cout
            patch_ref[dst0:dst0 + rpb, lo:lo + cout] = (
                h1pad_ref[src0 + off:src0 + off + rpb, lo:lo + cout]
                .astype(patch_ref.dtype))
        # Row-validity mask for the 2 garbage columns of the padded-width
        # frame = interior indicator shifted by the centre tap (wp + 1).
        coff = wp + 1
        patch_ref[dst0:dst0 + rpb, ind:ind + 1] = (
            h1pad_ref[src0 + coff:src0 + coff + rpb, ind:ind + 1]
            .astype(patch_ref.dtype))

    # ---------------- conv2: one (R2, K2) x (K2, 128) bf16 MXU matmul --------
    acc2 = jnp.dot(patch_ref[...], w2_ref[...],
                   preferred_element_type=jnp.float32)
    m2 = patch_ref[:, ind:ind + 1].astype(jnp.float32)
    o_ref[...] = bn_relu(acc2, g2_ref[...], b2_ref[...], row_mask=m2)


@jax.jit
def double_conv(x_nchw, w1_hwio, w2_hwio, g1, b1, g2, b2):
    """DoubleConv forward. x_nchw: (N, Cin, H, W) f32 -> (N, Cout, H, W) f32."""
    x = jnp.transpose(x_nchw, (0, 2, 3, 1)).astype(jnp.float32)   # NCHW->NHWC
    n, h, w, cin = x.shape
    cout = w1_hwio.shape[-1]
    cl = _LANES
    # Lane-replicated joint-K path needs 9*Cout (+1 indicator lane) <= 128.
    assert 9 * cout + 1 <= cl, "small-Cout demo path only (see TODO above)"

    hp, wp = h + 2, w + 2
    k1 = 9 * cin + 1                      # + interior-indicator column
    k1p = _round_up(k1, cl)               # joint-K padding (128 at demo size)
    rows1 = hp * wp                       # padded-frame rows per batch
    rows1p = _round_up(rows1 + 2, 8)      # +2 rows slack for the last tap view
    rpb = h * wp                          # conv2 rows per batch
    m = n * h * w                         # true BN population

    # --- conv1 joint-K im2col (layout plumbing only; all FLOPs stay in-kernel)
    xpad = jnp.pad(x, ((0, 0), (1, 1), (1, 1), (0, 0)))
    taps = [xpad[:, dh:dh + h, dw:dw + w, :]
            for dh in range(3) for dw in range(3)]
    cols = jnp.concatenate(taps + [jnp.ones((n, h, w, 1), jnp.float32)],
                           axis=-1)                                 # (N,H,W,K1)
    cols = jnp.pad(cols, ((0, 0), (1, 1), (1, 1), (0, k1p - k1)))   # zero halos
    cols = cols.reshape(n, rows1, k1p)
    cols = jnp.pad(cols, ((0, 0), (0, rows1p - rows1), (0, 0)))     # row slack
    xcol = cols.reshape(n * rows1p, k1p).astype(jnp.bfloat16)

    # --- weights: conv1 9-way lane-replicated, conv2 joint-K (tap-major) -----
    w1p = jnp.pad(jnp.tile(w1_hwio.reshape(9 * cin, cout), (1, 9)),
                  ((0, k1p - 9 * cin), (0, cl - 9 * cout))).astype(jnp.bfloat16)
    w2p = jnp.pad(w2_hwio.reshape(9 * cout, cout),
                  ((0, cl - 9 * cout), (0, cl - cout))).astype(jnp.bfloat16)

    # --- BN affine params: BN1 replicated 9x; lane 9*Cout rigged (gamma=0,
    # beta=1) so it carries the interior indicator through BN1+ReLU.
    g1p = jnp.concatenate(
        [jnp.tile(g1, 9), jnp.zeros((cl - 9 * cout,), jnp.float32)])
    b1p = jnp.concatenate(
        [jnp.tile(b1, 9), jnp.ones((1,), jnp.float32),
         jnp.zeros((cl - 9 * cout - 1,), jnp.float32)])
    g2p = jnp.pad(g2, (0, cl - cout))
    b2p = jnp.pad(b2, (0, cl - cout))
    g1p, b1p, g2p, b2p = [a.reshape(1, cl).astype(jnp.float32)
                          for a in (g1p, b1p, g2p, b2p)]

    kernel = functools.partial(
        _double_conv_kernel, n=n, h=h, w=w, cout=cout, mask1_col=9 * cin,
        rows1p=rows1p, inv_m=1.0 / m)

    # vmem limit derived from the actual operand/scratch footprint (+headroom
    # for live f32 accumulators and compiler scratch).
    io_bytes = (n * rows1p * k1p * 2            # xcol (bf16)
                + 2 * k1p * cl * 2              # weights (bf16)
                + 4 * cl * 4                    # BN params
                + n * rpb * cl * 4              # output (f32)
                + n * rows1p * cl * 4           # h1pad scratch (f32)
                + n * rpb * cl * 2)             # patch scratch (bf16)
    vmem_limit = int(min(2 * io_bytes + (16 << 20), 100 << 20))

    vmem = pl.BlockSpec(memory_space=pltpu.MemorySpace.VMEM)
    out2d = pl.pallas_call(
        kernel,
        out_shape=jax.ShapeDtypeStruct((n * rpb, cl), jnp.float32),
        in_specs=[vmem] * 7,
        out_specs=vmem,
        scratch_shapes=[
            pltpu.VMEM((n * rows1p, cl), jnp.float32),   # padded h1 (replicated)
            pltpu.VMEM((n * rpb, cl), jnp.bfloat16),     # conv2 joint-K patches
        ],
        compiler_params=pltpu.CompilerParams(vmem_limit_bytes=vmem_limit),
    )(xcol, w1p, w2p, g1p, b1p, g2p, b2p)

    # Drop the 2 garbage padded-width columns + padded lanes, back to NCHW.
    out = out2d.reshape(n, h, wp, cl)[:, :, :w, :cout]
    return jnp.transpose(out, (0, 3, 1, 2))


# ------------------------------ pure-JAX reference ------------------------------
def _ref_double_conv(x_nchw, w1_hwio, w2_hwio, g1, b1, g2, b2):
    # Mirrors the kernel's declared numerics: bf16 conv operands, f32
    # accumulation, f32 training-mode BatchNorm + ReLU.
    x = jnp.transpose(x_nchw, (0, 2, 3, 1))

    def conv(y, w):
        return jax.lax.conv_general_dilated(
            y.astype(jnp.bfloat16), w.astype(jnp.bfloat16),
            window_strides=(1, 1), padding="SAME",
            dimension_numbers=("NHWC", "HWIO", "NHWC"),
            preferred_element_type=jnp.float32)

    def bn_relu(y, g, b):
        mean = jnp.mean(y, axis=(0, 1, 2), keepdims=True)
        var = jnp.mean((y - mean) ** 2, axis=(0, 1, 2), keepdims=True)
        return jnp.maximum((y - mean) * (g * jax.lax.rsqrt(var + EPS)) + b, 0.0)

    y = bn_relu(conv(x, w1_hwio), g1, b1)
    y = bn_relu(conv(y, w2_hwio), g2, b2)
    return jnp.transpose(y, (0, 3, 1, 2))


if __name__ == "__main__":
    N, Cin, Cout, H, W = 2, 4, 8, 16, 16

    key = jax.random.PRNGKey(0)
    kx, kw1, kw2, kg1, kb1, kg2, kb2 = jax.random.split(key, 7)

    x = jax.random.normal(kx, (N, Cin, H, W), jnp.float32)
    # Conv weights (HWIO); deterministic synthetic init (no checkpoint load).
    w1 = 0.1 * jax.random.normal(kw1, (3, 3, Cin, Cout), jnp.float32)
    w2 = 0.1 * jax.random.normal(kw2, (3, 3, Cout, Cout), jnp.float32)
    # BatchNorm affine params (perturbed around PyTorch defaults 1 / 0).
    g1 = 1.0 + 0.1 * jax.random.normal(kg1, (Cout,), jnp.float32)
    b1 = 0.1 * jax.random.normal(kb1, (Cout,), jnp.float32)
    g2 = 1.0 + 0.1 * jax.random.normal(kg2, (Cout,), jnp.float32)
    b2 = 0.1 * jax.random.normal(kb2, (Cout,), jnp.float32)

    out = jax.block_until_ready(double_conv(x, w1, w2, g1, b1, g2, b2))
    ref = _ref_double_conv(x, w1, w2, g1, b1, g2, b2)

    assert out.shape == (N, Cout, H, W), out.shape
    # Tolerance sized for bf16-operand rounding (independent rounding points in
    # kernel vs XLA conv, incl. rare 1-ulp flips of the bf16 intermediate h1);
    # structural/indexing bugs would show up as O(0.1-1) errors.
    assert jnp.allclose(out, ref, atol=3e-2, rtol=3e-2), (
        float(jnp.max(jnp.abs(out - ref))))

    print("KERNEL_OK")
</pallas_src>

<mosaic_0001>
module attributes {stable_mosaic.version = 11 : i64} {
  func.func @_double_conv_kernel(%arg0: memref<656x128xbf16, #tpu.memory_space<vmem>>, %arg1: memref<128x128xbf16, #tpu.memory_space<vmem>>, %arg2: memref<128x128xbf16, #tpu.memory_space<vmem>>, %arg3: memref<1x128xf32, #tpu.memory_space<vmem>>, %arg4: memref<1x128xf32, #tpu.memory_space<vmem>>, %arg5: memref<1x128xf32, #tpu.memory_space<vmem>>, %arg6: memref<1x128xf32, #tpu.memory_space<vmem>>, %arg7: memref<576x128xf32, #tpu.memory_space<vmem>>, %arg8: memref<656x128xf32, #tpu.memory_space<vmem>>, %arg9: memref<576x128xbf16, #tpu.memory_space<vmem>>) attributes {dimension_semantics = [], scalar_prefetch = 0 : i64, scratch_operands = 2 : i64, tpu.core_type = #tpu.core_type<tc>} {
    %c0 = arith.constant 0 : index
    %c0_0 = arith.constant 0 : index
    %0 = vector.load %arg0[%c0, %c0_0] : memref<656x128xbf16, #tpu.memory_space<vmem>>, vector<656x128xbf16>
    %c0_1 = arith.constant 0 : index
    %c0_2 = arith.constant 0 : index
    %1 = vector.load %arg1[%c0_1, %c0_2] : memref<128x128xbf16, #tpu.memory_space<vmem>>, vector<128x128xbf16>
    %cst = arith.constant dense<0.000000e+00> : vector<656x128xf32>
    %2 = tpu.matmul %0, %1, %cst {dimension_numbers = #tpu.dot_dimension_numbers<[1], [0], [0], [1], [0, 0, 1, 1], [], []>} : vector<656x128xbf16>, vector<128x128xbf16>, vector<656x128xf32> -> vector<656x128xf32>
    %c0_3 = arith.constant 0 : index
    %c0_4 = arith.constant 0 : index
    %3 = vector.load %arg3[%c0_3, %c0_4] : memref<1x128xf32, #tpu.memory_space<vmem>>, vector<1x128xf32>
    %c0_5 = arith.constant 0 : index
    %c0_6 = arith.constant 0 : index
    %4 = vector.load %arg4[%c0_5, %c0_6] : memref<1x128xf32, #tpu.memory_space<vmem>>, vector<1x128xf32>
    %cst_7 = arith.constant dense<0.000000e+00> : vector<128xf32>
    %5 = vector.multi_reduction <add>, %2, %cst_7 [0] : vector<656x128xf32> to vector<128xf32>
    %6 = vector.shape_cast %5 : vector<128xf32> to vector<1x128xf32>
    %7 = arith.mulf %2, %2 : vector<656x128xf32>
    %cst_8 = arith.constant dense<0.000000e+00> : vector<128xf32>
    %8 = vector.multi_reduction <add>, %7, %cst_8 [0] : vector<656x128xf32> to vector<128xf32>
    %9 = vector.shape_cast %8 : vector<128xf32> to vector<1x128xf32>
    %cst_9 = arith.constant 0.001953125 : f32
    %10 = vector.broadcast %cst_9 : f32 to vector<1x128xf32>
    %11 = arith.mulf %6, %10 : vector<1x128xf32>
    %cst_10 = arith.constant 0.001953125 : f32
    %12 = vector.broadcast %cst_10 : f32 to vector<1x128xf32>
    %13 = arith.mulf %9, %12 : vector<1x128xf32>
    %14 = arith.mulf %11, %11 : vector<1x128xf32>
    %15 = arith.subf %13, %14 : vector<1x128xf32>
    %cst_11 = arith.constant 9.99999974E-6 : f32
    %16 = vector.broadcast %cst_11 : f32 to vector<1x128xf32>
    %17 = arith.addf %15, %16 : vector<1x128xf32>
    %18 = math.rsqrt %17 : vector<1x128xf32>
    %19 = arith.mulf %3, %18 : vector<1x128xf32>
    %20 = arith.mulf %11, %19 : vector<1x128xf32>
    %21 = arith.subf %4, %20 : vector<1x128xf32>
    %22 = vector.broadcast %19 : vector<1x128xf32> to vector<656x128xf32>
    %23 = arith.mulf %2, %22 : vector<656x128xf32>
    %24 = vector.broadcast %21 : vector<1x128xf32> to vector<656x128xf32>
    %25 = arith.addf %23, %24 : vector<656x128xf32>
    %cst_12 = arith.constant 0.000000e+00 : f32
    %26 = vector.broadcast %cst_12 : f32 to vector<656x128xf32>
    %27 = arith.maximumf %25, %26 : vector<656x128xf32>
    %c0_13 = arith.constant 0 : index
    %c36 = arith.constant 36 : index
    %28 = vector.load %arg0[%c0_13, %c36] : memref<656x128xbf16, #tpu.memory_space<vmem>>, vector<656x1xbf16>
    %29 = arith.extf %28 : vector<656x1xbf16> to vector<656x1xf32>
    %30 = vector.broadcast %29 : vector<656x1xf32> to vector<656x128xf32>
    %31 = arith.mulf %27, %30 : vector<656x128xf32>
    %c0_14 = arith.constant 0 : index
    %c0_15 = arith.constant 0 : index
    %32 = vector.load %arg8[%c0_14, %c0_15] : memref<656x128xf32, #tpu.memory_space<vmem>>, vector<656x128xf32>
    tpu.vector_store %arg8[%c0_14, %c0_15], %31 {strides = array<i32>} : memref<656x128xf32, #tpu.memory_space<vmem>>, vector<656x128xf32>,
    %cst_16 = arith.constant 0.000000e+00 : bf16
    %33 = vector.broadcast %cst_16 : bf16 to vector<576x55xbf16>
    %c0_17 = arith.constant 0 : index
    %c73 = arith.constant 73 : index
    %34 = vector.load %arg9[%c0_17, %c73] : memref<576x128xbf16, #tpu.memory_space<vmem>>, vector<576x55xbf16>
    tpu.vector_store %arg9[%c0_17, %c73], %33 {strides = array<i32>} : memref<576x128xbf16, #tpu.memory_space<vmem>>, vector<576x55xbf16>,
    %c0_18 = arith.constant 0 : index
    %c0_19 = arith.constant 0 : index
    %35 = vector.load %arg8[%c0_18, %c0_19] : memref<656x128xf32, #tpu.memory_space<vmem>>, vector<288x8xf32>
    %36 = arith.truncf %35 : vector<288x8xf32> to vector<288x8xbf16>
    %c0_20 = arith.constant 0 : index
    %c0_21 = arith.constant 0 : index
    %37 = vector.load %arg9[%c0_20, %c0_21] : memref<576x128xbf16, #tpu.memory_space<vmem>>, vector<288x8xbf16>
    tpu.vector_store %arg9[%c0_20, %c0_21], %36 {strides = array<i32>} : memref<576x128xbf16, #tpu.memory_space<vmem>>, vector<288x8xbf16>,
    %c1 = arith.constant 1 : index
    %c8 = arith.constant 8 : index
    %38 = vector.load %arg8[%c1, %c8] : memref<656x128xf32, #tpu.memory_space<vmem>>, vector<288x8xf32>
    %39 = arith.truncf %38 : vector<288x8xf32> to vector<288x8xbf16>
    %c0_22 = arith.constant 0 : index
    %c8_23 = arith.constant 8 : index
    %40 = vector.load %arg9[%c0_22, %c8_23] : memref<576x128xbf16, #tpu.memory_space<vmem>>, vector<288x8xbf16>
    tpu.vector_store %arg9[%c0_22, %c8_23], %39 {strides = array<i32>} : memref<576x128xbf16, #tpu.memory_space<vmem>>, vector<288x8xbf16>,
    %c2 = arith.constant 2 : index
    %c16 = arith.constant 16 : index
    %41 = vector.load %arg8[%c2, %c16] : memref<656x128xf32, #tpu.memory_space<vmem>>, vector<288x8xf32>
    %42 = arith.truncf %41 : vector<288x8xf32> to vector<288x8xbf16>
    %c0_24 = arith.constant 0 : index
    %c16_25 = arith.constant 16 : index
    %43 = vector.load %arg9[%c0_24, %c16_25] : memref<576x128xbf16, #tpu.memory_space<vmem>>, vector<288x8xbf16>
    tpu.vector_store %arg9[%c0_24, %c16_25], %42 {strides = array<i32>} : memref<576x128xbf16, #tpu.memory_space<vmem>>, vector<288x8xbf16>,
    %c18 = arith.constant 18 : index
    %c24 = arith.constant 24 : index
    %44 = vector.load %arg8[%c18, %c24] : memref<656x128xf32, #tpu.memory_space<vmem>>, vector<288x8xf32>
    %45 = arith.truncf %44 : vector<288x8xf32> to vector<288x8xbf16>
    %c0_26 = arith.constant 0 : index
    %c24_27 = arith.constant 24 : index
    %46 = vector.load %arg9[%c0_26, %c24_27] : memref<576x128xbf16, #tpu.memory_space<vmem>>, vector<288x8xbf16>
    tpu.vector_store %arg9[%c0_26, %c24_27], %45 {strides = array<i32>} : memref<576x128xbf16, #tpu.memory_space<vmem>>, vector<288x8xbf16>,
    %c19 = arith.constant 19 : index
    %c32 = arith.constant 32 : index
    %47 = vector.load %arg8[%c19, %c32] : memref<656x128xf32, #tpu.memory_space<vmem>>, vector<288x8xf32>
    %48 = arith.truncf %47 : vector<288x8xf32> to vector<288x8xbf16>
    %c0_28 = arith.constant 0 : index
    %c32_29 = arith.constant 32 : index
    %49 = vector.load %arg9[%c0_28, %c32_29] : memref<576x128xbf16, #tpu.memory_space<vmem>>, vector<288x8xbf16>
    tpu.vector_store %arg9[%c0_28, %c32_29], %48 {strides = array<i32>} : memref<576x128xbf16, #tpu.memory_space<vmem>>, vector<288x8xbf16>,
    %c20 = arith.constant 20 : index
    %c40 = arith.constant 40 : index
    %50 = vector.load %arg8[%c20, %c40] : memref<656x128xf32, #tpu.memory_space<vmem>>, vector<288x8xf32>
    %51 = arith.truncf %50 : vector<288x8xf32> to vector<288x8xbf16>
    %c0_30 = arith.constant 0 : index
    %c40_31 = arith.constant 40 : index
    %52 = vector.load %arg9[%c0_30, %c40_31] : memref<576x128xbf16, #tpu.memory_space<vmem>>, vector<288x8xbf16>
    tpu.vector_store %arg9[%c0_30, %c40_31], %51 {strides = array<i32>} : memref<576x128xbf16, #tpu.memory_space<vmem>>, vector<288x8xbf16>,
    %c36_32 = arith.constant 36 : index
    %c48 = arith.constant 48 : index
    %53 = vector.load %arg8[%c36_32, %c48] : memref<656x128xf32, #tpu.memory_space<vmem>>, vector<288x8xf32>
    %54 = arith.truncf %53 : vector<288x8xf32> to vector<288x8xbf16>
    %c0_33 = arith.constant 0 : index
    %c48_34 = arith.constant 48 : index
    %55 = vector.load %arg9[%c0_33, %c48_34] : memref<576x128xbf16, #tpu.memory_space<vmem>>, vector<288x8xbf16>
    tpu.vector_store %arg9[%c0_33, %c48_34], %54 {strides = array<i32>} : memref<576x128xbf16, #tpu.memory_space<vmem>>, vector<288x8xbf16>,
    %c37 = arith.constant 37 : index
    %c56 = arith.constant 56 : index
    %56 = vector.load %arg8[%c37, %c56] : memref<656x128xf32, #tpu.memory_space<vmem>>, vector<288x8xf32>
    %57 = arith.truncf %56 : vector<288x8xf32> to vector<288x8xbf16>
    %c0_35 = arith.constant 0 : index
    %c56_36 = arith.constant 56 : index
    %58 = vector.load %arg9[%c0_35, %c56_36] : memref<576x128xbf16, #tpu.memory_space<vmem>>, vector<288x8xbf16>
    tpu.vector_store %arg9[%c0_35, %c56_36], %57 {strides = array<i32>} : memref<576x128xbf16, #tpu.memory_space<vmem>>, vector<288x8xbf16>,
    %c38 = arith.constant 38 : index
    %c64 = arith.constant 64 : index
    %59 = vector.load %arg8[%c38, %c64] : memref<656x128xf32, #tpu.memory_space<vmem>>, vector<288x8xf32>
    %60 = arith.truncf %59 : vector<288x8xf32> to vector<288x8xbf16>
    %c0_37 = arith.constant 0 : index
    %c64_38 = arith.constant 64 : index
    %61 = vector.load %arg9[%c0_37, %c64_38] : memref<576x128xbf16, #tpu.memory_space<vmem>>, vector<288x8xbf16>
    tpu.vector_store %arg9[%c0_37, %c64_38], %60 {strides = array<i32>} : memref<576x128xbf16, #tpu.memory_space<vmem>>, vector<288x8xbf16>,
    %c19_39 = arith.constant 19 : index
    %c72 = arith.constant 72 : index
    %62 = vector.load %arg8[%c19_39, %c72] : memref<656x128xf32, #tpu.memory_space<vmem>>, vector<288x1xf32>
    %63 = arith.truncf %62 : vector<288x1xf32> to vector<288x1xbf16>
    %c0_40 = arith.constant 0 : index
    %c72_41 = arith.constant 72 : index
    %64 = vector.load %arg9[%c0_40, %c72_41] : memref<576x128xbf16, #tpu.memory_space<vmem>>, vector<288x1xbf16>
    tpu.vector_store %arg9[%c0_40, %c72_41], %63 {strides = array<i32>} : memref<576x128xbf16, #tpu.memory_space<vmem>>, vector<288x1xbf16>,
    %c328 = arith.constant 328 : index
    %c0_42 = arith.constant 0 : index
    %65 = vector.load %arg8[%c328, %c0_42] : memref<656x128xf32, #tpu.memory_space<vmem>>, vector<288x8xf32>
    %66 = arith.truncf %65 : vector<288x8xf32> to vector<288x8xbf16>
    %c288 = arith.constant 288 : index
    %c0_43 = arith.constant 0 : index
    %67 = vector.load %arg9[%c288, %c0_43] : memref<576x128xbf16, #tpu.memory_space<vmem>>, vector<288x8xbf16>
    tpu.vector_store %arg9[%c288, %c0_43], %66 {strides = array<i32>} : memref<576x128xbf16, #tpu.memory_space<vmem>>, vector<288x8xbf16>,
    %c329 = arith.constant 329 : index
    %c8_44 = arith.constant 8 : index
    %68 = vector.load %arg8[%c329, %c8_44] : memref<656x128xf32, #tpu.memory_space<vmem>>, vector<288x8xf32>
    %69 = arith.truncf %68 : vector<288x8xf32> to vector<288x8xbf16>
    %c288_45 = arith.constant 288 : index
    %c8_46 = arith.constant 8 : index
    %70 = vector.load %arg9[%c288_45, %c8_46] : memref<576x128xbf16, #tpu.memory_space<vmem>>, vector<288x8xbf16>
    tpu.vector_store %arg9[%c288_45, %c8_46], %69 {strides = array<i32>} : memref<576x128xbf16, #tpu.memory_space<vmem>>, vector<288x8xbf16>,
    %c330 = arith.constant 330 : index
    %c16_47 = arith.constant 16 : index
    %71 = vector.load %arg8[%c330, %c16_47] : memref<656x128xf32, #tpu.memory_space<vmem>>, vector<288x8xf32>
    %72 = arith.truncf %71 : vector<288x8xf32> to vector<288x8xbf16>
    %c288_48 = arith.constant 288 : index
    %c16_49 = arith.constant 16 : index
    %73 = vector.load %arg9[%c288_48, %c16_49] : memref<576x128xbf16, #tpu.memory_space<vmem>>, vector<288x8xbf16>
    tpu.vector_store %arg9[%c288_48, %c16_49], %72 {strides = array<i32>} : memref<576x128xbf16, #tpu.memory_space<vmem>>, vector<288x8xbf16>,
    %c346 = arith.constant 346 : index
    %c24_50 = arith.constant 24 : index
    %74 = vector.load %arg8[%c346, %c24_50] : memref<656x128xf32, #tpu.memory_space<vmem>>, vector<288x8xf32>
    %75 = arith.truncf %74 : vector<288x8xf32> to vector<288x8xbf16>
    %c288_51 = arith.constant 288 : index
    %c24_52 = arith.constant 24 : index
    %76 = vector.load %arg9[%c288_51, %c24_52] : memref<576x128xbf16, #tpu.memory_space<vmem>>, vector<288x8xbf16>
    tpu.vector_store %arg9[%c288_51, %c24_52], %75 {strides = array<i32>} : memref<576x128xbf16, #tpu.memory_space<vmem>>, vector<288x8xbf16>,
    %c347 = arith.constant 347 : index
    %c32_53 = arith.constant 32 : index
    %77 = vector.load %arg8[%c347, %c32_53] : memref<656x128xf32, #tpu.memory_space<vmem>>, vector<288x8xf32>
    %78 = arith.truncf %77 : vector<288x8xf32> to vector<288x8xbf16>
    %c288_54 = arith.constant 288 : index
    %c32_55 = arith.constant 32 : index
    %79 = vector.load %arg9[%c288_54, %c32_55] : memref<576x128xbf16, #tpu.memory_space<vmem>>, vector<288x8xbf16>
    tpu.vector_store %arg9[%c288_54, %c32_55], %78 {strides = array<i32>} : memref<576x128xbf16, #tpu.memory_space<vmem>>, vector<288x8xbf16>,
    %c348 = arith.constant 348 : index
    %c40_56 = arith.constant 40 : index
    %80 = vector.load %arg8[%c348, %c40_56] : memref<656x128xf32, #tpu.memory_space<vmem>>, vector<288x8xf32>
    %81 = arith.truncf %80 : vector<288x8xf32> to vector<288x8xbf16>
    %c288_57 = arith.constant 288 : index
    %c40_58 = arith.constant 40 : index
    %82 = vector.load %arg9[%c288_57, %c40_58] : memref<576x128xbf16, #tpu.memory_space<vmem>>, vector<288x8xbf16>
    tpu.vector_store %arg9[%c288_57, %c40_58], %81 {strides = array<i32>} : memref<576x128xbf16, #tpu.memory_space<vmem>>, vector<288x8xbf16>,
    %c364 = arith.constant 364 : index
    %c48_59 = arith.constant 48 : index
    %83 = vector.load %arg8[%c364, %c48_59] : memref<656x128xf32, #tpu.memory_space<vmem>>, vector<288x8xf32>
    %84 = arith.truncf %83 : vector<288x8xf32> to vector<288x8xbf16>
    %c288_60 = arith.constant 288 : index
    %c48_61 = arith.constant 48 : index
    %85 = vector.load %arg9[%c288_60, %c48_61] : memref<576x128xbf16, #tpu.memory_space<vmem>>, vector<288x8xbf16>
    tpu.vector_store %arg9[%c288_60, %c48_61], %84 {strides = array<i32>} : memref<576x128xbf16, #tpu.memory_space<vmem>>, vector<288x8xbf16>,
    %c365 = arith.constant 365 : index
    %c56_62 = arith.constant 56 : index
    %86 = vector.load %arg8[%c365, %c56_62] : memref<656x128xf32, #tpu.memory_space<vmem>>, vector<288x8xf32>
    %87 = arith.truncf %86 : vector<288x8xf32> to vector<288x8xbf16>
    %c288_63 = arith.constant 288 : index
    %c56_64 = arith.constant 56 : index
    %88 = vector.load %arg9[%c288_63, %c56_64] : memref<576x128xbf16, #tpu.memory_space<vmem>>, vector<288x8xbf16>
    tpu.vector_store %arg9[%c288_63, %c56_64], %87 {strides = array<i32>} : memref<576x128xbf16, #tpu.memory_space<vmem>>, vector<288x8xbf16>,
    %c366 = arith.constant 366 : index
    %c64_65 = arith.constant 64 : index
    %89 = vector.load %arg8[%c366, %c64_65] : memref<656x128xf32, #tpu.memory_space<vmem>>, vector<288x8xf32>
    %90 = arith.truncf %89 : vector<288x8xf32> to vector<288x8xbf16>
    %c288_66 = arith.constant 288 : index
    %c64_67 = arith.constant 64 : index
    %91 = vector.load %arg9[%c288_66, %c64_67] : memref<576x128xbf16, #tpu.memory_space<vmem>>, vector<288x8xbf16>
    tpu.vector_store %arg9[%c288_66, %c64_67], %90 {strides = array<i32>} : memref<576x128xbf16, #tpu.memory_space<vmem>>, vector<288x8xbf16>,
    %c347_68 = arith.constant 347 : index
    %c72_69 = arith.constant 72 : index
    %92 = vector.load %arg8[%c347_68, %c72_69] : memref<656x128xf32, #tpu.memory_space<vmem>>, vector<288x1xf32>
    %93 = arith.truncf %92 : vector<288x1xf32> to vector<288x1xbf16>
    %c288_70 = arith.constant 288 : index
    %c72_71 = arith.constant 72 : index
    %94 = vector.load %arg9[%c288_70, %c72_71] : memref<576x128xbf16, #tpu.memory_space<vmem>>, vector<288x1xbf16>
    tpu.vector_store %arg9[%c288_70, %c72_71], %93 {strides = array<i32>} : memref<576x128xbf16, #tpu.memory_space<vmem>>, vector<288x1xbf16>,
    %c0_72 = arith.constant 0 : index
    %c0_73 = arith.constant 0 : index
    %95 = vector.load %arg9[%c0_72, %c0_73] : memref<576x128xbf16, #tpu.memory_space<vmem>>, vector<576x128xbf16>
    %c0_74 = arith.constant 0 : index
    %c0_75 = arith.constant 0 : index
    %96 = vector.load %arg2[%c0_74, %c0_75] : memref<128x128xbf16, #tpu.memory_space<vmem>>, vector<128x128xbf16>
    %cst_76 = arith.constant dense<0.000000e+00> : vector<576x128xf32>
    %97 = tpu.matmul %95, %96, %cst_76 {dimension_numbers = #tpu.dot_dimension_numbers<[1], [0], [0], [1], [0, 0, 1, 1], [], []>} : vector<576x128xbf16>, vector<128x128xbf16>, vector<576x128xf32> -> vector<576x128xf32>
    %c0_77 = arith.constant 0 : index
    %c72_78 = arith.constant 72 : index
    %98 = vector.load %arg9[%c0_77, %c72_78] : memref<576x128xbf16, #tpu.memory_space<vmem>>, vector<576x1xbf16>
    %99 = arith.extf %98 : vector<576x1xbf16> to vector<576x1xf32>
    %c0_79 = arith.constant 0 : index
    %c0_80 = arith.constant 0 : index
    %100 = vector.load %arg5[%c0_79, %c0_80] : memref<1x128xf32, #tpu.memory_space<vmem>>, vector<1x128xf32>
    %c0_81 = arith.constant 0 : index
    %c0_82 = arith.constant 0 : index
    %101 = vector.load %arg6[%c0_81, %c0_82] : memref<1x128xf32, #tpu.memory_space<vmem>>, vector<1x128xf32>
    %102 = vector.broadcast %99 : vector<576x1xf32> to vector<576x128xf32>
    %103 = arith.mulf %97, %102 : vector<576x128xf32>
    %cst_83 = arith.constant dense<0.000000e+00> : vector<128xf32>
    %104 = vector.multi_reduction <add>, %103, %cst_83 [0] : vector<576x128xf32> to vector<128xf32>
    %105 = vector.shape_cast %104 : vector<128xf32> to vector<1x128xf32>
    %106 = arith.mulf %103, %97 : vector<576x128xf32>
    %cst_84 = arith.constant dense<0.000000e+00> : vector<128xf32>
    %107 = vector.multi_reduction <add>, %106, %cst_84 [0] : vector<576x128xf32> to vector<128xf32>
    %108 = vector.shape_cast %107 : vector<128xf32> to vector<1x128xf32>
    %cst_85 = arith.constant 0.001953125 : f32
    %109 = vector.broadcast %cst_85 : f32 to vector<1x128xf32>
    %110 = arith.mulf %105, %109 : vector<1x128xf32>
    %cst_86 = arith.constant 0.001953125 : f32
    %111 = vector.broadcast %cst_86 : f32 to vector<1x128xf32>
    %112 = arith.mulf %108, %111 : vector<1x128xf32>
    %113 = arith.mulf %110, %110 : vector<1x128xf32>
    %114 = arith.subf %112, %113 : vector<1x128xf32>
    %cst_87 = arith.constant 9.99999974E-6 : f32
    %115 = vector.broadcast %cst_87 : f32 to vector<1x128xf32>
    %116 = arith.addf %114, %115 : vector<1x128xf32>
    %117 = math.rsqrt %116 : vector<1x128xf32>
    %118 = arith.mulf %100, %117 : vector<1x128xf32>
    %119 = arith.mulf %110, %118 : vector<1x128xf32>
    %120 = arith.subf %101, %119 : vector<1x128xf32>
    %121 = vector.broadcast %118 : vector<1x128xf32> to vector<576x128xf32>
    %122 = arith.mulf %97, %121 : vector<576x128xf32>
    %123 = vector.broadcast %120 : vector<1x128xf32> to vector<576x128xf32>
    %124 = arith.addf %122, %123 : vector<576x128xf32>
    %cst_88 = arith.constant 0.000000e+00 : f32
    %125 = vector.broadcast %cst_88 : f32 to vector<576x128xf32>
    %126 = arith.maximumf %124, %125 : vector<576x128xf32>
    %c0_89 = arith.constant 0 : index
    %c0_90 = arith.constant 0 : index
    %127 = vector.load %arg7[%c0_89, %c0_90] : memref<576x128xf32, #tpu.memory_space<vmem>>, vector<576x128xf32>
    tpu.vector_store %arg7[%c0_89, %c0_90], %126 {strides = array<i32>} : memref<576x128xf32, #tpu.memory_space<vmem>>, vector<576x128xf32>,
    return
  }
}

</mosaic_0001>

<bundles_post_ra>
// kernel: tile.21
= control target key start
LH: loop header
LB: loop body
LE: loop exit
PB: predicated region body
PF: predicated region fallthrough
CT: control target
= control target key end

     0   :  { %s28_s0 = inlined_call_operand.vmem [shape: f32[8], index: 0, kind: input, shape index: {}]   ;;  %s29_s1 = inlined_call_operand.vmem [shape: f32[9,8], index: 1, kind: output, shape index: {}]  }
   0x1   :  { %v4_v0 = vld [vmem:[%s28_s0] ss:$0 sm:$0xff] }
   0x2   :  { %5 = vst [vmem:[%s29_s1] sm:$0xff] %v4_v0  ;;  %8 = vst [vmem:[%s29_s1 + $0x8] sm:$0xff] %v4_v0 }

// kernel: tile.22
= control target key start
LH: loop header
LB: loop body
LE: loop exit
PB: predicated region body
PF: predicated region fallthrough
CT: control target
= control target key end

     0   :  { %s75_s10 = smov 64   ;;  %s76_s11 = smov 48   ;;  %vm3_vm0 = vcmask 64512   ;;  %vm9_vm1 = vcmask 589312   ;;  %vm15_vm2 = vcmask 523712   ;;  %vm21_vm3 = vcmask 458112   ;;  %s123_s0 = inlined_call_operand.vmem [shape: f32[9,8], index: 0, kind: input, shape index: {}]   ;;  %s124_s1 = inlined_call_operand.vmem [shape: f32[72], index: 1, kind: output, shape index: {}]  }
   0x1   :  { %v59_v0 = vld [vmem:[%s123_s0 + $0x8] sm:$0x1]   ;;  %v61_v1 = vld [vmem:[%s123_s0 + $0x6] sm:$0x1]   ;;  %v60_v2 = vld [vmem:[%s123_s0 + $0x7] sm:$0x1]  }
   0x2   :  { %7 = vrot.lane.b32.xlu0 %v59_v0, %s75_s10  ;;  %19 = vrot.lane.b32.xlu1 %v61_v1, %s76_s11  ;;  %v62_v3 = vld [vmem:[%s123_s0 + $0x5] sm:$0x1]   ;;  %v2_v4 = vld [vmem:[%s123_s0] sm:$0x1]   ;;  %s77_s18 = smov 56   ;;  %s78_s19 = smov 40  }
   0x3   :  { %4 = vst.msk [vmem:[#allocation0] sm:$0x1] %vm3_vm0, %v2_v4   ;;  %v63_v5 = vld [vmem:[%s123_s0 + $0x4] sm:$0x1]   ;;  %v64_v6 = vld [vmem:[%s123_s0 + $0x3] sm:$0x1]  }
   0x4   :  { %s79_s24 = smov 32   ;;  %s80_s25 = smov 24   ;;  %v65_v7 = vld [vmem:[%s123_s0 + $0x2] sm:$0x1]   ;;  %v66_v8 = vld [vmem:[%s123_s0 + $0x1] sm:$0x1]  }
   0x5   :  { %s81_s0 = smov 16   ;;  %s82_s30 = smov 8   ;;  %vm27_vm4 = vcmask 392512   ;;  %vm33_vm5 = vcmask 326912   ;;  %vm39_vm6 = vcmask 261312   ;;  %vm45_vm7 = vcmask 195712  }
   0x6   :  { %13 = vrot.lane.b32.xlu0 %v60_v2, %s77_s18  ;;  %25 = vrot.lane.b32.xlu1 %v62_v3, %s78_s19  ;;  %vm51_vm8 = vcmask 130112  }
   0xa   :  { %31 = vrot.lane.b32.xlu0 %v63_v5, %s79_s24  ;;  %37 = vrot.lane.b32.xlu1 %v64_v6, %s80_s25 }
   0xe   :  { %43 = vrot.lane.b32.xlu0 %v65_v7, %s81_s0  ;;  %49 = vrot.lane.b32.xlu1 %v66_v8, %s82_s30 }
  0x74   :  { %v8_v9 = vpop.permute.xlu0 %7   ;;  %v20_v10 = vpop.permute.xlu1 %19  }
  0x75   :  { %10 = vst.msk [vmem:[#allocation0] sm:$0x1] %vm9_vm1, %v8_v9  }
  0x78   :  { %v14_v11 = vpop.permute.xlu0 %13   ;;  %v26_v12 = vpop.permute.xlu1 %25  }
  0x79   :  { %16 = vst.msk [vmem:[#allocation0] sm:$0x1] %vm15_vm2, %v14_v11  }
  0x7a   :  { %22 = vst.msk [vmem:[#allocation0] sm:$0x1] %vm21_vm3, %v20_v10  }
  0x7b   :  { %28 = vst.msk [vmem:[#allocation0] sm:$0x1] %vm27_vm4, %v26_v12  }
  0x7c   :  { %v32_v13 = vpop.permute.xlu0 %31   ;;  %v38_v14 = vpop.permute.xlu1 %37  }
  0x7d   :  { %34 = vst.msk [vmem:[#allocation0] sm:$0x1] %vm33_vm5, %v32_v13  }
  0x7e   :  { %40 = vst.msk [vmem:[#allocation0] sm:$0x1] %vm39_vm6, %v38_v14  }
  0x80   :  { %v44_v15 = vpop.permute.xlu0 %43   ;;  %v50_v16 = vpop.permute.xlu1 %49  }
  0x81   :  { %46 = vst.msk [vmem:[#allocation0] sm:$0x1] %vm45_vm7, %v44_v15  }
  0x82   :  { %52 = vst.msk [vmem:[#allocation0] sm:$0x1] %vm51_vm8, %v50_v16  }
  0x89   :  { %v56_v17 = vld [vmem:[#allocation0] sm:$0x1] }
  0x8a   :  { %58 = vst [vmem:[%s124_s1] sm:$0x1] %v56_v17 }

// kernel: double_conv.1
= control target key start
LH: loop header
LB: loop body
LE: loop exit
PB: predicated region body
PF: predicated region fallthrough
CT: control target
= control target key end

     0   :  { %v5669_v0 = vmov 0.0   ;;  %vm5670_vm0 = vmmov 0   ;;  %v5671_v48 = vmov 36   ;;  %vm1961_vm1 = vcmask 1048136   ;;  %s9871_s1 = inlined_call_operand.vmem [shape: bf16[128,128], index: 1, kind: input, shape index: {}]   ;;  %s9872_s0 = inlined_call_operand.vmem [shape: bf16[656,128], index: 0, kind: input, shape index: {}]   ;;  %s9873_s2 = inlined_call_operand.vmem [shape: bf16[128,128], index: 2, kind: input, shape index: {}]   ;;  %s9874_s3 = inlined_call_operand.vmem [shape: f32[1,128], index: 3, kind: input, shape index: {}]   ;;  %s9875_s4 = inlined_call_operand.vmem [shape: f32[1,128], index: 4, kind: input, shape index: {}]   ;;  %s9876_s5 = inlined_call_operand.vmem [shape: f32[1,128], index: 5, kind: input, shape index: {}]   ;;  %s9877_s6 = inlined_call_operand.vmem [shape: f32[1,128], index: 6, kind: input, shape index: {}]   ;;  %s9878_s7 = inlined_call_operand.vmem [shape: f32[576,128], index: 7, kind: output, shape index: {}]  }
   0x1   :  { %5064 = vmatprep.subr.bf16.mxu0 %v5669_v0  ;;  %v5567_v1 = vld [vmem:[%s9871_s1] sm:$0xff]   ;;  %5080 = vmatprep.mubr.msk.bf16.mxu0 %vm5670_vm0, %v5669_v0  ;;  %v5568_v2 = vld [vmem:[%s9871_s1 + $0x8] sm:$0xff]   ;;  %v5569_v3 = vld [vmem:[%s9871_s1 + $0x10] sm:$0xff]   ;;  %vm2052_vm2 = vcmask 64512   ;;  %vm2125_vm3 = vcmask 130112   ;;  %vm2198_vm4 = vcmask 195712  }
   0x2   :  { %5332 = vmatprep.subr.bf16.mxu1 %v5669_v0  ;;  %5200 = vmatprep.mubr.msk.bf16.mxu1 %vm5670_vm0, %v5669_v0  ;;  %v5570_v4 = vld [vmem:[%s9871_s1 + $0x18] sm:$0xff]   ;;  %v5571_v5 = vld [vmem:[%s9871_s1 + $0x20] sm:$0xff]   ;;  %v5572_v6 = vld [vmem:[%s9871_s1 + $0x28] sm:$0xff]   ;;  %vm2271_vm5 = vcmask 261312   ;;  %vm2344_vm6 = vcmask 326912   ;;  %vm2417_vm7 = vcmask 392512  }
   0x3   :  { %5065 = vmatpush3.bf16.msra.mxu0 %v5567_v1  ;;  %5340 = vmatpush3.bf16.msra.mxu1 %v5567_v1  ;;  %v5573_v7 = vld [vmem:[%s9871_s1 + $0x30] sm:$0xff]   ;;  %v5574_v8 = vld [vmem:[%s9871_s1 + $0x38] sm:$0xff]   ;;  %v5759_v9 = vld [vmem:[%s9872_s0] sm:$0xff]   ;;  %vm2490_vm8 = vcmask 458112   ;;  %vm2563_vm9 = vcmask 523712   ;;  %vm2636_vm10 = vcmask 589312  }
   0x4   :  { %5066 = vmatprep.subr.bf16.mxu0 %v5669_v0  ;;  %5333 = vmatprep.subr.bf16.mxu1 %v5669_v0  ;;  %v5769_v10 = vld [vmem:[%s9872_s0 + $0x8] sm:$0xff]   ;;  %v5777_v11 = vld [vmem:[%s9872_s0 + $0x10] sm:$0xff]   ;;  %v5785_v12 = vld [vmem:[%s9872_s0 + $0x18] sm:$0xff]   ;;  %v1305_v45 = vunpack.c.l.bf16 %v5759_v9  ;;  %v1306_v46 = vunpack.c.h.bf16 %v5759_v9  ;;  %vm2709_vm11 = vcmask 597568  }
   0x5   :  { %v5793_v13 = vld [vmem:[%s9872_s0 + $0x20] sm:$0xff]   ;;  %v5801_v14 = vld [vmem:[%s9872_s0 + $0x28] sm:$0xff]   ;;  %v5809_v15 = vld [vmem:[%s9872_s0 + $0x30] sm:$0xff]   ;;  %5353 = vset.pattern.permute.xlu0 %v5671_v48  ;;  %v1307_v50 = vunpack.c.l.bf16 %v5769_v10  ;;  %v1308_v51 = vunpack.c.h.bf16 %v5769_v10  ;;  %5364 = vset.pattern.permute.xlu1 %v5671_v48  ;;  %v1309_v53 = vunpack.c.l.bf16 %v5777_v11  ;;  %v1310_v54 = vunpack.c.h.bf16 %v5777_v11 }
   0x6   :  { %v5817_v16 = vld [vmem:[%s9872_s0 + $0x38] sm:$0xff]   ;;  %v5825_v17 = vld [vmem:[%s9872_s0 + $0x40] sm:$0xff]   ;;  %v5830_v18 = vld [vmem:[%s9872_s0 + $0xf0] sm:$0xff]   ;;  %v5354_v47 = vpack.i.bf16 %v1306_v46, %v1305_v45  ;;  %v1313_v55 = vunpack.c.l.bf16 %v5793_v13  ;;  %v1314_v56 = vunpack.c.h.bf16 %v5793_v13  ;;  %v1311_v59 = vunpack.c.l.bf16 %v5785_v12 }
   0x7   :  { %5067 = vmatpush3.bf16.msra.mxu0 %v5568_v2  ;;  %5341 = vmatpush3.bf16.msra.mxu1 %v5568_v2  ;;  %v5838_v19 = vld [vmem:[%s9872_s0 + $0x48] sm:$0xff]   ;;  %v5846_v20 = vld [vmem:[%s9872_s0 + $0xf8] sm:$0xff]   ;;  %v5854_v21 = vld [vmem:[%s9872_s0 + $0x50] sm:$0xff]   ;;  %v5359_v52 = vpack.i.bf16 %v1308_v51, %v1307_v50  ;;  %v5365_v57 = vpack.i.bf16 %v1310_v54, %v1309_v53  ;;  %v1312_v60 = vunpack.c.h.bf16 %v5785_v12  ;;  %v1317_v62 = vunpack.c.l.bf16 %v5809_v15 }
   0x8   :  { %5068 = vmatprep.subr.bf16.mxu0 %v5669_v0  ;;  %5334 = vmatprep.subr.bf16.mxu1 %v5669_v0  ;;  %v5862_v22 = vld [vmem:[%s9872_s0 + $0x100] sm:$0xff]   ;;  %v5870_v23 = vld [vmem:[%s9872_s0 + $0x58] sm:$0xff]   ;;  %v5878_v24 = vld [vmem:[%s9872_s0 + $0x108] sm:$0xff]   ;;  %v5375_v58 = vpack.i.bf16 %v1314_v56, %v1313_v55  ;;  %v1318_v63 = vunpack.c.h.bf16 %v5809_v15  ;;  %v1324_v46 = vunpack.c.h.bf16 %v5838_v19 }
   0x9   :  { %v5886_v25 = vld [vmem:[%s9872_s0 + $0x60] sm:$0xff]   ;;  %v5894_v26 = vld [vmem:[%s9872_s0 + $0x110] sm:$0xff]   ;;  %v5902_v27 = vld [vmem:[%s9872_s0 + $0x68] sm:$0xff]   ;;  %5355 = vperm.xlu0 %5353, %v5354_v47   ;;  %5366 = vperm.xlu1 %5364, %v5365_v57   ;;  %v5370_v1 = vpack.i.bf16 %v1312_v60, %v1311_v59  ;;  %v1328_v57 = vunpack.c.h.bf16 %v5870_v23 }
   0xa   :  { %v5910_v28 = vld [vmem:[%s9872_s0 + $0x118] sm:$0xff]   ;;  %v5918_v29 = vld [vmem:[%s9872_s0 + $0x70] sm:$0xff]   ;;  %v5926_v30 = vld [vmem:[%s9872_s0 + $0x120] sm:$0xff]   ;;  %v5385_v2 = vpack.i.bf16 %v1318_v63, %v1317_v62  ;;  %v1329_v48 = vunpack.c.l.bf16 %v5886_v25  ;;  %v1330_v50 = vunpack.c.h.bf16 %v5886_v25 }
   0xb   :  { %5069 = vmatpush3.bf16.msra.mxu0 %v5569_v3  ;;  %5342 = vmatpush3.bf16.msra.mxu1 %v5569_v3  ;;  %v5934_v31 = vld [vmem:[%s9872_s0 + $0x78] sm:$0xff]   ;;  %v5942_v32 = vld [vmem:[%s9872_s0 + $0x128] sm:$0xff]   ;;  %v5950_v33 = vld [vmem:[%s9872_s0 + $0x80] sm:$0xff]   ;;  %v1315_v3 = vunpack.c.l.bf16 %v5801_v14  ;;  %v1334_v59 = vunpack.c.h.bf16 %v5918_v29 }
   0xc   :  { %5070 = vmatprep.subr.bf16.mxu0 %v5669_v0  ;;  %5335 = vmatprep.subr.bf16.mxu1 %v5669_v0  ;;  %v5958_v34 = vld [vmem:[%s9872_s0 + $0x130] sm:$0xff]   ;;  %v5966_v35 = vld [vmem:[%s9872_s0 + $0x88] sm:$0xff]   ;;  %v5974_v36 = vld [vmem:[%s9872_s0 + $0x138] sm:$0xff]   ;;  %v5415_v55 = vpack.i.bf16 %v1330_v50, %v1329_v48 }
   0xd   :  { %v5982_v37 = vld [vmem:[%s9872_s0 + $0x90] sm:$0xff]   ;;  %v5990_v38 = vld [vmem:[%s9872_s0 + $0x140] sm:$0xff]   ;;  %v5998_v39 = vld [vmem:[%s9872_s0 + $0x98] sm:$0xff]   ;;  %5360 = vperm.xlu0 %5353, %v5359_v52   ;;  %5371 = vperm.xlu1 %5364, %v5370_v1  }
   0xe   :  { %v6007_v40 = vld [vmem:[%s9872_s0 + $0xa0] sm:$0xff]   ;;  %v6015_v41 = vld [vmem:[%s9872_s0 + $0xa8] sm:$0xff]   ;;  %v6023_v42 = vld [vmem:[%s9872_s0 + $0xb0] sm:$0xff]  }
   0xf   :  { %5071 = vmatpush3.bf16.msra.mxu0 %v5570_v4  ;;  %5343 = vmatpush3.bf16.msra.mxu1 %v5570_v4  ;;  %v6031_v43 = vld [vmem:[%s9872_s0 + $0xb8] sm:$0xff]   ;;  %v6039_v44 = vld [vmem:[%s9872_s0 + $0xc0] sm:$0xff]   ;;  %v6049_v49 = vld [vmem:[%s9872_s0 + $0xc8] sm:$0xff]   ;;  %v1316_v4 = vunpack.c.h.bf16 %v5801_v14 }
  0x10   :  { %5072 = vmatprep.subr.bf16.mxu0 %v5669_v0  ;;  %5336 = vmatprep.subr.bf16.mxu1 %v5669_v0  ;;  %v6065_v61 = vld [vmem:[%s9872_s0 + $0xd0] sm:$0xff]   ;;  %v6103_v56 = vld [vmem:[%s9872_s0 + $0xe0] sm:$0xff]  }
  0x11   :  { %5376 = vperm.xlu0 %5353, %v5375_v58   ;;  %v1333_v58 = vunpack.c.l.bf16 %v5918_v29 }
  0x13   :  { %5073 = vmatpush3.bf16.msra.mxu0 %v5571_v5  ;;  %5344 = vmatpush3.bf16.msra.mxu1 %v5571_v5  ;;  %v1321_v5 = vunpack.c.l.bf16 %v5825_v17  ;;  %v5425_v63 = vpack.i.bf16 %v1334_v59, %v1333_v58 }
  0x14   :  { %5074 = vmatprep.subr.bf16.mxu0 %v5669_v0  ;;  %5337 = vmatprep.subr.bf16.mxu1 %v5669_v0 }
  0x15   :  { %5386 = vperm.xlu0 %5353, %v5385_v2  }
  0x17   :  { %5075 = vmatpush3.bf16.msra.mxu0 %v5572_v6  ;;  %5345 = vmatpush3.bf16.msra.mxu1 %v5572_v6  ;;  %v1322_v6 = vunpack.c.h.bf16 %v5825_v17 }
  0x18   :  { %5076 = vmatprep.subr.bf16.mxu0 %v5669_v0  ;;  %5338 = vmatprep.subr.bf16.mxu1 %v5669_v0 }
  0x1b   :  { %5077 = vmatpush3.bf16.msra.mxu0 %v5573_v7  ;;  %5346 = vmatpush3.bf16.msra.mxu1 %v5573_v7  ;;  %v5380_v7 = vpack.i.bf16 %v1316_v4, %v1315_v3  ;;  %v1332_v4 = vunpack.c.h.bf16 %v5902_v27 }
  0x1c   :  { %5078 = vmatprep.subr.bf16.mxu0 %v5669_v0  ;;  %5339 = vmatprep.subr.bf16.mxu1 %v5669_v0 }
  0x1d   :  { %5381 = vperm.xlu1 %5364, %v5380_v7  }
  0x1f   :  { %5079 = vmatpush3.bf16.msra.mxu0 %v5574_v8  ;;  %5347 = vmatpush3.bf16.msra.mxu1 %v5574_v8  ;;  %v5395_v8 = vpack.i.bf16 %v1322_v6, %v1321_v5  ;;  %v1338_v6 = vunpack.c.h.bf16 %v5950_v33 }
  0x21   :  { %5396 = vperm.xlu0 %5353, %v5395_v8  }
  0x22   :  { %5081 = vmatmul.mubr.bf16.vlgmr.msra.gmra.mrb[0].mxu0 %v5759_v9  ;;  %5201 = vmatmul.mubr.bf16.vlgmr.msra.gmra.mrb[0].mxu1 %v5830_v18  ;;  %v1319_v9 = vunpack.c.l.bf16 %v5817_v16 }
  0x23   :  { %5084 = vmatprep.mubr.msk.bf16.mxu0 %vm5670_vm0, %v5669_v0  ;;  %5204 = vmatprep.mubr.msk.bf16.mxu1 %vm5670_vm0, %v5669_v0 }
  0x2a   :  { %5085 = vmatmul.mubr.bf16.gmra.mrb[4].mxu0 %v5769_v10  ;;  %5205 = vmatmul.mubr.bf16.gmra.mrb[4].mxu1 %v5846_v20  ;;  %v1320_v10 = vunpack.c.h.bf16 %v5817_v16 }
  0x2b   :  { %5088 = vmatprep.mubr.msk.bf16.mxu0 %vm5670_vm0, %v5669_v0  ;;  %5208 = vmatprep.mubr.msk.bf16.mxu1 %vm5670_vm0, %v5669_v0 }
  0x32   :  { %5089 = vmatmul.mubr.bf16.gmra.mrb[8].mxu0 %v5777_v11  ;;  %5209 = vmatmul.mubr.bf16.gmra.mrb[8].mxu1 %v5862_v22  ;;  %v6081_v11 = vld [vmem:[%s9872_s0 + $0xd8] sm:$0xff]  }
  0x33   :  { %5092 = vmatprep.mubr.msk.bf16.mxu0 %vm5670_vm0, %v5669_v0  ;;  %5212 = vmatprep.mubr.msk.bf16.mxu1 %vm5670_vm0, %v5669_v0 }
  0x3a   :  { %5093 = vmatmul.mubr.bf16.gmra.mrb[12].mxu0 %v5785_v12  ;;  %5213 = vmatmul.mubr.bf16.gmra.mrb[12].mxu1 %v5878_v24  ;;  %v1325_v12 = vunpack.c.l.bf16 %v5854_v21 }
  0x3b   :  { %5096 = vmatprep.mubr.msk.bf16.mxu0 %vm5670_vm0, %v5669_v0  ;;  %5216 = vmatprep.mubr.msk.bf16.mxu1 %vm5670_vm0, %v5669_v0 }
  0x42   :  { %5097 = vmatmul.mubr.bf16.gmra.mrb[16].mxu0 %v5793_v13  ;;  %5217 = vmatmul.mubr.bf16.gmra.mrb[16].mxu1 %v5894_v26  ;;  %v1326_v13 = vunpack.c.h.bf16 %v5854_v21 }
  0x43   :  { %5100 = vmatprep.mubr.msk.bf16.mxu0 %vm5670_vm0, %v5669_v0  ;;  %5220 = vmatprep.mubr.msk.bf16.mxu1 %vm5670_vm0, %v5669_v0 }
  0x4a   :  { %5101 = vmatmul.mubr.bf16.gmra.mrb[20].mxu0 %v5801_v14  ;;  %5221 = vmatmul.mubr.bf16.gmra.mrb[20].mxu1 %v5910_v28  ;;  %v5390_v14 = vpack.i.bf16 %v1320_v10, %v1319_v9 }
  0x4b   :  { %5104 = vmatprep.mubr.msk.bf16.mxu0 %vm5670_vm0, %v5669_v0  ;;  %5224 = vmatprep.mubr.msk.bf16.mxu1 %vm5670_vm0, %v5669_v0 }
  0x4c   :  { %5391 = vperm.xlu1 %5364, %v5390_v14  }
  0x52   :  { %5105 = vmatmul.mubr.bf16.gmra.mrb[24].mxu0 %v5809_v15  ;;  %5225 = vmatmul.mubr.bf16.gmra.mrb[24].mxu1 %v5926_v30 }
  0x53   :  { %5108 = vmatprep.mubr.msk.bf16.mxu0 %vm5670_vm0, %v5669_v0  ;;  %5228 = vmatprep.mubr.msk.bf16.mxu1 %vm5670_vm0, %v5669_v0 }
  0x5a   :  { %5109 = vmatmul.mubr.bf16.gmra.mrb[28].mxu0 %v5817_v16  ;;  %5229 = vmatmul.mubr.bf16.gmra.mrb[28].mxu1 %v5942_v32  ;;  %v1323_v16 = vunpack.c.l.bf16 %v5838_v19 }
  0x5b   :  { %5112 = vmatprep.mubr.msk.bf16.mxu0 %vm5670_vm0, %v5669_v0  ;;  %5232 = vmatprep.mubr.msk.bf16.mxu1 %vm5670_vm0, %v5669_v0 }
  0x5c   :  { %v5400_v54 = vpack.i.bf16 %v1324_v46, %v1323_v16  ;;  %v1342_v16 = vunpack.c.h.bf16 %v5982_v37 }
  0x5e   :  { %5401 = vperm.xlu1 %5364, %v5400_v54   ;;  %v1346_v54 = vunpack.c.h.bf16 %v6007_v40 }
  0x62   :  { %5113 = vmatmul.mubr.bf16.gmra.mrb[32].mxu0 %v5825_v17  ;;  %5233 = vmatmul.mubr.bf16.gmra.mrb[32].mxu1 %v5958_v34  ;;  %v5405_v17 = vpack.i.bf16 %v1326_v13, %v1325_v12 }
  0x63   :  { %5116 = vmatprep.mubr.msk.bf16.mxu0 %vm5670_vm0, %v5669_v0  ;;  %5236 = vmatprep.mubr.msk.bf16.mxu1 %vm5670_vm0, %v5669_v0 }
  0x64   :  { %5406 = vperm.xlu0 %5353, %v5405_v17   ;;  %v1336_v17 = vunpack.c.h.bf16 %v5934_v31 }
  0x68   :  { %5416 = vperm.xlu0 %5353, %v5415_v55  }
  0x6a   :  { %5117 = vmatmul.mubr.bf16.gmra.mrb[36].mxu0 %v5838_v19  ;;  %5237 = vmatmul.mubr.bf16.gmra.mrb[36].mxu1 %v5974_v36 }
  0x6b   :  { %5120 = vmatprep.mubr.msk.bf16.mxu0 %vm5670_vm0, %v5669_v0  ;;  %5240 = vmatprep.mubr.msk.bf16.mxu1 %vm5670_vm0, %v5669_v0 }
  0x6c   :  { %5426 = vperm.xlu0 %5353, %v5425_v63   ;;  %v1344_v63 = vunpack.c.h.bf16 %v5998_v39 }
  0x72   :  { %5121 = vmatmul.mubr.bf16.gmra.mrb[40].mxu0 %v5854_v21  ;;  %5241 = vmatmul.mubr.bf16.gmra.mrb[40].mxu1 %v5990_v38 }
  0x73   :  { %5124 = vmatprep.mubr.msk.bf16.mxu0 %vm5670_vm0, %v5669_v0 }
  0x7a   :  { %5125 = vmatmul.mubr.bf16.gmra.mrb[44].mxu0 %v5870_v23 }
  0x7b   :  { %5128 = vmatprep.mubr.msk.bf16.mxu0 %vm5670_vm0, %v5669_v0 }
  0x82   :  { %5129 = vmatmul.mubr.bf16.gmra.mrb[48].mxu0 %v5886_v25  ;;  %v1327_v25 = vunpack.c.l.bf16 %v5870_v23  ;;  %v1331_v23 = vunpack.c.l.bf16 %v5902_v27 }
  0x83   :  { %5132 = vmatprep.mubr.msk.bf16.mxu0 %vm5670_vm0, %v5669_v0 }
  0x84   :  { %v5410_v60 = vpack.i.bf16 %v1328_v57, %v1327_v25  ;;  %v5420_v12 = vpack.i.bf16 %v1332_v4, %v1331_v23 }
  0x86   :  { %5411 = vperm.xlu1 %5364, %v5410_v60  }
  0x8a   :  { %5133 = vmatmul.mubr.bf16.gmra.mrb[52].mxu0 %v5902_v27  ;;  %v6129_v27 = vld [vmem:[%s9872_s0 + $0xe8] sm:$0xff]   ;;  %5421 = vperm.xlu1 %5364, %v5420_v12  }
  0x8b   :  { %5136 = vmatprep.mubr.msk.bf16.mxu0 %vm5670_vm0, %v5669_v0 }
  0x92   :  { %5137 = vmatmul.mubr.bf16.gmra.mrb[56].mxu0 %v5918_v29  ;;  %v1337_v29 = vunpack.c.l.bf16 %v5950_v33 }
  0x93   :  { %5140 = vmatprep.mubr.msk.bf16.mxu0 %vm5670_vm0, %v5669_v0 }
  0x94   :  { %v5435_v13 = vpack.i.bf16 %v1338_v6, %v1337_v29 }
  0x96   :  { %5436 = vperm.xlu0 %5353, %v5435_v13  }
  0x9a   :  { %5141 = vmatmul.mubr.bf16.gmra.mrb[60].mxu0 %v5934_v31 }
  0x9b   :  { %5144 = vmatprep.mubr.msk.bf16.mxu0 %vm5670_vm0, %v5669_v0 }
  0xa2   :  { %5145 = vmatmul.mubr.bf16.gmra.mrb[64].mxu0 %v5950_v33  ;;  %v1335_v33 = vunpack.c.l.bf16 %v5934_v31  ;;  %v1339_v31 = vunpack.c.l.bf16 %v5966_v35 }
  0xa3   :  { %5148 = vmatprep.mubr.msk.bf16.mxu0 %vm5670_vm0, %v5669_v0 }
  0xa4   :  { %v5430_v46 = vpack.i.bf16 %v1336_v17, %v1335_v33 }
  0xa6   :  { %5431 = vperm.xlu1 %5364, %v5430_v46   ;;  %v1357_v46 = vunpack.c.l.bf16 %v6065_v61 }
  0xaa   :  { %5149 = vmatmul.mubr.bf16.gmra.mrb[68].mxu0 %v5966_v35 }
  0xab   :  { %5152 = vmatprep.mubr.msk.bf16.mxu0 %vm5670_vm0, %v5669_v0 }
  0xb2   :  { %5153 = vmatmul.mubr.bf16.gmra.mrb[72].mxu0 %v5982_v37 }
  0xb3   :  { %5156 = vmatprep.mubr.msk.bf16.mxu0 %vm5670_vm0, %v5669_v0 }
  0xba   :  { %5157 = vmatmul.mubr.bf16.gmra.mrb[76].mxu0 %v5998_v39 }
  0xbb   :  { %5160 = vmatprep.mubr.msk.bf16.mxu0 %vm5670_vm0, %v5669_v0 }
  0xc2   :  { %5161 = vmatmul.mubr.bf16.gmra.mrb[80].mxu0 %v6007_v40 }
  0xc3   :  { %5164 = vmatprep.mubr.msk.bf16.mxu0 %vm5670_vm0, %v5669_v0 }
  0xca   :  { %5165 = vmatmul.mubr.bf16.gmra.mrb[84].mxu0 %v6015_v41 }
  0xcb   :  { %5168 = vmatprep.mubr.msk.bf16.mxu0 %vm5670_vm0, %v5669_v0 }
  0xd2   :  { %5169 = vmatmul.mubr.bf16.gmra.mrb[88].mxu0 %v6023_v42 }
  0xd3   :  { %5172 = vmatprep.mubr.msk.bf16.mxu0 %vm5670_vm0, %v5669_v0 }
  0xda   :  { %5173 = vmatmul.mubr.bf16.gmra.mrb[92].mxu0 %v6031_v43 }
  0xdb   :  { %5176 = vmatprep.mubr.msk.bf16.mxu0 %vm5670_vm0, %v5669_v0 }
  0xe2   :  { %5177 = vmatmul.mubr.bf16.gmra.mrb[96].mxu0 %v6039_v44 }
  0xe3   :  { %5180 = vmatprep.mubr.msk.bf16.mxu0 %vm5670_vm0, %v5669_v0 }
  0xea   :  { %5181 = vmatmul.mubr.bf16.gmra.mrb[100].mxu0 %v6049_v49 }
  0xeb   :  { %5184 = vmatprep.mubr.msk.bf16.mxu0 %vm5670_vm0, %v5669_v0 }
  0xf2   :  { %5185 = vmatmul.mubr.bf16.gmra.mrb[104].mxu0 %v6065_v61 }
  0xf3   :  { %5188 = vmatprep.mubr.msk.bf16.mxu0 %vm5670_vm0, %v5669_v0 }
  0xf5   :  { %v6085_v15 = vpop.f32.mrb[0].mxu0 }
  0xf6   :  { %v5082_v45 = vpop.f32.mrb[1].mxu0  ;;  %v869_v21 = vmul.f32 %v6085_v15, %v6085_v15 }
  0xf7   :  { %v6089_v47 = vpop.f32.mrb[2].mxu0  ;;  %v1341_v45 = vunpack.c.l.bf16 %v5982_v37  ;;  %v1345_v37 = vunpack.c.l.bf16 %v6007_v40  ;;  %v1349_v40 = vunpack.c.l.bf16 %v6023_v42 }
  0xf8   :  { %v782_v51 = vadd.f32 %v6089_v47, %v6085_v15  ;;  %v870_v52 = vmul.f32 %v6089_v47, %v6089_v47  ;;  %v5083_v53 = vpop.f32.mrb[3].mxu0 }
  0xf9   :  { %v5445_v50 = vpack.i.bf16 %v1342_v16, %v1341_v45  ;;  %v5455_v59 = vpack.i.bf16 %v1346_v54, %v1345_v37  ;;  %v1352_v16 = vunpack.c.h.bf16 %v6031_v43  ;;  %v1355_v37 = vunpack.c.l.bf16 %v6049_v49 }
  0xfa   :  { %v951_v19 = vadd.f32 %v870_v52, %v869_v21  ;;  %5189 = vmatmul.mubr.bf16.gmra.mrb[108].mxu0 %v6081_v11 }
  0xfb   :  { %5192 = vmatprep.mubr.msk.bf16.mxu0 %vm5670_vm0, %v5669_v0  ;;  %5446 = vperm.xlu0 %5353, %v5445_v50  }
  0xfd   :  { %v6111_v62 = vpop.f32.mrb[4].mxu0 }
  0xfe   :  { %v783_v1 = vadd.f32 %v782_v51, %v6111_v62  ;;  %v871_v2 = vmul.f32 %v6111_v62, %v6111_v62  ;;  %v5086_v3 = vpop.f32.mrb[5].mxu0 }
  0xff   :  { %v6118_v5 = vpop.f32.mrb[6].mxu0  ;;  %5456 = vperm.xlu0 %5353, %v5455_v59  }
 0x100   :  { %v952_v7 = vadd.f32 %v951_v19, %v871_v2  ;;  %v784_v8 = vadd.f32 %v783_v1, %v6118_v5  ;;  %v872_v9 = vmul.f32 %v6118_v5, %v6118_v5  ;;  %v5087_v10 = vpop.f32.mrb[7].mxu0  ;;  %v1350_v1 = vunpack.c.h.bf16 %v6023_v42 }
 0x101   :  { %v1353_v42 = vunpack.c.l.bf16 %v6039_v44 }
 0x102   :  { %v953_v14 = vadd.f32 %v952_v7, %v872_v9  ;;  %5193 = vmatmul.mubr.bf16.gmra.mrb[112].mxu0 %v6103_v56  ;;  %v5465_v23 = vpack.i.bf16 %v1350_v1, %v1349_v40  ;;  %v1347_v7 = vunpack.c.l.bf16 %v6015_v41  ;;  %v1354_v9 = vunpack.c.h.bf16 %v6039_v44 }
 0x103   :  { %5196 = vmatprep.mubr.msk.bf16.mxu0 %vm5670_vm0, %v5669_v0  ;;  %v1340_v0 = vunpack.c.h.bf16 %v5966_v35  ;;  %v1343_v35 = vunpack.c.l.bf16 %v5998_v39  ;;  %v1348_v39 = vunpack.c.h.bf16 %v6015_v41  ;;  %v1351_v41 = vunpack.c.l.bf16 %v6031_v43 }
 0x104   :  { %5466 = vperm.xlu0 %5353, %v5465_v23   ;;  %v5475_v17 = vpack.i.bf16 %v1354_v9, %v1353_v42  ;;  %v1358_v44 = vunpack.c.h.bf16 %v6065_v61  ;;  %v1356_v43 = vunpack.c.h.bf16 %v6049_v49  ;;  %v1361_v61 = vunpack.c.l.bf16 %v6103_v56 }
 0x105   :  { %v6137_v48 = vpop.f32.mrb[8].mxu0  ;;  %v5440_v58 = vpack.i.bf16 %v1340_v0, %v1339_v31  ;;  %v5450_v2 = vpack.i.bf16 %v1344_v63, %v1343_v35  ;;  %v5460_v33 = vpack.i.bf16 %v1348_v39, %v1347_v7  ;;  %v5470_v50 = vpack.i.bf16 %v1352_v16, %v1351_v41 }
 0x106   :  { %v785_v21 = vadd.f32 %v784_v8, %v6137_v48  ;;  %v873_v51 = vmul.f32 %v6137_v48, %v6137_v48  ;;  %v5090_v52 = vpop.f32.mrb[9].mxu0  ;;  %v5480_v59 = vpack.i.bf16 %v1356_v43, %v1355_v37  ;;  %v1359_v49 = vunpack.c.l.bf16 %v6081_v11 }
 0x107   :  { %v6144_v53 = vpop.f32.mrb[10].mxu0  ;;  %5441 = vperm.xlu1 %5364, %v5440_v58   ;;  %v1360_v63 = vunpack.c.h.bf16 %v6081_v11  ;;  %v1365_v40 = vunpack.c.l.bf16 %v5830_v18  ;;  %v1363_v7 = vunpack.c.l.bf16 %v6129_v27  ;;  %v1364_v11 = vunpack.c.h.bf16 %v6129_v27 }
 0x108   :  { %v954_v55 = vadd.f32 %v953_v14, %v873_v51  ;;  %v786_v19 = vadd.f32 %v785_v21, %v6144_v53  ;;  %v874_v25 = vmul.f32 %v6144_v53, %v6144_v53  ;;  %v5091_v57 = vpop.f32.mrb[11].mxu0  ;;  %5476 = vperm.xlu0 %5353, %v5475_v17   ;;  %v5485_v51 = vpack.i.bf16 %v1358_v44, %v1357_v46 }
 0x109   :  { %v5490_v1 = vpack.i.bf16 %v1360_v63, %v1359_v49  ;;  %v1370_v42 = vunpack.c.h.bf16 %v5862_v22  ;;  %v1373_v41 = vunpack.c.l.bf16 %v5894_v26  ;;  %v1378_v37 = vunpack.c.h.bf16 %v5926_v30 }
 0x10a   :  { %v955_v60 = vadd.f32 %v954_v55, %v874_v25  ;;  %5197 = vmatmul.mubr.bf16.gmra.mrb[116].mxu0 %v6129_v27  ;;  %v1362_v55 = vunpack.c.h.bf16 %v6103_v56  ;;  %v1366_v56 = vunpack.c.h.bf16 %v5830_v18  ;;  %v1369_v18 = vunpack.c.l.bf16 %v5862_v22 }
 0x10b   :  { %5451 = vperm.xlu1 %5364, %v5450_v2   ;;  %v1367_v27 = vunpack.c.l.bf16 %v5846_v20  ;;  %v1374_v22 = vunpack.c.h.bf16 %v5894_v26  ;;  %v1377_v26 = vunpack.c.l.bf16 %v5926_v30  ;;  %v1382_v30 = vunpack.c.h.bf16 %v5958_v34 }
 0x10c   :  { %5486 = vperm.xlu0 %5353, %v5485_v51   ;;  %v5505_v23 = vpack.i.bf16 %v1366_v56, %v1365_v40 }
 0x10d   :  { %v6156_v3 = vpop.f32.mrb[12].mxu0  ;;  %v5525_v44 = vpack.i.bf16 %v1374_v22, %v1373_v41 }
 0x10e   :  { %v787_v4 = vadd.f32 %v786_v19, %v6156_v3  ;;  %v875_v29 = vmul.f32 %v6156_v3, %v6156_v3  ;;  %v5094_v6 = vpop.f32.mrb[13].mxu0 }
 0x10f   :  { %v6163_v8 = vpop.f32.mrb[14].mxu0  ;;  %5461 = vperm.xlu1 %5364, %v5460_v33   ;;  %v5515_v33 = vpack.i.bf16 %v1370_v42, %v1369_v18 }
 0x110   :  { %v956_v10 = vadd.f32 %v955_v60, %v875_v29  ;;  %v788_v12 = vadd.f32 %v787_v4, %v6163_v8  ;;  %v876_v13 = vmul.f32 %v6163_v8, %v6163_v8  ;;  %v5095_v14 = vpop.f32.mrb[15].mxu0  ;;  %v5495_v60 = vpack.i.bf16 %v1362_v55, %v1361_v61 }
 0x111   :  { %v5500_v14 = vpack.i.bf16 %v1364_v11, %v1363_v7 }
 0x112   :  { %v957_v45 = vadd.f32 %v956_v10, %v876_v13  ;;  %5496 = vperm.xlu0 %5353, %v5495_v60   ;;  %v1381_v60 = vunpack.c.l.bf16 %v5958_v34  ;;  %v1385_v34 = vunpack.c.l.bf16 %v5990_v38 }
 0x113   :  { %5471 = vperm.xlu1 %5364, %v5470_v50  }
 0x114   :  { %v5545_v63 = vpack.i.bf16 %v1382_v30, %v1381_v60 }
 0x115   :  { %v6174_v21 = vpop.f32.mrb[16].mxu0 }
 0x116   :  { %v789_v52 = vadd.f32 %v788_v12, %v6174_v21  ;;  %v877_v31 = vmul.f32 %v6174_v21, %v6174_v21  ;;  %v5098_v0 = vpop.f32.mrb[17].mxu0  ;;  %5506 = vperm.xlu0 %5353, %v5505_v23   ;;  %v1379_v23 = vunpack.c.l.bf16 %v5942_v32 }
 0x117   :  { %v6181_v54 = vpop.f32.mrb[18].mxu0  ;;  %5481 = vperm.xlu1 %5364, %v5480_v59   ;;  %v1376_v59 = vunpack.c.h.bf16 %v5910_v28 }
 0x118   :  { %v958_v19 = vadd.f32 %v957_v45, %v877_v31  ;;  %v790_v25 = vadd.f32 %v789_v52, %v6181_v54  ;;  %v878_v57 = vmul.f32 %v6181_v54, %v6181_v54  ;;  %v5099_v58 = vpop.f32.mrb[19].mxu0  ;;  %v1368_v45 = vunpack.c.h.bf16 %v5846_v20 }
 0x119   :  { %v1371_v31 = vunpack.c.l.bf16 %v5878_v24  ;;  %v1372_v20 = vunpack.c.h.bf16 %v5878_v24  ;;  %v1375_v24 = vunpack.c.l.bf16 %v5910_v28  ;;  %v1380_v28 = vunpack.c.h.bf16 %v5942_v32 }
 0x11a   :  { %v959_v35 = vadd.f32 %v958_v19, %v878_v57  ;;  %5516 = vperm.xlu0 %5353, %v5515_v33   ;;  %v5510_v16 = vpack.i.bf16 %v1368_v45, %v1367_v27  ;;  %v5535_v57 = vpack.i.bf16 %v1378_v37, %v1377_v26  ;;  %v1383_v32 = vunpack.c.l.bf16 %v5974_v36  ;;  %v6249_v27 = vpop.f32.mrb[0].mxu1 }
 0x11b   :  { %5491 = vperm.xlu1 %5364, %v5490_v1   ;;  %v5540_v42 = vpack.i.bf16 %v1380_v28, %v1379_v23  ;;  %v5202_v41 = vpop.f32.mrb[1].mxu1 }
 0x11d   :  { %v6192_v2 = vpop.f32.mrb[20].mxu0 }
 0x11e   :  { %v791_v4 = vadd.f32 %v790_v25, %v6192_v2  ;;  %v879_v29 = vmul.f32 %v6192_v2, %v6192_v2  ;;  %v5102_v6 = vpop.f32.mrb[21].mxu0  ;;  %5526 = vperm.xlu0 %5353, %v5525_v44   ;;  %v5520_v25 = vpack.i.bf16 %v1372_v20, %v1371_v31 }
 0x11f   :  { %v6199_v39 = vpop.f32.mrb[22].mxu0  ;;  %5501 = vperm.xlu1 %5364, %v5500_v14  }
 0x120   :  { %v960_v9 = vadd.f32 %v959_v35, %v879_v29  ;;  %v792_v10 = vadd.f32 %v791_v4, %v6199_v39  ;;  %v880_v12 = vmul.f32 %v6199_v39, %v6199_v39  ;;  %v5103_v13 = vpop.f32.mrb[23].mxu0  ;;  %v5530_v35 = vpack.i.bf16 %v1376_v59, %v1375_v24 }
 0x121   :  { %v1386_v29 = vunpack.c.h.bf16 %v5990_v38 }
 0x122   :  { %v961_v17 = vadd.f32 %v960_v9, %v880_v12  ;;  %5536 = vperm.xlu0 %5353, %v5535_v57   ;;  %v1384_v12 = vunpack.c.h.bf16 %v5974_v36 }
 0x123   :  { %5511 = vperm.xlu1 %5364, %v5510_v16   ;;  %v5555_v9 = vpack.i.bf16 %v1386_v29, %v1385_v34 }
 0x124   :  { %v5550_v13 = vpack.i.bf16 %v1384_v12, %v1383_v32 }
 0x125   :  { %v6210_v46 = vpop.f32.mrb[24].mxu0 }
 0x126   :  { %v793_v50 = vadd.f32 %v792_v10, %v6210_v46  ;;  %v881_v51 = vmul.f32 %v6210_v46, %v6210_v46  ;;  %v5106_v52 = vpop.f32.mrb[25].mxu0  ;;  %5546 = vperm.xlu0 %5353, %v5545_v63  }
 0x127   :  { %v6217_v0 = vpop.f32.mrb[26].mxu0  ;;  %5521 = vperm.xlu1 %5364, %v5520_v25  }
 0x128   :  { %v962_v43 = vadd.f32 %v961_v17, %v881_v51  ;;  %v794_v61 = vadd.f32 %v793_v50, %v6217_v0  ;;  %v882_v55 = vmul.f32 %v6217_v0, %v6217_v0  ;;  %v5107_v19 = vpop.f32.mrb[27].mxu0  ;;  %v6256_v50 = vpop.f32.mrb[2].mxu1 }
 0x129   :  { %10032 = vst [vmem:[#allocation4_spill] sm:$0xff] %v6256_v50  ;;  %v5203_v51 = vpop.f32.mrb[3].mxu1 }
 0x12a   :  { %v963_v58 = vadd.f32 %v962_v43, %v882_v55  ;;  %5556 = vperm.xlu0 %5353, %v5555_v9   ;;  %v6263_v43 = vpop.f32.mrb[4].mxu1 }
 0x12b   :  { %5531 = vperm.xlu1 %5364, %v5530_v35   ;;  %v5206_v55 = vpop.f32.mrb[5].mxu1 }
 0x12c   :  { %v6270_v24 = vpop.f32.mrb[6].mxu1 }
 0x12d   :  { %v6228_v49 = vpop.f32.mrb[28].mxu0  ;;  %10033 = vst [vmem:[#allocation5_spill] sm:$0xff] %v6270_v24  ;;  %v5207_v59 = vpop.f32.mrb[7].mxu1 }
 0x12e   :  { %v795_v40 = vadd.f32 %v794_v61, %v6228_v49  ;;  %v883_v56 = vmul.f32 %v6228_v49, %v6228_v49  ;;  %v5110_v1 = vpop.f32.mrb[29].mxu0 }
 0x12f   :  { %v6235_v4 = vpop.f32.mrb[30].mxu0  ;;  %5541 = vperm.xlu1 %5364, %v5540_v42  }
 0x130   :  { %v964_v6 = vadd.f32 %v963_v58, %v883_v56  ;;  %v796_v7 = vadd.f32 %v795_v40, %v6235_v4  ;;  %v884_v11 = vmul.f32 %v6235_v4, %v6235_v4  ;;  %v5111_v18 = vpop.f32.mrb[31].mxu0  ;;  %v6277_v56 = vpop.f32.mrb[8].mxu1 }
 0x131   :  { %10034 = vst [vmem:[#allocation6_spill] sm:$0xff] %v6277_v56  ;;  %v5210_v23 = vpop.f32.mrb[9].mxu1 }
 0x132   :  { %v965_v10 = vadd.f32 %v964_v6, %v884_v11 }
 0x133   :  { %5551 = vperm.xlu1 %5364, %v5550_v13  }
 0x135   :  { %v6244_v14 = vpop.f32.mrb[32].mxu0 }
 0x136   :  { %v797_v38 = vadd.f32 %v796_v7, %v6244_v14  ;;  %v885_v33 = vmul.f32 %v6244_v14, %v6244_v14  ;;  %v5114_v17 = vpop.f32.mrb[33].mxu0  ;;  %v6284_v7 = vpop.f32.mrb[10].mxu1 }
 0x137   :  { %v6251_v45 = vpop.f32.mrb[34].mxu0  ;;  %10035 = vst [vmem:[#allocation7_spill] sm:$0xff] %v6284_v7  ;;  %v5211_v11 = vpop.f32.mrb[11].mxu1 }
 0x138   :  { %v966_v22 = vadd.f32 %v965_v10, %v885_v33  ;;  %v798_v16 = vadd.f32 %v797_v38, %v6251_v45  ;;  %v886_v36 = vmul.f32 %v6251_v45, %v6251_v45  ;;  %v5115_v44 = vpop.f32.mrb[35].mxu0  ;;  %v6291_v12 = vpop.f32.mrb[12].mxu1 }
 0x139   :  { %10036 = vst [vmem:[#allocation8_spill] sm:$0xff] %v6291_v12  ;;  %v5214_v38 = vpop.f32.mrb[13].mxu1 }
 0x13a   :  { %v967_v52 = vadd.f32 %v966_v22, %v886_v36 }
 0x13d   :  { %v6258_v31 = vpop.f32.mrb[36].mxu0 }
 0x13e   :  { %v799_v20 = vadd.f32 %v798_v16, %v6258_v31  ;;  %v887_v26 = vmul.f32 %v6258_v31, %v6258_v31  ;;  %v5118_v37 = vpop.f32.mrb[37].mxu0  ;;  %v6298_v16 = vpop.f32.mrb[14].mxu1 }
 0x13f   :  { %v6265_v61 = vpop.f32.mrb[38].mxu0  ;;  %10037 = vst [vmem:[#allocation9_spill] sm:$0xff] %v6298_v16  ;;  %v5215_v36 = vpop.f32.mrb[15].mxu1 }
 0x140   :  { %v968_v19 = vadd.f32 %v967_v52, %v887_v26  ;;  %v800_v25 = vadd.f32 %v799_v20, %v6265_v61  ;;  %v888_v57 = vmul.f32 %v6265_v61, %v6265_v61  ;;  %v5119_v58 = vpop.f32.mrb[39].mxu0  ;;  %v6305_v37 = vpop.f32.mrb[16].mxu1 }
 0x141   :  { %10038 = vst [vmem:[#allocation10_spill] sm:$0xff] %v6305_v37 }
 0x142   :  { %v969_v60 = vadd.f32 %v968_v19, %v888_v57  ;;  %v5218_v19 = vpop.f32.mrb[17].mxu1 }
 0x145   :  { %v6272_v30 = vpop.f32.mrb[40].mxu0 }
 0x146   :  { %v801_v35 = vadd.f32 %v800_v25, %v6272_v30  ;;  %v889_v63 = vmul.f32 %v6272_v30, %v6272_v30  ;;  %v5122_v40 = vpop.f32.mrb[41].mxu0 }
 0x147   :  { %v6279_v1 = vpop.f32.mrb[42].mxu0 }
 0x148   :  { %v970_v28 = vadd.f32 %v969_v60, %v889_v63  ;;  %v802_v34 = vadd.f32 %v801_v35, %v6279_v1  ;;  %v890_v29 = vmul.f32 %v6279_v1, %v6279_v1  ;;  %v5123_v6 = vpop.f32.mrb[43].mxu0  ;;  %v6312_v60 = vpop.f32.mrb[18].mxu1 }
 0x149   :  { %10039 = vst [vmem:[#allocation11_spill] sm:$0xff] %v6312_v60  ;;  %v5219_v35 = vpop.f32.mrb[19].mxu1 }
 0x14a   :  { %v971_v18 = vadd.f32 %v970_v28, %v890_v29  ;;  %v6319_v29 = vpop.f32.mrb[20].mxu1 }
 0x14b   :  { %10040 = vst [vmem:[#allocation12_spill] sm:$0xff] %v6319_v29  ;;  %v5222_v11 = vpop.f32.mrb[21].mxu1 }
 0x14c   :  { %v6326_v38 = vpop.f32.mrb[22].mxu1 }
 0x14d   :  { %v6286_v42 = vpop.f32.mrb[44].mxu0  ;;  %10042 = vst [vmem:[#allocation14_spill] sm:$0xff] %v6326_v38 }
 0x14e   :  { %v803_v9 = vadd.f32 %v802_v34, %v6286_v42  ;;  %v891_v10 = vmul.f32 %v6286_v42, %v6286_v42  ;;  %v5126_v32 = vpop.f32.mrb[45].mxu0 }
 0x14f   :  { %v6293_v13 = vpop.f32.mrb[46].mxu0 }
 0x150   :  { %v972_v33 = vadd.f32 %v971_v18, %v891_v10  ;;  %v804_v17 = vadd.f32 %v803_v9, %v6293_v13  ;;  %v892_v41 = vmul.f32 %v6293_v13, %v6293_v13  ;;  %v5127_v22 = vpop.f32.mrb[47].mxu0 }
 0x152   :  { %v973_v44 = vadd.f32 %v972_v33, %v892_v41  ;;  %v5223_v33 = vpop.f32.mrb[23].mxu1 }
 0x155   :  { %v6300_v51 = vpop.f32.mrb[48].mxu0 }
 0x156   :  { %v805_v52 = vadd.f32 %v804_v17, %v6300_v51  ;;  %v893_v20 = vmul.f32 %v6300_v51, %v6300_v51  ;;  %v5130_v26 = vpop.f32.mrb[49].mxu0 }
 0x157   :  { %v6307_v55 = vpop.f32.mrb[50].mxu0 }
 0x158   :  { %v974_v25 = vadd.f32 %v973_v44, %v893_v20  ;;  %v806_v57 = vadd.f32 %v805_v52, %v6307_v55  ;;  %v894_v58 = vmul.f32 %v6307_v55, %v6307_v55  ;;  %v5131_v59 = vpop.f32.mrb[51].mxu0  ;;  %v6333_v52 = vpop.f32.mrb[24].mxu1 }
 0x159   :  { %10044 = vst [vmem:[#allocation16_spill] sm:$0xff] %v6333_v52  ;;  %v5226_v26 = vpop.f32.mrb[25].mxu1 }
 0x15a   :  { %v975_v63 = vadd.f32 %v974_v25, %v894_v58  ;;  %v6340_v59 = vpop.f32.mrb[26].mxu1 }
 0x15b   :  { %10046 = vst [vmem:[#allocation18_spill] sm:$0xff] %v6340_v59 }
 0x15d   :  { %v6314_v40 = vpop.f32.mrb[52].mxu0 }
 0x15e   :  { %v807_v23 = vadd.f32 %v806_v57, %v6314_v40  ;;  %v895_v28 = vmul.f32 %v6314_v40, %v6314_v40  ;;  %v5134_v34 = vpop.f32.mrb[53].mxu0 }
 0x15f   :  { %v6321_v6 = vpop.f32.mrb[54].mxu0 }
 0x160   :  { %10041 = vst [vmem:[#allocation13_spill] sm:$0xff] %v6321_v6  ;;  %v976_v18 = vadd.f32 %v975_v63, %v895_v28  ;;  %v808_v9 = vadd.f32 %v807_v23, %v6321_v6  ;;  %v896_v10 = vmul.f32 %v6321_v6, %v6321_v6  ;;  %v5135_v32 = vpop.f32.mrb[55].mxu0  ;;  %v5227_v63 = vpop.f32.mrb[27].mxu1 }
 0x162   :  { %v977_v17 = vadd.f32 %v976_v18, %v896_v10  ;;  %v6347_v18 = vpop.f32.mrb[28].mxu1 }
 0x163   :  { %10048 = vst [vmem:[#allocation20_spill] sm:$0xff] %v6347_v18  ;;  %v5230_v10 = vpop.f32.mrb[29].mxu1 }
 0x165   :  { %v6328_v41 = vpop.f32.mrb[56].mxu0 }
 0x166   :  { %10043 = vst [vmem:[#allocation15_spill] sm:$0xff] %v6328_v41  ;;  %v809_v22 = vadd.f32 %v808_v9, %v6328_v41  ;;  %v897_v36 = vmul.f32 %v6328_v41, %v6328_v41  ;;  %v5138_v44 = vpop.f32.mrb[57].mxu0 }
 0x167   :  { %v6335_v20 = vpop.f32.mrb[58].mxu0 }
 0x168   :  { %10045 = vst [vmem:[#allocation17_spill] sm:$0xff] %v6335_v20  ;;  %v978_v19 = vadd.f32 %v977_v17, %v897_v36  ;;  %v810_v25 = vadd.f32 %v809_v22, %v6335_v20  ;;  %v898_v57 = vmul.f32 %v6335_v20, %v6335_v20  ;;  %v5139_v58 = vpop.f32.mrb[59].mxu0  ;;  %v6354_v36 = vpop.f32.mrb[30].mxu1 }
 0x169   :  { %10050 = vst [vmem:[#allocation22_spill] sm:$0xff] %v6354_v36  ;;  %v5231_v26 = vpop.f32.mrb[31].mxu1 }
 0x16a   :  { %v979_v35 = vadd.f32 %v978_v19, %v898_v57  ;;  %v6361_v63 = vpop.f32.mrb[32].mxu1  ;;  %v5672_v26 = vmov 0  }
 0x16b   :  { %10052 = vst [vmem:[#allocation24_spill] sm:$0xff] %v6361_v63  ;;  %1962 = vst.msk [vmem:[#allocation3] sm:$0xff] %vm1961_vm1, %v5672_v26 }
 0x16c   :  { %1963 = vst.msk [vmem:[#allocation3 + $0x8] sm:$0xff] %vm1961_vm1, %v5672_v26  ;;  %1964 = vst.msk [vmem:[#allocation3 + $0x10] sm:$0xff] %vm1961_vm1, %v5672_v26 }
 0x16d   :  { %v6342_v23 = vpop.f32.mrb[60].mxu0  ;;  %1965 = vst.msk [vmem:[#allocation3 + $0x18] sm:$0xff] %vm1961_vm1, %v5672_v26  ;;  %1966 = vst.msk [vmem:[#allocation3 + $0x20] sm:$0xff] %vm1961_vm1, %v5672_v26 }
 0x16e   :  { %10047 = vst [vmem:[#allocation19_spill] sm:$0xff] %v6342_v23  ;;  %v811_v28 = vadd.f32 %v810_v25, %v6342_v23  ;;  %v899_v34 = vmul.f32 %v6342_v23, %v6342_v23  ;;  %v5142_v11 = vpop.f32.mrb[61].mxu0  ;;  %1967 = vst.msk [vmem:[#allocation3 + $0x28] sm:$0xff] %vm1961_vm1, %v5672_v26 }
 0x16f   :  { %v6349_v9 = vpop.f32.mrb[62].mxu0  ;;  %1968 = vst.msk [vmem:[#allocation3 + $0x30] sm:$0xff] %vm1961_vm1, %v5672_v26  ;;  %1969 = vst.msk [vmem:[#allocation3 + $0x38] sm:$0xff] %vm1961_vm1, %v5672_v26 }
 0x170   :  { %10049 = vst [vmem:[#allocation21_spill] sm:$0xff] %v6349_v9  ;;  %v980_v32 = vadd.f32 %v979_v35, %v899_v34  ;;  %v812_v33 = vadd.f32 %v811_v28, %v6349_v9  ;;  %v900_v17 = vmul.f32 %v6349_v9, %v6349_v9  ;;  %v5143_v22 = vpop.f32.mrb[63].mxu0  ;;  %v5234_v28 = vpop.f32.mrb[33].mxu1  ;;  %1970 = vst.msk [vmem:[#allocation3 + $0x40] sm:$0xff] %vm1961_vm1, %v5672_v26 }
 0x171   :  { %1971 = vst.msk [vmem:[#allocation3 + $0x48] sm:$0xff] %vm1961_vm1, %v5672_v26  ;;  %1972 = vst.msk [vmem:[#allocation3 + $0x50] sm:$0xff] %vm1961_vm1, %v5672_v26 }
 0x172   :  { %v981_v44 = vadd.f32 %v980_v32, %v900_v17  ;;  %v6368_v17 = vpop.f32.mrb[34].mxu1  ;;  %1973 = vst.msk [vmem:[#allocation3 + $0x58] sm:$0xff] %vm1961_vm1, %v5672_v26  ;;  %1974 = vst.msk [vmem:[#allocation3 + $0x60] sm:$0xff] %vm1961_vm1, %v5672_v26 }
 0x173   :  { %10054 = vst [vmem:[#allocation26_spill] sm:$0xff] %v6368_v17  ;;  %1975 = vst.msk [vmem:[#allocation3 + $0x68] sm:$0xff] %vm1961_vm1, %v5672_v26 }
 0x174   :  { %1976 = vst.msk [vmem:[#allocation3 + $0x70] sm:$0xff] %vm1961_vm1, %v5672_v26  ;;  %1977 = vst.msk [vmem:[#allocation3 + $0x78] sm:$0xff] %vm1961_vm1, %v5672_v26 }
 0x175   :  { %v6356_v19 = vpop.f32.mrb[64].mxu0  ;;  %1978 = vst.msk [vmem:[#allocation3 + $0x80] sm:$0xff] %vm1961_vm1, %v5672_v26  ;;  %1979 = vst.msk [vmem:[#allocation3 + $0x88] sm:$0xff] %vm1961_vm1, %v5672_v26 }
 0x176   :  { %10051 = vst [vmem:[#allocation23_spill] sm:$0xff] %v6356_v19  ;;  %v813_v25 = vadd.f32 %v812_v33, %v6356_v19  ;;  %v901_v57 = vmul.f32 %v6356_v19, %v6356_v19  ;;  %v5146_v58 = vpop.f32.mrb[65].mxu0  ;;  %v5235_v33 = vpop.f32.mrb[35].mxu1  ;;  %1980 = vst.msk [vmem:[#allocation3 + $0x90] sm:$0xff] %vm1961_vm1, %v5672_v26 }
 0x177   :  { %v6363_v35 = vpop.f32.mrb[66].mxu0  ;;  %1981 = vst.msk [vmem:[#allocation3 + $0x98] sm:$0xff] %vm1961_vm1, %v5672_v26  ;;  %1982 = vst.msk [vmem:[#allocation3 + $0xa0] sm:$0xff] %vm1961_vm1, %v5672_v26  ;;  %v6411_v28 = vpop.f32.mrb[36].mxu1 }
 0x178   :  { %10053 = vst [vmem:[#allocation25_spill] sm:$0xff] %v6363_v35  ;;  %v982_v34 = vadd.f32 %v981_v44, %v901_v57  ;;  %v814_v11 = vadd.f32 %v813_v25, %v6363_v35  ;;  %v902_v10 = vmul.f32 %v6363_v35, %v6363_v35  ;;  %v5147_v32 = vpop.f32.mrb[67].mxu0  ;;  %1983 = vst.msk [vmem:[#allocation3 + $0xa8] sm:$0xff] %vm1961_vm1, %v5672_v26 }
 0x179   :  { %1984 = vst.msk [vmem:[#allocation3 + $0xb0] sm:$0xff] %vm1961_vm1, %v5672_v26  ;;  %1985 = vst.msk [vmem:[#allocation3 + $0xb8] sm:$0xff] %vm1961_vm1, %v5672_v26 }
 0x17a   :  { %v983_v22 = vadd.f32 %v982_v34, %v902_v10  ;;  %1986 = vst.msk [vmem:[#allocation3 + $0xc0] sm:$0xff] %vm1961_vm1, %v5672_v26  ;;  %1987 = vst.msk [vmem:[#allocation3 + $0xc8] sm:$0xff] %vm1961_vm1, %v5672_v26  ;;  %v5238_v10 = vpop.f32.mrb[37].mxu1 }
 0x17b   :  { %1988 = vst.msk [vmem:[#allocation3 + $0xd0] sm:$0xff] %vm1961_vm1, %v5672_v26  ;;  %1989 = vst.msk [vmem:[#allocation3 + $0xd8] sm:$0xff] %vm1961_vm1, %v5672_v26  ;;  %v6418_v19 = vpop.f32.mrb[38].mxu1 }
 0x17c   :  { %1990 = vst.msk [vmem:[#allocation3 + $0xe0] sm:$0xff] %vm1961_vm1, %v5672_v26  ;;  %1991 = vst.msk [vmem:[#allocation3 + $0xe8] sm:$0xff] %vm1961_vm1, %v5672_v26 }
 0x17d   :  { %1992 = vst.msk [vmem:[#allocation3 + $0xf0] sm:$0xff] %vm1961_vm1, %v5672_v26  ;;  %1993 = vst.msk [vmem:[#allocation3 + $0xf8] sm:$0xff] %vm1961_vm1, %v5672_v26  ;;  %v6406_v44 = vpop.f32.mrb[68].mxu0 }
 0x17e   :  { %1994 = vst.msk [vmem:[#allocation3 + $0x100] sm:$0xff] %vm1961_vm1, %v5672_v26  ;;  %1995 = vst.msk [vmem:[#allocation3 + $0x108] sm:$0xff] %vm1961_vm1, %v5672_v26  ;;  %v815_v25 = vadd.f32 %v814_v11, %v6406_v44  ;;  %v903_v57 = vmul.f32 %v6406_v44, %v6406_v44  ;;  %v5150_v58 = vpop.f32.mrb[69].mxu0  ;;  %v5239_v11 = vpop.f32.mrb[39].mxu1 }
 0x17f   :  { %1996 = vst.msk [vmem:[#allocation3 + $0x110] sm:$0xff] %vm1961_vm1, %v5672_v26  ;;  %1997 = vst.msk [vmem:[#allocation3 + $0x118] sm:$0xff] %vm1961_vm1, %v5672_v26  ;;  %v6413_v34 = vpop.f32.mrb[70].mxu0  ;;  %v6425_v10 = vpop.f32.mrb[40].mxu1 }
 0x180   :  { %10055 = vst [vmem:[#allocation27_spill] sm:$0xff] %v6406_v44  ;;  %10056 = vst [vmem:[#allocation28_spill] sm:$0xff] %v6411_v28  ;;  %v984_v32 = vadd.f32 %v983_v22, %v903_v57  ;;  %v816_v33 = vadd.f32 %v815_v25, %v6413_v34  ;;  %v904_v35 = vmul.f32 %v6413_v34, %v6413_v34  ;;  %v5151_v26 = vpop.f32.mrb[71].mxu0  ;;  %v5242_v25 = vpop.f32.mrb[41].mxu1 }
 0x181   :  { %10057 = vst [vmem:[#allocation29_spill] sm:$0xff] %v6413_v34  ;;  %10058 = vst [vmem:[#allocation30_spill] sm:$0xff] %v6418_v19  ;;  %v6435_v11 = vpop.f32.mrb[42].mxu1 }
 0x182   :  { %v985_v9 = vadd.f32 %v984_v32, %v904_v35  ;;  %10060 = vst [vmem:[#allocation32_spill] sm:$0xff] %v6425_v10 }
 0x185   :  { %v6420_v23 = vpop.f32.mrb[72].mxu0 }
 0x186   :  { %10059 = vst [vmem:[#allocation31_spill] sm:$0xff] %v6420_v23  ;;  %v817_v58 = vadd.f32 %v816_v33, %v6420_v23  ;;  %v905_v44 = vmul.f32 %v6420_v23, %v6420_v23  ;;  %v5154_v20 = vpop.f32.mrb[73].mxu0  ;;  %v5616_v33 = vld [vmem:[%s9873_s2] sm:$0xff]  }
 0x187   :  { %v6427_v22 = vpop.f32.mrb[74].mxu0  ;;  %v5243_v20 = vpop.f32.mrb[43].mxu1  ;;  %5244 = vmatprep.subr.bf16.mxu1 %v5616_v33 }
 0x188   :  { %10061 = vst [vmem:[#allocation33_spill] sm:$0xff] %v6427_v22  ;;  %v986_v57 = vadd.f32 %v985_v9, %v905_v44  ;;  %v818_v26 = vadd.f32 %v817_v58, %v6427_v22  ;;  %v906_v35 = vmul.f32 %v6427_v22, %v6427_v22  ;;  %v5155_v32 = vpop.f32.mrb[75].mxu0  ;;  %5245 = vmatpush3.bf16.msra.mxu1 %v5616_v33 }
 0x18a   :  { %v987_v23 = vadd.f32 %v986_v57, %v906_v35 }
 0x18d   :  { %v6437_v34 = vpop.f32.mrb[76].mxu0 }
 0x18e   :  { %10062 = vst [vmem:[#allocation34_spill] sm:$0xff] %v6437_v34  ;;  %v819_v9 = vadd.f32 %v818_v26, %v6437_v34  ;;  %v907_v44 = vmul.f32 %v6437_v34, %v6437_v34  ;;  %v5158_v58 = vpop.f32.mrb[77].mxu0 }
 0x18f   :  { %v6442_v25 = vpop.f32.mrb[78].mxu0 }
 0x190   :  { %10063 = vst [vmem:[#allocation35_spill] sm:$0xff] %v6442_v25  ;;  %v988_v32 = vadd.f32 %v987_v23, %v907_v44  ;;  %v820_v22 = vadd.f32 %v819_v9, %v6442_v25  ;;  %v908_v41 = vmul.f32 %v6442_v25, %v6442_v25  ;;  %v5159_v57 = vpop.f32.mrb[79].mxu0 }
 0x192   :  { %v989_v35 = vadd.f32 %v988_v32, %v908_v41 }
 0x195   :  { %v6447_v20 = vpop.f32.mrb[80].mxu0 }
 0x196   :  { %10064 = vst [vmem:[#allocation36_spill] sm:$0xff] %v6447_v20  ;;  %v821_v33 = vadd.f32 %v820_v22, %v6447_v20  ;;  %v909_v26 = vmul.f32 %v6447_v20, %v6447_v20  ;;  %v5162_v6 = vpop.f32.mrb[81].mxu0 }
 0x197   :  { %v6452_v34 = vpop.f32.mrb[82].mxu0 }
 0x198   :  { %10065 = vst [vmem:[#allocation37_spill] sm:$0xff] %v6452_v34  ;;  %v990_v58 = vadd.f32 %v989_v35, %v909_v26  ;;  %v822_v23 = vadd.f32 %v821_v33, %v6452_v34  ;;  %v910_v9 = vmul.f32 %v6452_v34, %v6452_v34  ;;  %v5163_v44 = vpop.f32.mrb[83].mxu0 }
 0x19a   :  { %v991_v25 = vadd.f32 %v990_v58, %v910_v9 }
 0x19d   :  { %v6457_v57 = vpop.f32.mrb[84].mxu0 }
 0x19e   :  { %10066 = vst [vmem:[#allocation38_spill] sm:$0xff] %v6457_v57  ;;  %v823_v41 = vadd.f32 %v822_v23, %v6457_v57  ;;  %v911_v22 = vmul.f32 %v6457_v57, %v6457_v57  ;;  %v5166_v32 = vpop.f32.mrb[85].mxu0 }
 0x19f   :  { %v6462_v20 = vpop.f32.mrb[86].mxu0 }
 0x1a0   :  { %10067 = vst [vmem:[#allocation39_spill] sm:$0xff] %v6462_v20  ;;  %v992_v6 = vadd.f32 %v991_v25, %v911_v22  ;;  %v824_v35 = vadd.f32 %v823_v41, %v6462_v20  ;;  %v912_v33 = vmul.f32 %v6462_v20, %v6462_v20  ;;  %v5167_v26 = vpop.f32.mrb[87].mxu0 }
 0x1a2   :  { %v993_v34 = vadd.f32 %v992_v6, %v912_v33 }
 0x1a5   :  { %v6467_v44 = vpop.f32.mrb[88].mxu0 }
 0x1a6   :  { %10068 = vst [vmem:[#allocation40_spill] sm:$0xff] %v6467_v44  ;;  %v825_v58 = vadd.f32 %v824_v35, %v6467_v44  ;;  %v913_v23 = vmul.f32 %v6467_v44, %v6467_v44  ;;  %v5170_v9 = vpop.f32.mrb[89].mxu0 }
 0x1a7   :  { %v6472_v57 = vpop.f32.mrb[90].mxu0 }
 0x1a8   :  { %10069 = vst [vmem:[#allocation41_spill] sm:$0xff] %v6472_v57  ;;  %v994_v32 = vadd.f32 %v993_v34, %v913_v23  ;;  %v826_v25 = vadd.f32 %v825_v58, %v6472_v57  ;;  %v914_v41 = vmul.f32 %v6472_v57, %v6472_v57  ;;  %v5171_v22 = vpop.f32.mrb[91].mxu0 }
 0x1aa   :  { %v995_v20 = vadd.f32 %v994_v32, %v914_v41 }
 0x1ad   :  { %v6477_v26 = vpop.f32.mrb[92].mxu0 }
 0x1ae   :  { %10070 = vst [vmem:[#allocation42_spill] sm:$0xff] %v6477_v26  ;;  %v827_v6 = vadd.f32 %v826_v25, %v6477_v26  ;;  %v915_v35 = vmul.f32 %v6477_v26, %v6477_v26  ;;  %v5174_v33 = vpop.f32.mrb[93].mxu0 }
 0x1af   :  { %v6482_v44 = vpop.f32.mrb[94].mxu0 }
 0x1b0   :  { %10071 = vst [vmem:[#allocation43_spill] sm:$0xff] %v6482_v44  ;;  %v996_v9 = vadd.f32 %v995_v20, %v915_v35  ;;  %v828_v34 = vadd.f32 %v827_v6, %v6482_v44  ;;  %v916_v58 = vmul.f32 %v6482_v44, %v6482_v44  ;;  %v5175_v23 = vpop.f32.mrb[95].mxu0 }
 0x1b2   :  { %v997_v57 = vadd.f32 %v996_v9, %v916_v58 }
 0x1b5   :  { %v6487_v22 = vpop.f32.mrb[96].mxu0 }
 0x1b6   :  { %10072 = vst [vmem:[#allocation44_spill] sm:$0xff] %v6487_v22  ;;  %v829_v32 = vadd.f32 %v828_v34, %v6487_v22  ;;  %v917_v25 = vmul.f32 %v6487_v22, %v6487_v22  ;;  %v5178_v41 = vpop.f32.mrb[97].mxu0 }
 0x1b7   :  { %v6492_v26 = vpop.f32.mrb[98].mxu0 }
 0x1b8   :  { %10073 = vst [vmem:[#allocation45_spill] sm:$0xff] %v6492_v26  ;;  %v998_v33 = vadd.f32 %v997_v57, %v917_v25  ;;  %v830_v20 = vadd.f32 %v829_v32, %v6492_v26  ;;  %v918_v6 = vmul.f32 %v6492_v26, %v6492_v26  ;;  %v5179_v35 = vpop.f32.mrb[99].mxu0 }
 0x1ba   :  { %v999_v44 = vadd.f32 %v998_v33, %v918_v6 }
 0x1bd   :  { %v6497_v23 = vpop.f32.mrb[100].mxu0 }
 0x1be   :  { %10074 = vst [vmem:[#allocation46_spill] sm:$0xff] %v6497_v23  ;;  %v831_v9 = vadd.f32 %v830_v20, %v6497_v23  ;;  %v919_v34 = vmul.f32 %v6497_v23, %v6497_v23  ;;  %v5182_v58 = vpop.f32.mrb[101].mxu0 }
 0x1bf   :  { %v6502_v22 = vpop.f32.mrb[102].mxu0 }
 0x1c0   :  { %10075 = vst [vmem:[#allocation47_spill] sm:$0xff] %v6502_v22  ;;  %v1000_v41 = vadd.f32 %v999_v44, %v919_v34  ;;  %v832_v57 = vadd.f32 %v831_v9, %v6502_v22  ;;  %v920_v32 = vmul.f32 %v6502_v22, %v6502_v22  ;;  %v5183_v25 = vpop.f32.mrb[103].mxu0 }
 0x1c2   :  { %v1001_v26 = vadd.f32 %v1000_v41, %v920_v32 }
 0x1c5   :  { %v6507_v35 = vpop.f32.mrb[104].mxu0 }
 0x1c6   :  { %10076 = vst [vmem:[#allocation48_spill] sm:$0xff] %v6507_v35  ;;  %v833_v33 = vadd.f32 %v832_v57, %v6507_v35  ;;  %v921_v20 = vmul.f32 %v6507_v35, %v6507_v35  ;;  %v5186_v6 = vpop.f32.mrb[105].mxu0 }
 0x1c7   :  { %v6512_v23 = vpop.f32.mrb[106].mxu0 }
 0x1c8   :  { %10077 = vst [vmem:[#allocation49_spill] sm:$0xff] %v6512_v23  ;;  %v1002_v58 = vadd.f32 %v1001_v26, %v921_v20  ;;  %v834_v44 = vadd.f32 %v833_v33, %v6512_v23  ;;  %v922_v9 = vmul.f32 %v6512_v23, %v6512_v23  ;;  %v5187_v34 = vpop.f32.mrb[107].mxu0 }
 0x1ca   :  { %v1003_v22 = vadd.f32 %v1002_v58, %v922_v9 }
 0x1cd   :  { %v6517_v25 = vpop.f32.mrb[108].mxu0 }
 0x1ce   :  { %10078 = vst [vmem:[#allocation50_spill] sm:$0xff] %v6517_v25  ;;  %v835_v41 = vadd.f32 %v834_v44, %v6517_v25  ;;  %v923_v57 = vmul.f32 %v6517_v25, %v6517_v25  ;;  %v5190_v32 = vpop.f32.mrb[109].mxu0 }
 0x1cf   :  { %v6522_v35 = vpop.f32.mrb[110].mxu0 }
 0x1d0   :  { %10079 = vst [vmem:[#allocation51_spill] sm:$0xff] %v6522_v35  ;;  %v1004_v6 = vadd.f32 %v1003_v22, %v923_v57  ;;  %v836_v26 = vadd.f32 %v835_v41, %v6522_v35  ;;  %v924_v33 = vmul.f32 %v6522_v35, %v6522_v35  ;;  %v5191_v20 = vpop.f32.mrb[111].mxu0 }
 0x1d2   :  { %v1005_v23 = vadd.f32 %v1004_v6, %v924_v33 }
 0x1d5   :  { %v6527_v34 = vpop.f32.mrb[112].mxu0 }
 0x1d6   :  { %10080 = vst [vmem:[#allocation52_spill] sm:$0xff] %v6527_v34  ;;  %v837_v58 = vadd.f32 %v836_v26, %v6527_v34  ;;  %v925_v44 = vmul.f32 %v6527_v34, %v6527_v34  ;;  %v5194_v9 = vpop.f32.mrb[113].mxu0 }
 0x1d7   :  { %v6532_v25 = vpop.f32.mrb[114].mxu0 }
 0x1d8   :  { %v1006_v32 = vadd.f32 %v1005_v23, %v925_v44  ;;  %v838_v22 = vadd.f32 %v837_v58, %v6532_v25  ;;  %v926_v41 = vmul.f32 %v6532_v25, %v6532_v25  ;;  %v5195_v57 = vpop.f32.mrb[115].mxu0 }
 0x1da   :  { %v1007_v35 = vadd.f32 %v1006_v32, %v926_v41  ;;  %v929_v32 = vmul.f32 %v6249_v27, %v6249_v27 }
 0x1dd   :  { %v6537_v20 = vpop.f32.mrb[116].mxu0 }
 0x1de   :  { %10081 = vst [vmem:[#allocation53_spill] sm:$0xff] %v6537_v20  ;;  %v839_v6 = vadd.f32 %v838_v22, %v6537_v20  ;;  %v927_v26 = vmul.f32 %v6537_v20, %v6537_v20  ;;  %v5198_v33 = vpop.f32.mrb[117].mxu0  ;;  %v930_v22 = vmul.f32 %v6256_v50, %v6256_v50 }
 0x1df   :  { %v6542_v34 = vpop.f32.mrb[118].mxu0 }
 0x1e0   :  { %10082 = vst [vmem:[#allocation54_spill] sm:$0xff] %v6542_v34  ;;  %v1008_v9 = vadd.f32 %v1007_v35, %v927_v26  ;;  %v840_v23 = vadd.f32 %v839_v6, %v6542_v34  ;;  %v928_v58 = vmul.f32 %v6542_v34, %v6542_v34  ;;  %v5199_v44 = vpop.f32.mrb[119].mxu0  ;;  %v931_v35 = vmul.f32 %v6263_v43, %v6263_v43  ;;  %v6556_v34 = vpop.permute.xlu0 %5355 }
 0x1e1   :  { %10083 = vst [vmem:[#allocation55_spill] sm:$0xff] %v6556_v34  ;;  %v932_v44 = vmul.f32 %v6270_v24, %v6270_v24  ;;  %v780_v34 = vld [vmem:[%s9874_s3] sm:$0x1] }
 0x1e2   :  { %v841_v41 = vadd.f32 %v840_v23, %v6249_v27  ;;  %v1009_v57 = vadd.f32 %v1008_v9, %v928_v58  ;;  %v933_v58 = vmul.f32 %v6277_v56, %v6277_v56 }
 0x1e4   :  { %v842_v33 = vadd.f32 %v841_v41, %v6256_v50  ;;  %v1010_v20 = vadd.f32 %v1009_v57, %v929_v32  ;;  %v934_v57 = vmul.f32 %v6284_v7, %v6284_v7 }
 0x1e6   :  { %v843_v6 = vadd.f32 %v842_v33, %v6263_v43  ;;  %v1011_v26 = vadd.f32 %v1010_v20, %v930_v22  ;;  %v6567_v22 = vpop.permute.xlu0 %5360  ;;  %v6569_v33 = vpop.permute.xlu1 %5366 }
 0x1e7   :  { %10084 = vst [vmem:[#allocation56_spill] sm:$0xff] %v6567_v22  ;;  %10085 = vst [vmem:[#allocation57_spill] sm:$0xff] %v6569_v33  ;;  %v10138_v33 = vld [vmem:[#allocation48_spill] sm:$0xff]  ;;  %v10140_v22 = vld [vmem:[#allocation49_spill] sm:$0xff] }
 0x1e8   :  { %v844_v23 = vadd.f32 %v843_v6, %v6270_v24  ;;  %v1012_v9 = vadd.f32 %v1011_v26, %v931_v35  ;;  %v935_v6 = vmul.f32 %v6291_v12, %v6291_v12 }
 0x1ea   :  { %v845_v41 = vadd.f32 %v844_v23, %v6277_v56  ;;  %v1013_v32 = vadd.f32 %v1012_v9, %v932_v44  ;;  %v936_v23 = vmul.f32 %v6298_v16, %v6298_v16  ;;  %v6582_v56 = vpop.permute.xlu1 %5371 }
 0x1eb   :  { %10087 = vst [vmem:[#allocation59_spill] sm:$0xff] %v6582_v56  ;;  %v10137_v56 = vld [vmem:[#allocation47_spill] sm:$0xff] }
 0x1ec   :  { %v1014_v50 = vadd.f32 %v1013_v32, %v933_v58  ;;  %v846_v20 = vadd.f32 %v845_v41, %v6284_v7  ;;  %v937_v58 = vmul.f32 %v6305_v37, %v6305_v37  ;;  %v6580_v7 = vpop.permute.xlu0 %5376 }
 0x1ed   :  { %10086 = vst [vmem:[#allocation58_spill] sm:$0xff] %v6580_v7  ;;  %v10135_v7 = vld [vmem:[#allocation46_spill] sm:$0xff] }
 0x1ee   :  { %v847_v35 = vadd.f32 %v846_v20, %v6291_v12  ;;  %v1015_v26 = vadd.f32 %v1014_v50, %v934_v57  ;;  %v938_v20 = vmul.f32 %v6312_v60, %v6312_v60 }
 0x1f0   :  { %v848_v44 = vadd.f32 %v847_v35, %v6298_v16  ;;  %v1016_v9 = vadd.f32 %v1015_v26, %v935_v6  ;;  %v939_v35 = vmul.f32 %v6319_v29, %v6319_v29 }
 0x1f2   :  { %v849_v41 = vadd.f32 %v848_v44, %v6305_v37  ;;  %v1017_v32 = vadd.f32 %v1016_v9, %v936_v23  ;;  %v940_v23 = vmul.f32 %v6326_v38, %v6326_v38  ;;  %v6593_v9 = vpop.permute.xlu0 %5386  ;;  %v6595_v37 = vpop.permute.xlu1 %5381 }
 0x1f3   :  { %10088 = vst [vmem:[#allocation60_spill] sm:$0xff] %v6593_v9  ;;  %10089 = vst [vmem:[#allocation61_spill] sm:$0xff] %v6595_v37  ;;  %v10131_v9 = vld [vmem:[#allocation44_spill] sm:$0xff]  ;;  %v10133_v37 = vld [vmem:[#allocation45_spill] sm:$0xff] }
 0x1f4   :  { %v850_v50 = vadd.f32 %v849_v41, %v6312_v60  ;;  %v1018_v57 = vadd.f32 %v1017_v32, %v937_v58  ;;  %v941_v58 = vmul.f32 %v6333_v52, %v6333_v52 }
 0x1f6   :  { %v851_v6 = vadd.f32 %v850_v50, %v6319_v29  ;;  %v1019_v26 = vadd.f32 %v1018_v57, %v938_v20  ;;  %v942_v20 = vmul.f32 %v6340_v59, %v6340_v59 }
 0x1f8   :  { %v852_v16 = vadd.f32 %v851_v6, %v6326_v38  ;;  %v1020_v44 = vadd.f32 %v1019_v26, %v939_v35  ;;  %v943_v35 = vmul.f32 %v6347_v18, %v6347_v18  ;;  %v6606_v26 = vpop.permute.xlu0 %5396 }
 0x1f9   :  { %10090 = vst [vmem:[#allocation62_spill] sm:$0xff] %v6606_v26  ;;  %v10129_v26 = vld [vmem:[#allocation42_spill] sm:$0xff] }
 0x1fa   :  { %v1021_v12 = vadd.f32 %v1020_v44, %v940_v23  ;;  %v853_v41 = vadd.f32 %v852_v16, %v6333_v52  ;;  %v6608_v23 = vpop.permute.xlu1 %5391 }
 0x1fb   :  { %10091 = vst [vmem:[#allocation63_spill] sm:$0xff] %v6608_v23  ;;  %v10130_v23 = vld [vmem:[#allocation43_spill] sm:$0xff] }
 0x1fc   :  { %v1022_v32 = vadd.f32 %v1021_v12, %v941_v58  ;;  %v854_v50 = vadd.f32 %v853_v41, %v6340_v59  ;;  %v944_v12 = vmul.f32 %v6354_v36, %v6354_v36  ;;  %v6619_v59 = vpop.permute.xlu0 %5406 }
 0x1fd   :  { %10092 = vst [vmem:[#allocation64_spill] sm:$0xff] %v6619_v59  ;;  %v10127_v59 = vld [vmem:[#allocation40_spill] sm:$0xff] }
 0x1fe   :  { %v1023_v57 = vadd.f32 %v1022_v32, %v942_v20  ;;  %v855_v6 = vadd.f32 %v854_v50, %v6347_v18  ;;  %v945_v32 = vmul.f32 %v6361_v63, %v6361_v63  ;;  %v946_v18 = vmul.f32 %v6368_v17, %v6368_v17 }
 0x200   :  { %v1024_v16 = vadd.f32 %v1023_v57, %v943_v35  ;;  %v856_v44 = vadd.f32 %v855_v6, %v6354_v36  ;;  %v6621_v57 = vpop.permute.xlu1 %5401 }
 0x201   :  { %10093 = vst [vmem:[#allocation65_spill] sm:$0xff] %v6621_v57  ;;  %v10128_v57 = vld [vmem:[#allocation41_spill] sm:$0xff] }
 0x202   :  { %v1025_v41 = vadd.f32 %v1024_v16, %v944_v12  ;;  %v857_v58 = vadd.f32 %v856_v44, %v6361_v63  ;;  %v947_v16 = vmul.f32 %v6411_v28, %v6411_v28  ;;  %v6632_v63 = vpop.permute.xlu0 %5416 }
 0x203   :  { %10094 = vst [vmem:[#allocation66_spill] sm:$0xff] %v6632_v63 }
 0x204   :  { %v1026_v50 = vadd.f32 %v1025_v41, %v945_v32  ;;  %v858_v20 = vadd.f32 %v857_v58, %v6368_v17  ;;  %v948_v41 = vmul.f32 %v6418_v19, %v6418_v19  ;;  %v949_v58 = vmul.f32 %v6425_v10, %v6425_v10 }
 0x206   :  { %v1027_v6 = vadd.f32 %v1026_v50, %v946_v18  ;;  %v859_v35 = vadd.f32 %v858_v20, %v6411_v28  ;;  %v6634_v18 = vpop.permute.xlu1 %5411  ;;  %v6639_v36 = vpop.permute.xlu0 %5426 }
 0x207   :  { %10095 = vst [vmem:[#allocation67_spill] sm:$0xff] %v6634_v18  ;;  %10096 = vst [vmem:[#allocation68_spill] sm:$0xff] %v6639_v36  ;;  %v10126_v18 = vld [vmem:[#allocation39_spill] sm:$0xff] }
 0x208   :  { %v1028_v44 = vadd.f32 %v1027_v6, %v947_v16  ;;  %v860_v12 = vadd.f32 %v859_v35, %v6418_v19  ;;  %v950_v6 = vmul.f32 %v6435_v11, %v6435_v11 }
 0x20a   :  { %v1029_v32 = vadd.f32 %v1028_v44, %v948_v41  ;;  %v861_v17 = vadd.f32 %v860_v12, %v6425_v10  ;;  %v6641_v52 = vpop.permute.xlu1 %5421 }
 0x20b   :  { %10097 = vst [vmem:[#allocation69_spill] sm:$0xff] %v6641_v52 }
 0x20c   :  { %v1030_v50 = vadd.f32 %v1029_v32, %v949_v58  ;;  %v862_v20 = vadd.f32 %v861_v17, %v6435_v11  ;;  %v6643_v58 = vpop.permute.xlu0 %5436 }
 0x20d   :  { %10098 = vst [vmem:[#allocation70_spill] sm:$0xff] %v6643_v58  ;;  %v10124_v58 = vld [vmem:[#allocation37_spill] sm:$0xff] }
 0x20e   :  { %v863_v35 = vrot.slane %v862_v20, 4  ;;  %v1031_v16 = vadd.f32 %v1030_v50, %v950_v6  ;;  %v6645_v17 = vpop.permute.xlu1 %5431 }
 0x20f   :  { %10099 = vst [vmem:[#allocation71_spill] sm:$0xff] %v6645_v17  ;;  %v10125_v17 = vld [vmem:[#allocation38_spill] sm:$0xff] }
 0x210   :  { %v864_v28 = vadd.f32 %v863_v35, %v862_v20  ;;  %v1032_v19 = vrot.slane %v1031_v16, 4  ;;  %v6651_v35 = vpop.permute.xlu0 %5446 }
 0x211   :  { %10100 = vst [vmem:[#allocation72_spill] sm:$0xff] %v6651_v35  ;;  %v10123_v35 = vld [vmem:[#allocation36_spill] sm:$0xff] }
 0x212   :  { %v865_v44 = vrot.slane %v864_v28, 2  ;;  %v1033_v12 = vadd.f32 %v1032_v19, %v1031_v16  ;;  %v6653_v19 = vpop.permute.xlu1 %5441 }
 0x213   :  { %10101 = vst [vmem:[#allocation73_spill] sm:$0xff] %v6653_v19  ;;  %v10122_v19 = vld [vmem:[#allocation35_spill] sm:$0xff] }
 0x214   :  { %v866_v41 = vadd.f32 %v865_v44, %v864_v28  ;;  %v1034_v10 = vrot.slane %v1033_v12, 2  ;;  %v6661_v44 = vpop.permute.xlu0 %5456 }
 0x215   :  { %10102 = vst [vmem:[#allocation74_spill] sm:$0xff] %v6661_v44  ;;  %v10121_v44 = vld [vmem:[#allocation34_spill] sm:$0xff] }
 0x216   :  { %v867_v38 = vrot.slane %v866_v41, 1  ;;  %v1035_v29 = vadd.f32 %v1034_v10, %v1033_v12  ;;  %v5617_v10 = vld [vmem:[%s9873_s2 + $0x8] sm:$0xff]   ;;  %v6663_v12 = vpop.permute.xlu1 %5451 }
 0x217   :  { %5246 = vmatprep.subr.bf16.mxu1 %v5617_v10  ;;  %10103 = vst [vmem:[#allocation75_spill] sm:$0xff] %v6663_v12  ;;  %v10120_v12 = vld [vmem:[#allocation33_spill] sm:$0xff] }
 0x218   :  { %v868_v32 = vadd.f32 %v867_v38, %v866_v41  ;;  %v1036_v60 = vrot.slane %v1035_v29, 1  ;;  %5247 = vmatpush3.bf16.msra.mxu1 %v5617_v10  ;;  %v6688_v10 = vpop.permute.xlu0 %5466 }
 0x219   :  { %10104 = vst [vmem:[#allocation76_spill] sm:$0xff] %v6688_v10  ;;  %v10119_v10 = vld [vmem:[#allocation31_spill] sm:$0xff] }
 0x21a   :  { %v1037_v24 = vadd.f32 %v1036_v60, %v1035_v29  ;;  %v6647_v50 = vmul.f32 0.001953125, %v868_v32  ;;  %v1048_v29 = vlaneseq }
 0x21c   :  { %v1039_v20 = vmul.f32 0.001953125, %v1037_v24  ;;  %v1040_v6 = vmul.f32 %v6647_v50, %v6647_v50  ;;  %v6724_v38 = vpop.permute.xlu0 %5476 }
 0x21d   :  { %10107 = vst [vmem:[#allocation79_spill] sm:$0xff] %v6724_v38  ;;  %v10117_v38 = vld [vmem:[#allocation27_spill] sm:$0xff] }
 0x21e   :  { %v1041_v28 = vsub.f32 %v1039_v20, %v1040_v6  ;;  %v6690_v6 = vpop.permute.xlu1 %5461 }
 0x21f   :  { %10105 = vst [vmem:[#allocation77_spill] sm:$0xff] %v6690_v6  ;;  %v10118_v6 = vld [vmem:[#allocation29_spill] sm:$0xff] }
 0x220   :  { %v1042_v16 = vadd.f32 1e-05, %v1041_v28  ;;  %v1049_v28 = vshrl.u32 %v1048_v29, 7  ;;  %v10112_v29 = vld [vmem:[#allocation17_spill] sm:$0xff] }
 0x222   :  { %5665 = vrsqrt.f32 %v1042_v16  ;;  %v6702_v60 = vsub.s32 0, %v1049_v28  ;;  %v781_v28 = vld [vmem:[%s9875_s4] sm:$0x1]  ;;  %v6726_v52 = vpop.permute.xlu1 %5471 }
 0x223   :  { %10108 = vst [vmem:[#allocation80_spill] sm:$0xff] %v6726_v52  ;;  %v10115_v52 = vld [vmem:[#allocation23_spill] sm:$0xff] }
 0x224   :  { %10106 = vst [vmem:[#allocation78_spill] sm:$0xff] %v6702_v60 }
 0x22c   :  { %v5666_v63 = vpop.eup %5665 }
 0x22d   :  { %v1044_v36 = vmul.f32 %v5666_v63, %v780_v34 }
 0x22f   :  { %v1045_v63 = vmul.f32 %v1044_v36, %v6647_v50  ;;  %v6720_v34 = vrot.slane %v1044_v36, %v6702_v60 }
 0x231   :  { %v1046_v50 = vsub.f32 %v781_v28, %v1045_v63  ;;  %v1134_v36 = vmul.f32 %v6720_v34, %v6435_v11  ;;  %v6736_v41 = vmul.f32 %v6720_v34, %v6085_v15  ;;  %v6740_v32 = vmul.f32 %v6720_v34, %v6089_v47 }
 0x232   :  { %v6744_v20 = vmul.f32 %v6720_v34, %v6111_v62  ;;  %v6748_v16 = vmul.f32 %v6720_v34, %v6118_v5  ;;  %v6752_v28 = vmul.f32 %v6720_v34, %v6137_v48  ;;  %v6756_v15 = vmul.f32 %v6720_v34, %v6144_v53 }
 0x233   :  { %v6759_v11 = vrot.slane %v1046_v50, %v6702_v60  ;;  %v6763_v47 = vmul.f32 %v6720_v34, %v6156_v3  ;;  %v6767_v62 = vmul.f32 %v6720_v34, %v6163_v8  ;;  %v6771_v5 = vmul.f32 %v6720_v34, %v6174_v21  ;;  %v10113_v60 = vld [vmem:[#allocation19_spill] sm:$0xff] }
 0x234   :  { %v6775_v48 = vmul.f32 %v6720_v34, %v6181_v54  ;;  %v6779_v53 = vmul.f32 %v6720_v34, %v6192_v2  ;;  %v6783_v3 = vmul.f32 %v6720_v34, %v6199_v39  ;;  %v6787_v8 = vmul.f32 %v6720_v34, %v6210_v46  ;;  %v5618_v39 = vld [vmem:[%s9873_s2 + $0x10] sm:$0xff]  }
 0x235   :  { %v6790_v63 = vadd.f32 %v6759_v11, %v1134_v36  ;;  %v6794_v21 = vmul.f32 %v6720_v34, %v6217_v0  ;;  %v6798_v54 = vmul.f32 %v6720_v34, %v6228_v49  ;;  %v6802_v2 = vmul.f32 %v6720_v34, %v6235_v4  ;;  %5248 = vmatprep.subr.bf16.mxu1 %v5618_v39  ;;  %v10110_v36 = vld [vmem:[#allocation13_spill] sm:$0xff] }
 0x236   :  { %v6809_v46 = vmul.f32 %v6720_v34, %v6244_v14  ;;  %v6813_v0 = vmul.f32 %v6720_v34, %v6251_v45  ;;  %v6817_v49 = vmul.f32 %v6720_v34, %v6258_v31  ;;  %v6821_v4 = vmul.f32 %v6720_v34, %v6265_v61  ;;  %5249 = vmatpush3.bf16.msra.mxu1 %v5618_v39  ;;  %v10116_v39 = vld [vmem:[#allocation25_spill] sm:$0xff] }
 0x237   :  { %10109 = vst [vmem:[#allocation81_spill] sm:$0xff] %v6790_v63  ;;  %v6825_v50 = vmul.f32 %v6720_v34, %v6272_v30  ;;  %v6829_v14 = vmul.f32 %v6720_v34, %v6279_v1  ;;  %v6833_v45 = vmul.f32 %v6720_v34, %v6286_v42  ;;  %v6837_v31 = vmul.f32 %v6720_v34, %v6293_v13  ;;  %v10111_v13 = vld [vmem:[#allocation15_spill] sm:$0xff]  ;;  %v10114_v63 = vld [vmem:[#allocation21_spill] sm:$0xff] }
 0x238   :  { %v6841_v61 = vmul.f32 %v6720_v34, %v6300_v51  ;;  %v6845_v30 = vmul.f32 %v6720_v34, %v6307_v55  ;;  %v6849_v1 = vmul.f32 %v6720_v34, %v6314_v40  ;;  %v6853_v42 = vmul.f32 %v6720_v34, %v10110_v36 }
 0x239   :  { %v6857_v24 = vmul.f32 %v6720_v34, %v10111_v13  ;;  %v6861_v51 = vmul.f32 %v6720_v34, %v10112_v29  ;;  %v6865_v55 = vmul.f32 %v6720_v34, %v10113_v60  ;;  %v6869_v40 = vmul.f32 %v6720_v34, %v10114_v63 }
 0x23a   :  { %v6873_v36 = vmul.f32 %v6720_v34, %v10115_v52  ;;  %v6877_v13 = vmul.f32 %v6720_v34, %v10116_v39  ;;  %v6881_v29 = vmul.f32 %v6720_v34, %v10117_v38  ;;  %v6885_v60 = vmul.f32 %v6720_v34, %v10118_v6 }
 0x23b   :  { %v6889_v63 = vmul.f32 %v6720_v34, %v10119_v10  ;;  %v6893_v52 = vmul.f32 %v6720_v34, %v10120_v12  ;;  %v6897_v39 = vmul.f32 %v6720_v34, %v10121_v44  ;;  %v6901_v38 = vmul.f32 %v6720_v34, %v10122_v19 }
 0x23c   :  { %v6905_v6 = vmul.f32 %v6720_v34, %v10123_v35  ;;  %v6909_v10 = vmul.f32 %v6720_v34, %v10124_v58  ;;  %v6913_v12 = vmul.f32 %v6720_v34, %v10125_v17  ;;  %v6917_v44 = vmul.f32 %v6720_v34, %v10126_v18 }
 0x23d   :  { %v6921_v19 = vmul.f32 %v6720_v34, %v10127_v59  ;;  %v6925_v35 = vmul.f32 %v6720_v34, %v10128_v57  ;;  %v6929_v58 = vmul.f32 %v6720_v34, %v10129_v26  ;;  %v6933_v17 = vmul.f32 %v6720_v34, %v10130_v23 }
 0x23e   :  { %v6937_v18 = vmul.f32 %v6720_v34, %v10131_v9  ;;  %v6941_v59 = vmul.f32 %v6720_v34, %v10133_v37  ;;  %v6945_v57 = vmul.f32 %v6720_v34, %v10135_v7  ;;  %v6949_v26 = vmul.f32 %v6720_v34, %v10137_v56 }
 0x23f   :  { %v6953_v23 = vmul.f32 %v6720_v34, %v10138_v33  ;;  %v6957_v9 = vmul.f32 %v6720_v34, %v10140_v22  ;;  %v6973_v33 = vmul.f32 %v6720_v34, %v6532_v25  ;;  %v6993_v25 = vmul.f32 %v6720_v34, %v6263_v43 }
 0x240   :  { %10132 = vst [vmem:[#allocation13_spill] sm:$0xff] %v6937_v18  ;;  %10134 = vst [vmem:[#allocation15_spill] sm:$0xff] %v6941_v59  ;;  %v10142_v18 = vld [vmem:[#allocation50_spill] sm:$0xff]  ;;  %v10143_v59 = vld [vmem:[#allocation51_spill] sm:$0xff] }
 0x241   :  { %10136 = vst [vmem:[#allocation17_spill] sm:$0xff] %v6945_v57  ;;  %10139 = vst [vmem:[#allocation19_spill] sm:$0xff] %v6953_v23  ;;  %v6961_v37 = vmul.f32 %v6720_v34, %v10142_v18  ;;  %v6965_v7 = vmul.f32 %v6720_v34, %v10143_v59  ;;  %v10145_v57 = vld [vmem:[#allocation52_spill] sm:$0xff]  ;;  %v10147_v23 = vld [vmem:[#allocation53_spill] sm:$0xff]  ;;  %v6985_v59 = vmul.f32 %v6720_v34, %v6249_v27 }
 0x242   :  { %10141 = vst [vmem:[#allocation21_spill] sm:$0xff] %v6957_v9  ;;  %v6969_v56 = vmul.f32 %v6720_v34, %v10145_v57  ;;  %10146 = vst [vmem:[#allocation25_spill] sm:$0xff] %v6973_v33  ;;  %v6977_v22 = vmul.f32 %v6720_v34, %v10147_v23  ;;  %v10149_v9 = vld [vmem:[#allocation54_spill] sm:$0xff]  ;;  %v10155_v33 = vld [vmem:[#allocation5_spill] sm:$0xff] }
 0x243   :  { %10144 = vst [vmem:[#allocation23_spill] sm:$0xff] %v6965_v7  ;;  %v6981_v18 = vmul.f32 %v6720_v34, %v10149_v9  ;;  %10151 = vst [vmem:[#allocation31_spill] sm:$0xff] %v6985_v59  ;;  %v10152_v7 = vld [vmem:[#allocation4_spill] sm:$0xff]  ;;  %v6997_v23 = vmul.f32 %v6720_v34, %v10155_v33 }
 0x244   :  { %10148 = vst [vmem:[#allocation27_spill] sm:$0xff] %v6977_v22  ;;  %v6989_v57 = vmul.f32 %v6720_v34, %v10152_v7  ;;  %10154 = vst [vmem:[#allocation34_spill] sm:$0xff] %v6993_v25  ;;  %v10157_v22 = vld [vmem:[#allocation6_spill] sm:$0xff]  ;;  %v10161_v59 = vld [vmem:[#allocation8_spill] sm:$0xff] }
 0x245   :  { %10150 = vst [vmem:[#allocation29_spill] sm:$0xff] %v6981_v18  ;;  %10156 = vst [vmem:[#allocation35_spill] sm:$0xff] %v6997_v23  ;;  %v7001_v9 = vmul.f32 %v6720_v34, %v10157_v22  ;;  %v10159_v18 = vld [vmem:[#allocation7_spill] sm:$0xff]  ;;  %v7009_v7 = vmul.f32 %v6720_v34, %v10161_v59  ;;  %v10165_v25 = vld [vmem:[#allocation10_spill] sm:$0xff] }
 0x246   :  { %10153 = vst [vmem:[#allocation33_spill] sm:$0xff] %v6989_v57  ;;  %v7005_v27 = vmul.f32 %v6720_v34, %v10159_v18  ;;  %v10163_v57 = vld [vmem:[#allocation9_spill] sm:$0xff]  ;;  %v7017_v33 = vmul.f32 %v6720_v34, %v10165_v25  ;;  %v10167_v23 = vld [vmem:[#allocation11_spill] sm:$0xff] }
 0x247   :  { %10158 = vst [vmem:[#allocation36_spill] sm:$0xff] %v7001_v9  ;;  %10162 = vst [vmem:[#allocation38_spill] sm:$0xff] %v7009_v7  ;;  %v7013_v43 = vmul.f32 %v6720_v34, %v10163_v57  ;;  %v7021_v22 = vmul.f32 %v6720_v34, %v10167_v23  ;;  %v10169_v9 = vld [vmem:[#allocation12_spill] sm:$0xff] }
 0x248   :  { %10160 = vst [vmem:[#allocation37_spill] sm:$0xff] %v7005_v27  ;;  %10166 = vst [vmem:[#allocation40_spill] sm:$0xff] %v7017_v33  ;;  %v7025_v18 = vmul.f32 %v6720_v34, %v10169_v9  ;;  %v10171_v27 = vld [vmem:[#allocation14_spill] sm:$0xff]  ;;  %v10173_v7 = vld [vmem:[#allocation16_spill] sm:$0xff] }
 0x249   :  { %10164 = vst [vmem:[#allocation39_spill] sm:$0xff] %v7013_v43  ;;  %10168 = vst [vmem:[#allocation41_spill] sm:$0xff] %v7021_v22  ;;  %v7029_v59 = vmul.f32 %v6720_v34, %v10171_v27  ;;  %v7033_v57 = vmul.f32 %v6720_v34, %v10173_v7  ;;  %v10175_v43 = vld [vmem:[#allocation18_spill] sm:$0xff]  ;;  %v10177_v33 = vld [vmem:[#allocation20_spill] sm:$0xff] }
 0x24a   :  { %10170 = vst [vmem:[#allocation42_spill] sm:$0xff] %v7025_v18  ;;  %v7037_v25 = vmul.f32 %v6720_v34, %v10175_v43  ;;  %v7041_v23 = vmul.f32 %v6720_v34, %v10177_v33  ;;  %v10179_v22 = vld [vmem:[#allocation22_spill] sm:$0xff]  ;;  %v10180_v18 = vld [vmem:[#allocation24_spill] sm:$0xff] }
 0x24b   :  { %10172 = vst [vmem:[#allocation43_spill] sm:$0xff] %v7029_v59  ;;  %10174 = vst [vmem:[#allocation44_spill] sm:$0xff] %v7033_v57  ;;  %v7045_v9 = vmul.f32 %v6720_v34, %v10179_v22  ;;  %v7049_v27 = vmul.f32 %v6720_v34, %v10180_v18  ;;  %v10181_v59 = vld [vmem:[#allocation26_spill] sm:$0xff]  ;;  %v10182_v57 = vld [vmem:[#allocation28_spill] sm:$0xff]  ;;  %v7069_v18 = vadd.f32 %v6759_v11, %v6736_v41 }
 0x24c   :  { %10176 = vst [vmem:[#allocation45_spill] sm:$0xff] %v7037_v25  ;;  %10178 = vst [vmem:[#allocation46_spill] sm:$0xff] %v7041_v23  ;;  %v7053_v7 = vmul.f32 %v6720_v34, %v10181_v59  ;;  %v7057_v43 = vmul.f32 %v6720_v34, %v10182_v57  ;;  %v10183_v25 = vld [vmem:[#allocation30_spill] sm:$0xff]  ;;  %v10184_v23 = vld [vmem:[#allocation32_spill] sm:$0xff]  ;;  %v7073_v59 = vadd.f32 %v6759_v11, %v6740_v32 }
 0x24d   :  { %v7061_v33 = vmul.f32 %v6720_v34, %v10183_v25  ;;  %v7065_v22 = vmul.f32 %v6720_v34, %v10184_v23  ;;  %v7077_v57 = vadd.f32 %v6759_v11, %v6744_v20  ;;  %v7081_v25 = vadd.f32 %v6759_v11, %v6748_v16 }
 0x24e   :  { %v7085_v34 = vadd.f32 %v6759_v11, %v6752_v28  ;;  %v7089_v41 = vadd.f32 %v6759_v11, %v6756_v15  ;;  %v7093_v32 = vadd.f32 %v6759_v11, %v6763_v47  ;;  %v7097_v20 = vadd.f32 %v6759_v11, %v6767_v62 }
 0x24f   :  { %v7101_v16 = vadd.f32 %v6759_v11, %v6771_v5  ;;  %v7105_v28 = vadd.f32 %v6759_v11, %v6775_v48  ;;  %v7109_v15 = vadd.f32 %v6759_v11, %v6779_v53  ;;  %v7113_v47 = vadd.f32 %v6759_v11, %v6783_v3 }
 0x250   :  { %v7117_v62 = vadd.f32 %v6759_v11, %v6787_v8  ;;  %v7121_v5 = vadd.f32 %v6759_v11, %v6794_v21  ;;  %v7125_v48 = vadd.f32 %v6759_v11, %v6798_v54  ;;  %v7129_v53 = vadd.f32 %v6759_v11, %v6802_v2 }
 0x251   :  { %v7133_v3 = vadd.f32 %v6759_v11, %v6809_v46  ;;  %v7137_v8 = vadd.f32 %v6759_v11, %v6813_v0  ;;  %v7141_v21 = vadd.f32 %v6759_v11, %v6817_v49  ;;  %v7145_v54 = vadd.f32 %v6759_v11, %v6821_v4 }
 0x252   :  { %v7149_v2 = vadd.f32 %v6759_v11, %v6825_v50  ;;  %v7153_v46 = vadd.f32 %v6759_v11, %v6829_v14  ;;  %v7157_v0 = vadd.f32 %v6759_v11, %v6833_v45  ;;  %v7161_v49 = vadd.f32 %v6759_v11, %v6837_v31 }
 0x253   :  { %v7165_v4 = vadd.f32 %v6759_v11, %v6841_v61  ;;  %v7169_v50 = vadd.f32 %v6759_v11, %v6845_v30  ;;  %v7173_v14 = vadd.f32 %v6759_v11, %v6849_v1  ;;  %v7177_v45 = vadd.f32 %v6759_v11, %v6853_v42 }
 0x254   :  { %v7181_v31 = vadd.f32 %v6759_v11, %v6857_v24  ;;  %v7185_v61 = vadd.f32 %v6759_v11, %v6861_v51  ;;  %v7189_v30 = vadd.f32 %v6759_v11, %v6865_v55  ;;  %v7193_v1 = vadd.f32 %v6759_v11, %v6869_v40 }
 0x255   :  { %v7197_v42 = vadd.f32 %v6759_v11, %v6873_v36  ;;  %v7201_v24 = vadd.f32 %v6759_v11, %v6877_v13  ;;  %v7205_v51 = vadd.f32 %v6759_v11, %v6881_v29  ;;  %v7209_v55 = vadd.f32 %v6759_v11, %v6885_v60  ;;  %v5619_v29 = vld [vmem:[%s9873_s2 + $0x18] sm:$0xff]  }
 0x256   :  { %v7213_v40 = vadd.f32 %v6759_v11, %v6889_v63  ;;  %v7217_v36 = vadd.f32 %v6759_v11, %v6893_v52  ;;  %v7221_v13 = vadd.f32 %v6759_v11, %v6897_v39  ;;  %v7228_v60 = vadd.f32 %v6759_v11, %v6901_v38  ;;  %5250 = vmatprep.subr.bf16.mxu1 %v5619_v29 }
 0x257   :  { %v7232_v63 = vadd.f32 %v6759_v11, %v6905_v6  ;;  %v7236_v52 = vadd.f32 %v6759_v11, %v6909_v10  ;;  %v7240_v39 = vadd.f32 %v6759_v11, %v6913_v12  ;;  %v7244_v23 = vadd.f32 %v6759_v11, %v6917_v44  ;;  %5251 = vmatpush3.bf16.msra.mxu1 %v5619_v29  ;;  %v10202_v29 = vld [vmem:[#allocation25_spill] sm:$0xff] }
 0x258   :  { %v7248_v38 = vadd.f32 %v6759_v11, %v6921_v19  ;;  %v7252_v6 = vadd.f32 %v6759_v11, %v6925_v35  ;;  %v7256_v10 = vadd.f32 %v6759_v11, %v6929_v58  ;;  %v7260_v12 = vadd.f32 %v6759_v11, %v6933_v17 }
 0x259   :  { %10185 = vst [vmem:[#allocation47_spill] sm:$0xff] %v7240_v39  ;;  %10186 = vst [vmem:[#allocation48_spill] sm:$0xff] %v7244_v23  ;;  %v10190_v39 = vld [vmem:[#allocation13_spill] sm:$0xff]  ;;  %v10191_v23 = vld [vmem:[#allocation15_spill] sm:$0xff]  ;;  %v7276_v58 = vadd.f32 %v6759_v11, %v6949_v26  ;;  %v7296_v26 = vadd.f32 %v6759_v11, %v6969_v56 }
 0x25a   :  { %10187 = vst [vmem:[#allocation49_spill] sm:$0xff] %v7248_v38  ;;  %10188 = vst [vmem:[#allocation50_spill] sm:$0xff] %v7256_v10  ;;  %v7264_v44 = vadd.f32 %v6759_v11, %v10190_v39  ;;  %v7268_v19 = vadd.f32 %v6759_v11, %v10191_v23  ;;  %v10193_v38 = vld [vmem:[#allocation17_spill] sm:$0xff]  ;;  %v10196_v10 = vld [vmem:[#allocation19_spill] sm:$0xff]  ;;  %v7288_v23 = vadd.f32 %v6759_v11, %v6961_v37 }
 0x25b   :  { %10189 = vst [vmem:[#allocation51_spill] sm:$0xff] %v7260_v12  ;;  %v7272_v35 = vadd.f32 %v6759_v11, %v10193_v38  ;;  %10195 = vst [vmem:[#allocation54_spill] sm:$0xff] %v7276_v58  ;;  %v7280_v17 = vadd.f32 %v6759_v11, %v10196_v10  ;;  %v10197_v12 = vld [vmem:[#allocation21_spill] sm:$0xff]  ;;  %v7300_v10 = vadd.f32 %v6759_v11, %v10202_v29  ;;  %v10204_v58 = vld [vmem:[#allocation27_spill] sm:$0xff] }
 0x25c   :  { %10192 = vst [vmem:[#allocation52_spill] sm:$0xff] %v7268_v19  ;;  %v7284_v39 = vadd.f32 %v6759_v11, %v10197_v12  ;;  %10198 = vst [vmem:[#allocation4_spill] sm:$0xff] %v7288_v23  ;;  %v10199_v19 = vld [vmem:[#allocation23_spill] sm:$0xff]  ;;  %v7304_v12 = vadd.f32 %v6759_v11, %v10204_v58 }
 0x25d   :  { %10194 = vst [vmem:[#allocation53_spill] sm:$0xff] %v7272_v35  ;;  %v7292_v38 = vadd.f32 %v6759_v11, %v10199_v19  ;;  %10201 = vst [vmem:[#allocation6_spill] sm:$0xff] %v7296_v26  ;;  %v10206_v35 = vld [vmem:[#allocation29_spill] sm:$0xff]  ;;  %v10208_v23 = vld [vmem:[#allocation31_spill] sm:$0xff] }
 0x25e   :  { %10203 = vst [vmem:[#allocation7_spill] sm:$0xff] %v7300_v10  ;;  %10205 = vst [vmem:[#allocation8_spill] sm:$0xff] %v7304_v12  ;;  %v7308_v37 = vadd.f32 %v6759_v11, %v10206_v35  ;;  %v7312_v19 = vadd.f32 %v6759_v11, %v10208_v23  ;;  %v10212_v26 = vld [vmem:[#allocation34_spill] sm:$0xff]  ;;  %v10214_v10 = vld [vmem:[#allocation35_spill] sm:$0xff] }
 0x25f   :  { %10200 = vst [vmem:[#allocation5_spill] sm:$0xff] %v7292_v38  ;;  %v10210_v38 = vld [vmem:[#allocation33_spill] sm:$0xff]  ;;  %v7320_v29 = vadd.f32 %v6759_v11, %v10212_v26  ;;  %v7324_v58 = vadd.f32 %v6759_v11, %v10214_v10  ;;  %v10216_v12 = vld [vmem:[#allocation36_spill] sm:$0xff] }
 0x260   :  { %10207 = vst [vmem:[#allocation9_spill] sm:$0xff] %v7308_v37  ;;  %10209 = vst [vmem:[#allocation10_spill] sm:$0xff] %v7312_v19  ;;  %v7316_v56 = vadd.f32 %v6759_v11, %v10210_v38  ;;  %v7328_v35 = vadd.f32 %v6759_v11, %v10216_v12  ;;  %v10218_v37 = vld [vmem:[#allocation37_spill] sm:$0xff]  ;;  %v10220_v19 = vld [vmem:[#allocation38_spill] sm:$0xff] }
 0x261   :  { %10213 = vst [vmem:[#allocation12_spill] sm:$0xff] %v7320_v29  ;;  %10215 = vst [vmem:[#allocation14_spill] sm:$0xff] %v7324_v58  ;;  %v7332_v23 = vadd.f32 %v6759_v11, %v10218_v37  ;;  %v7336_v38 = vadd.f32 %v6759_v11, %v10220_v19  ;;  %v10224_v29 = vld [vmem:[#allocation40_spill] sm:$0xff]  ;;  %v10226_v58 = vld [vmem:[#allocation41_spill] sm:$0xff] }
 0x262   :  { %10211 = vst [vmem:[#allocation11_spill] sm:$0xff] %v7316_v56  ;;  %10217 = vst [vmem:[#allocation16_spill] sm:$0xff] %v7328_v35  ;;  %v10222_v56 = vld [vmem:[#allocation39_spill] sm:$0xff]  ;;  %v7344_v10 = vadd.f32 %v6759_v11, %v10224_v29  ;;  %v7348_v12 = vadd.f32 %v6759_v11, %v10226_v58  ;;  %v10227_v35 = vld [vmem:[#allocation42_spill] sm:$0xff] }
 0x263   :  { %10219 = vst [vmem:[#allocation18_spill] sm:$0xff] %v7332_v23  ;;  %10221 = vst [vmem:[#allocation20_spill] sm:$0xff] %v7336_v38  ;;  %v7340_v26 = vadd.f32 %v6759_v11, %v10222_v56  ;;  %v7352_v37 = vadd.f32 %v6759_v11, %v10227_v35  ;;  %v10229_v23 = vld [vmem:[#allocation43_spill] sm:$0xff]  ;;  %v10231_v38 = vld [vmem:[#allocation44_spill] sm:$0xff]  ;;  %v7372_v35 = vadd.f32 %v6759_v11, %v7045_v9 }
 0x264   :  { %10225 = vst [vmem:[#allocation24_spill] sm:$0xff] %v7344_v10  ;;  %v7356_v19 = vadd.f32 %v6759_v11, %v10229_v23  ;;  %v7360_v56 = vadd.f32 %v6759_v11, %v10231_v38  ;;  %v10233_v10 = vld [vmem:[#allocation46_spill] sm:$0xff]  ;;  %v7376_v23 = vadd.f32 %v6759_v11, %v7049_v27  ;;  %v7380_v38 = vadd.f32 %v6759_v11, %v7053_v7 }
 0x265   :  { %10223 = vst [vmem:[#allocation22_spill] sm:$0xff] %v7340_v26  ;;  %10228 = vst [vmem:[#allocation26_spill] sm:$0xff] %v7352_v37  ;;  %v10232_v26 = vld [vmem:[#allocation45_spill] sm:$0xff]  ;;  %v7368_v58 = vadd.f32 %v6759_v11, %v10233_v10  ;;  %v7388_v10 = vadd.f32 %v6759_v11, %v7061_v33  ;;  %v7392_v9 = vadd.f32 %v6759_v11, %v7065_v22  ;;  %v1224_v27 = vmax.f32 %v7073_v59, 0.0 }
 0x266   :  { %10230 = vst [vmem:[#allocation28_spill] sm:$0xff] %v7356_v19  ;;  %v7364_v29 = vadd.f32 %v6759_v11, %v10232_v26  ;;  %10235 = vst [vmem:[#allocation32_spill] sm:$0xff] %v7372_v35  ;;  %v7384_v26 = vadd.f32 %v6759_v11, %v7057_v43  ;;  %v1223_v35 = vmax.f32 %v7069_v18, 0.0  ;;  %v1226_v7 = vmax.f32 %v7081_v25, 0.0 }
 0x267   :  { %10234 = vst [vmem:[#allocation30_spill] sm:$0xff] %v7368_v58  ;;  %10236 = vst [vmem:[#allocation13_spill] sm:$0xff] %v7376_v23  ;;  %v1225_v58 = vmax.f32 %v7077_v57, 0.0  ;;  %v1228_v43 = vmax.f32 %v7089_v41, 0.0  ;;  %v1230_v33 = vmax.f32 %v7097_v20, 0.0  ;;  %v1232_v11 = vmax.f32 %v7105_v28, 0.0 }
 0x268   :  { %10237 = vst [vmem:[#allocation15_spill] sm:$0xff] %v7380_v38  ;;  %10238 = vst [vmem:[#allocation17_spill] sm:$0xff] %v7384_v26  ;;  %v1227_v38 = vmax.f32 %v7085_v34, 0.0  ;;  %v1229_v26 = vmax.f32 %v7093_v32, 0.0  ;;  %v1233_v22 = vmax.f32 %v7109_v15, 0.0  ;;  %v1234_v18 = vmax.f32 %v7113_v47, 0.0 }
 0x269   :  { %10239 = vst [vmem:[#allocation19_spill] sm:$0xff] %v7388_v10  ;;  %10240 = vst [vmem:[#allocation21_spill] sm:$0xff] %v7392_v9  ;;  %v1231_v10 = vmax.f32 %v7101_v16, 0.0  ;;  %v1235_v59 = vmax.f32 %v7117_v62, 0.0  ;;  %v1236_v57 = vmax.f32 %v7121_v5, 0.0  ;;  %v1237_v25 = vmax.f32 %v7125_v48, 0.0 }
 0x26a   :  { %v1238_v34 = vmax.f32 %v7129_v53, 0.0  ;;  %v1239_v41 = vmax.f32 %v7133_v3, 0.0  ;;  %v1240_v32 = vmax.f32 %v7137_v8, 0.0  ;;  %v1241_v20 = vmax.f32 %v7141_v21, 0.0 }
 0x26b   :  { %v1242_v16 = vmax.f32 %v7145_v54, 0.0  ;;  %v1243_v28 = vmax.f32 %v7149_v2, 0.0  ;;  %v1244_v15 = vmax.f32 %v7153_v46, 0.0  ;;  %v1245_v47 = vmax.f32 %v7157_v0, 0.0  ;;  %v5620_v2 = vld [vmem:[%s9873_s2 + $0x20] sm:$0xff]   ;;  %v10244_v46 = vld [vmem:[#allocation56_spill] sm:$0xff] }
 0x26c   :  { %v1246_v62 = vmax.f32 %v7161_v49, 0.0  ;;  %v1247_v5 = vmax.f32 %v7165_v4, 0.0  ;;  %v1248_v48 = vmax.f32 %v7169_v50, 0.0  ;;  %v1249_v53 = vmax.f32 %v7173_v14, 0.0  ;;  %v10241_v50 = vld [vmem:[#allocation55_spill] sm:$0xff]  ;;  %v10247_v4 = vld [vmem:[#allocation57_spill] sm:$0xff]  ;;  %5252 = vmatprep.subr.bf16.mxu1 %v5620_v2 }
 0x26d   :  { %v1250_v3 = vmax.f32 %v7177_v45, 0.0  ;;  %v1251_v8 = vmax.f32 %v7181_v31, 0.0  ;;  %v1252_v21 = vmax.f32 %v7185_v61, 0.0  ;;  %v10242_v14 = vunpack.i.l.bf16 %v10241_v50  ;;  %5253 = vmatpush3.bf16.msra.mxu1 %v5620_v2 }
 0x26e   :  { %v10243_v31 = vunpack.i.h.bf16 %v10241_v50  ;;  %v10245_v54 = vunpack.i.l.bf16 %v10244_v46  ;;  %v10246_v49 = vunpack.i.h.bf16 %v10244_v46  ;;  %v10248_v23 = vunpack.i.l.bf16 %v10247_v4 }
 0x26f   :  { %v7432_v45 = vmul.f32 %v10242_v14, %v1223_v35  ;;  %v10249_v50 = vunpack.i.h.bf16 %v10247_v4  ;;  %v10250_v14 = vld [vmem:[#allocation59_spill] sm:$0xff]  ;;  %v10259_v4 = vld [vmem:[#allocation60_spill] sm:$0xff] }
 0x270   :  { %v7436_v61 = vmul.f32 %v10243_v31, %v1224_v27  ;;  %v7443_v0 = vmul.f32 %v10245_v54, %v1225_v58  ;;  %v7447_v9 = vmul.f32 %v10246_v49, %v1226_v7  ;;  %v7451_v35 = vmul.f32 %v10248_v23, %v1227_v38  ;;  %v10253_v54 = vld [vmem:[#allocation58_spill] sm:$0xff]  ;;  %v10256_v38 = vld [vmem:[#allocation61_spill] sm:$0xff] }
 0x271   :  { %v7455_v27 = vmul.f32 %v10249_v50, %v1228_v43  ;;  %v10251_v31 = vunpack.i.l.bf16 %v10250_v14  ;;  %v10252_v37 = vunpack.i.h.bf16 %v10250_v14  ;;  %v10254_v46 = vunpack.i.l.bf16 %v10253_v54  ;;  %1879 = vst [vmem:[#allocation2] sm:$0xff] %v7432_v45 }
 0x272   :  { %v10255_v49 = vunpack.i.h.bf16 %v10253_v54  ;;  %1880 = vst [vmem:[#allocation2 + $0x8] sm:$0xff] %v7436_v61  ;;  %1881 = vst [vmem:[#allocation2 + $0x10] sm:$0xff] %v7443_v0 }
 0x273   :  { %v7459_v19 = vmul.f32 %v10251_v31, %v1229_v26  ;;  %v7463_v58 = vmul.f32 %v10252_v37, %v1230_v33  ;;  %v7467_v7 = vmul.f32 %v10254_v46, %v1231_v10  ;;  %v10257_v26 = vunpack.i.l.bf16 %v10256_v38  ;;  %1882 = vst [vmem:[#allocation2 + $0x18] sm:$0xff] %v7447_v9  ;;  %1883 = vst [vmem:[#allocation2 + $0x20] sm:$0xff] %v7451_v35 }
 0x274   :  { %v7471_v23 = vmul.f32 %v10255_v49, %v1232_v11  ;;  %v10258_v37 = vunpack.i.h.bf16 %v10256_v38  ;;  %v10260_v10 = vunpack.i.l.bf16 %v10259_v4  ;;  %v10261_v11 = vunpack.i.h.bf16 %v10259_v4  ;;  %1884 = vst [vmem:[#allocation2 + $0x28] sm:$0xff] %v7455_v27  ;;  %v10271_v4 = vld [vmem:[#allocation64_spill] sm:$0xff] }
 0x275   :  { %v7477_v43 = vmul.f32 %v10257_v26, %v1233_v22  ;;  %v10262_v22 = vld [vmem:[#allocation63_spill] sm:$0xff]  ;;  %1885 = vst [vmem:[#allocation2 + $0x30] sm:$0xff] %v7459_v19  ;;  %1886 = vst [vmem:[#allocation2 + $0x38] sm:$0xff] %v7463_v58 }
 0x276   :  { %v7481_v33 = vmul.f32 %v10258_v37, %v1234_v18  ;;  %v7485_v50 = vmul.f32 %v10260_v10, %v1235_v59  ;;  %v7489_v14 = vmul.f32 %v10261_v11, %v1236_v57  ;;  %v10263_v18 = vunpack.i.l.bf16 %v10262_v22  ;;  %v10265_v57 = vld [vmem:[#allocation62_spill] sm:$0xff]  ;;  %1887 = vst [vmem:[#allocation2 + $0x40] sm:$0xff] %v7467_v7  ;;  %1888 = vst [vmem:[#allocation2 + $0x48] sm:$0xff] %v7471_v23 }
 0x277   :  { %v10264_v59 = vunpack.i.h.bf16 %v10262_v22  ;;  %v10266_v46 = vunpack.i.l.bf16 %v10265_v57  ;;  %v10267_v38 = vunpack.i.h.bf16 %v10265_v57  ;;  %v10272_v10 = vunpack.i.l.bf16 %v10271_v4  ;;  %1889 = vst [vmem:[#allocation2 + $0x50] sm:$0xff] %v7477_v43  ;;  %v10277_v57 = vld [vmem:[#allocation66_spill] sm:$0xff] }
 0x278   :  { %v7497_v31 = vmul.f32 %v10263_v18, %v1237_v25  ;;  %v10268_v25 = vld [vmem:[#allocation65_spill] sm:$0xff]  ;;  %v10273_v11 = vunpack.i.h.bf16 %v10271_v4  ;;  %1890 = vst [vmem:[#allocation2 + $0x58] sm:$0xff] %v7481_v33  ;;  %1891 = vst [vmem:[#allocation2 + $0x60] sm:$0xff] %v7485_v50  ;;  %v10283_v4 = vld [vmem:[#allocation68_spill] sm:$0xff] }
 0x279   :  { %v7501_v54 = vmul.f32 %v10264_v59, %v1238_v34  ;;  %v7505_v49 = vmul.f32 %v10266_v46, %v1239_v41  ;;  %v7509_v26 = vmul.f32 %v10267_v38, %v1240_v32  ;;  %v10269_v2 = vunpack.i.l.bf16 %v10268_v25  ;;  %1892 = vst [vmem:[#allocation2 + $0x68] sm:$0xff] %v7489_v14 }
 0x27a   :  { %v10270_v37 = vunpack.i.h.bf16 %v10268_v25  ;;  %v7525_v32 = vmul.f32 %v10272_v10, %v1243_v28  ;;  %v7529_v22 = vmul.f32 %v10273_v11, %v1244_v15  ;;  %v10278_v46 = vunpack.i.l.bf16 %v10277_v57  ;;  %1893 = vst [vmem:[#allocation2 + $0x70] sm:$0xff] %v7497_v31 }
 0x27b   :  { %v7517_v34 = vmul.f32 %v10269_v2, %v1241_v20  ;;  %v10274_v20 = vld [vmem:[#allocation67_spill] sm:$0xff]  ;;  %v10279_v38 = vunpack.i.h.bf16 %v10277_v57  ;;  %1894 = vst [vmem:[#allocation2 + $0x78] sm:$0xff] %v7501_v54  ;;  %1895 = vst [vmem:[#allocation2 + $0x80] sm:$0xff] %v7505_v49  ;;  %v10284_v10 = vunpack.i.l.bf16 %v10283_v4  ;;  %v10285_v11 = vunpack.i.h.bf16 %v10283_v4 }
 0x27c   :  { %v7521_v41 = vmul.f32 %v10270_v37, %v1242_v16  ;;  %v10275_v18 = vunpack.i.l.bf16 %v10274_v20  ;;  %v10276_v59 = vunpack.i.h.bf16 %v10274_v20  ;;  %v7545_v15 = vmul.f32 %v10278_v46, %v1247_v5  ;;  %1896 = vst [vmem:[#allocation2 + $0x88] sm:$0xff] %v7509_v26  ;;  %1899 = vst [vmem:[#allocation2 + $0xa0] sm:$0xff] %v7525_v32 }
 0x27d   :  { %v7549_v25 = vmul.f32 %v10279_v38, %v1248_v48  ;;  %v7565_v48 = vmul.f32 %v10284_v10, %v1251_v8  ;;  %v7569_v20 = vmul.f32 %v10285_v11, %v1252_v21  ;;  %1897 = vst [vmem:[#allocation2 + $0x90] sm:$0xff] %v7517_v34  ;;  %1900 = vst [vmem:[#allocation2 + $0xa8] sm:$0xff] %v7529_v22  ;;  %v10289_v8 = vmax.f32 %v7193_v1, 0.0  ;;  %v10292_v38 = vld [vmem:[#allocation70_spill] sm:$0xff] }
 0x27e   :  { %v7537_v16 = vmul.f32 %v10275_v18, %v1245_v47  ;;  %v7541_v28 = vmul.f32 %v10276_v59, %v1246_v62  ;;  %v10280_v47 = vld [vmem:[#allocation69_spill] sm:$0xff]  ;;  %1898 = vst [vmem:[#allocation2 + $0x98] sm:$0xff] %v7521_v41  ;;  %v10291_v46 = vmax.f32 %v7197_v42, 0.0  ;;  %1903 = vst [vmem:[#allocation2 + $0xc0] sm:$0xff] %v7545_v15  ;;  %v10296_v1 = vmax.f32 %v7213_v40, 0.0  ;;  %v10297_v42 = vld [vmem:[#allocation72_spill] sm:$0xff] }
 0x27f   :  { %v10281_v2 = vunpack.i.l.bf16 %v10280_v47  ;;  %v10282_v37 = vunpack.i.h.bf16 %v10280_v47  ;;  %v10293_v47 = vunpack.i.l.bf16 %v10292_v38  ;;  %1904 = vst [vmem:[#allocation2 + $0xc8] sm:$0xff] %v7549_v25  ;;  %v10298_v10 = vunpack.i.l.bf16 %v10297_v42  ;;  %1907 = vst [vmem:[#allocation2 + $0xe0] sm:$0xff] %v7565_v48 }
 0x280   :  { %1901 = vst [vmem:[#allocation2 + $0xb0] sm:$0xff] %v7537_v16  ;;  %1902 = vst [vmem:[#allocation2 + $0xb8] sm:$0xff] %v7541_v28  ;;  %v2035_v40 = vpack.c.bf16 %v7447_v9, %v7443_v0  ;;  %v2039_v9 = vpack.c.bf16 %v7481_v33, %v7477_v43  ;;  %v2072_v0 = vld [vmem:[#allocation2 + $0x9] sm:$0xff]  ;;  %v2044_v43 = vpack.c.bf16 %v7529_v22, %v7525_v32  ;;  %v2081_v32 = vld [vmem:[#allocation2 + $0x51] sm:$0xff] }
 0x281   :  { %v7557_v62 = vmul.f32 %v10281_v2, %v1249_v53  ;;  %v7561_v5 = vmul.f32 %v10282_v37, %v1250_v3  ;;  %v10286_v53 = vmax.f32 %v7189_v30, 0.0  ;;  %v10287_v3 = vld [vmem:[#allocation71_spill] sm:$0xff]  ;;  %v7591_v2 = vmul.f32 %v10293_v47, %v10291_v46  ;;  %1908 = vst [vmem:[#allocation2 + $0xe8] sm:$0xff] %v7569_v20  ;;  %v7635_v46 = vld [vmem:[#allocation2 + $0x19] sm:$0xff] }
 0x282   :  { %v10288_v18 = vunpack.i.l.bf16 %v10287_v3  ;;  %v10290_v57 = vunpack.i.h.bf16 %v10287_v3  ;;  %v10294_v37 = vmax.f32 %v7201_v24, 0.0  ;;  %v10295_v30 = vunpack.i.h.bf16 %v10292_v38  ;;  %2054 = vst.msk [vmem:[#allocation3 + $0x8] sm:$0xff] %vm2052_vm2, %v2035_v40  ;;  %2058 = vst.msk [vmem:[#allocation3 + $0x28] sm:$0xff] %vm2052_vm2, %v2039_v9  ;;  %v2082_v22 = vld [vmem:[#allocation2 + $0x59] sm:$0xff] }
 0x283   :  { %v1833_v11 = vmul.f32 %v10298_v10, %v10296_v1  ;;  %v10300_v24 = vunpack.i.h.bf16 %v10297_v42  ;;  %1905 = vst [vmem:[#allocation2 + $0xd0] sm:$0xff] %v7557_v62  ;;  %1906 = vst [vmem:[#allocation2 + $0xd8] sm:$0xff] %v7561_v5  ;;  %v2040_v38 = vpack.c.bf16 %v7489_v14, %v7485_v50  ;;  %v2045_v33 = vpack.c.bf16 %v7541_v28, %v7537_v16  ;;  %v2083_v16 = vld [vmem:[#allocation2 + $0x61] sm:$0xff]  ;;  %v10301_v9 = vld [vmem:[#allocation73_spill] sm:$0xff] }
 0x284   :  { %v7579_v59 = vmul.f32 %v10288_v18, %v10286_v53  ;;  %v7585_v21 = vmul.f32 %v10290_v57, %v10289_v8  ;;  %v7597_v4 = vmul.f32 %v10295_v30, %v10294_v37  ;;  %v10299_v53 = vmax.f32 %v7217_v36, 0.0  ;;  %v7619_v8 = vld [vmem:[#allocation2 + $0x1] sm:$0xff]  ;;  %1911 = vst [vmem:[#allocation2 + $0x100] sm:$0xff] %v7591_v2  ;;  %2063 = vst.msk [vmem:[#allocation3 + $0x50] sm:$0xff] %vm2052_vm2, %v2044_v43  ;;  %v2088_v47 = vld [vmem:[#allocation2 + $0x89] sm:$0xff] }
 0x285   :  { %v2034_v18 = vpack.c.bf16 %v7436_v61, %v7432_v45  ;;  %v2036_v36 = vpack.c.bf16 %v7455_v27, %v7451_v35  ;;  %v2037_v57 = vpack.c.bf16 %v7463_v58, %v7459_v19  ;;  %v2038_v45 = vpack.c.bf16 %v7471_v23, %v7467_v7  ;;  %v7633_v61 = vld [vmem:[#allocation2 + $0x11] sm:$0xff]  ;;  %1915 = vst [vmem:[#allocation2 + $0x120] sm:$0xff] %v1833_v11  ;;  %v2075_v58 = vld [vmem:[#allocation2 + $0x21] sm:$0xff]  ;;  %v2076_v7 = vld [vmem:[#allocation2 + $0x29] sm:$0xff] }
 0x286   :  { %v1834_v3 = vmul.f32 %v10300_v24, %v10299_v53  ;;  %1909 = vst [vmem:[#allocation2 + $0xf0] sm:$0xff] %v7579_v59  ;;  %1910 = vst [vmem:[#allocation2 + $0xf8] sm:$0xff] %v7585_v21  ;;  %v2041_v35 = vpack.c.bf16 %v7501_v54, %v7497_v31  ;;  %v2042_v19 = vpack.c.bf16 %v7509_v26, %v7505_v49  ;;  %v2077_v23 = vld [vmem:[#allocation2 + $0x31] sm:$0xff]  ;;  %v2078_v31 = vld [vmem:[#allocation2 + $0x39] sm:$0xff]  ;;  %v1257_v1 = vmax.f32 %v7205_v51, 0.0 }
 0x287   :  { %1912 = vst [vmem:[#allocation2 + $0x108] sm:$0xff] %v7597_v4  ;;  %v2043_v27 = vpack.c.bf16 %v7521_v41, %v7517_v34  ;;  %2053 = vst.msk [vmem:[#allocation3] sm:$0xff] %vm2052_vm2, %v2034_v18  ;;  %v2046_v50 = vpack.c.bf16 %v7549_v25, %v7545_v15  ;;  %v2047_v14 = vpack.c.bf16 %v7561_v5, %v7557_v62  ;;  %v2079_v54 = vld [vmem:[#allocation2 + $0x41] sm:$0xff]  ;;  %v2080_v49 = vld [vmem:[#allocation2 + $0x49] sm:$0xff]  ;;  %v1263_v18 = vmax.f32 %v7232_v63, 0.0 }
 0x288   :  { %1916 = vst [vmem:[#allocation2 + $0x128] sm:$0xff] %v1834_v3  ;;  %2055 = vst.msk [vmem:[#allocation3 + $0x10] sm:$0xff] %vm2052_vm2, %v2036_v36  ;;  %v2048_v26 = vpack.c.bf16 %v7569_v20, %v7565_v48  ;;  %v2049_v34 = vpack.c.bf16 %v7585_v21, %v7579_v59  ;;  %v2050_v41 = vpack.c.bf16 %v7597_v4, %v7591_v2  ;;  %v2084_v15 = vld [vmem:[#allocation2 + $0x69] sm:$0xff]  ;;  %v2085_v25 = vld [vmem:[#allocation2 + $0x71] sm:$0xff]  ;;  %v1258_v3 = vmax.f32 %v7209_v55, 0.0 }
 0x289   :  { %2056 = vst.msk [vmem:[#allocation3 + $0x18] sm:$0xff] %vm2052_vm2, %v2037_v57  ;;  %2057 = vst.msk [vmem:[#allocation3 + $0x20] sm:$0xff] %vm2052_vm2, %v2038_v45  ;;  %v2107_v28 = vpack.c.bf16 %v2072_v0, %v7619_v8  ;;  %v2086_v62 = vld [vmem:[#allocation2 + $0x79] sm:$0xff]  ;;  %v2108_v5 = vpack.c.bf16 %v7635_v46, %v7633_v61  ;;  %v2109_v48 = vpack.c.bf16 %v2076_v7, %v2075_v58  ;;  %v2087_v21 = vld [vmem:[#allocation2 + $0x81] sm:$0xff]  ;;  %v1264_v51 = vmax.f32 %v7236_v52, 0.0 }
 0x28a   :  { %2059 = vst.msk [vmem:[#allocation3 + $0x30] sm:$0xff] %vm2052_vm2, %v2040_v38  ;;  %2060 = vst.msk [vmem:[#allocation3 + $0x38] sm:$0xff] %vm2052_vm2, %v2041_v35  ;;  %v2110_v20 = vpack.c.bf16 %v2078_v31, %v2077_v23  ;;  %v2111_v59 = vpack.c.bf16 %v2080_v49, %v2079_v54  ;;  %v2089_v2 = vld [vmem:[#allocation2 + $0x91] sm:$0xff]  ;;  %v2112_v37 = vpack.c.bf16 %v2082_v22, %v2081_v32  ;;  %v2090_v42 = vld [vmem:[#allocation2 + $0x99] sm:$0xff]  ;;  %v10302_v0 = vunpack.i.l.bf16 %v10301_v9 }
 0x28b   :  { %2061 = vst.msk [vmem:[#allocation3 + $0x40] sm:$0xff] %vm2052_vm2, %v2042_v19  ;;  %2062 = vst.msk [vmem:[#allocation3 + $0x48] sm:$0xff] %vm2052_vm2, %v2043_v27  ;;  %v2113_v30 = vpack.c.bf16 %v2084_v15, %v2083_v16  ;;  %v2114_v4 = vpack.c.bf16 %v2086_v62, %v2085_v25  ;;  %v2091_v10 = vld [vmem:[#allocation2 + $0xa1] sm:$0xff]  ;;  %v2092_v11 = vld [vmem:[#allocation2 + $0xa9] sm:$0xff]  ;;  %v2115_v53 = vpack.c.bf16 %v2088_v47, %v2087_v21  ;;  %v1261_v55 = vmax.f32 %v7221_v13, 0.0 }
 0x28c   :  { %2064 = vst.msk [vmem:[#allocation3 + $0x58] sm:$0xff] %vm2052_vm2, %v2045_v33  ;;  %2065 = vst.msk [vmem:[#allocation3 + $0x60] sm:$0xff] %vm2052_vm2, %v2046_v50  ;;  %v7685_v24 = vld [vmem:[#allocation2 + $0x2] sm:$0xff]  ;;  %v2093_v40 = vld [vmem:[#allocation2 + $0xb1] sm:$0xff]  ;;  %v2116_v57 = vpack.c.bf16 %v2090_v42, %v2089_v2  ;;  %v2117_v45 = vpack.c.bf16 %v2092_v11, %v2091_v10  ;;  %v1831_v61 = vmul.f32 %v10302_v0, %v1257_v1  ;;  %v10303_v35 = vunpack.i.h.bf16 %v10301_v9 }
 0x28d   :  { %2066 = vst.msk [vmem:[#allocation3 + $0x68] sm:$0xff] %vm2052_vm2, %v2047_v14  ;;  %2067 = vst.msk [vmem:[#allocation3 + $0x70] sm:$0xff] %vm2052_vm2, %v2048_v26  ;;  %v2094_v8 = vld [vmem:[#allocation2 + $0xb9] sm:$0xff]  ;;  %v2095_v36 = vld [vmem:[#allocation2 + $0xc1] sm:$0xff]  ;;  %v1262_v54 = vmax.f32 %v7228_v60, 0.0  ;;  %v1268_v62 = vmax.f32 %v7252_v6, 0.0 }
 0x28e   :  { %2068 = vst.msk [vmem:[#allocation3 + $0x78] sm:$0xff] %vm2052_vm2, %v2049_v34  ;;  %2069 = vst.msk [vmem:[#allocation3 + $0x80] sm:$0xff] %vm2052_vm2, %v2050_v41  ;;  %v2096_v46 = vld [vmem:[#allocation2 + $0xc9] sm:$0xff]  ;;  %v2097_v63 = vld [vmem:[#allocation2 + $0xd1] sm:$0xff]  ;;  %v2118_v52 = vpack.c.bf16 %v2094_v8, %v2093_v40  ;;  %v1832_v19 = vmul.f32 %v10303_v35, %v1258_v3  ;;  %v7710_v41 = vpop.permute.xlu0 %5486 }
 0x28f   :  { %2126 = vst.msk [vmem:[#allocation3] sm:$0xff] %vm2125_vm3, %v2107_v28  ;;  %2127 = vst.msk [vmem:[#allocation3 + $0x8] sm:$0xff] %vm2125_vm3, %v2108_v5  ;;  %v2098_v38 = vld [vmem:[#allocation2 + $0xd9] sm:$0xff]  ;;  %v2099_v33 = vld [vmem:[#allocation2 + $0xe1] sm:$0xff]  ;;  %v2119_v13 = vpack.c.bf16 %v2096_v46, %v2095_v36 }
 0x290   :  { %2128 = vst.msk [vmem:[#allocation3 + $0x10] sm:$0xff] %vm2125_vm3, %v2109_v48  ;;  %2129 = vst.msk [vmem:[#allocation3 + $0x18] sm:$0xff] %vm2125_vm3, %v2110_v20  ;;  %v10304_v27 = vld [vmem:[#allocation74_spill] sm:$0xff]  ;;  %v2100_v50 = vld [vmem:[#allocation2 + $0xe9] sm:$0xff]  ;;  %v2120_v31 = vpack.c.bf16 %v2098_v38, %v2097_v63  ;;  %v2051_v28 = vpack.c.bf16 %v1832_v19, %v1831_v61 }
 0x291   :  { %2130 = vst.msk [vmem:[#allocation3 + $0x20] sm:$0xff] %vm2125_vm3, %v2111_v59  ;;  %2131 = vst.msk [vmem:[#allocation3 + $0x28] sm:$0xff] %vm2125_vm3, %v2112_v37  ;;  %v10305_v58 = vunpack.i.l.bf16 %v10304_v27  ;;  %v10306_v23 = vunpack.i.h.bf16 %v10304_v27  ;;  %v2101_v14 = vld [vmem:[#allocation2 + $0xf1] sm:$0xff]  ;;  %v10307_v49 = vld [vmem:[#allocation75_spill] sm:$0xff]  ;;  %v2121_v22 = vpack.c.bf16 %v2100_v50, %v2099_v33 }
 0x292   :  { %2132 = vst.msk [vmem:[#allocation3 + $0x30] sm:$0xff] %vm2125_vm3, %v2113_v30  ;;  %2133 = vst.msk [vmem:[#allocation3 + $0x38] sm:$0xff] %vm2125_vm3, %v2114_v4  ;;  %v10308_v26 = vunpack.i.l.bf16 %v10307_v49  ;;  %v2102_v32 = vld [vmem:[#allocation2 + $0xf9] sm:$0xff]  ;;  %v2145_v16 = vld [vmem:[#allocation2 + $0xa] sm:$0xff]  ;;  %v10310_v21 = vunpack.i.h.bf16 %v10307_v49 }
 0x293   :  { %2134 = vst.msk [vmem:[#allocation3 + $0x40] sm:$0xff] %vm2125_vm3, %v2115_v53  ;;  %v1837_v7 = vmul.f32 %v10305_v58, %v1263_v18  ;;  %v7703_v43 = vmul.f32 %v10306_v23, %v1264_v51  ;;  %2135 = vst.msk [vmem:[#allocation3 + $0x48] sm:$0xff] %vm2125_vm3, %v2116_v57  ;;  %v10309_v15 = vld [vmem:[#allocation49_spill] sm:$0xff]  ;;  %v2122_v60 = vpack.c.bf16 %v2102_v32, %v2101_v14  ;;  %v2148_v20 = vld [vmem:[#allocation2 + $0x22] sm:$0xff]  ;;  %v7733_v51 = vpop.permute.xlu1 %5481 }
 0x294   :  { %2136 = vst.msk [vmem:[#allocation3 + $0x50] sm:$0xff] %vm2125_vm3, %v2117_v45  ;;  %1913 = vst [vmem:[#allocation2 + $0x110] sm:$0xff] %v1831_v61  ;;  %v1835_v34 = vmul.f32 %v10308_v26, %v1261_v55  ;;  %v1267_v25 = vmax.f32 %v10309_v15, 0.0  ;;  %v2146_v5 = vld [vmem:[#allocation2 + $0x12] sm:$0xff]  ;;  %v2147_v48 = vld [vmem:[#allocation2 + $0x1a] sm:$0xff]  ;;  %v2180_v59 = vpack.c.bf16 %v2145_v16, %v7685_v24  ;;  %v1836_v47 = vmul.f32 %v10310_v21, %v1262_v54 }
 0x295   :  { %2137 = vst.msk [vmem:[#allocation3 + $0x58] sm:$0xff] %vm2125_vm3, %v2118_v52  ;;  %1914 = vst [vmem:[#allocation2 + $0x118] sm:$0xff] %v1832_v19  ;;  %v10311_v2 = vld [vmem:[#allocation47_spill] sm:$0xff]  ;;  %v2150_v6 = vld [vmem:[#allocation2 + $0x32] sm:$0xff]  ;;  %v2181_v1 = vpack.c.bf16 %v2147_v48, %v2146_v5  ;;  %v1271_v55 = vmax.f32 %v7264_v44, 0.0 }
 0x296   :  { %1919 = vst [vmem:[#allocation2 + $0x140] sm:$0xff] %v1837_v7  ;;  %1920 = vst [vmem:[#allocation2 + $0x148] sm:$0xff] %v7703_v43  ;;  %v1265_v37 = vmax.f32 %v10311_v2, 0.0  ;;  %v2149_v30 = vld [vmem:[#allocation2 + $0x2a] sm:$0xff]  ;;  %v2151_v4 = vld [vmem:[#allocation2 + $0x3a] sm:$0xff] }
 0x297   :  { %2138 = vst.msk [vmem:[#allocation3 + $0x60] sm:$0xff] %vm2125_vm3, %v2119_v13  ;;  %2139 = vst.msk [vmem:[#allocation3 + $0x68] sm:$0xff] %vm2125_vm3, %v2120_v31  ;;  %v10312_v42 = vld [vmem:[#allocation76_spill] sm:$0xff]  ;;  %v2152_v40 = vld [vmem:[#allocation2 + $0x42] sm:$0xff]  ;;  %v2182_v57 = vpack.c.bf16 %v2149_v30, %v2148_v20  ;;  %v2183_v45 = vpack.c.bf16 %v2151_v4, %v2150_v6  ;;  %v5489_v30 = vunpack.i.h.bf16 %v7710_v41 }
 0x298   :  { %1917 = vst [vmem:[#allocation2 + $0x130] sm:$0xff] %v1835_v34  ;;  %2140 = vst.msk [vmem:[#allocation3 + $0x70] sm:$0xff] %vm2125_vm3, %v2121_v22  ;;  %v10313_v10 = vunpack.i.l.bf16 %v10312_v42  ;;  %v10314_v53 = vunpack.i.h.bf16 %v10312_v42  ;;  %v10315_v3 = vld [vmem:[#allocation48_spill] sm:$0xff]  ;;  %v10316_v9 = vld [vmem:[#allocation77_spill] sm:$0xff]  ;;  %v7756_v34 = vpop.permute.xlu0 %5496 }
 0x299   :  { %2070 = vst.msk [vmem:[#allocation3 + $0x88] sm:$0xff] %vm2052_vm2, %v2051_v28  ;;  %v1266_v18 = vmax.f32 %v10315_v3, 0.0  ;;  %v2153_v8 = vld [vmem:[#allocation2 + $0x4a] sm:$0xff]  ;;  %v2154_v36 = vld [vmem:[#allocation2 + $0x52] sm:$0xff]  ;;  %1918 = vst [vmem:[#allocation2 + $0x138] sm:$0xff] %v1836_v47  ;;  %v10317_v0 = vunpack.i.l.bf16 %v10316_v9  ;;  %v10318_v35 = vunpack.i.h.bf16 %v10316_v9  ;;  %v1275_v3 = vmax.f32 %v7280_v17, 0.0 }
 0x29a   :  { %v7726_v11 = vmul.f32 %v10313_v10, %v1267_v25  ;;  %v7730_v24 = vmul.f32 %v10314_v53, %v1268_v62  ;;  %2141 = vst.msk [vmem:[#allocation3 + $0x78] sm:$0xff] %vm2125_vm3, %v2122_v60  ;;  %v2155_v46 = vld [vmem:[#allocation2 + $0x5a] sm:$0xff]  ;;  %v2156_v63 = vld [vmem:[#allocation2 + $0x62] sm:$0xff]  ;;  %v2157_v38 = vld [vmem:[#allocation2 + $0x6a] sm:$0xff]  ;;  %v2184_v52 = vpack.c.bf16 %v2153_v8, %v2152_v40  ;;  %v5488_v53 = vunpack.i.l.bf16 %v7710_v41 }
 0x29b   :  { %2199 = vst.msk [vmem:[#allocation3] sm:$0xff] %vm2198_vm4, %v2180_v59  ;;  %v1839_v61 = vmul.f32 %v10317_v0, %v1265_v37  ;;  %2200 = vst.msk [vmem:[#allocation3 + $0x8] sm:$0xff] %vm2198_vm4, %v2181_v1  ;;  %v1840_v19 = vmul.f32 %v10318_v35, %v1266_v18  ;;  %v10319_v27 = vld [vmem:[#allocation52_spill] sm:$0xff]  ;;  %v10320_v7 = vld [vmem:[#allocation50_spill] sm:$0xff]  ;;  %v2185_v14 = vpack.c.bf16 %v2155_v46, %v2154_v36  ;;  %v7784_v18 = vpop.permute.xlu1 %5491  ;;  %v1276_v41 = vmax.f32 %v7284_v39, 0.0 }
 0x29c   :  { %2272 = vst.msk [vmem:[#allocation3] sm:$0xff] %vm2271_vm5, %v2181_v1  ;;  %1923 = vst [vmem:[#allocation2 + $0x160] sm:$0xff] %v7726_v11  ;;  %v1272_v58 = vmax.f32 %v10319_v27, 0.0  ;;  %v1269_v44 = vmax.f32 %v10320_v7, 0.0  ;;  %v2158_v23 = vld [vmem:[#allocation2 + $0x72] sm:$0xff]  ;;  %v2159_v33 = vld [vmem:[#allocation2 + $0x7a] sm:$0xff]  ;;  %v2186_v13 = vpack.c.bf16 %v2157_v38, %v2156_v63  ;;  %v7795_v63 = vmul.f32 %v5488_v53, %v1275_v3  ;;  %v7805_v27 = vpop.permute.xlu0 %5506 }
 0x29d   :  { %1924 = vst [vmem:[#allocation2 + $0x168] sm:$0xff] %v7730_v24  ;;  %v2160_v50 = vld [vmem:[#allocation2 + $0x82] sm:$0xff]  ;;  %2201 = vst.msk [vmem:[#allocation3 + $0x10] sm:$0xff] %vm2198_vm4, %v2182_v57  ;;  %v2764_v31 = vpack.c.bf16 %v1839_v61, %v7703_v43  ;;  %v2161_v32 = vld [vmem:[#allocation2 + $0x8a] sm:$0xff]  ;;  %v2187_v28 = vpack.c.bf16 %v2159_v33, %v2158_v23  ;;  %v2765_v15 = vpack.c.bf16 %v7726_v11, %v1840_v19  ;;  %v5484_v38 = vunpack.i.h.bf16 %v7733_v51 }
 0x29e   :  { %2202 = vst.msk [vmem:[#allocation3 + $0x18] sm:$0xff] %vm2198_vm4, %v2183_v45  ;;  %1921 = vst [vmem:[#allocation2 + $0x150] sm:$0xff] %v1839_v61  ;;  %v10321_v54 = vld [vmem:[#allocation79_spill] sm:$0xff]  ;;  %v2162_v22 = vld [vmem:[#allocation2 + $0x92] sm:$0xff]  ;;  %v2188_v59 = vpack.c.bf16 %v2161_v32, %v2160_v50  ;;  %v7802_v35 = vmul.f32 %v5489_v30, %v1276_v41 }
 0x29f   :  { %2273 = vst.msk [vmem:[#allocation3 + $0x8] sm:$0xff] %vm2271_vm5, %v2182_v57  ;;  %v10322_v49 = vunpack.i.l.bf16 %v10321_v54  ;;  %v2163_v16 = vld [vmem:[#allocation2 + $0x9a] sm:$0xff]  ;;  %2274 = vst.msk [vmem:[#allocation3 + $0x10] sm:$0xff] %vm2271_vm5, %v2183_v45  ;;  %v10323_v43 = vunpack.i.h.bf16 %v10321_v54  ;;  %v10324_v62 = vld [vmem:[#allocation51_spill] sm:$0xff] }
 0x2a0   :  { %2203 = vst.msk [vmem:[#allocation3 + $0x20] sm:$0xff] %vm2198_vm4, %v2184_v52  ;;  %1922 = vst [vmem:[#allocation2 + $0x158] sm:$0xff] %v1840_v19  ;;  %v1270_v60 = vmax.f32 %v10324_v62, 0.0  ;;  %v2164_v5 = vld [vmem:[#allocation2 + $0xa2] sm:$0xff]  ;;  %v2165_v48 = vld [vmem:[#allocation2 + $0xaa] sm:$0xff]  ;;  %v2189_v21 = vpack.c.bf16 %v2163_v16, %v2162_v22  ;;  %v5483_v19 = vunpack.i.l.bf16 %v7733_v51  ;;  %v5499_v51 = vunpack.i.h.bf16 %v7756_v34 }
 0x2a1   :  { %v7754_v26 = vmul.f32 %v10322_v49, %v1271_v55  ;;  %2275 = vst.msk [vmem:[#allocation3 + $0x18] sm:$0xff] %vm2271_vm5, %v2184_v52  ;;  %v7764_v25 = vmul.f32 %v10323_v43, %v1272_v58  ;;  %v2166_v20 = vld [vmem:[#allocation2 + $0xb2] sm:$0xff]  ;;  %2276 = vst.msk [vmem:[#allocation3 + $0x20] sm:$0xff] %vm2271_vm5, %v2185_v14  ;;  %v2167_v6 = vld [vmem:[#allocation2 + $0xba] sm:$0xff]  ;;  %v2190_v42 = vpack.c.bf16 %v2165_v48, %v2164_v5 }
 0x2a2   :  { %2204 = vst.msk [vmem:[#allocation3 + $0x28] sm:$0xff] %vm2198_vm4, %v2185_v14  ;;  %2205 = vst.msk [vmem:[#allocation3 + $0x30] sm:$0xff] %vm2198_vm4, %v2186_v13  ;;  %v10325_v47 = vld [vmem:[#allocation80_spill] sm:$0xff]  ;;  %v2168_v4 = vld [vmem:[#allocation2 + $0xc2] sm:$0xff]  ;;  %v2191_v57 = vpack.c.bf16 %v2167_v6, %v2166_v20  ;;  %v5494_v20 = vunpack.i.h.bf16 %v7784_v18 }
 0x2a3   :  { %2782 = vst.msk [vmem:[#allocation3 + $0x90] sm:$0xff] %vm2052_vm2, %v2764_v31  ;;  %1927 = vst [vmem:[#allocation2 + $0x180] sm:$0xff] %v7754_v26  ;;  %v10326_v2 = vunpack.i.l.bf16 %v10325_v47  ;;  %v2169_v1 = vld [vmem:[#allocation2 + $0xca] sm:$0xff]  ;;  %v10327_v10 = vunpack.i.h.bf16 %v10325_v47  ;;  %v2170_v40 = vld [vmem:[#allocation2 + $0xd2] sm:$0xff] }
 0x2a4   :  { %2206 = vst.msk [vmem:[#allocation3 + $0x38] sm:$0xff] %vm2198_vm4, %v2187_v28  ;;  %1928 = vst [vmem:[#allocation2 + $0x188] sm:$0xff] %v7764_v25  ;;  %v2171_v8 = vld [vmem:[#allocation2 + $0xda] sm:$0xff]  ;;  %v2172_v36 = vld [vmem:[#allocation2 + $0xe2] sm:$0xff]  ;;  %v2192_v45 = vpack.c.bf16 %v2169_v1, %v2168_v4 }
 0x2a5   :  { %v1843_v37 = vmul.f32 %v10326_v2, %v1269_v44  ;;  %2277 = vst.msk [vmem:[#allocation3 + $0x28] sm:$0xff] %vm2271_vm5, %v2186_v13  ;;  %2278 = vst.msk [vmem:[#allocation3 + $0x30] sm:$0xff] %vm2271_vm5, %v2187_v28  ;;  %v1844_v11 = vmul.f32 %v10327_v10, %v1270_v60  ;;  %v2173_v0 = vld [vmem:[#allocation2 + $0xea] sm:$0xff]  ;;  %v2174_v17 = vld [vmem:[#allocation2 + $0xf2] sm:$0xff]  ;;  %v2193_v55 = vpack.c.bf16 %v2171_v8, %v2170_v40  ;;  %v5498_v13 = vunpack.i.l.bf16 %v7756_v34 }
 0x2a6   :  { %2783 = vst.msk [vmem:[#allocation3 + $0x98] sm:$0xff] %vm2052_vm2, %v2765_v15  ;;  %v2175_v61 = vld [vmem:[#allocation2 + $0xfa] sm:$0xff]  ;;  %v2292_v7 = vld [vmem:[#allocation2 + $0x23] sm:$0xff]  ;;  %v2293_v44 = vld [vmem:[#allocation2 + $0x2b] sm:$0xff]  ;;  %v5493_v40 = vunpack.i.l.bf16 %v7784_v18 }
 0x2a7   :  { %2207 = vst.msk [vmem:[#allocation3 + $0x40] sm:$0xff] %vm2198_vm4, %v2188_v59  ;;  %2208 = vst.msk [vmem:[#allocation3 + $0x48] sm:$0xff] %vm2198_vm4, %v2189_v21  ;;  %v2766_v9 = vpack.c.bf16 %v1843_v37, %v7730_v24  ;;  %v2767_v46 = vpack.c.bf16 %v7754_v26, %v1844_v11  ;;  %v2194_v24 = vpack.c.bf16 %v2173_v0, %v2172_v36  ;;  %v2290_v39 = vld [vmem:[#allocation2 + $0x13] sm:$0xff]  ;;  %v2291_v58 = vld [vmem:[#allocation2 + $0x1b] sm:$0xff] }
 0x2a8   :  { %2279 = vst.msk [vmem:[#allocation3 + $0x38] sm:$0xff] %vm2271_vm5, %v2188_v59  ;;  %1925 = vst [vmem:[#allocation2 + $0x170] sm:$0xff] %v1843_v37  ;;  %v2195_v52 = vpack.c.bf16 %v2175_v61, %v2174_v17  ;;  %v10328_v23 = vld [vmem:[#allocation53_spill] sm:$0xff]  ;;  %v10329_v50 = vld [vmem:[#allocation54_spill] sm:$0xff]  ;;  %v7819_v26 = vpack.c.bf16 %v2291_v58, %v2290_v39  ;;  %v7821_v32 = vpack.c.bf16 %v2293_v44, %v2292_v7  ;;  %v7830_v59 = vpop.permute.xlu1 %5501  ;;  %v7863_v17 = vpop.permute.xlu0 %5516 }
 0x2a9   :  { %2209 = vst.msk [vmem:[#allocation3 + $0x50] sm:$0xff] %vm2198_vm4, %v2190_v42  ;;  %1926 = vst [vmem:[#allocation2 + $0x178] sm:$0xff] %v1844_v11  ;;  %v1273_v33 = vmax.f32 %v10328_v23, 0.0  ;;  %v1274_v14 = vmax.f32 %v10329_v50, 0.0  ;;  %v2294_v31 = vld [vmem:[#allocation2 + $0x33] sm:$0xff]  ;;  %v2295_v54 = vld [vmem:[#allocation2 + $0x3b] sm:$0xff] }
 0x2aa   :  { %2280 = vst.msk [vmem:[#allocation3 + $0x40] sm:$0xff] %vm2271_vm5, %v2189_v21  ;;  %2281 = vst.msk [vmem:[#allocation3 + $0x48] sm:$0xff] %vm2271_vm5, %v2190_v42  ;;  %v2296_v49 = vld [vmem:[#allocation2 + $0x43] sm:$0xff]  ;;  %v2297_v34 = vld [vmem:[#allocation2 + $0x4b] sm:$0xff]  ;;  %v7827_v60 = vpack.c.bf16 %v2295_v54, %v2294_v31 }
 0x2ab   :  { %2210 = vst.msk [vmem:[#allocation3 + $0x58] sm:$0xff] %vm2198_vm4, %v2191_v57  ;;  %2211 = vst.msk [vmem:[#allocation3 + $0x60] sm:$0xff] %vm2198_vm4, %v2192_v45  ;;  %v10332_v22 = vld [vmem:[#allocation6_spill] sm:$0xff]  ;;  %v10333_v28 = vld [vmem:[#allocation7_spill] sm:$0xff]  ;;  %v1847_v5 = vmul.f32 %v5483_v19, %v1273_v33  ;;  %v1848_v48 = vmul.f32 %v5484_v38, %v1274_v14  ;;  %v7832_v37 = vpack.c.bf16 %v2297_v34, %v2296_v49  ;;  %v5509_v38 = vunpack.i.h.bf16 %v7805_v27 }
 0x2ac   :  { %2282 = vst.msk [vmem:[#allocation3 + $0x50] sm:$0xff] %vm2271_vm5, %v2191_v57  ;;  %2283 = vst.msk [vmem:[#allocation3 + $0x58] sm:$0xff] %vm2271_vm5, %v2192_v45  ;;  %v1279_v16 = vmax.f32 %v10332_v22, 0.0  ;;  %v1280_v15 = vmax.f32 %v10333_v28, 0.0  ;;  %v2298_v43 = vld [vmem:[#allocation2 + $0x53] sm:$0xff]  ;;  %v2299_v62 = vld [vmem:[#allocation2 + $0x5b] sm:$0xff]  ;;  %v5504_v22 = vunpack.i.h.bf16 %v7830_v59 }
 0x2ad   :  { %2784 = vst.msk [vmem:[#allocation3 + $0xa0] sm:$0xff] %vm2052_vm2, %v2766_v9  ;;  %2785 = vst.msk [vmem:[#allocation3 + $0xa8] sm:$0xff] %vm2052_vm2, %v2767_v46  ;;  %v2300_v21 = vld [vmem:[#allocation2 + $0x63] sm:$0xff]  ;;  %v2301_v47 = vld [vmem:[#allocation2 + $0x6b] sm:$0xff]  ;;  %v7834_v30 = vpack.c.bf16 %v2299_v62, %v2298_v43  ;;  %v2768_v53 = vpack.c.bf16 %v1847_v5, %v7764_v25  ;;  %v2769_v3 = vpack.c.bf16 %v7795_v63, %v1848_v48 }
 0x2ae   :  { %2212 = vst.msk [vmem:[#allocation3 + $0x68] sm:$0xff] %vm2198_vm4, %v2193_v55  ;;  %1931 = vst [vmem:[#allocation2 + $0x1a0] sm:$0xff] %v7795_v63  ;;  %v2302_v2 = vld [vmem:[#allocation2 + $0x73] sm:$0xff]  ;;  %v7840_v6 = vmul.f32 %v5498_v13, %v1279_v16  ;;  %v7842_v4 = vmul.f32 %v5499_v51, %v1280_v15  ;;  %v2303_v1 = vld [vmem:[#allocation2 + $0x7b] sm:$0xff]  ;;  %v7844_v11 = vpack.c.bf16 %v2301_v47, %v2300_v21  ;;  %v7890_v16 = vpop.permute.xlu1 %5511 }
 0x2af   :  { %2284 = vst.msk [vmem:[#allocation3 + $0x60] sm:$0xff] %vm2271_vm5, %v2193_v55  ;;  %2285 = vst.msk [vmem:[#allocation3 + $0x68] sm:$0xff] %vm2271_vm5, %v2194_v24  ;;  %v2304_v42 = vld [vmem:[#allocation2 + $0x83] sm:$0xff]  ;;  %v2305_v10 = vld [vmem:[#allocation2 + $0x8b] sm:$0xff]  ;;  %v7851_v45 = vpack.c.bf16 %v2303_v1, %v2302_v2  ;;  %v5503_v2 = vunpack.i.l.bf16 %v7830_v59  ;;  %v5519_v59 = vunpack.i.h.bf16 %v7863_v17 }
 0x2b0   :  { %2213 = vst.msk [vmem:[#allocation3 + $0x70] sm:$0xff] %vm2198_vm4, %v2194_v24  ;;  %2214 = vst.msk [vmem:[#allocation3 + $0x78] sm:$0xff] %vm2198_vm4, %v2195_v52  ;;  %v2306_v8 = vld [vmem:[#allocation2 + $0x93] sm:$0xff]  ;;  %v2307_v36 = vld [vmem:[#allocation2 + $0x9b] sm:$0xff]  ;;  %v7853_v9 = vpack.c.bf16 %v2305_v10, %v2304_v42  ;;  %v5508_v24 = vunpack.i.l.bf16 %v7805_v27 }
 0x2b1   :  { %10330 = vst [vmem:[#allocation23_spill] sm:$0xff] %v7819_v26  ;;  %10331 = vst [vmem:[#allocation25_spill] sm:$0xff] %v7821_v32  ;;  %v2308_v57 = vld [vmem:[#allocation2 + $0xa3] sm:$0xff]  ;;  %v10340_v25 = vld [vmem:[#allocation4_spill] sm:$0xff]  ;;  %v7865_v63 = vpack.c.bf16 %v2307_v36, %v2306_v8  ;;  %v5518_v8 = vunpack.i.l.bf16 %v7863_v17  ;;  %v7920_v36 = vpop.permute.xlu0 %5526 }
 0x2b2   :  { %1932 = vst [vmem:[#allocation2 + $0x1a8] sm:$0xff] %v7802_v35  ;;  %2286 = vst.msk [vmem:[#allocation3 + $0x70] sm:$0xff] %vm2271_vm5, %v2195_v52  ;;  %v1277_v41 = vmax.f32 %v10340_v25, 0.0  ;;  %v10341_v18 = vld [vmem:[#allocation5_spill] sm:$0xff]  ;;  %v2309_v61 = vld [vmem:[#allocation2 + $0xab] sm:$0xff] }
 0x2b3   :  { %10334 = vst [vmem:[#allocation27_spill] sm:$0xff] %v7827_v60  ;;  %10335 = vst [vmem:[#allocation29_spill] sm:$0xff] %v7832_v37  ;;  %v1278_v0 = vmax.f32 %v10341_v18, 0.0  ;;  %v2310_v55 = vld [vmem:[#allocation2 + $0xb3] sm:$0xff]  ;;  %v2311_v46 = vld [vmem:[#allocation2 + $0xbb] sm:$0xff]  ;;  %v7874_v44 = vpack.c.bf16 %v2309_v61, %v2308_v57 }
 0x2b4   :  { %10336 = vst [vmem:[#allocation31_spill] sm:$0xff] %v7834_v30  ;;  %2345 = vst.msk [vmem:[#allocation3] sm:$0xff] %vm2344_vm6, %v7819_v26  ;;  %v10343_v52 = vld [vmem:[#allocation10_spill] sm:$0xff]  ;;  %v2313_v58 = vld [vmem:[#allocation2 + $0xcb] sm:$0xff]  ;;  %v7876_v23 = vpack.c.bf16 %v2311_v46, %v2310_v55  ;;  %v1851_v33 = vmul.f32 %v5493_v40, %v1277_v41 }
 0x2b5   :  { %2346 = vst.msk [vmem:[#allocation3 + $0x8] sm:$0xff] %vm2344_vm6, %v7821_v32  ;;  %10337 = vst [vmem:[#allocation33_spill] sm:$0xff] %v7844_v11  ;;  %v1283_v39 = vmax.f32 %v10343_v52, 0.0  ;;  %v2312_v19 = vld [vmem:[#allocation2 + $0xc3] sm:$0xff]  ;;  %v2314_v7 = vld [vmem:[#allocation2 + $0xd3] sm:$0xff]  ;;  %v1852_v50 = vmul.f32 %v5494_v20, %v1278_v0 }
 0x2b6   :  { %2347 = vst.msk [vmem:[#allocation3 + $0x10] sm:$0xff] %vm2344_vm6, %v7827_v60  ;;  %1929 = vst [vmem:[#allocation2 + $0x190] sm:$0xff] %v1847_v5  ;;  %v2315_v14 = vld [vmem:[#allocation2 + $0xdb] sm:$0xff]  ;;  %v2316_v51 = vld [vmem:[#allocation2 + $0xe3] sm:$0xff]  ;;  %v7882_v13 = vpack.c.bf16 %v2313_v58, %v2312_v19  ;;  %v2770_v62 = vpack.c.bf16 %v1851_v33, %v7802_v35 }
 0x2b7   :  { %1930 = vst [vmem:[#allocation2 + $0x198] sm:$0xff] %v1848_v48  ;;  %10338 = vst [vmem:[#allocation34_spill] sm:$0xff] %v7851_v45  ;;  %v2317_v27 = vld [vmem:[#allocation2 + $0xeb] sm:$0xff]  ;;  %v7887_v49 = vmul.f32 %v5508_v24, %v1283_v39  ;;  %v2318_v28 = vld [vmem:[#allocation2 + $0xf3] sm:$0xff]  ;;  %v7892_v34 = vpack.c.bf16 %v2315_v14, %v2314_v7  ;;  %v2771_v5 = vpack.c.bf16 %v7840_v6, %v1852_v50  ;;  %v5514_v7 = vunpack.i.h.bf16 %v7890_v16 }
 0x2b8   :  { %10339 = vst [vmem:[#allocation35_spill] sm:$0xff] %v7853_v9  ;;  %2348 = vst.msk [vmem:[#allocation3 + $0x18] sm:$0xff] %vm2344_vm6, %v7832_v37  ;;  %v10347_v31 = vld [vmem:[#allocation11_spill] sm:$0xff]  ;;  %v2319_v15 = vld [vmem:[#allocation2 + $0xfb] sm:$0xff]  ;;  %v7894_v43 = vpack.c.bf16 %v2317_v27, %v2316_v51 }
 0x2b9   :  { %2349 = vst.msk [vmem:[#allocation3 + $0x20] sm:$0xff] %vm2344_vm6, %v7834_v30  ;;  %1935 = vst [vmem:[#allocation2 + $0x1c0] sm:$0xff] %v7840_v6  ;;  %v1284_v54 = vmax.f32 %v10347_v31, 0.0  ;;  %v7902_v48 = vpack.c.bf16 %v2319_v15, %v2318_v28  ;;  %v2363_v20 = vld [vmem:[#allocation2 + $0x14] sm:$0xff]  ;;  %v2364_v21 = vld [vmem:[#allocation2 + $0x1c] sm:$0xff]  ;;  %v7936_v28 = vpop.permute.xlu1 %5521 }
 0x2ba   :  { %1936 = vst [vmem:[#allocation2 + $0x1c8] sm:$0xff] %v7842_v4  ;;  %10342 = vst [vmem:[#allocation36_spill] sm:$0xff] %v7865_v63  ;;  %v10351_v1 = vld [vmem:[#allocation8_spill] sm:$0xff]  ;;  %v2365_v35 = vld [vmem:[#allocation2 + $0x24] sm:$0xff] }
 0x2bb   :  { %2350 = vst.msk [vmem:[#allocation3 + $0x28] sm:$0xff] %vm2344_vm6, %v7844_v11  ;;  %10344 = vst [vmem:[#allocation37_spill] sm:$0xff] %v7874_v44  ;;  %v7906_v47 = vmul.f32 %v5509_v38, %v1284_v54  ;;  %v1281_v42 = vmax.f32 %v10351_v1, 0.0  ;;  %v2366_v6 = vld [vmem:[#allocation2 + $0x2c] sm:$0xff]  ;;  %v2367_v10 = vld [vmem:[#allocation2 + $0x34] sm:$0xff] }
 0x2bc   :  { %2786 = vst.msk [vmem:[#allocation3 + $0xb0] sm:$0xff] %vm2052_vm2, %v2768_v53  ;;  %2787 = vst.msk [vmem:[#allocation3 + $0xb8] sm:$0xff] %vm2052_vm2, %v2769_v3  ;;  %v2399_v53 = vpack.c.bf16 %v2364_v21, %v2363_v20  ;;  %v10352_v3 = vld [vmem:[#allocation9_spill] sm:$0xff]  ;;  %v2369_v25 = vld [vmem:[#allocation2 + $0x44] sm:$0xff]  ;;  %v2400_v18 = vpack.c.bf16 %v2366_v6, %v2365_v35  ;;  %v5513_v21 = vunpack.i.l.bf16 %v7890_v16 }
 0x2bd   :  { %10345 = vst [vmem:[#allocation38_spill] sm:$0xff] %v7876_v23  ;;  %2351 = vst.msk [vmem:[#allocation3 + $0x30] sm:$0xff] %vm2344_vm6, %v7851_v45  ;;  %v1282_v40 = vmax.f32 %v10352_v3, 0.0  ;;  %v2368_v57 = vld [vmem:[#allocation2 + $0x3c] sm:$0xff]  ;;  %v2370_v41 = vld [vmem:[#allocation2 + $0x4c] sm:$0xff]  ;;  %v1855_v0 = vmul.f32 %v5503_v2, %v1281_v42 }
 0x2be   :  { %2352 = vst.msk [vmem:[#allocation3 + $0x38] sm:$0xff] %vm2344_vm6, %v7853_v9  ;;  %10346 = vst [vmem:[#allocation39_spill] sm:$0xff] %v7882_v13  ;;  %v10353_v61 = vld [vmem:[#allocation16_spill] sm:$0xff]  ;;  %v10354_v46 = vld [vmem:[#allocation18_spill] sm:$0xff]  ;;  %v2401_v17 = vpack.c.bf16 %v2368_v57, %v2367_v10  ;;  %v2402_v19 = vpack.c.bf16 %v2370_v41, %v2369_v25  ;;  %v5528_v25 = vunpack.i.l.bf16 %v7920_v36 }
 0x2bf   :  { %2353 = vst.msk [vmem:[#allocation3 + $0x40] sm:$0xff] %vm2344_vm6, %v7865_v63  ;;  %10348 = vst [vmem:[#allocation40_spill] sm:$0xff] %v7892_v34  ;;  %v1287_v55 = vmax.f32 %v10353_v61, 0.0  ;;  %v1288_v38 = vmax.f32 %v10354_v46, 0.0  ;;  %v2371_v24 = vld [vmem:[#allocation2 + $0x54] sm:$0xff]  ;;  %v2372_v52 = vld [vmem:[#allocation2 + $0x5c] sm:$0xff]  ;;  %v1856_v58 = vmul.f32 %v5504_v22, %v1282_v40  ;;  %v2772_v27 = vpack.c.bf16 %v1855_v0, %v7842_v4 }
 0x2c0   :  { %10349 = vst [vmem:[#allocation41_spill] sm:$0xff] %v7894_v43  ;;  %2354 = vst.msk [vmem:[#allocation3 + $0x48] sm:$0xff] %vm2344_vm6, %v7874_v44  ;;  %v2373_v39 = vld [vmem:[#allocation2 + $0x64] sm:$0xff]  ;;  %v2376_v14 = vld [vmem:[#allocation2 + $0x7c] sm:$0xff]  ;;  %v2403_v51 = vpack.c.bf16 %v2372_v52, %v2371_v24 }
 0x2c1   :  { %2355 = vst.msk [vmem:[#allocation3 + $0x50] sm:$0xff] %vm2344_vm6, %v7876_v23  ;;  %1933 = vst [vmem:[#allocation2 + $0x1b0] sm:$0xff] %v1851_v33  ;;  %v2374_v33 = vld [vmem:[#allocation2 + $0x6c] sm:$0xff]  ;;  %v7932_v31 = vmul.f32 %v5518_v8, %v1287_v55  ;;  %v7934_v54 = vmul.f32 %v5519_v59, %v1288_v38  ;;  %v2377_v22 = vld [vmem:[#allocation2 + $0x84] sm:$0xff]  ;;  %v2773_v4 = vpack.c.bf16 %v7887_v49, %v1856_v58 }
 0x2c2   :  { %1934 = vst [vmem:[#allocation2 + $0x1b8] sm:$0xff] %v1852_v50  ;;  %10350 = vst [vmem:[#allocation42_spill] sm:$0xff] %v7902_v48  ;;  %v2375_v50 = vld [vmem:[#allocation2 + $0x74] sm:$0xff]  ;;  %v2378_v15 = vld [vmem:[#allocation2 + $0x8c] sm:$0xff] }
 0x2c3   :  { %2356 = vst.msk [vmem:[#allocation3 + $0x58] sm:$0xff] %vm2344_vm6, %v7882_v13  ;;  %1939 = vst [vmem:[#allocation2 + $0x1e0] sm:$0xff] %v7887_v49  ;;  %v2405_v20 = vpack.c.bf16 %v2376_v14, %v2375_v50  ;;  %v2380_v2 = vld [vmem:[#allocation2 + $0x9c] sm:$0xff]  ;;  %v2381_v1 = vld [vmem:[#allocation2 + $0xa4] sm:$0xff]  ;;  %v2406_v35 = vpack.c.bf16 %v2378_v15, %v2377_v22  ;;  %v5524_v14 = vunpack.i.h.bf16 %v7936_v28  ;;  %v7977_v15 = vpop.permute.xlu1 %5531 }
 0x2c4   :  { %2357 = vst.msk [vmem:[#allocation3 + $0x60] sm:$0xff] %vm2344_vm6, %v7892_v34  ;;  %2358 = vst.msk [vmem:[#allocation3 + $0x68] sm:$0xff] %vm2344_vm6, %v7894_v43  ;;  %v2382_v42 = vld [vmem:[#allocation2 + $0xac] sm:$0xff]  ;;  %v10356_v10 = vld [vmem:[#allocation14_spill] sm:$0xff] }
 0x2c5   :  { %2788 = vst.msk [vmem:[#allocation3 + $0xc0] sm:$0xff] %vm2052_vm2, %v2770_v62  ;;  %2789 = vst.msk [vmem:[#allocation3 + $0xc8] sm:$0xff] %vm2052_vm2, %v2771_v5  ;;  %v2379_v62 = vld [vmem:[#allocation2 + $0x94] sm:$0xff]  ;;  %v2404_v5 = vpack.c.bf16 %v2374_v33, %v2373_v39  ;;  %v1286_v16 = vmax.f32 %v10356_v10, 0.0  ;;  %v2384_v40 = vld [vmem:[#allocation2 + $0xbc] sm:$0xff]  ;;  %v2408_v57 = vpack.c.bf16 %v2382_v42, %v2381_v1  ;;  %v1292_v39 = vmax.f32 %v7348_v12, 0.0 }
 0x2c6   :  { %2359 = vst.msk [vmem:[#allocation3 + $0x70] sm:$0xff] %vm2344_vm6, %v7902_v48  ;;  %1940 = vst [vmem:[#allocation2 + $0x1e8] sm:$0xff] %v7906_v47  ;;  %v10355_v6 = vld [vmem:[#allocation12_spill] sm:$0xff]  ;;  %v2385_v59 = vld [vmem:[#allocation2 + $0xc4] sm:$0xff]  ;;  %v2407_v8 = vpack.c.bf16 %v2380_v2, %v2379_v62 }
 0x2c7   :  { %2418 = vst.msk [vmem:[#allocation3] sm:$0xff] %vm2417_vm7, %v2399_v53  ;;  %2419 = vst.msk [vmem:[#allocation3 + $0x8] sm:$0xff] %vm2417_vm7, %v2400_v18  ;;  %v1285_v49 = vmax.f32 %v10355_v6, 0.0  ;;  %v5529_v53 = vunpack.i.h.bf16 %v7920_v36  ;;  %v2383_v3 = vld [vmem:[#allocation2 + $0xb4] sm:$0xff]  ;;  %v2386_v61 = vld [vmem:[#allocation2 + $0xcc] sm:$0xff]  ;;  %v1860_v52 = vmul.f32 %v5514_v7, %v1286_v16  ;;  %v1295_v16 = vmax.f32 %v7360_v56, 0.0 }
 0x2c8   :  { %2491 = vst.msk [vmem:[#allocation3] sm:$0xff] %vm2490_vm8, %v2400_v18  ;;  %1937 = vst [vmem:[#allocation2 + $0x1d0] sm:$0xff] %v1855_v0  ;;  %v10357_v41 = vld [vmem:[#allocation24_spill] sm:$0xff]  ;;  %v7958_v0 = vpop.permute.xlu0 %5536  ;;  %v2388_v46 = vld [vmem:[#allocation2 + $0xdc] sm:$0xff]  ;;  %v2409_v38 = vpack.c.bf16 %v2384_v40, %v2383_v3 }
 0x2c9   :  { %2492 = vst.msk [vmem:[#allocation3 + $0x8] sm:$0xff] %vm2490_vm8, %v2401_v17  ;;  %1938 = vst [vmem:[#allocation2 + $0x1d8] sm:$0xff] %v1856_v58  ;;  %v1291_v18 = vmax.f32 %v10357_v41, 0.0  ;;  %v2387_v55 = vld [vmem:[#allocation2 + $0xd4] sm:$0xff]  ;;  %v1859_v24 = vmul.f32 %v5513_v21, %v1285_v49  ;;  %v2390_v36 = vld [vmem:[#allocation2 + $0xec] sm:$0xff]  ;;  %v2410_v58 = vpack.c.bf16 %v2386_v61, %v2385_v59  ;;  %v2775_v7 = vpack.c.bf16 %v7932_v31, %v1860_v52 }
 0x2ca   :  { %2420 = vst.msk [vmem:[#allocation3 + $0x10] sm:$0xff] %vm2417_vm7, %v2401_v17  ;;  %2421 = vst.msk [vmem:[#allocation3 + $0x18] sm:$0xff] %vm2417_vm7, %v2402_v19  ;;  %v2389_v17 = vld [vmem:[#allocation2 + $0xe4] sm:$0xff]  ;;  %v2411_v33 = vpack.c.bf16 %v2388_v46, %v2387_v55  ;;  %v7975_v22 = vmul.f32 %v5529_v53, %v1292_v39  ;;  %v7997_v6 = vld [vmem:[#allocation2 + $0x4d] sm:$0xff]  ;;  %v5538_v10 = vunpack.i.l.bf16 %v7958_v0  ;;  %v1296_v55 = vmax.f32 %v7364_v29, 0.0 }
 0x2cb   :  { %2422 = vst.msk [vmem:[#allocation3 + $0x20] sm:$0xff] %vm2417_vm7, %v2403_v51  ;;  %1943 = vst [vmem:[#allocation2 + $0x200] sm:$0xff] %v7932_v31  ;;  %v7967_v50 = vmul.f32 %v5528_v25, %v1291_v18  ;;  %v2774_v12 = vpack.c.bf16 %v1859_v24, %v7906_v47  ;;  %v5523_v47 = vunpack.i.l.bf16 %v7936_v28  ;;  %v10358_v31 = vld [vmem:[#allocation20_spill] sm:$0xff]  ;;  %v10359_v2 = vld [vmem:[#allocation22_spill] sm:$0xff]  ;;  %v5539_v28 = vunpack.i.h.bf16 %v7958_v0 }
 0x2cc   :  { %2493 = vst.msk [vmem:[#allocation3 + $0x10] sm:$0xff] %vm2490_vm8, %v2402_v19  ;;  %2494 = vst.msk [vmem:[#allocation3 + $0x18] sm:$0xff] %vm2490_vm8, %v2403_v51  ;;  %v2391_v19 = vld [vmem:[#allocation2 + $0xf4] sm:$0xff]  ;;  %v2392_v51 = vld [vmem:[#allocation2 + $0xfc] sm:$0xff]  ;;  %v1289_v21 = vmax.f32 %v10358_v31, 0.0  ;;  %v1290_v1 = vmax.f32 %v10359_v2, 0.0  ;;  %v8021_v41 = vpop.permute.xlu0 %5546  ;;  %v8032_v46 = vmul.f32 %v5538_v10, %v1295_v16 }
 0x2cd   :  { %2790 = vst.msk [vmem:[#allocation3 + $0xd0] sm:$0xff] %vm2052_vm2, %v2772_v27  ;;  %1944 = vst [vmem:[#allocation2 + $0x208] sm:$0xff] %v7934_v54  ;;  %v2412_v27 = vpack.c.bf16 %v2390_v36, %v2389_v17  ;;  %v2413_v62 = vpack.c.bf16 %v2392_v51, %v2391_v19  ;;  %v7993_v42 = vld [vmem:[#allocation2 + $0x3d] sm:$0xff]  ;;  %v8010_v53 = vld [vmem:[#allocation2 + $0x55] sm:$0xff] }
 0x2ce   :  { %2423 = vst.msk [vmem:[#allocation3 + $0x28] sm:$0xff] %vm2417_vm7, %v2404_v5  ;;  %2424 = vst.msk [vmem:[#allocation3 + $0x30] sm:$0xff] %vm2417_vm7, %v2405_v20  ;;  %v8012_v3 = vld [vmem:[#allocation2 + $0x5d] sm:$0xff]  ;;  %v8014_v40 = vld [vmem:[#allocation2 + $0x65] sm:$0xff]  ;;  %v1864_v25 = vmul.f32 %v5524_v14, %v1290_v1 }
 0x2cf   :  { %2495 = vst.msk [vmem:[#allocation3 + $0x20] sm:$0xff] %vm2490_vm8, %v2404_v5  ;;  %2496 = vst.msk [vmem:[#allocation3 + $0x28] sm:$0xff] %vm2490_vm8, %v2405_v20  ;;  %v7979_v5 = vld [vmem:[#allocation2 + $0x25] sm:$0xff]  ;;  %v7981_v20 = vld [vmem:[#allocation2 + $0x2d] sm:$0xff] }
 0x2d0   :  { %2791 = vst.msk [vmem:[#allocation3 + $0xd8] sm:$0xff] %vm2052_vm2, %v2773_v4  ;;  %1941 = vst [vmem:[#allocation2 + $0x1f0] sm:$0xff] %v1859_v24  ;;  %v7983_v4 = vld [vmem:[#allocation2 + $0x35] sm:$0xff]  ;;  %v8023_v56 = vld [vmem:[#allocation2 + $0x6d] sm:$0xff]  ;;  %v2777_v19 = vpack.c.bf16 %v7967_v50, %v1864_v25 }
 0x2d1   :  { %2425 = vst.msk [vmem:[#allocation3 + $0x38] sm:$0xff] %vm2417_vm7, %v2406_v35  ;;  %2426 = vst.msk [vmem:[#allocation3 + $0x40] sm:$0xff] %vm2417_vm7, %v2407_v8  ;;  %v8025_v18 = vld [vmem:[#allocation2 + $0x75] sm:$0xff]  ;;  %v8027_v0 = vld [vmem:[#allocation2 + $0x7d] sm:$0xff] }
 0x2d2   :  { %2497 = vst.msk [vmem:[#allocation3 + $0x30] sm:$0xff] %vm2490_vm8, %v2406_v35  ;;  %2498 = vst.msk [vmem:[#allocation3 + $0x38] sm:$0xff] %vm2490_vm8, %v2407_v8  ;;  %v7995_v35 = vld [vmem:[#allocation2 + $0x45] sm:$0xff]  ;;  %v8039_v39 = vld [vmem:[#allocation2 + $0x95] sm:$0xff] }
 0x2d3   :  { %2427 = vst.msk [vmem:[#allocation3 + $0x48] sm:$0xff] %vm2417_vm7, %v2408_v57  ;;  %2428 = vst.msk [vmem:[#allocation3 + $0x50] sm:$0xff] %vm2417_vm7, %v2409_v38  ;;  %v8035_v24 = vld [vmem:[#allocation2 + $0x85] sm:$0xff]  ;;  %v8051_v14 = vld [vmem:[#allocation2 + $0xad] sm:$0xff] }
 0x2d4   :  { %2499 = vst.msk [vmem:[#allocation3 + $0x40] sm:$0xff] %vm2490_vm8, %v2408_v57  ;;  %2500 = vst.msk [vmem:[#allocation3 + $0x48] sm:$0xff] %vm2490_vm8, %v2409_v38  ;;  %v1863_v57 = vmul.f32 %v5523_v47, %v1289_v21  ;;  %v5534_v38 = vunpack.i.h.bf16 %v7977_v15  ;;  %v8064_v47 = vld [vmem:[#allocation2 + $0xbd] sm:$0xff]  ;;  %v8066_v31 = vld [vmem:[#allocation2 + $0xc5] sm:$0xff] }
 0x2d5   :  { %1942 = vst [vmem:[#allocation2 + $0x1f8] sm:$0xff] %v1860_v52  ;;  %2429 = vst.msk [vmem:[#allocation3 + $0x58] sm:$0xff] %vm2417_vm7, %v2410_v58  ;;  %v8037_v52 = vld [vmem:[#allocation2 + $0x8d] sm:$0xff]  ;;  %v8078_v16 = vld [vmem:[#allocation2 + $0xd5] sm:$0xff] }
 0x2d6   :  { %2430 = vst.msk [vmem:[#allocation3 + $0x60] sm:$0xff] %vm2417_vm7, %v2411_v33  ;;  %1947 = vst [vmem:[#allocation2 + $0x220] sm:$0xff] %v7967_v50  ;;  %v2776_v29 = vpack.c.bf16 %v1863_v57, %v7934_v54  ;;  %v8060_v54 = vpop.permute.xlu1 %5541  ;;  %v8062_v50 = vld [vmem:[#allocation2 + $0xb5] sm:$0xff]  ;;  %v8076_v10 = vld [vmem:[#allocation2 + $0xcd] sm:$0xff] }
 0x2d7   :  { %2501 = vst.msk [vmem:[#allocation3 + $0x50] sm:$0xff] %vm2490_vm8, %v2410_v58  ;;  %2502 = vst.msk [vmem:[#allocation3 + $0x58] sm:$0xff] %vm2490_vm8, %v2411_v33  ;;  %v8047_v58 = vld [vmem:[#allocation2 + $0x9d] sm:$0xff]  ;;  %v8049_v33 = vld [vmem:[#allocation2 + $0xa5] sm:$0xff]  ;;  %v5544_v59 = vunpack.i.h.bf16 %v8060_v54  ;;  %v5543_v49 = vunpack.i.l.bf16 %v8060_v54 }
 0x2d8   :  { %2431 = vst.msk [vmem:[#allocation3 + $0x68] sm:$0xff] %vm2417_vm7, %v2412_v27  ;;  %1948 = vst [vmem:[#allocation2 + $0x228] sm:$0xff] %v7975_v22  ;;  %v8087_v2 = vld [vmem:[#allocation2 + $0xe5] sm:$0xff]  ;;  %v8091_v21 = vld [vmem:[#allocation2 + $0xf5] sm:$0xff] }
 0x2d9   :  { %2503 = vst.msk [vmem:[#allocation3 + $0x60] sm:$0xff] %vm2490_vm8, %v2412_v27  ;;  %2504 = vst.msk [vmem:[#allocation3 + $0x68] sm:$0xff] %vm2490_vm8, %v2413_v62  ;;  %v8055_v27 = vmul.f32 %v5539_v28, %v1296_v55  ;;  %v5549_v28 = vunpack.i.h.bf16 %v8021_v41  ;;  %v10363_v17 = vld [vmem:[#allocation15_spill] sm:$0xff]  ;;  %v10364_v51 = vld [vmem:[#allocation30_spill] sm:$0xff] }
 0x2da   :  { %2792 = vst.msk [vmem:[#allocation3 + $0xe0] sm:$0xff] %vm2052_vm2, %v2774_v12  ;;  %2793 = vst.msk [vmem:[#allocation3 + $0xe8] sm:$0xff] %vm2052_vm2, %v2775_v7  ;;  %v5533_v12 = vunpack.i.l.bf16 %v7977_v15  ;;  %v10360_v7 = vld [vmem:[#allocation26_spill] sm:$0xff]  ;;  %v10361_v15 = vld [vmem:[#allocation28_spill] sm:$0xff]  ;;  %v1300_v61 = vmax.f32 %v10363_v17, 0.0  ;;  %v1297_v48 = vmax.f32 %v10364_v51, 0.0 }
 0x2db   :  { %2432 = vst.msk [vmem:[#allocation3 + $0x70] sm:$0xff] %vm2417_vm7, %v2413_v62  ;;  %1945 = vst [vmem:[#allocation2 + $0x210] sm:$0xff] %v1863_v57  ;;  %v1293_v62 = vmax.f32 %v10360_v7, 0.0  ;;  %v1294_v1 = vmax.f32 %v10361_v15, 0.0  ;;  %v8080_v57 = vld [vmem:[#allocation2 + $0xdd] sm:$0xff]  ;;  %v8089_v15 = vld [vmem:[#allocation2 + $0xed] sm:$0xff] }
 0x2dc   :  { %1946 = vst [vmem:[#allocation2 + $0x218] sm:$0xff] %v1864_v25  ;;  %1951 = vst [vmem:[#allocation2 + $0x240] sm:$0xff] %v8032_v46  ;;  %v10362_v7 = vld [vmem:[#allocation13_spill] sm:$0xff]  ;;  %v8108_v36 = vld [vmem:[#allocation2 + $0x26] sm:$0xff]  ;;  %v1871_v11 = vmul.f32 %v5543_v49, %v1297_v48 }
 0x2dd   :  { %2794 = vst.msk [vmem:[#allocation3 + $0xf0] sm:$0xff] %vm2052_vm2, %v2776_v29  ;;  %2795 = vst.msk [vmem:[#allocation3 + $0xf8] sm:$0xff] %vm2052_vm2, %v2777_v19  ;;  %v1867_v55 = vmul.f32 %v5533_v12, %v1293_v62  ;;  %v5548_v29 = vunpack.i.l.bf16 %v8021_v41  ;;  %v1299_v19 = vmax.f32 %v10362_v7, 0.0  ;;  %v1868_v25 = vmul.f32 %v5534_v38, %v1294_v1  ;;  %v5557_v12 = vpop.permute.xlu0 %5556  ;;  %v8098_v62 = vld [vmem:[#allocation2 + $0xfd] sm:$0xff]  ;;  %v8110_v38 = vld [vmem:[#allocation2 + $0x2e] sm:$0xff] }
 0x2de   :  { %1952 = vst [vmem:[#allocation2 + $0x248] sm:$0xff] %v8055_v27  ;;  %v8112_v17 = vld [vmem:[#allocation2 + $0x36] sm:$0xff]  ;;  %v1874_v41 = vmul.f32 %v5549_v28, %v1300_v61  ;;  %v5559_v61 = vunpack.i.h.bf16 %v5557_v12  ;;  %v8128_v28 = vpop.permute.xlu1 %5551  ;;  %v8134_v13 = vld [vmem:[#allocation2 + $0x66] sm:$0xff]  ;;  %v5558_v51 = vunpack.i.l.bf16 %v5557_v12  ;;  %v8142_v44 = vld [vmem:[#allocation2 + $0x6e] sm:$0xff] }
 0x2df   :  { %1949 = vst [vmem:[#allocation2 + $0x230] sm:$0xff] %v1867_v55  ;;  %v2778_v7 = vpack.c.bf16 %v1867_v55, %v7975_v22  ;;  %v8103_v8 = vmul.f32 %v5548_v29, %v1299_v19  ;;  %1950 = vst [vmem:[#allocation2 + $0x238] sm:$0xff] %v1868_v25  ;;  %v2779_v1 = vpack.c.bf16 %v8032_v46, %v1868_v25  ;;  %v8116_v22 = vld [vmem:[#allocation2 + $0x3e] sm:$0xff]  ;;  %v8118_v55 = vld [vmem:[#allocation2 + $0x46] sm:$0xff]  ;;  %v5554_v60 = vunpack.i.h.bf16 %v8128_v28 }
 0x2e0   :  { %v8120_v29 = vld [vmem:[#allocation2 + $0x4e] sm:$0xff]  ;;  %v8130_v54 = vld [vmem:[#allocation2 + $0x56] sm:$0xff]  ;;  %v8132_v25 = vld [vmem:[#allocation2 + $0x5e] sm:$0xff]  ;;  %1956 = vst [vmem:[#allocation2 + $0x268] sm:$0xff] %v1874_v41 }
 0x2e1   :  { %2796 = vst.msk [vmem:[#allocation3 + $0x100] sm:$0xff] %vm2052_vm2, %v2778_v7  ;;  %1955 = vst [vmem:[#allocation2 + $0x260] sm:$0xff] %v8103_v8  ;;  %v10365_v34 = vld [vmem:[#allocation32_spill] sm:$0xff]  ;;  %v8146_v9 = vld [vmem:[#allocation2 + $0x7e] sm:$0xff] }
 0x2e2   :  { %v1298_v46 = vmax.f32 %v10365_v34, 0.0  ;;  %2797 = vst.msk [vmem:[#allocation3 + $0x108] sm:$0xff] %vm2052_vm2, %v2779_v1  ;;  %v10366_v34 = vld [vmem:[#allocation21_spill] sm:$0xff]  ;;  %10368 = vst [vmem:[#allocation44_spill] sm:$0xff] %v8146_v9  ;;  %v8151_v7 = vld [vmem:[#allocation2 + $0x86] sm:$0xff] }
 0x2e3   :  { %v1303_v23 = vmax.f32 %v10366_v34, 0.0  ;;  %v8144_v63 = vld [vmem:[#allocation2 + $0x76] sm:$0xff]  ;;  %v8153_v1 = vld [vmem:[#allocation2 + $0x8e] sm:$0xff]  ;;  %v8162_v45 = vld [vmem:[#allocation2 + $0x9e] sm:$0xff]  ;;  %1953 = vst [vmem:[#allocation2 + $0x250] sm:$0xff] %v1871_v11 }
 0x2e4   :  { %10367 = vst [vmem:[#allocation43_spill] sm:$0xff] %v8144_v63  ;;  %v1872_v19 = vmul.f32 %v5544_v59, %v1298_v46  ;;  %v10369_v30 = vld [vmem:[#allocation81_spill] sm:$0xff]  ;;  %v8164_v48 = vld [vmem:[#allocation2 + $0xa6] sm:$0xff]  ;;  %v2624_v49 = vpack.c.bf16 %v8153_v1, %v8151_v7  ;;  %v2780_v59 = vpack.c.bf16 %v1871_v11, %v8055_v27  ;;  %v5553_v7 = vunpack.i.l.bf16 %v8128_v28 }
 0x2e5   :  { %v1304_v43 = vmax.f32 %v10369_v30, 0.0  ;;  %v8155_v12 = vld [vmem:[#allocation2 + $0x96] sm:$0xff]  ;;  %v1877_v37 = vmul.f32 %v5558_v51, %v1303_v23  ;;  %v2599_v30 = vld [vmem:[#allocation2 + $0xae] sm:$0xff]  ;;  %v8170_v32 = vld [vmem:[#allocation2 + $0x101] sm:$0xff] }
 0x2e6   :  { %1954 = vst [vmem:[#allocation2 + $0x258] sm:$0xff] %v1872_v19  ;;  %v2781_v46 = vpack.c.bf16 %v8103_v8, %v1872_v19  ;;  %v2600_v23 = vld [vmem:[#allocation2 + $0xb6] sm:$0xff]  ;;  %v2601_v51 = vld [vmem:[#allocation2 + $0xbe] sm:$0xff]  ;;  %v8172_v34 = vld [vmem:[#allocation2 + $0xc6] sm:$0xff]  ;;  %v2625_v26 = vpack.c.bf16 %v8162_v45, %v8155_v12  ;;  %v2626_v63 = vpack.c.bf16 %v2599_v30, %v8164_v48 }
 0x2e7   :  { %v1878_v41 = vmul.f32 %v5559_v61, %v1304_v43  ;;  %1959 = vst [vmem:[#allocation2 + $0x280] sm:$0xff] %v1877_v37  ;;  %v10370_v1 = vld [vmem:[#allocation17_spill] sm:$0xff]  ;;  %v8179_v11 = vld [vmem:[#allocation2 + $0x102] sm:$0xff]  ;;  %v2603_v8 = vld [vmem:[#allocation2 + $0xce] sm:$0xff]  ;;  %v2627_v19 = vpack.c.bf16 %v2601_v51, %v2600_v23  ;;  %v10372_v23 = vpack.c.bf16 %v7981_v20, %v7979_v5  ;;  %v10377_v5 = vpack.c.bf16 %v8027_v0, %v8025_v18 }
 0x2e8   :  { %v1301_v9 = vmax.f32 %v10370_v1, 0.0  ;;  %v2604_v43 = vld [vmem:[#allocation2 + $0xd6] sm:$0xff]  ;;  %v2605_v27 = vld [vmem:[#allocation2 + $0xde] sm:$0xff]  ;;  %2798 = vst.msk [vmem:[#allocation3 + $0x110] sm:$0xff] %vm2052_vm2, %v2780_v59  ;;  %2799 = vst.msk [vmem:[#allocation3 + $0x118] sm:$0xff] %vm2052_vm2, %v2781_v46  ;;  %v2628_v48 = vpack.c.bf16 %v2603_v8, %v8172_v34  ;;  %v10374_v59 = vpack.c.bf16 %v7997_v6, %v7995_v35  ;;  %v10375_v34 = vpack.c.bf16 %v8012_v3, %v8010_v53 }
 0x2e9   :  { %1960 = vst [vmem:[#allocation2 + $0x288] sm:$0xff] %v1878_v41  ;;  %v10371_v61 = vld [vmem:[#allocation19_spill] sm:$0xff]  ;;  %v8184_v28 = vld [vmem:[#allocation2 + $0xf6] sm:$0xff]  ;;  %v2629_v30 = vpack.c.bf16 %v2605_v27, %v2604_v43  ;;  %2564 = vst.msk [vmem:[#allocation3] sm:$0xff] %vm2563_vm9, %v10372_v23  ;;  %v10373_v41 = vpack.c.bf16 %v7993_v42, %v7983_v4  ;;  %v10378_v20 = vpack.c.bf16 %v8037_v52, %v8035_v24 }
 0x2ea   :  { %v1302_v45 = vmax.f32 %v10371_v61, 0.0  ;;  %v2606_v37 = vld [vmem:[#allocation2 + $0xe6] sm:$0xff]  ;;  %v2607_v12 = vld [vmem:[#allocation2 + $0xee] sm:$0xff]  ;;  %v1875_v1 = vmul.f32 %v5553_v7, %v1301_v9  ;;  %2566 = vst.msk [vmem:[#allocation3 + $0x10] sm:$0xff] %vm2563_vm9, %v10374_v59  ;;  %2567 = vst.msk [vmem:[#allocation3 + $0x18] sm:$0xff] %vm2563_vm9, %v10375_v34  ;;  %v10376_v9 = vpack.c.bf16 %v8023_v56, %v8014_v40  ;;  %v10379_v4 = vpack.c.bf16 %v8047_v58, %v8039_v39 }
 0x2eb   :  { %2565 = vst.msk [vmem:[#allocation3 + $0x8] sm:$0xff] %vm2563_vm9, %v10373_v41  ;;  %2569 = vst.msk [vmem:[#allocation3 + $0x28] sm:$0xff] %vm2563_vm9, %v10377_v5  ;;  %v10380_v42 = vpack.c.bf16 %v8051_v14, %v8049_v33  ;;  %v10381_v35 = vpack.c.bf16 %v8064_v47, %v8062_v50  ;;  %v10382_v6 = vpack.c.bf16 %v8076_v10, %v8066_v31  ;;  %v2320_v56 = vld [vmem:[#allocation2 + $0x103] sm:$0xff]  ;;  %v2323_v46 = vld [vmem:[#allocation2 + $0x11b] sm:$0xff] }
 0x2ec   :  { %2568 = vst.msk [vmem:[#allocation3 + $0x20] sm:$0xff] %vm2563_vm9, %v10376_v9  ;;  %2570 = vst.msk [vmem:[#allocation3 + $0x30] sm:$0xff] %vm2563_vm9, %v10378_v20  ;;  %v10383_v53 = vpack.c.bf16 %v8080_v57, %v8078_v16  ;;  %v10384_v3 = vpack.c.bf16 %v8089_v15, %v8087_v2  ;;  %v10385_v40 = vpack.c.bf16 %v8098_v62, %v8091_v21  ;;  %v2393_v18 = vld [vmem:[#allocation2 + $0x104] sm:$0xff]  ;;  %v2106_v2 = vld [vmem:[#allocation2 + $0x119] sm:$0xff]  ;;  %v5673_v16 = vmov 72  }
 0x2ed   :  { %2571 = vst.msk [vmem:[#allocation3 + $0x38] sm:$0xff] %vm2563_vm9, %v10379_v4  ;;  %2572 = vst.msk [vmem:[#allocation3 + $0x40] sm:$0xff] %vm2563_vm9, %v10380_v42  ;;  %v2609_v0 = vld [vmem:[#allocation2 + $0xfe] sm:$0xff]  ;;  %v2630_v24 = vpack.c.bf16 %v2607_v12, %v2606_v37  ;;  %v1876_v52 = vmul.f32 %v5554_v60, %v1302_v45  ;;  %v10386_v39 = vpack.c.bf16 %v8110_v38, %v8108_v36  ;;  %v10391_v36 = vld [vmem:[#allocation44_spill] sm:$0xff]  ;;  %5566 = vset.pattern.permute.xlu0 %v5673_v16 }
 0x2ee   :  { %2573 = vst.msk [vmem:[#allocation3 + $0x48] sm:$0xff] %vm2563_vm9, %v10381_v35  ;;  %2574 = vst.msk [vmem:[#allocation3 + $0x50] sm:$0xff] %vm2563_vm9, %v10382_v6  ;;  %v10387_v58 = vpack.c.bf16 %v8116_v22, %v8112_v17  ;;  %v10388_v33 = vpack.c.bf16 %v8120_v29, %v8118_v55  ;;  %v10389_v14 = vpack.c.bf16 %v8132_v25, %v8130_v54  ;;  %v10392_v50 = vld [vmem:[#allocation43_spill] sm:$0xff]  ;;  %5560 = vset.pattern.permute.xlu1 %v5673_v16  ;;  %v2178_v38 = vld [vmem:[#allocation2 + $0x112] sm:$0xff] }
 0x2ef   :  { %2575 = vst.msk [vmem:[#allocation3 + $0x58] sm:$0xff] %vm2563_vm9, %v10383_v53  ;;  %2576 = vst.msk [vmem:[#allocation3 + $0x60] sm:$0xff] %vm2563_vm9, %v10384_v3  ;;  %v10390_v60 = vpack.c.bf16 %v8142_v44, %v8134_v13  ;;  %v10393_v47 = vpack.c.bf16 %v10391_v36, %v10392_v50  ;;  %v8271_v31 = vld [vmem:[#allocation2 + $0x105] sm:$0xff]  ;;  %v2631_v21 = vpack.c.bf16 %v2609_v0, %v8184_v28  ;;  %v2105_v13 = vld [vmem:[#allocation2 + $0x111] sm:$0xff] }
 0x2f0   :  { %2577 = vst.msk [vmem:[#allocation3 + $0x68] sm:$0xff] %vm2563_vm9, %v10385_v40  ;;  %v2104_v44 = vld [vmem:[#allocation2 + $0x109] sm:$0xff]  ;;  %1957 = vst [vmem:[#allocation2 + $0x270] sm:$0xff] %v1875_v1  ;;  %v2124_v15 = vpack.c.bf16 %v2106_v2, %v2105_v13  ;;  %v2179_v17 = vld [vmem:[#allocation2 + $0x11a] sm:$0xff] }
 0x2f1   :  { %2637 = vst.msk [vmem:[#allocation3] sm:$0xff] %vm2636_vm10, %v10386_v39  ;;  %2638 = vst.msk [vmem:[#allocation3 + $0x8] sm:$0xff] %vm2636_vm10, %v10387_v58  ;;  %v10394_v10 = vld [vmem:[#allocation23_spill] sm:$0xff]  ;;  %v2123_v57 = vpack.c.bf16 %v2104_v44, %v8170_v32  ;;  %v2197_v54 = vpack.c.bf16 %v2179_v17, %v2178_v38  ;;  %v10397_v32 = vld [vmem:[#allocation29_spill] sm:$0xff] }
 0x2f2   :  { %2639 = vst.msk [vmem:[#allocation3 + $0x10] sm:$0xff] %vm2636_vm10, %v10388_v33  ;;  %2640 = vst.msk [vmem:[#allocation3 + $0x18] sm:$0xff] %vm2636_vm10, %v10389_v14  ;;  %v2177_v62 = vld [vmem:[#allocation2 + $0x10a] sm:$0xff]  ;;  %v8284_v22 = vld [vmem:[#allocation2 + $0x122] sm:$0xff] }
 0x2f3   :  { %2641 = vst.msk [vmem:[#allocation3 + $0x20] sm:$0xff] %vm2636_vm10, %v10390_v60  ;;  %2642 = vst.msk [vmem:[#allocation3 + $0x28] sm:$0xff] %vm2636_vm10, %v10393_v47  ;;  %v2397_v55 = vld [vmem:[#allocation2 + $0x124] sm:$0xff]  ;;  %v2196_v29 = vpack.c.bf16 %v2177_v62, %v8179_v11  ;;  %v2394_v43 = vld [vmem:[#allocation2 + $0x10c] sm:$0xff] }
 0x2f4   :  { %2643 = vst.msk [vmem:[#allocation3 + $0x30] sm:$0xff] %vm2636_vm10, %v2624_v49  ;;  %2644 = vst.msk [vmem:[#allocation3 + $0x38] sm:$0xff] %vm2636_vm10, %v2625_v26  ;;  %v10395_v26 = vld [vmem:[#allocation25_spill] sm:$0xff]  ;;  %v2321_v25 = vld [vmem:[#allocation2 + $0x10b] sm:$0xff] }
 0x2f5   :  { %2645 = vst.msk [vmem:[#allocation3 + $0x40] sm:$0xff] %vm2636_vm10, %v2626_v63  ;;  %2646 = vst.msk [vmem:[#allocation3 + $0x48] sm:$0xff] %vm2636_vm10, %v2627_v19  ;;  %v8280_v63 = vld [vmem:[#allocation2 + $0x106] sm:$0xff]  ;;  %v2322_v49 = vld [vmem:[#allocation2 + $0x113] sm:$0xff]  ;;  %v8296_v11 = vpack.c.bf16 %v2321_v25, %v2320_v56 }
 0x2f6   :  { %2710 = vst.msk [vmem:[#allocation3] sm:$0xff] %vm2709_vm11, %v10394_v10  ;;  %2711 = vst.msk [vmem:[#allocation3 + $0x8] sm:$0xff] %vm2709_vm11, %v10395_v26  ;;  %v10396_v51 = vld [vmem:[#allocation27_spill] sm:$0xff]  ;;  %v2395_v27 = vld [vmem:[#allocation2 + $0x114] sm:$0xff]  ;;  %v8309_v28 = vpack.c.bf16 %v2323_v46, %v2322_v49 }
 0x2f7   :  { %2647 = vst.msk [vmem:[#allocation3 + $0x50] sm:$0xff] %vm2636_vm10, %v2628_v48  ;;  %2648 = vst.msk [vmem:[#allocation3 + $0x58] sm:$0xff] %vm2636_vm10, %v2629_v30  ;;  %v2324_v7 = vld [vmem:[#allocation2 + $0x123] sm:$0xff]  ;;  %v10398_v61 = vld [vmem:[#allocation41_spill] sm:$0xff]  ;;  %v2414_v48 = vpack.c.bf16 %v2394_v43, %v2393_v18 }
 0x2f8   :  { %1958 = vst [vmem:[#allocation2 + $0x278] sm:$0xff] %v1876_v52  ;;  %2649 = vst.msk [vmem:[#allocation3 + $0x60] sm:$0xff] %vm2636_vm10, %v2630_v24  ;;  %v8292_v8 = vld [vmem:[#allocation2 + $0x125] sm:$0xff]  ;;  %v2396_v19 = vld [vmem:[#allocation2 + $0x11c] sm:$0xff] }
 0x2f9   :  { %2650 = vst.msk [vmem:[#allocation3 + $0x68] sm:$0xff] %vm2636_vm10, %v2631_v21  ;;  %v10399_v45 = vld [vmem:[#allocation31_spill] sm:$0xff]  ;;  %v10400_v37 = vld [vmem:[#allocation33_spill] sm:$0xff]  ;;  %v10401_v41 = vld [vmem:[#allocation34_spill] sm:$0xff]  ;;  %v2415_v34 = vpack.c.bf16 %v2396_v19, %v2395_v27 }
 0x2fa   :  { %2712 = vst.msk [vmem:[#allocation3 + $0x10] sm:$0xff] %vm2709_vm11, %v10396_v51  ;;  %2713 = vst.msk [vmem:[#allocation3 + $0x18] sm:$0xff] %vm2709_vm11, %v10397_v32  ;;  %v8304_v12 = vld [vmem:[#allocation2 + $0x126] sm:$0xff]  ;;  %v2539_v1 = vld [vmem:[#allocation2 + $0x115] sm:$0xff] }
 0x2fb   :  { %2142 = vst.msk [vmem:[#allocation3 + $0x80] sm:$0xff] %vm2125_vm3, %v2123_v57  ;;  %2143 = vst.msk [vmem:[#allocation3 + $0x88] sm:$0xff] %vm2125_vm3, %v2124_v15  ;;  %v2538_v30 = vld [vmem:[#allocation2 + $0x10d] sm:$0xff]  ;;  %v2540_v23 = vld [vmem:[#allocation2 + $0x11d] sm:$0xff] }
 0x2fc   :  { %2723 = vst.msk [vmem:[#allocation3 + $0x68] sm:$0xff] %vm2709_vm11, %v10398_v61  ;;  %2714 = vst.msk [vmem:[#allocation3 + $0x20] sm:$0xff] %vm2709_vm11, %v10399_v45  ;;  %v10402_v59 = vld [vmem:[#allocation35_spill] sm:$0xff]  ;;  %v2559_v9 = vpack.c.bf16 %v2538_v30, %v8271_v31  ;;  %v2612_v20 = vld [vmem:[#allocation2 + $0x116] sm:$0xff]  ;;  %v2560_v6 = vpack.c.bf16 %v2540_v23, %v2539_v1 }
 0x2fd   :  { %2715 = vst.msk [vmem:[#allocation3 + $0x28] sm:$0xff] %vm2709_vm11, %v10400_v37  ;;  %2716 = vst.msk [vmem:[#allocation3 + $0x30] sm:$0xff] %vm2709_vm11, %v10401_v41  ;;  %v2611_v5 = vld [vmem:[#allocation2 + $0x10e] sm:$0xff]  ;;  %v2613_v4 = vld [vmem:[#allocation2 + $0x11e] sm:$0xff] }
 0x2fe   :  { %2215 = vst.msk [vmem:[#allocation3 + $0x80] sm:$0xff] %vm2198_vm4, %v2196_v29  ;;  %2216 = vst.msk [vmem:[#allocation3 + $0x88] sm:$0xff] %vm2198_vm4, %v2197_v54  ;;  %v10403_v42 = vld [vmem:[#allocation36_spill] sm:$0xff]  ;;  %v10404_v35 = vld [vmem:[#allocation37_spill] sm:$0xff]  ;;  %v2632_v53 = vpack.c.bf16 %v2611_v5, %v8280_v63  ;;  %v2633_v24 = vpack.c.bf16 %v2613_v4, %v2612_v20 }
 0x2ff   :  { %2287 = vst.msk [vmem:[#allocation3 + $0x78] sm:$0xff] %vm2271_vm5, %v2196_v29  ;;  %2288 = vst.msk [vmem:[#allocation3 + $0x80] sm:$0xff] %vm2271_vm5, %v2197_v54  ;;  %v2252_v3 = vld [vmem:[#allocation2 + $0x12a] sm:$0xff]  ;;  %v10405_v18 = vld [vmem:[#allocation38_spill] sm:$0xff] }
 0x300   :  { %2717 = vst.msk [vmem:[#allocation3 + $0x38] sm:$0xff] %vm2709_vm11, %v10402_v59  ;;  %2718 = vst.msk [vmem:[#allocation3 + $0x40] sm:$0xff] %vm2709_vm11, %v10403_v42  ;;  %v2325_v40 = vld [vmem:[#allocation2 + $0x12b] sm:$0xff]  ;;  %v2270_v52 = vpack.c.bf16 %v2252_v3, %v8284_v22  ;;  %v2470_v58 = vld [vmem:[#allocation2 + $0x134] sm:$0xff] }
 0x301   :  { %2360 = vst.msk [vmem:[#allocation3 + $0x78] sm:$0xff] %vm2344_vm6, %v8296_v11  ;;  %2361 = vst.msk [vmem:[#allocation3 + $0x80] sm:$0xff] %vm2344_vm6, %v8309_v28  ;;  %v2398_v56 = vld [vmem:[#allocation2 + $0x12c] sm:$0xff]  ;;  %v2471_v33 = vld [vmem:[#allocation2 + $0x13c] sm:$0xff]  ;;  %v2343_v36 = vpack.c.bf16 %v2325_v40, %v2324_v7 }
 0x302   :  { %2719 = vst.msk [vmem:[#allocation3 + $0x48] sm:$0xff] %vm2709_vm11, %v10404_v35  ;;  %2720 = vst.msk [vmem:[#allocation3 + $0x50] sm:$0xff] %vm2709_vm11, %v10405_v18  ;;  %v10406_v0 = vld [vmem:[#allocation39_spill] sm:$0xff]  ;;  %v2416_v39 = vpack.c.bf16 %v2398_v56, %v2397_v55  ;;  %v10407_v60 = vld [vmem:[#allocation40_spill] sm:$0xff]  ;;  %v2489_v26 = vpack.c.bf16 %v2471_v33, %v2470_v58 }
 0x303   :  { %2433 = vst.msk [vmem:[#allocation3 + $0x78] sm:$0xff] %vm2417_vm7, %v2414_v48  ;;  %2434 = vst.msk [vmem:[#allocation3 + $0x80] sm:$0xff] %vm2417_vm7, %v2415_v34  ;;  %v2542_v14 = vld [vmem:[#allocation2 + $0x12d] sm:$0xff]  ;;  %v2543_v50 = vld [vmem:[#allocation2 + $0x135] sm:$0xff] }
 0x304   :  { %2505 = vst.msk [vmem:[#allocation3 + $0x70] sm:$0xff] %vm2490_vm8, %v2414_v48  ;;  %2506 = vst.msk [vmem:[#allocation3 + $0x78] sm:$0xff] %vm2490_vm8, %v2415_v34  ;;  %v2544_v47 = vld [vmem:[#allocation2 + $0x13d] sm:$0xff]  ;;  %v2561_v31 = vpack.c.bf16 %v2542_v14, %v8292_v8  ;;  %v2615_v21 = vld [vmem:[#allocation2 + $0x12e] sm:$0xff] }
 0x305   :  { %2721 = vst.msk [vmem:[#allocation3 + $0x58] sm:$0xff] %vm2709_vm11, %v10406_v0  ;;  %2722 = vst.msk [vmem:[#allocation3 + $0x60] sm:$0xff] %vm2709_vm11, %v10407_v60  ;;  %v2616_v44 = vld [vmem:[#allocation2 + $0x136] sm:$0xff]  ;;  %v2617_v13 = vld [vmem:[#allocation2 + $0x13e] sm:$0xff]  ;;  %v2634_v2 = vpack.c.bf16 %v2615_v21, %v8304_v12  ;;  %v2562_v15 = vpack.c.bf16 %v2544_v47, %v2543_v50 }
 0x306   :  { %2578 = vst.msk [vmem:[#allocation3 + $0x70] sm:$0xff] %vm2563_vm9, %v2559_v9  ;;  %2579 = vst.msk [vmem:[#allocation3 + $0x78] sm:$0xff] %vm2563_vm9, %v2560_v6  ;;  %v2803_v10 = vld [vmem:[#allocation2 + $0x161] sm:$0xff]  ;;  %v2800_v62 = vld [vmem:[#allocation2 + $0x149] sm:$0xff]  ;;  %v2635_v22 = vpack.c.bf16 %v2617_v13, %v2616_v44 }
 0x307   :  { %2651 = vst.msk [vmem:[#allocation3 + $0x70] sm:$0xff] %vm2636_vm10, %v2632_v53  ;;  %2652 = vst.msk [vmem:[#allocation3 + $0x78] sm:$0xff] %vm2636_vm10, %v2633_v24  ;;  %v10408_v16 = vld [vmem:[#allocation42_spill] sm:$0xff]  ;;  %v2801_v38 = vld [vmem:[#allocation2 + $0x151] sm:$0xff] }
 0x308   :  { %2289 = vst.msk [vmem:[#allocation3 + $0x88] sm:$0xff] %vm2271_vm5, %v2270_v52  ;;  %v2875_v63 = vld [vmem:[#allocation2 + $0x162] sm:$0xff]  ;;  %v2802_v17 = vld [vmem:[#allocation2 + $0x159] sm:$0xff]  ;;  %v2836_v55 = vpack.c.bf16 %v2801_v38, %v2800_v62  ;;  %v2872_v54 = vld [vmem:[#allocation2 + $0x14a] sm:$0xff] }
 0x309   :  { %2507 = vst.msk [vmem:[#allocation3 + $0x80] sm:$0xff] %vm2490_vm8, %v2416_v39  ;;  %v3017_v57 = vld [vmem:[#allocation2 + $0x163] sm:$0xff]  ;;  %v2837_v29 = vpack.c.bf16 %v2803_v10, %v2802_v17  ;;  %v2873_v25 = vld [vmem:[#allocation2 + $0x152] sm:$0xff]  ;;  %v2874_v49 = vld [vmem:[#allocation2 + $0x15a] sm:$0xff] }
 0x30a   :  { %2724 = vst.msk [vmem:[#allocation3 + $0x70] sm:$0xff] %vm2709_vm11, %v10408_v16  ;;  %2725 = vst.msk [vmem:[#allocation3 + $0x78] sm:$0xff] %vm2709_vm11, %v8296_v11  ;;  %v3089_v46 = vld [vmem:[#allocation2 + $0x164] sm:$0xff]  ;;  %v2908_v51 = vpack.c.bf16 %v2873_v25, %v2872_v54  ;;  %v2909_v32 = vpack.c.bf16 %v2875_v63, %v2874_v49  ;;  %v3016_v7 = vld [vmem:[#allocation2 + $0x15b] sm:$0xff] }
 0x30b   :  { %2362 = vst.msk [vmem:[#allocation3 + $0x88] sm:$0xff] %vm2344_vm6, %v2343_v36  ;;  %v3088_v8 = vld [vmem:[#allocation2 + $0x15c] sm:$0xff]  ;;  %v8362_v43 = vpack.c.bf16 %v3017_v57, %v3016_v7  ;;  %v2804_v61 = vld [vmem:[#allocation2 + $0x169] sm:$0xff]  ;;  %v2805_v12 = vld [vmem:[#allocation2 + $0x171] sm:$0xff] }
 0x30c   :  { %2580 = vst.msk [vmem:[#allocation3 + $0x80] sm:$0xff] %vm2563_vm9, %v2561_v31  ;;  %v2807_v11 = vld [vmem:[#allocation2 + $0x181] sm:$0xff]  ;;  %v3124_v45 = vpack.c.bf16 %v3089_v46, %v3088_v8  ;;  %v2876_v48 = vld [vmem:[#allocation2 + $0x16a] sm:$0xff]  ;;  %v2838_v1 = vpack.c.bf16 %v2805_v12, %v2804_v61  ;;  %v2877_v41 = vld [vmem:[#allocation2 + $0x172] sm:$0xff] }
 0x30d   :  { %2435 = vst.msk [vmem:[#allocation3 + $0x88] sm:$0xff] %vm2417_vm7, %v2416_v39  ;;  %v2879_v27 = vld [vmem:[#allocation2 + $0x182] sm:$0xff]  ;;  %v2878_v59 = vld [vmem:[#allocation2 + $0x17a] sm:$0xff]  ;;  %v3018_v34 = vld [vmem:[#allocation2 + $0x16b] sm:$0xff]  ;;  %v2910_v5 = vpack.c.bf16 %v2877_v41, %v2876_v48 }
 0x30e   :  { %2653 = vst.msk [vmem:[#allocation3 + $0x80] sm:$0xff] %vm2636_vm10, %v2634_v2  ;;  %v3021_v19 = vld [vmem:[#allocation2 + $0x183] sm:$0xff]  ;;  %v2911_v20 = vpack.c.bf16 %v2879_v27, %v2878_v59  ;;  %v3019_v4 = vld [vmem:[#allocation2 + $0x173] sm:$0xff]  ;;  %v3020_v42 = vld [vmem:[#allocation2 + $0x17b] sm:$0xff] }
 0x30f   :  { %2508 = vst.msk [vmem:[#allocation3 + $0x88] sm:$0xff] %vm2490_vm8, %v2489_v26  ;;  %v3093_v37 = vld [vmem:[#allocation2 + $0x184] sm:$0xff]  ;;  %v3090_v35 = vld [vmem:[#allocation2 + $0x16c] sm:$0xff]  ;;  %v3053_v6 = vpack.c.bf16 %v3019_v4, %v3018_v34  ;;  %v3091_v53 = vld [vmem:[#allocation2 + $0x174] sm:$0xff]  ;;  %v8374_v56 = vpack.c.bf16 %v3021_v19, %v3020_v42 }
 0x310   :  { %2726 = vst.msk [vmem:[#allocation3 + $0x80] sm:$0xff] %vm2709_vm11, %v8309_v28  ;;  %v2806_v28 = vld [vmem:[#allocation2 + $0x179] sm:$0xff]  ;;  %v3235_v30 = vld [vmem:[#allocation2 + $0x185] sm:$0xff]  ;;  %v3232_v40 = vld [vmem:[#allocation2 + $0x16d] sm:$0xff]  ;;  %v3125_v18 = vpack.c.bf16 %v3091_v53, %v3090_v35 }
 0x311   :  { %2581 = vst.msk [vmem:[#allocation3 + $0x88] sm:$0xff] %vm2563_vm9, %v2562_v15  ;;  %v2839_v23 = vpack.c.bf16 %v2807_v11, %v2806_v28  ;;  %v3307_v9 = vld [vmem:[#allocation2 + $0x186] sm:$0xff]  ;;  %v3092_v3 = vld [vmem:[#allocation2 + $0x17c] sm:$0xff]  ;;  %v3304_v52 = vld [vmem:[#allocation2 + $0x16e] sm:$0xff] }
 0x312   :  { %2854 = vst.msk [vmem:[#allocation3 + $0x90] sm:$0xff] %vm2125_vm3, %v2836_v55  ;;  %2855 = vst.msk [vmem:[#allocation3 + $0x98] sm:$0xff] %vm2125_vm3, %v2837_v29  ;;  %v3233_v0 = vld [vmem:[#allocation2 + $0x175] sm:$0xff]  ;;  %v3234_v24 = vld [vmem:[#allocation2 + $0x17d] sm:$0xff]  ;;  %v3126_v39 = vpack.c.bf16 %v3093_v37, %v3092_v3 }
 0x313   :  { %2654 = vst.msk [vmem:[#allocation3 + $0x88] sm:$0xff] %vm2636_vm10, %v2635_v22  ;;  %v3268_v58 = vpack.c.bf16 %v3233_v0, %v3232_v40  ;;  %v3305_v33 = vld [vmem:[#allocation2 + $0x176] sm:$0xff]  ;;  %v3306_v14 = vld [vmem:[#allocation2 + $0x17e] sm:$0xff]  ;;  %v3269_v60 = vpack.c.bf16 %v3235_v30, %v3234_v24  ;;  %v2808_v44 = vld [vmem:[#allocation2 + $0x189] sm:$0xff] }
 0x314   :  { %2926 = vst.msk [vmem:[#allocation3 + $0x90] sm:$0xff] %vm2198_vm4, %v2908_v51  ;;  %2927 = vst.msk [vmem:[#allocation3 + $0x98] sm:$0xff] %vm2198_vm4, %v2909_v32  ;;  %v2811_v50 = vld [vmem:[#allocation2 + $0x1a1] sm:$0xff]  ;;  %v3341_v47 = vpack.c.bf16 %v3307_v9, %v3306_v14  ;;  %v2809_v2 = vld [vmem:[#allocation2 + $0x191] sm:$0xff] }
 0x315   :  { %2727 = vst.msk [vmem:[#allocation3 + $0x88] sm:$0xff] %vm2709_vm11, %v2343_v36  ;;  %v3340_v36 = vpack.c.bf16 %v3305_v33, %v3304_v52  ;;  %v2883_v31 = vld [vmem:[#allocation2 + $0x1a2] sm:$0xff]  ;;  %v2810_v10 = vld [vmem:[#allocation2 + $0x199] sm:$0xff]  ;;  %v2880_v16 = vld [vmem:[#allocation2 + $0x18a] sm:$0xff]  ;;  %v2840_v63 = vpack.c.bf16 %v2809_v2, %v2808_v44 }
 0x316   :  { %2998 = vst.msk [vmem:[#allocation3 + $0x90] sm:$0xff] %vm2271_vm5, %v2909_v32  ;;  %2999 = vst.msk [vmem:[#allocation3 + $0x98] sm:$0xff] %vm2271_vm5, %v2910_v5  ;;  %v3025_v21 = vld [vmem:[#allocation2 + $0x1a3] sm:$0xff]  ;;  %v2841_v57 = vpack.c.bf16 %v2811_v50, %v2810_v10  ;;  %v2881_v15 = vld [vmem:[#allocation2 + $0x192] sm:$0xff] }
 0x317   :  { %3070 = vst.msk [vmem:[#allocation3 + $0x90] sm:$0xff] %vm2344_vm6, %v8362_v43  ;;  %3071 = vst.msk [vmem:[#allocation3 + $0x98] sm:$0xff] %vm2344_vm6, %v3053_v6  ;;  %v3097_v13 = vld [vmem:[#allocation2 + $0x1a4] sm:$0xff]  ;;  %v2882_v62 = vld [vmem:[#allocation2 + $0x19a] sm:$0xff]  ;;  %v2912_v22 = vpack.c.bf16 %v2881_v15, %v2880_v16 }
 0x318   :  { %3142 = vst.msk [vmem:[#allocation3 + $0x90] sm:$0xff] %vm2417_vm7, %v3124_v45  ;;  %3143 = vst.msk [vmem:[#allocation3 + $0x98] sm:$0xff] %vm2417_vm7, %v3125_v18  ;;  %v3239_v26 = vld [vmem:[#allocation2 + $0x1a5] sm:$0xff]  ;;  %v2913_v55 = vpack.c.bf16 %v2883_v31, %v2882_v62  ;;  %v3023_v29 = vld [vmem:[#allocation2 + $0x193] sm:$0xff] }
 0x319   :  { %2856 = vst.msk [vmem:[#allocation3 + $0xa0] sm:$0xff] %vm2125_vm3, %v2838_v1  ;;  %2857 = vst.msk [vmem:[#allocation3 + $0xa8] sm:$0xff] %vm2125_vm3, %v2839_v23  ;;  %v3022_v38 = vld [vmem:[#allocation2 + $0x18b] sm:$0xff]  ;;  %v3024_v54 = vld [vmem:[#allocation2 + $0x19b] sm:$0xff] }
 0x31a   :  { %2928 = vst.msk [vmem:[#allocation3 + $0xa0] sm:$0xff] %vm2198_vm4, %v2910_v5  ;;  %2929 = vst.msk [vmem:[#allocation3 + $0xa8] sm:$0xff] %vm2198_vm4, %v2911_v20  ;;  %v3311_v17 = vld [vmem:[#allocation2 + $0x1a6] sm:$0xff]  ;;  %v3055_v49 = vpack.c.bf16 %v3023_v29, %v3022_v38  ;;  %v3095_v46 = vld [vmem:[#allocation2 + $0x194] sm:$0xff]  ;;  %v8396_v7 = vpack.c.bf16 %v3025_v21, %v3024_v54 }
 0x31b   :  { %3000 = vst.msk [vmem:[#allocation3 + $0xa0] sm:$0xff] %vm2271_vm5, %v2911_v20  ;;  %v3094_v25 = vld [vmem:[#allocation2 + $0x18c] sm:$0xff]  ;;  %v3096_v51 = vld [vmem:[#allocation2 + $0x19c] sm:$0xff]  ;;  %3001 = vst.msk [vmem:[#allocation3 + $0xa8] sm:$0xff] %vm2271_vm5, %v2912_v22 }
 0x31c   :  { %3072 = vst.msk [vmem:[#allocation3 + $0xa0] sm:$0xff] %vm2344_vm6, %v8374_v56  ;;  %v3236_v32 = vld [vmem:[#allocation2 + $0x18d] sm:$0xff]  ;;  %v3127_v8 = vpack.c.bf16 %v3095_v46, %v3094_v25  ;;  %v3237_v11 = vld [vmem:[#allocation2 + $0x195] sm:$0xff]  ;;  %3073 = vst.msk [vmem:[#allocation3 + $0xa8] sm:$0xff] %vm2344_vm6, %v3055_v49  ;;  %v3128_v19 = vpack.c.bf16 %v3097_v13, %v3096_v51 }
 0x31d   :  { %3214 = vst.msk [vmem:[#allocation3 + $0x90] sm:$0xff] %vm2490_vm8, %v3125_v18  ;;  %3215 = vst.msk [vmem:[#allocation3 + $0x98] sm:$0xff] %vm2490_vm8, %v3126_v39  ;;  %v3308_v27 = vld [vmem:[#allocation2 + $0x18e] sm:$0xff]  ;;  %v3270_v61 = vpack.c.bf16 %v3237_v11, %v3236_v32  ;;  %v3309_v45 = vld [vmem:[#allocation2 + $0x196] sm:$0xff] }
 0x31e   :  { %3144 = vst.msk [vmem:[#allocation3 + $0xa0] sm:$0xff] %vm2417_vm7, %v3126_v39  ;;  %v3310_v37 = vld [vmem:[#allocation2 + $0x19e] sm:$0xff]  ;;  %3145 = vst.msk [vmem:[#allocation3 + $0xa8] sm:$0xff] %vm2417_vm7, %v3127_v8  ;;  %v3342_v28 = vpack.c.bf16 %v3309_v45, %v3308_v27  ;;  %v2812_v41 = vld [vmem:[#allocation2 + $0x1a9] sm:$0xff] }
 0x31f   :  { %3286 = vst.msk [vmem:[#allocation3 + $0x90] sm:$0xff] %vm2563_vm9, %v3268_v58  ;;  %3287 = vst.msk [vmem:[#allocation3 + $0x98] sm:$0xff] %vm2563_vm9, %v3269_v60  ;;  %v2815_v48 = vld [vmem:[#allocation2 + $0x1c1] sm:$0xff]  ;;  %v3343_v30 = vpack.c.bf16 %v3311_v17, %v3310_v37  ;;  %v2813_v34 = vld [vmem:[#allocation2 + $0x1b1] sm:$0xff] }
 0x320   :  { %3358 = vst.msk [vmem:[#allocation3 + $0x90] sm:$0xff] %vm2636_vm10, %v3340_v36  ;;  %3359 = vst.msk [vmem:[#allocation3 + $0x98] sm:$0xff] %vm2636_vm10, %v3341_v47  ;;  %v2887_v1 = vld [vmem:[#allocation2 + $0x1c2] sm:$0xff]  ;;  %v2814_v9 = vld [vmem:[#allocation2 + $0x1b9] sm:$0xff]  ;;  %v2842_v4 = vpack.c.bf16 %v2813_v34, %v2812_v41 }
 0x321   :  { %3430 = vst.msk [vmem:[#allocation3 + $0x90] sm:$0xff] %vm2709_vm11, %v8362_v43  ;;  %3431 = vst.msk [vmem:[#allocation3 + $0x98] sm:$0xff] %vm2709_vm11, %v3053_v6  ;;  %v3238_v43 = vld [vmem:[#allocation2 + $0x19d] sm:$0xff]  ;;  %v2884_v5 = vld [vmem:[#allocation2 + $0x1aa] sm:$0xff]  ;;  %v2843_v42 = vpack.c.bf16 %v2815_v48, %v2814_v9 }
 0x322   :  { %2858 = vst.msk [vmem:[#allocation3 + $0xb0] sm:$0xff] %vm2125_vm3, %v2840_v63  ;;  %2859 = vst.msk [vmem:[#allocation3 + $0xb8] sm:$0xff] %vm2125_vm3, %v2841_v57  ;;  %v3271_v12 = vpack.c.bf16 %v3239_v26, %v3238_v43  ;;  %v3029_v23 = vld [vmem:[#allocation2 + $0x1c3] sm:$0xff]  ;;  %v2885_v35 = vld [vmem:[#allocation2 + $0x1b2] sm:$0xff] }
 0x323   :  { %2930 = vst.msk [vmem:[#allocation3 + $0xb0] sm:$0xff] %vm2198_vm4, %v2912_v22  ;;  %2931 = vst.msk [vmem:[#allocation3 + $0xb8] sm:$0xff] %vm2198_vm4, %v2913_v55  ;;  %v3101_v59 = vld [vmem:[#allocation2 + $0x1c4] sm:$0xff]  ;;  %v2886_v6 = vld [vmem:[#allocation2 + $0x1ba] sm:$0xff]  ;;  %v2914_v40 = vpack.c.bf16 %v2885_v35, %v2884_v5 }
 0x324   :  { %3002 = vst.msk [vmem:[#allocation3 + $0xb0] sm:$0xff] %vm2271_vm5, %v2913_v55  ;;  %v3243_v20 = vld [vmem:[#allocation2 + $0x1c5] sm:$0xff]  ;;  %v2915_v18 = vpack.c.bf16 %v2887_v1, %v2886_v6  ;;  %v3027_v0 = vld [vmem:[#allocation2 + $0x1b3] sm:$0xff]  ;;  %v3028_v24 = vld [vmem:[#allocation2 + $0x1bb] sm:$0xff] }
 0x325   :  { %3074 = vst.msk [vmem:[#allocation3 + $0xb0] sm:$0xff] %vm2344_vm6, %v8396_v7  ;;  %v3026_v53 = vld [vmem:[#allocation2 + $0x1ab] sm:$0xff]  ;;  %v3099_v58 = vld [vmem:[#allocation2 + $0x1b4] sm:$0xff]  ;;  %v3100_v33 = vld [vmem:[#allocation2 + $0x1bc] sm:$0xff] }
 0x326   :  { %3216 = vst.msk [vmem:[#allocation3 + $0xa0] sm:$0xff] %vm2490_vm8, %v3127_v8  ;;  %3217 = vst.msk [vmem:[#allocation3 + $0xa8] sm:$0xff] %vm2490_vm8, %v3128_v19  ;;  %v3315_v3 = vld [vmem:[#allocation2 + $0x1c6] sm:$0xff]  ;;  %v3057_v39 = vpack.c.bf16 %v3027_v0, %v3026_v53  ;;  %v3241_v36 = vld [vmem:[#allocation2 + $0x1b5] sm:$0xff]  ;;  %v3130_v31 = vpack.c.bf16 %v3101_v59, %v3100_v33 }
 0x327   :  { %3146 = vst.msk [vmem:[#allocation3 + $0xb0] sm:$0xff] %vm2417_vm7, %v3128_v19  ;;  %v3098_v52 = vld [vmem:[#allocation2 + $0x1ac] sm:$0xff]  ;;  %v3242_v50 = vld [vmem:[#allocation2 + $0x1bd] sm:$0xff] }
 0x328   :  { %3288 = vst.msk [vmem:[#allocation3 + $0xa0] sm:$0xff] %vm2563_vm9, %v3270_v61  ;;  %3289 = vst.msk [vmem:[#allocation3 + $0xa8] sm:$0xff] %vm2563_vm9, %v3271_v12  ;;  %v3240_v14 = vld [vmem:[#allocation2 + $0x1ad] sm:$0xff]  ;;  %v3129_v60 = vpack.c.bf16 %v3099_v58, %v3098_v52  ;;  %v3313_v44 = vld [vmem:[#allocation2 + $0x1b6] sm:$0xff]  ;;  %v3273_v2 = vpack.c.bf16 %v3243_v20, %v3242_v50 }
 0x329   :  { %3360 = vst.msk [vmem:[#allocation3 + $0xa0] sm:$0xff] %vm2636_vm10, %v3342_v28  ;;  %3361 = vst.msk [vmem:[#allocation3 + $0xa8] sm:$0xff] %vm2636_vm10, %v3343_v30  ;;  %v3312_v47 = vld [vmem:[#allocation2 + $0x1ae] sm:$0xff]  ;;  %v3272_v21 = vpack.c.bf16 %v3241_v36, %v3240_v14  ;;  %v3314_v13 = vld [vmem:[#allocation2 + $0x1be] sm:$0xff] }
 0x32a   :  { %3432 = vst.msk [vmem:[#allocation3 + $0xa0] sm:$0xff] %vm2709_vm11, %v8374_v56  ;;  %3433 = vst.msk [vmem:[#allocation3 + $0xa8] sm:$0xff] %vm2709_vm11, %v3055_v49  ;;  %v8418_v56 = vpack.c.bf16 %v3029_v23, %v3028_v24  ;;  %v3344_v10 = vpack.c.bf16 %v3313_v44, %v3312_v47  ;;  %v2819_v16 = vld [vmem:[#allocation2 + $0x1e1] sm:$0xff]  ;;  %v3345_v26 = vpack.c.bf16 %v3315_v3, %v3314_v13  ;;  %v2816_v15 = vld [vmem:[#allocation2 + $0x1c9] sm:$0xff] }
 0x32b   :  { %2860 = vst.msk [vmem:[#allocation3 + $0xc0] sm:$0xff] %vm2125_vm3, %v2842_v4  ;;  %2861 = vst.msk [vmem:[#allocation3 + $0xc8] sm:$0xff] %vm2125_vm3, %v2843_v42  ;;  %v2891_v63 = vld [vmem:[#allocation2 + $0x1e2] sm:$0xff]  ;;  %v2817_v38 = vld [vmem:[#allocation2 + $0x1d1] sm:$0xff] }
 0x32c   :  { %2932 = vst.msk [vmem:[#allocation3 + $0xc0] sm:$0xff] %vm2198_vm4, %v2914_v40  ;;  %2933 = vst.msk [vmem:[#allocation3 + $0xc8] sm:$0xff] %vm2198_vm4, %v2915_v18  ;;  %v3033_v57 = vld [vmem:[#allocation2 + $0x1e3] sm:$0xff]  ;;  %v2818_v17 = vld [vmem:[#allocation2 + $0x1d9] sm:$0xff]  ;;  %v2844_v29 = vpack.c.bf16 %v2817_v38, %v2816_v15 }
 0x32d   :  { %3003 = vst.msk [vmem:[#allocation3 + $0xb8] sm:$0xff] %vm2271_vm5, %v2914_v40  ;;  %3004 = vst.msk [vmem:[#allocation3 + $0xc0] sm:$0xff] %vm2271_vm5, %v2915_v18  ;;  %v3105_v62 = vld [vmem:[#allocation2 + $0x1e4] sm:$0xff]  ;;  %v2845_v54 = vpack.c.bf16 %v2819_v16, %v2818_v17  ;;  %v2889_v25 = vld [vmem:[#allocation2 + $0x1d2] sm:$0xff] }
 0x32e   :  { %3075 = vst.msk [vmem:[#allocation3 + $0xb8] sm:$0xff] %vm2344_vm6, %v3057_v39  ;;  %3076 = vst.msk [vmem:[#allocation3 + $0xc0] sm:$0xff] %vm2344_vm6, %v8418_v56  ;;  %v2888_v22 = vld [vmem:[#allocation2 + $0x1ca] sm:$0xff]  ;;  %v2890_v49 = vld [vmem:[#allocation2 + $0x1da] sm:$0xff] }
 0x32f   :  { %3147 = vst.msk [vmem:[#allocation3 + $0xb8] sm:$0xff] %vm2417_vm7, %v3129_v60  ;;  %3148 = vst.msk [vmem:[#allocation3 + $0xc0] sm:$0xff] %vm2417_vm7, %v3130_v31  ;;  %v3247_v55 = vld [vmem:[#allocation2 + $0x1e5] sm:$0xff]  ;;  %v2916_v32 = vpack.c.bf16 %v2889_v25, %v2888_v22  ;;  %v2917_v8 = vpack.c.bf16 %v2891_v63, %v2890_v49  ;;  %v3031_v11 = vld [vmem:[#allocation2 + $0x1d3] sm:$0xff] }
 0x330   :  { %3218 = vst.msk [vmem:[#allocation3 + $0xb0] sm:$0xff] %vm2490_vm8, %v3129_v60  ;;  %3219 = vst.msk [vmem:[#allocation3 + $0xb8] sm:$0xff] %vm2490_vm8, %v3130_v31  ;;  %v3030_v46 = vld [vmem:[#allocation2 + $0x1cb] sm:$0xff]  ;;  %v3032_v43 = vld [vmem:[#allocation2 + $0x1db] sm:$0xff] }
 0x331   :  { %3290 = vst.msk [vmem:[#allocation3 + $0xb0] sm:$0xff] %vm2563_vm9, %v3272_v21  ;;  %3291 = vst.msk [vmem:[#allocation3 + $0xb8] sm:$0xff] %vm2563_vm9, %v3273_v2  ;;  %v3319_v51 = vld [vmem:[#allocation2 + $0x1e6] sm:$0xff]  ;;  %v3059_v19 = vpack.c.bf16 %v3031_v11, %v3030_v46  ;;  %v3103_v61 = vld [vmem:[#allocation2 + $0x1d4] sm:$0xff] }
 0x332   :  { %3362 = vst.msk [vmem:[#allocation3 + $0xb0] sm:$0xff] %vm2636_vm10, %v3344_v10  ;;  %3363 = vst.msk [vmem:[#allocation3 + $0xb8] sm:$0xff] %vm2636_vm10, %v3345_v26  ;;  %v3102_v27 = vld [vmem:[#allocation2 + $0x1cc] sm:$0xff]  ;;  %v3104_v45 = vld [vmem:[#allocation2 + $0x1dc] sm:$0xff] }
 0x333   :  { %3434 = vst.msk [vmem:[#allocation3 + $0xb0] sm:$0xff] %vm2709_vm11, %v8396_v7  ;;  %3435 = vst.msk [vmem:[#allocation3 + $0xb8] sm:$0xff] %vm2709_vm11, %v3057_v39  ;;  %v3244_v37 = vld [vmem:[#allocation2 + $0x1cd] sm:$0xff]  ;;  %v8440_v7 = vpack.c.bf16 %v3033_v57, %v3032_v43  ;;  %v3131_v12 = vpack.c.bf16 %v3103_v61, %v3102_v27  ;;  %v3245_v28 = vld [vmem:[#allocation2 + $0x1d5] sm:$0xff]  ;;  %v3132_v1 = vpack.c.bf16 %v3105_v62, %v3104_v45 }
 0x334   :  { %2862 = vst.msk [vmem:[#allocation3 + $0xd0] sm:$0xff] %vm2125_vm3, %v2844_v29  ;;  %2863 = vst.msk [vmem:[#allocation3 + $0xd8] sm:$0xff] %vm2125_vm3, %v2845_v54  ;;  %v3246_v48 = vld [vmem:[#allocation2 + $0x1dd] sm:$0xff]  ;;  %v3316_v30 = vld [vmem:[#allocation2 + $0x1ce] sm:$0xff]  ;;  %v3274_v23 = vpack.c.bf16 %v3245_v28, %v3244_v37 }
 0x335   :  { %2934 = vst.msk [vmem:[#allocation3 + $0xd0] sm:$0xff] %vm2198_vm4, %v2916_v32  ;;  %2935 = vst.msk [vmem:[#allocation3 + $0xd8] sm:$0xff] %vm2198_vm4, %v2917_v8  ;;  %v3317_v41 = vld [vmem:[#allocation2 + $0x1d6] sm:$0xff]  ;;  %v3318_v59 = vld [vmem:[#allocation2 + $0x1de] sm:$0xff]  ;;  %v3275_v34 = vpack.c.bf16 %v3247_v55, %v3246_v48 }
 0x336   :  { %3005 = vst.msk [vmem:[#allocation3 + $0xc8] sm:$0xff] %vm2271_vm5, %v2916_v32  ;;  %3006 = vst.msk [vmem:[#allocation3 + $0xd0] sm:$0xff] %vm2271_vm5, %v2917_v8  ;;  %v3346_v9 = vpack.c.bf16 %v3317_v41, %v3316_v30  ;;  %v2823_v5 = vld [vmem:[#allocation2 + $0x201] sm:$0xff]  ;;  %v3347_v20 = vpack.c.bf16 %v3319_v51, %v3318_v59  ;;  %v2820_v35 = vld [vmem:[#allocation2 + $0x1e9] sm:$0xff] }
 0x337   :  { %3077 = vst.msk [vmem:[#allocation3 + $0xc8] sm:$0xff] %vm2344_vm6, %v3059_v19  ;;  %3078 = vst.msk [vmem:[#allocation3 + $0xd0] sm:$0xff] %vm2344_vm6, %v8440_v7  ;;  %v2895_v4 = vld [vmem:[#allocation2 + $0x202] sm:$0xff]  ;;  %v2821_v53 = vld [vmem:[#allocation2 + $0x1f1] sm:$0xff] }
 0x338   :  { %3149 = vst.msk [vmem:[#allocation3 + $0xc8] sm:$0xff] %vm2417_vm7, %v3131_v12  ;;  %3150 = vst.msk [vmem:[#allocation3 + $0xd0] sm:$0xff] %vm2417_vm7, %v3132_v1  ;;  %v3037_v42 = vld [vmem:[#allocation2 + $0x203] sm:$0xff]  ;;  %v2822_v3 = vld [vmem:[#allocation2 + $0x1f9] sm:$0xff]  ;;  %v2846_v0 = vpack.c.bf16 %v2821_v53, %v2820_v35 }
 0x339   :  { %3220 = vst.msk [vmem:[#allocation3 + $0xc0] sm:$0xff] %vm2490_vm8, %v3131_v12  ;;  %3221 = vst.msk [vmem:[#allocation3 + $0xc8] sm:$0xff] %vm2490_vm8, %v3132_v1  ;;  %v3109_v6 = vld [vmem:[#allocation2 + $0x204] sm:$0xff]  ;;  %v2847_v24 = vpack.c.bf16 %v2823_v5, %v2822_v3  ;;  %v2893_v52 = vld [vmem:[#allocation2 + $0x1f2] sm:$0xff] }
 0x33a   :  { %3292 = vst.msk [vmem:[#allocation3 + $0xc0] sm:$0xff] %vm2563_vm9, %v3274_v23  ;;  %v2892_v40 = vld [vmem:[#allocation2 + $0x1ea] sm:$0xff]  ;;  %3293 = vst.msk [vmem:[#allocation3 + $0xc8] sm:$0xff] %vm2563_vm9, %v3275_v34  ;;  %v2894_v39 = vld [vmem:[#allocation2 + $0x1fa] sm:$0xff] }
 0x33b   :  { %3364 = vst.msk [vmem:[#allocation3 + $0xc0] sm:$0xff] %vm2636_vm10, %v3346_v9  ;;  %v3251_v18 = vld [vmem:[#allocation2 + $0x205] sm:$0xff]  ;;  %3365 = vst.msk [vmem:[#allocation3 + $0xc8] sm:$0xff] %vm2636_vm10, %v3347_v20  ;;  %v2918_v14 = vpack.c.bf16 %v2893_v52, %v2892_v40  ;;  %v2919_v60 = vpack.c.bf16 %v2895_v4, %v2894_v39  ;;  %v3035_v36 = vld [vmem:[#allocation2 + $0x1f3] sm:$0xff] }
 0x33c   :  { %v3034_v58 = vld [vmem:[#allocation2 + $0x1eb] sm:$0xff]  ;;  %3436 = vst.msk [vmem:[#allocation3 + $0xc0] sm:$0xff] %vm2709_vm11, %v8418_v56  ;;  %v3036_v50 = vld [vmem:[#allocation2 + $0x1fb] sm:$0xff]  ;;  %3437 = vst.msk [vmem:[#allocation3 + $0xc8] sm:$0xff] %vm2709_vm11, %v3059_v19 }
 0x33d   :  { %v3323_v33 = vld [vmem:[#allocation2 + $0x206] sm:$0xff]  ;;  %2864 = vst.msk [vmem:[#allocation3 + $0xe0] sm:$0xff] %vm2125_vm3, %v2846_v0  ;;  %2865 = vst.msk [vmem:[#allocation3 + $0xe8] sm:$0xff] %vm2125_vm3, %v2847_v24  ;;  %v3061_v31 = vpack.c.bf16 %v3035_v36, %v3034_v58  ;;  %v3107_v21 = vld [vmem:[#allocation2 + $0x1f4] sm:$0xff]  ;;  %v8462_v56 = vpack.c.bf16 %v3037_v42, %v3036_v50 }
 0x33e   :  { %v3106_v47 = vld [vmem:[#allocation2 + $0x1ec] sm:$0xff]  ;;  %v3108_v44 = vld [vmem:[#allocation2 + $0x1fc] sm:$0xff]  ;;  %2936 = vst.msk [vmem:[#allocation3 + $0xe0] sm:$0xff] %vm2198_vm4, %v2918_v14  ;;  %2937 = vst.msk [vmem:[#allocation3 + $0xe8] sm:$0xff] %vm2198_vm4, %v2919_v60 }
 0x33f   :  { %v3248_v13 = vld [vmem:[#allocation2 + $0x1ed] sm:$0xff]  ;;  %3007 = vst.msk [vmem:[#allocation3 + $0xd8] sm:$0xff] %vm2271_vm5, %v2918_v14  ;;  %v3133_v2 = vpack.c.bf16 %v3107_v21, %v3106_v47  ;;  %v3249_v10 = vld [vmem:[#allocation2 + $0x1f5] sm:$0xff]  ;;  %v3250_v16 = vld [vmem:[#allocation2 + $0x1fd] sm:$0xff]  ;;  %v3134_v63 = vpack.c.bf16 %v3109_v6, %v3108_v44 }
 0x340   :  { %v3320_v26 = vld [vmem:[#allocation2 + $0x1ee] sm:$0xff]  ;;  %3008 = vst.msk [vmem:[#allocation3 + $0xe0] sm:$0xff] %vm2271_vm5, %v2919_v60  ;;  %v3276_v57 = vpack.c.bf16 %v3249_v10, %v3248_v13  ;;  %v3321_v15 = vld [vmem:[#allocation2 + $0x1f6] sm:$0xff]  ;;  %v3322_v62 = vld [vmem:[#allocation2 + $0x1fe] sm:$0xff]  ;;  %v3277_v38 = vpack.c.bf16 %v3251_v18, %v3250_v16 }
 0x341   :  { %3079 = vst.msk [vmem:[#allocation3 + $0xd8] sm:$0xff] %vm2344_vm6, %v3061_v31  ;;  %3080 = vst.msk [vmem:[#allocation3 + $0xe0] sm:$0xff] %vm2344_vm6, %v8462_v56  ;;  %v3348_v17 = vpack.c.bf16 %v3321_v15, %v3320_v26  ;;  %v2827_v22 = vld [vmem:[#allocation2 + $0x221] sm:$0xff]  ;;  %v3349_v55 = vpack.c.bf16 %v3323_v33, %v3322_v62  ;;  %v2824_v25 = vld [vmem:[#allocation2 + $0x209] sm:$0xff] }
 0x342   :  { %3151 = vst.msk [vmem:[#allocation3 + $0xd8] sm:$0xff] %vm2417_vm7, %v3133_v2  ;;  %3152 = vst.msk [vmem:[#allocation3 + $0xe0] sm:$0xff] %vm2417_vm7, %v3134_v63  ;;  %v2899_v29 = vld [vmem:[#allocation2 + $0x222] sm:$0xff]  ;;  %v2825_v46 = vld [vmem:[#allocation2 + $0x211] sm:$0xff] }
 0x343   :  { %3222 = vst.msk [vmem:[#allocation3 + $0xd0] sm:$0xff] %vm2490_vm8, %v3133_v2  ;;  %3223 = vst.msk [vmem:[#allocation3 + $0xd8] sm:$0xff] %vm2490_vm8, %v3134_v63  ;;  %v3041_v54 = vld [vmem:[#allocation2 + $0x223] sm:$0xff]  ;;  %v2826_v51 = vld [vmem:[#allocation2 + $0x219] sm:$0xff]  ;;  %v2848_v11 = vpack.c.bf16 %v2825_v46, %v2824_v25 }
 0x344   :  { %3294 = vst.msk [vmem:[#allocation3 + $0xd0] sm:$0xff] %vm2563_vm9, %v3276_v57  ;;  %v3113_v49 = vld [vmem:[#allocation2 + $0x224] sm:$0xff]  ;;  %3295 = vst.msk [vmem:[#allocation3 + $0xd8] sm:$0xff] %vm2563_vm9, %v3277_v38  ;;  %v2849_v43 = vpack.c.bf16 %v2827_v22, %v2826_v51  ;;  %v2897_v27 = vld [vmem:[#allocation2 + $0x212] sm:$0xff] }
 0x345   :  { %v2896_v32 = vld [vmem:[#allocation2 + $0x20a] sm:$0xff]  ;;  %3366 = vst.msk [vmem:[#allocation3 + $0xd0] sm:$0xff] %vm2636_vm10, %v3348_v17  ;;  %v2898_v19 = vld [vmem:[#allocation2 + $0x21a] sm:$0xff]  ;;  %3367 = vst.msk [vmem:[#allocation3 + $0xd8] sm:$0xff] %vm2636_vm10, %v3349_v55 }
 0x346   :  { %v3255_v8 = vld [vmem:[#allocation2 + $0x225] sm:$0xff]  ;;  %3438 = vst.msk [vmem:[#allocation3 + $0xd0] sm:$0xff] %vm2709_vm11, %v8440_v7  ;;  %v2920_v37 = vpack.c.bf16 %v2897_v27, %v2896_v32  ;;  %v2921_v12 = vpack.c.bf16 %v2899_v29, %v2898_v19  ;;  %v3039_v28 = vld [vmem:[#allocation2 + $0x213] sm:$0xff]  ;;  %v3040_v48 = vld [vmem:[#allocation2 + $0x21b] sm:$0xff] }
 0x347   :  { %v3038_v61 = vld [vmem:[#allocation2 + $0x20b] sm:$0xff]  ;;  %3439 = vst.msk [vmem:[#allocation3 + $0xd8] sm:$0xff] %vm2709_vm11, %v3061_v31  ;;  %v3111_v23 = vld [vmem:[#allocation2 + $0x214] sm:$0xff]  ;;  %v3112_v41 = vld [vmem:[#allocation2 + $0x21c] sm:$0xff]  ;;  %v8484_v7 = vpack.c.bf16 %v3041_v54, %v3040_v48 }
 0x348   :  { %v3327_v45 = vld [vmem:[#allocation2 + $0x226] sm:$0xff]  ;;  %2866 = vst.msk [vmem:[#allocation3 + $0xf0] sm:$0xff] %vm2125_vm3, %v2848_v11  ;;  %2867 = vst.msk [vmem:[#allocation3 + $0xf8] sm:$0xff] %vm2125_vm3, %v2849_v43  ;;  %v3063_v1 = vpack.c.bf16 %v3039_v28, %v3038_v61  ;;  %v3253_v9 = vld [vmem:[#allocation2 + $0x215] sm:$0xff]  ;;  %v3136_v4 = vpack.c.bf16 %v3113_v49, %v3112_v41 }
 0x349   :  { %v3110_v30 = vld [vmem:[#allocation2 + $0x20c] sm:$0xff]  ;;  %2938 = vst.msk [vmem:[#allocation3 + $0xf0] sm:$0xff] %vm2198_vm4, %v2920_v37  ;;  %2939 = vst.msk [vmem:[#allocation3 + $0xf8] sm:$0xff] %vm2198_vm4, %v2921_v12  ;;  %v3254_v5 = vld [vmem:[#allocation2 + $0x21d] sm:$0xff] }
 0x34a   :  { %v3252_v59 = vld [vmem:[#allocation2 + $0x20d] sm:$0xff]  ;;  %3009 = vst.msk [vmem:[#allocation3 + $0xe8] sm:$0xff] %vm2271_vm5, %v2920_v37  ;;  %v3135_v34 = vpack.c.bf16 %v3111_v23, %v3110_v30  ;;  %3010 = vst.msk [vmem:[#allocation3 + $0xf0] sm:$0xff] %vm2271_vm5, %v2921_v12  ;;  %v3325_v35 = vld [vmem:[#allocation2 + $0x216] sm:$0xff]  ;;  %v3279_v53 = vpack.c.bf16 %v3255_v8, %v3254_v5 }
 0x34b   :  { %v3324_v20 = vld [vmem:[#allocation2 + $0x20e] sm:$0xff]  ;;  %3081 = vst.msk [vmem:[#allocation3 + $0xe8] sm:$0xff] %vm2344_vm6, %v3063_v1  ;;  %v3278_v42 = vpack.c.bf16 %v3253_v9, %v3252_v59  ;;  %v3326_v6 = vld [vmem:[#allocation2 + $0x21e] sm:$0xff]  ;;  %3082 = vst.msk [vmem:[#allocation3 + $0xf0] sm:$0xff] %vm2344_vm6, %v8484_v7 }
 0x34c   :  { %3153 = vst.msk [vmem:[#allocation3 + $0xe8] sm:$0xff] %vm2417_vm7, %v3135_v34  ;;  %v3350_v3 = vpack.c.bf16 %v3325_v35, %v3324_v20  ;;  %v2831_v40 = vld [vmem:[#allocation2 + $0x241] sm:$0xff]  ;;  %3154 = vst.msk [vmem:[#allocation3 + $0xf0] sm:$0xff] %vm2417_vm7, %v3136_v4  ;;  %v3351_v18 = vpack.c.bf16 %v3327_v45, %v3326_v6  ;;  %v2828_v52 = vld [vmem:[#allocation2 + $0x229] sm:$0xff] }
 0x34d   :  { %3224 = vst.msk [vmem:[#allocation3 + $0xe0] sm:$0xff] %vm2490_vm8, %v3135_v34  ;;  %3225 = vst.msk [vmem:[#allocation3 + $0xe8] sm:$0xff] %vm2490_vm8, %v3136_v4  ;;  %v2903_v0 = vld [vmem:[#allocation2 + $0x242] sm:$0xff]  ;;  %v2829_v58 = vld [vmem:[#allocation2 + $0x231] sm:$0xff] }
 0x34e   :  { %v3045_v24 = vld [vmem:[#allocation2 + $0x243] sm:$0xff]  ;;  %3296 = vst.msk [vmem:[#allocation3 + $0xe0] sm:$0xff] %vm2563_vm9, %v3278_v42  ;;  %v2830_v33 = vld [vmem:[#allocation2 + $0x239] sm:$0xff]  ;;  %3297 = vst.msk [vmem:[#allocation3 + $0xe8] sm:$0xff] %vm2563_vm9, %v3279_v53  ;;  %v2850_v36 = vpack.c.bf16 %v2829_v58, %v2828_v52 }
 0x34f   :  { %v3117_v39 = vld [vmem:[#allocation2 + $0x244] sm:$0xff]  ;;  %3368 = vst.msk [vmem:[#allocation3 + $0xe0] sm:$0xff] %vm2636_vm10, %v3350_v3  ;;  %v2851_v50 = vpack.c.bf16 %v2831_v40, %v2830_v33  ;;  %v2901_v47 = vld [vmem:[#allocation2 + $0x232] sm:$0xff]  ;;  %v2902_v31 = vld [vmem:[#allocation2 + $0x23a] sm:$0xff] }
 0x350   :  { %v2900_v14 = vld [vmem:[#allocation2 + $0x22a] sm:$0xff]  ;;  %3369 = vst.msk [vmem:[#allocation3 + $0xe8] sm:$0xff] %vm2636_vm10, %v3351_v18  ;;  %v2923_v2 = vpack.c.bf16 %v2903_v0, %v2902_v31  ;;  %v3043_v10 = vld [vmem:[#allocation2 + $0x233] sm:$0xff]  ;;  %v3044_v16 = vld [vmem:[#allocation2 + $0x23b] sm:$0xff] }
 0x351   :  { %v3259_v60 = vld [vmem:[#allocation2 + $0x245] sm:$0xff]  ;;  %3440 = vst.msk [vmem:[#allocation3 + $0xe0] sm:$0xff] %vm2709_vm11, %v8462_v56  ;;  %v2922_v13 = vpack.c.bf16 %v2901_v47, %v2900_v14  ;;  %3441 = vst.msk [vmem:[#allocation3 + $0xe8] sm:$0xff] %vm2709_vm11, %v3063_v1  ;;  %v3115_v57 = vld [vmem:[#allocation2 + $0x234] sm:$0xff]  ;;  %v8506_v56 = vpack.c.bf16 %v3045_v24, %v3044_v16 }
 0x352   :  { %v3042_v21 = vld [vmem:[#allocation2 + $0x22b] sm:$0xff]  ;;  %2868 = vst.msk [vmem:[#allocation3 + $0x100] sm:$0xff] %vm2125_vm3, %v2850_v36  ;;  %2869 = vst.msk [vmem:[#allocation3 + $0x108] sm:$0xff] %vm2125_vm3, %v2851_v50  ;;  %v3116_v15 = vld [vmem:[#allocation2 + $0x23c] sm:$0xff] }
 0x353   :  { %v3331_v44 = vld [vmem:[#allocation2 + $0x246] sm:$0xff]  ;;  %v3065_v63 = vpack.c.bf16 %v3043_v10, %v3042_v21  ;;  %2940 = vst.msk [vmem:[#allocation3 + $0x100] sm:$0xff] %vm2198_vm4, %v2922_v13  ;;  %2941 = vst.msk [vmem:[#allocation3 + $0x108] sm:$0xff] %vm2198_vm4, %v2923_v2  ;;  %v3257_v17 = vld [vmem:[#allocation2 + $0x235] sm:$0xff]  ;;  %v3138_v29 = vpack.c.bf16 %v3117_v39, %v3116_v15 }
 0x354   :  { %v3114_v26 = vld [vmem:[#allocation2 + $0x22c] sm:$0xff]  ;;  %3011 = vst.msk [vmem:[#allocation3 + $0xf8] sm:$0xff] %vm2271_vm5, %v2922_v13  ;;  %v3258_v22 = vld [vmem:[#allocation2 + $0x23d] sm:$0xff]  ;;  %3012 = vst.msk [vmem:[#allocation3 + $0x100] sm:$0xff] %vm2271_vm5, %v2923_v2 }
 0x355   :  { %v3256_v62 = vld [vmem:[#allocation2 + $0x22d] sm:$0xff]  ;;  %v3137_v38 = vpack.c.bf16 %v3115_v57, %v3114_v26  ;;  %3083 = vst.msk [vmem:[#allocation3 + $0xf8] sm:$0xff] %vm2344_vm6, %v3065_v63  ;;  %v3329_v25 = vld [vmem:[#allocation2 + $0x236] sm:$0xff]  ;;  %v3330_v49 = vld [vmem:[#allocation2 + $0x23e] sm:$0xff]  ;;  %v3281_v46 = vpack.c.bf16 %v3259_v60, %v3258_v22 }
 0x356   :  { %v3328_v55 = vld [vmem:[#allocation2 + $0x22e] sm:$0xff]  ;;  %v3280_v54 = vpack.c.bf16 %v3257_v17, %v3256_v62  ;;  %3084 = vst.msk [vmem:[#allocation3 + $0x100] sm:$0xff] %vm2344_vm6, %v8506_v56  ;;  %v2835_v32 = vld [vmem:[#allocation2 + $0x261] sm:$0xff]  ;;  %v3353_v8 = vpack.c.bf16 %v3331_v44, %v3330_v49  ;;  %v2834_v45 = vld [vmem:[#allocation2 + $0x259] sm:$0xff] }
 0x357   :  { %3155 = vst.msk [vmem:[#allocation3 + $0xf8] sm:$0xff] %vm2417_vm7, %v3137_v38  ;;  %v3352_v51 = vpack.c.bf16 %v3329_v25, %v3328_v55  ;;  %3156 = vst.msk [vmem:[#allocation3 + $0x100] sm:$0xff] %vm2417_vm7, %v3138_v29  ;;  %v2907_v11 = vld [vmem:[#allocation2 + $0x262] sm:$0xff]  ;;  %v2833_v61 = vld [vmem:[#allocation2 + $0x251] sm:$0xff]  ;;  %v2853_v48 = vpack.c.bf16 %v2835_v32, %v2834_v45 }
 0x358   :  { %3226 = vst.msk [vmem:[#allocation3 + $0xf0] sm:$0xff] %vm2490_vm8, %v3137_v38  ;;  %3227 = vst.msk [vmem:[#allocation3 + $0xf8] sm:$0xff] %vm2490_vm8, %v3138_v29  ;;  %v3049_v43 = vld [vmem:[#allocation2 + $0x263] sm:$0xff]  ;;  %v2905_v30 = vld [vmem:[#allocation2 + $0x252] sm:$0xff] }
 0x359   :  { %v2832_v27 = vld [vmem:[#allocation2 + $0x249] sm:$0xff]  ;;  %3298 = vst.msk [vmem:[#allocation3 + $0xf0] sm:$0xff] %vm2563_vm9, %v3280_v54  ;;  %3299 = vst.msk [vmem:[#allocation3 + $0xf8] sm:$0xff] %vm2563_vm9, %v3281_v46  ;;  %v2906_v1 = vld [vmem:[#allocation2 + $0x25a] sm:$0xff] }
 0x35a   :  { %v3121_v19 = vld [vmem:[#allocation2 + $0x264] sm:$0xff]  ;;  %3370 = vst.msk [vmem:[#allocation3 + $0xf0] sm:$0xff] %vm2636_vm10, %v3352_v51  ;;  %v2852_v28 = vpack.c.bf16 %v2833_v61, %v2832_v27  ;;  %3371 = vst.msk [vmem:[#allocation3 + $0xf8] sm:$0xff] %vm2636_vm10, %v3353_v8  ;;  %v2925_v34 = vpack.c.bf16 %v2907_v11, %v2906_v1  ;;  %v3047_v9 = vld [vmem:[#allocation2 + $0x253] sm:$0xff] }
 0x35b   :  { %v2904_v37 = vld [vmem:[#allocation2 + $0x24a] sm:$0xff]  ;;  %3442 = vst.msk [vmem:[#allocation3 + $0xf0] sm:$0xff] %vm2709_vm11, %v8484_v7  ;;  %v3048_v5 = vld [vmem:[#allocation2 + $0x25b] sm:$0xff]  ;;  %3443 = vst.msk [vmem:[#allocation3 + $0xf8] sm:$0xff] %vm2709_vm11, %v3065_v63 }
 0x35c   :  { %v3263_v12 = vld [vmem:[#allocation2 + $0x265] sm:$0xff]  ;;  %v2924_v59 = vpack.c.bf16 %v2905_v30, %v2904_v37  ;;  %2870 = vst.msk [vmem:[#allocation3 + $0x110] sm:$0xff] %vm2125_vm3, %v2852_v28  ;;  %2871 = vst.msk [vmem:[#allocation3 + $0x118] sm:$0xff] %vm2125_vm3, %v2853_v48  ;;  %v3119_v42 = vld [vmem:[#allocation2 + $0x254] sm:$0xff]  ;;  %v8528_v7 = vpack.c.bf16 %v3049_v43, %v3048_v5 }
 0x35d   :  { %v3046_v23 = vld [vmem:[#allocation2 + $0x24b] sm:$0xff]  ;;  %v3120_v35 = vld [vmem:[#allocation2 + $0x25c] sm:$0xff]  ;;  %2943 = vst.msk [vmem:[#allocation3 + $0x118] sm:$0xff] %vm2198_vm4, %v2925_v34  ;;  %v3051_v2 = vld [vmem:[#allocation2 + $0x273] sm:$0xff] }
 0x35e   :  { %v3335_v41 = vld [vmem:[#allocation2 + $0x266] sm:$0xff]  ;;  %v3067_v4 = vpack.c.bf16 %v3047_v9, %v3046_v23  ;;  %2942 = vst.msk [vmem:[#allocation3 + $0x110] sm:$0xff] %vm2198_vm4, %v2924_v59  ;;  %v3261_v3 = vld [vmem:[#allocation2 + $0x255] sm:$0xff]  ;;  %v3262_v40 = vld [vmem:[#allocation2 + $0x25d] sm:$0xff]  ;;  %v3140_v0 = vpack.c.bf16 %v3121_v19, %v3120_v35 }
 0x35f   :  { %v3118_v20 = vld [vmem:[#allocation2 + $0x24c] sm:$0xff]  ;;  %3013 = vst.msk [vmem:[#allocation3 + $0x108] sm:$0xff] %vm2271_vm5, %v2924_v59  ;;  %3014 = vst.msk [vmem:[#allocation3 + $0x110] sm:$0xff] %vm2271_vm5, %v2925_v34  ;;  %v3333_v52 = vld [vmem:[#allocation2 + $0x256] sm:$0xff]  ;;  %v3283_v58 = vpack.c.bf16 %v3263_v12, %v3262_v40 }
 0x360   :  { %v3260_v6 = vld [vmem:[#allocation2 + $0x24d] sm:$0xff]  ;;  %v3139_v53 = vpack.c.bf16 %v3119_v42, %v3118_v20  ;;  %3085 = vst.msk [vmem:[#allocation3 + $0x108] sm:$0xff] %vm2344_vm6, %v3067_v4  ;;  %v3334_v39 = vld [vmem:[#allocation2 + $0x25e] sm:$0xff]  ;;  %3086 = vst.msk [vmem:[#allocation3 + $0x110] sm:$0xff] %vm2344_vm6, %v8528_v7 }
 0x361   :  { %v3332_v18 = vld [vmem:[#allocation2 + $0x24e] sm:$0xff]  ;;  %v3282_v24 = vpack.c.bf16 %v3261_v3, %v3260_v6  ;;  %v3195_v14 = vld [vmem:[#allocation2 + $0x284] sm:$0xff]  ;;  %3158 = vst.msk [vmem:[#allocation3 + $0x110] sm:$0xff] %vm2417_vm7, %v3140_v0  ;;  %v3355_v36 = vpack.c.bf16 %v3335_v41, %v3334_v39  ;;  %v3194_v57 = vld [vmem:[#allocation2 + $0x27c] sm:$0xff] }
 0x362   :  { %3157 = vst.msk [vmem:[#allocation3 + $0x108] sm:$0xff] %vm2417_vm7, %v3139_v53  ;;  %v3354_v33 = vpack.c.bf16 %v3333_v52, %v3332_v18  ;;  %v5621_v60 = vld [vmem:[%s9873_s2 + $0x28] sm:$0xff]   ;;  %v2979_v31 = vld [vmem:[#allocation2 + $0x272] sm:$0xff]  ;;  %v3266_v38 = vld [vmem:[#allocation2 + $0x27d] sm:$0xff]  ;;  %v3213_v29 = vpack.c.bf16 %v3195_v14, %v3194_v57 }
 0x363   :  { %3228 = vst.msk [vmem:[#allocation3 + $0x100] sm:$0xff] %vm2490_vm8, %v3139_v53  ;;  %3229 = vst.msk [vmem:[#allocation3 + $0x108] sm:$0xff] %vm2490_vm8, %v3140_v0  ;;  %v3267_v50 = vld [vmem:[#allocation2 + $0x285] sm:$0xff]  ;;  %5254 = vmatprep.subr.bf16.mxu1 %v5621_v60  ;;  %v3123_v16 = vld [vmem:[#allocation2 + $0x274] sm:$0xff] }
 0x364   :  { %v2978_v47 = vld [vmem:[#allocation2 + $0x26a] sm:$0xff]  ;;  %3300 = vst.msk [vmem:[#allocation3 + $0x100] sm:$0xff] %vm2563_vm9, %v3282_v24  ;;  %3301 = vst.msk [vmem:[#allocation3 + $0x108] sm:$0xff] %vm2563_vm9, %v3283_v58  ;;  %5255 = vmatpush3.bf16.msra.mxu1 %v5621_v60  ;;  %v3265_v62 = vld [vmem:[#allocation2 + $0x275] sm:$0xff]  ;;  %v3285_v46 = vpack.c.bf16 %v3267_v50, %v3266_v38 }
 0x365   :  { %v3050_v21 = vld [vmem:[#allocation2 + $0x26b] sm:$0xff]  ;;  %v2997_v13 = vpack.c.bf16 %v2979_v31, %v2978_v47  ;;  %3372 = vst.msk [vmem:[#allocation3 + $0x100] sm:$0xff] %vm2636_vm10, %v3354_v33  ;;  %3373 = vst.msk [vmem:[#allocation3 + $0x108] sm:$0xff] %vm2636_vm10, %v3355_v36  ;;  %v3337_v55 = vld [vmem:[#allocation2 + $0x276] sm:$0xff] }
 0x366   :  { %v3339_v44 = vld [vmem:[#allocation2 + $0x286] sm:$0xff]  ;;  %v3069_v26 = vpack.c.bf16 %v3051_v2, %v3050_v21  ;;  %3444 = vst.msk [vmem:[#allocation3 + $0x100] sm:$0xff] %vm2709_vm11, %v8506_v56  ;;  %v3336_v22 = vld [vmem:[#allocation2 + $0x26e] sm:$0xff]  ;;  %3445 = vst.msk [vmem:[#allocation3 + $0x108] sm:$0xff] %vm2709_vm11, %v3067_v4 }
 0x367   :  { %v3122_v10 = vld [vmem:[#allocation2 + $0x26c] sm:$0xff]  ;;  %3015 = vst.msk [vmem:[#allocation3 + $0x118] sm:$0xff] %vm2271_vm5, %v2997_v13  ;;  %v3338_v54 = vld [vmem:[#allocation2 + $0x27e] sm:$0xff]  ;;  %v3356_v25 = vpack.c.bf16 %v3337_v55, %v3336_v22 }
 0x368   :  { %v3141_v63 = vpack.c.bf16 %v3123_v16, %v3122_v10  ;;  %v3264_v15 = vld [vmem:[#allocation2 + $0x26d] sm:$0xff]  ;;  %3087 = vst.msk [vmem:[#allocation3 + $0x118] sm:$0xff] %vm2344_vm6, %v3069_v26  ;;  %v5623_v56 = vld [vmem:[%s9873_s2 + $0x38] sm:$0xff]   ;;  %v3357_v8 = vpack.c.bf16 %v3339_v44, %v3338_v54  ;;  %v3450_v19 = vld [vmem:[#allocation3 + $0x10] sm:$0xff] }
 0x369   :  { %v3284_v17 = vpack.c.bf16 %v3265_v62, %v3264_v15  ;;  %v5622_v49 = vld [vmem:[%s9873_s2 + $0x30] sm:$0xff]   ;;  %v3449_v32 = vld [vmem:[#allocation3 + $0x8] sm:$0xff]  ;;  %v3874_v45 = vunpack.c.h.bf16 %v3450_v19  ;;  %v3451_v37 = vld [vmem:[#allocation3 + $0x18] sm:$0xff]  ;;  %v3873_v30 = vunpack.c.l.bf16 %v3450_v19 }
 0x36a   :  { %3230 = vst.msk [vmem:[#allocation3 + $0x110] sm:$0xff] %vm2490_vm8, %v3141_v63  ;;  %v3448_v51 = vld [vmem:[#allocation3] sm:$0xff]  ;;  %5256 = vmatprep.subr.bf16.mxu1 %v5622_v49  ;;  %v3871_v27 = vunpack.c.l.bf16 %v3449_v32  ;;  %v3872_v12 = vunpack.c.h.bf16 %v3449_v32  ;;  %v3876_v28 = vunpack.c.h.bf16 %v3451_v37  ;;  %v3453_v23 = vld [vmem:[#allocation3 + $0x28] sm:$0xff]  ;;  %v3875_v41 = vunpack.c.l.bf16 %v3451_v37  ;;  %v3454_v34 = vld [vmem:[#allocation3 + $0x30] sm:$0xff] }
 0x36b   :  { %3159 = vst.msk [vmem:[#allocation3 + $0x118] sm:$0xff] %vm2417_vm7, %v3141_v63  ;;  %5260 = vmatprep.mubr.bf16.mxu1 %v3448_v51  ;;  %v3869_v11 = vunpack.c.l.bf16 %v3448_v51  ;;  %v3870_v43 = vunpack.c.h.bf16 %v3448_v51  ;;  %5257 = vmatpush3.bf16.msra.mxu1 %v5622_v49  ;;  %v3452_v48 = vld [vmem:[#allocation3 + $0x20] sm:$0xff]  ;;  %v3880_v59 = vunpack.c.h.bf16 %v3453_v23  ;;  %v3882_v5 = vunpack.c.h.bf16 %v3454_v34  ;;  %v3455_v20 = vld [vmem:[#allocation3 + $0x38] sm:$0xff]  ;;  %v3457_v53 = vld [vmem:[#allocation3 + $0x48] sm:$0xff] }
 0x36c   :  { %3302 = vst.msk [vmem:[#allocation3 + $0x110] sm:$0xff] %vm2563_vm9, %v3284_v17  ;;  %5258 = vmatprep.subr.bf16.mxu1 %v5623_v56  ;;  %3955 = vperm.xlu0 %5566, %v3871_v27   ;;  %v3878_v1 = vunpack.c.h.bf16 %v3452_v48  ;;  %v3877_v9 = vunpack.c.l.bf16 %v3452_v48  ;;  %v3879_v4 = vunpack.c.l.bf16 %v3453_v23  ;;  %v3884_v42 = vunpack.c.h.bf16 %v3455_v20  ;;  %v3456_v35 = vld [vmem:[#allocation3 + $0x40] sm:$0xff]  ;;  %v3458_v18 = vld [vmem:[#allocation3 + $0x50] sm:$0xff]  ;;  %v3459_v52 = vld [vmem:[#allocation3 + $0x58] sm:$0xff] }
 0x36d   :  { %3231 = vst.msk [vmem:[#allocation3 + $0x118] sm:$0xff] %vm2490_vm8, %v3213_v29  ;;  %v5561_v61 = vpack.i.bf16 %v3870_v43, %v3869_v11  ;;  %v3881_v6 = vunpack.c.l.bf16 %v3454_v34  ;;  %v3883_v3 = vunpack.c.l.bf16 %v3455_v20  ;;  %v3888_v40 = vunpack.c.h.bf16 %v3457_v53  ;;  %v3460_v33 = vld [vmem:[#allocation3 + $0x60] sm:$0xff]  ;;  %v3461_v36 = vld [vmem:[#allocation3 + $0x68] sm:$0xff]  ;;  %v3462_v31 = vld [vmem:[#allocation3 + $0x70] sm:$0xff] }
 0x36e   :  { %3374 = vst.msk [vmem:[#allocation3 + $0x110] sm:$0xff] %vm2636_vm10, %v3356_v25  ;;  %v3885_v0 = vunpack.c.l.bf16 %v3456_v35  ;;  %v3890_v24 = vunpack.c.h.bf16 %v3458_v18  ;;  %v3887_v39 = vunpack.c.l.bf16 %v3457_v53  ;;  %v3892_v58 = vunpack.c.h.bf16 %v3459_v52  ;;  %v3463_v13 = vld [vmem:[#allocation3 + $0x78] sm:$0xff]  ;;  %v3464_v16 = vld [vmem:[#allocation3 + $0x80] sm:$0xff]  ;;  %v3465_v57 = vld [vmem:[#allocation3 + $0x88] sm:$0xff] }
 0x36f   :  { %3303 = vst.msk [vmem:[#allocation3 + $0x118] sm:$0xff] %vm2563_vm9, %v3285_v46  ;;  %5562 = vperm.xlu1 %5560, %v5561_v61   ;;  %5259 = vmatpush3.bf16.msra.mxu1 %v5623_v56  ;;  %v3889_v14 = vunpack.c.l.bf16 %v3458_v18  ;;  %v3894_v60 = vunpack.c.h.bf16 %v3460_v33  ;;  %v3891_v50 = vunpack.c.l.bf16 %v3459_v52  ;;  %v3896_v47 = vunpack.c.h.bf16 %v3461_v36  ;;  %v3466_v38 = vld [vmem:[#allocation3 + $0x90] sm:$0xff]  ;;  %v3467_v55 = vld [vmem:[#allocation3 + $0x98] sm:$0xff]  ;;  %v3468_v25 = vld [vmem:[#allocation3 + $0xa0] sm:$0xff] }
 0x370   :  { %3446 = vst.msk [vmem:[#allocation3 + $0x110] sm:$0xff] %vm2709_vm11, %v8528_v7  ;;  %3970 = vperm.xlu0 %5566, %v3874_v45   ;;  %v3886_v7 = vunpack.c.h.bf16 %v3456_v35  ;;  %v3893_v21 = vunpack.c.l.bf16 %v3460_v33  ;;  %v3898_v44 = vunpack.c.h.bf16 %v3462_v31  ;;  %v3895_v2 = vunpack.c.l.bf16 %v3461_v36  ;;  %v3469_v46 = vld [vmem:[#allocation3 + $0xa8] sm:$0xff]  ;;  %v3471_v27 = vld [vmem:[#allocation3 + $0xb8] sm:$0xff]  ;;  %v3472_v45 = vld [vmem:[#allocation3 + $0xc0] sm:$0xff] }
 0x371   :  { %3375 = vst.msk [vmem:[#allocation3 + $0x118] sm:$0xff] %vm2636_vm10, %v3357_v8  ;;  %v3900_v10 = vunpack.c.h.bf16 %v3463_v13  ;;  %v3902_v63 = vunpack.c.h.bf16 %v3464_v16  ;;  %v3899_v15 = vunpack.c.l.bf16 %v3463_v13  ;;  %v3904_v62 = vunpack.c.h.bf16 %v3465_v57  ;;  %v3470_v8 = vld [vmem:[#allocation3 + $0xb0] sm:$0xff] }
 0x372   :  { %3447 = vst.msk [vmem:[#allocation3 + $0x118] sm:$0xff] %vm2709_vm11, %v3069_v26  ;;  %5261 = vmatmul.mubr.bf16.vlgmr.msra.gmra.mrb[44].mxu1 %v3449_v32  ;;  %v3897_v26 = vunpack.c.l.bf16 %v3462_v31  ;;  %v3901_v17 = vunpack.c.l.bf16 %v3464_v16  ;;  %v3906_v22 = vunpack.c.h.bf16 %v3466_v38  ;;  %v3903_v29 = vunpack.c.l.bf16 %v3465_v57 }
 0x373   :  { %3960 = vperm.xlu1 %5560, %v3872_v12   ;;  %5264 = vmatprep.mubr.bf16.mxu1 %v3450_v19  ;;  %v3908_v54 = vunpack.c.h.bf16 %v3467_v55  ;;  %v3905_v49 = vunpack.c.l.bf16 %v3466_v38  ;;  %v3910_v56 = vunpack.c.h.bf16 %v3468_v25  ;;  %v3907_v51 = vunpack.c.l.bf16 %v3467_v55 }
 0x374   :  { %3980 = vperm.xlu0 %5566, %v3876_v28   ;;  %v3912_v32 = vunpack.c.h.bf16 %v3469_v46  ;;  %v3909_v11 = vunpack.c.l.bf16 %v3468_v25  ;;  %v3914_v43 = vunpack.c.h.bf16 %v3470_v8  ;;  %v3911_v19 = vunpack.c.l.bf16 %v3469_v46  ;;  %v3473_v28 = vld [vmem:[#allocation3 + $0xc8] sm:$0xff] }
 0x375   :  { %v3916_v61 = vunpack.c.h.bf16 %v3471_v27  ;;  %v3918_v12 = vunpack.c.h.bf16 %v3472_v45 }
 0x377   :  { %3965 = vperm.xlu1 %5560, %v3873_v30   ;;  %v3920_v30 = vunpack.c.h.bf16 %v3473_v28 }
 0x378   :  { %3990 = vperm.xlu0 %5566, %v3878_v1   ;;  %v3474_v1 = vld [vmem:[#allocation3 + $0xd0] sm:$0xff] }
 0x37a   :  { %5265 = vmatmul.mubr.bf16.gmra.mrb[48].mxu1 %v3451_v37  ;;  %v3913_v37 = vunpack.c.l.bf16 %v3470_v8 }
 0x37b   :  { %3975 = vperm.xlu1 %5560, %v3875_v41   ;;  %5268 = vmatprep.mubr.bf16.mxu1 %v3452_v48  ;;  %v3915_v48 = vunpack.c.l.bf16 %v3471_v27  ;;  %v3922_v41 = vunpack.c.h.bf16 %v3474_v1 }
 0x37c   :  { %4000 = vperm.xlu0 %5566, %v3880_v59   ;;  %v3475_v59 = vld [vmem:[#allocation3 + $0xd8] sm:$0xff] }
 0x37f   :  { %3985 = vperm.xlu1 %5560, %v3877_v9   ;;  %v3924_v9 = vunpack.c.h.bf16 %v3475_v59 }
 0x380   :  { %4010 = vperm.xlu0 %5566, %v3882_v5   ;;  %v3476_v5 = vld [vmem:[#allocation3 + $0xe0] sm:$0xff] }
 0x382   :  { %5269 = vmatmul.mubr.bf16.gmra.mrb[52].mxu1 %v3453_v23  ;;  %v3917_v23 = vunpack.c.l.bf16 %v3472_v45 }
 0x383   :  { %3995 = vperm.xlu1 %5560, %v3879_v4   ;;  %5272 = vmatprep.mubr.bf16.mxu1 %v3454_v34  ;;  %v3919_v34 = vunpack.c.l.bf16 %v3473_v28  ;;  %v3926_v4 = vunpack.c.h.bf16 %v3476_v5 }
 0x384   :  { %4020 = vperm.xlu0 %5566, %v3884_v42   ;;  %v3477_v42 = vld [vmem:[#allocation3 + $0xe8] sm:$0xff] }
 0x387   :  { %4005 = vperm.xlu1 %5560, %v3881_v6   ;;  %v3928_v6 = vunpack.c.h.bf16 %v3477_v42 }
 0x388   :  { %4030 = vperm.xlu0 %5566, %v3886_v7   ;;  %v3478_v7 = vld [vmem:[#allocation3 + $0xf0] sm:$0xff] }
 0x38a   :  { %5273 = vmatmul.mubr.bf16.gmra.mrb[56].mxu1 %v3455_v20  ;;  %v3921_v20 = vunpack.c.l.bf16 %v3474_v1 }
 0x38b   :  { %4015 = vperm.xlu1 %5560, %v3883_v3   ;;  %5276 = vmatprep.mubr.bf16.mxu1 %v3456_v35  ;;  %v3923_v35 = vunpack.c.l.bf16 %v3475_v59  ;;  %v3930_v3 = vunpack.c.h.bf16 %v3478_v7 }
 0x38c   :  { %4040 = vperm.xlu0 %5566, %v3888_v40   ;;  %v3479_v40 = vld [vmem:[#allocation3 + $0xf8] sm:$0xff] }
 0x38f   :  { %4025 = vperm.xlu1 %5560, %v3885_v0   ;;  %v3932_v0 = vunpack.c.h.bf16 %v3479_v40 }
 0x390   :  { %4050 = vperm.xlu0 %5566, %v3890_v24   ;;  %v3480_v24 = vld [vmem:[#allocation3 + $0x100] sm:$0xff] }
 0x392   :  { %5277 = vmatmul.mubr.bf16.gmra.mrb[60].mxu1 %v3457_v53  ;;  %v3925_v53 = vunpack.c.l.bf16 %v3476_v5 }
 0x393   :  { %4035 = vperm.xlu1 %5560, %v3887_v39   ;;  %5280 = vmatprep.mubr.bf16.mxu1 %v3458_v18  ;;  %v3927_v18 = vunpack.c.l.bf16 %v3477_v42  ;;  %v3934_v39 = vunpack.c.h.bf16 %v3480_v24 }
 0x394   :  { %4060 = vperm.xlu0 %5566, %v3892_v58   ;;  %v3481_v58 = vld [vmem:[#allocation3 + $0x108] sm:$0xff] }
 0x397   :  { %4045 = vperm.xlu1 %5560, %v3889_v14   ;;  %v3936_v14 = vunpack.c.h.bf16 %v3481_v58 }
 0x398   :  { %4070 = vperm.xlu0 %5566, %v3894_v60   ;;  %v3482_v60 = vld [vmem:[#allocation3 + $0x110] sm:$0xff] }
 0x39a   :  { %5281 = vmatmul.mubr.bf16.gmra.mrb[64].mxu1 %v3459_v52  ;;  %v3929_v52 = vunpack.c.l.bf16 %v3478_v7 }
 0x39b   :  { %4055 = vperm.xlu1 %5560, %v3891_v50   ;;  %5284 = vmatprep.mubr.bf16.mxu1 %v3460_v33  ;;  %v3931_v33 = vunpack.c.l.bf16 %v3479_v40  ;;  %v3938_v50 = vunpack.c.h.bf16 %v3482_v60 }
 0x39c   :  { %4080 = vperm.xlu0 %5566, %v3896_v47   ;;  %v3483_v47 = vld [vmem:[#allocation3 + $0x118] sm:$0xff] }
 0x39f   :  { %4065 = vperm.xlu1 %5560, %v3893_v21   ;;  %v3940_v21 = vunpack.c.h.bf16 %v3483_v47 }
 0x3a0   :  { %4090 = vperm.xlu0 %5566, %v3898_v44   ;;  %v3937_v44 = vunpack.c.l.bf16 %v3482_v60 }
 0x3a2   :  { %5285 = vmatmul.mubr.bf16.gmra.mrb[68].mxu1 %v3461_v36  ;;  %v3933_v36 = vunpack.c.l.bf16 %v3480_v24 }
 0x3a3   :  { %4075 = vperm.xlu1 %5560, %v3895_v2   ;;  %5288 = vmatprep.mubr.bf16.mxu1 %v3462_v31  ;;  %v3935_v31 = vunpack.c.l.bf16 %v3481_v58 }
 0x3a4   :  { %4100 = vperm.xlu0 %5566, %v3900_v10  }
 0x3a7   :  { %4085 = vperm.xlu1 %5560, %v3897_v26  }
 0x3a8   :  { %4110 = vperm.xlu0 %5566, %v3902_v63  }
 0x3aa   :  { %5289 = vmatmul.mubr.bf16.gmra.mrb[72].mxu1 %v3463_v13  ;;  %v3939_v13 = vunpack.c.l.bf16 %v3483_v47 }
 0x3ab   :  { %4095 = vperm.xlu1 %5560, %v3899_v15   ;;  %5292 = vmatprep.mubr.bf16.mxu1 %v3464_v16 }
 0x3ac   :  { %4120 = vperm.xlu0 %5566, %v3904_v62  }
 0x3af   :  { %4105 = vperm.xlu1 %5560, %v3901_v17  }
 0x3b0   :  { %4130 = vperm.xlu0 %5566, %v3906_v22  }
 0x3b2   :  { %5293 = vmatmul.mubr.bf16.gmra.mrb[76].mxu1 %v3465_v57 }
 0x3b3   :  { %4115 = vperm.xlu1 %5560, %v3903_v29   ;;  %5296 = vmatprep.mubr.bf16.mxu1 %v3466_v38 }
 0x3b4   :  { %4140 = vperm.xlu0 %5566, %v3908_v54  }
 0x3b7   :  { %4125 = vperm.xlu1 %5560, %v3905_v49  }
 0x3b8   :  { %4150 = vperm.xlu0 %5566, %v3910_v56  }
 0x3ba   :  { %5297 = vmatmul.mubr.bf16.gmra.mrb[80].mxu1 %v3467_v55 }
 0x3bb   :  { %4135 = vperm.xlu1 %5560, %v3907_v51   ;;  %5300 = vmatprep.mubr.bf16.mxu1 %v3468_v25 }
 0x3bc   :  { %4160 = vperm.xlu0 %5566, %v3912_v32  }
 0x3bf   :  { %4145 = vperm.xlu1 %5560, %v3909_v11  }
 0x3c0   :  { %4170 = vperm.xlu0 %5566, %v3914_v43  }
 0x3c2   :  { %5301 = vmatmul.mubr.bf16.gmra.mrb[84].mxu1 %v3469_v46 }
 0x3c3   :  { %4155 = vperm.xlu1 %5560, %v3911_v19   ;;  %5304 = vmatprep.mubr.bf16.mxu1 %v3470_v8 }
 0x3c4   :  { %4180 = vperm.xlu0 %5566, %v3916_v61  }
 0x3c7   :  { %4165 = vperm.xlu1 %5560, %v3913_v37  }
 0x3c8   :  { %4190 = vperm.xlu0 %5566, %v3918_v12  }
 0x3ca   :  { %5305 = vmatmul.mubr.bf16.gmra.mrb[88].mxu1 %v3471_v27 }
 0x3cb   :  { %4175 = vperm.xlu1 %5560, %v3915_v48   ;;  %5308 = vmatprep.mubr.bf16.mxu1 %v3472_v45 }
 0x3cc   :  { %4200 = vperm.xlu0 %5566, %v3920_v30  }
 0x3cf   :  { %4185 = vperm.xlu1 %5560, %v3917_v23  }
 0x3d0   :  { %4210 = vperm.xlu0 %5566, %v3922_v41  }
 0x3d2   :  { %5309 = vmatmul.mubr.bf16.gmra.mrb[92].mxu1 %v3473_v28 }
 0x3d3   :  { %4195 = vperm.xlu1 %5560, %v3919_v34   ;;  %5312 = vmatprep.mubr.bf16.mxu1 %v3474_v1 }
 0x3d4   :  { %4220 = vperm.xlu0 %5566, %v3924_v9  }
 0x3d7   :  { %4205 = vperm.xlu1 %5560, %v3921_v20  }
 0x3d8   :  { %4230 = vperm.xlu0 %5566, %v3926_v4  }
 0x3da   :  { %5313 = vmatmul.mubr.bf16.gmra.mrb[96].mxu1 %v3475_v59 }
 0x3db   :  { %4215 = vperm.xlu1 %5560, %v3923_v35   ;;  %5316 = vmatprep.mubr.bf16.mxu1 %v3476_v5 }
 0x3dc   :  { %4240 = vperm.xlu0 %5566, %v3928_v6  }
 0x3df   :  { %4225 = vperm.xlu1 %5560, %v3925_v53  }
 0x3e0   :  { %4250 = vperm.xlu0 %5566, %v3930_v3  }
 0x3e2   :  { %5317 = vmatmul.mubr.bf16.gmra.mrb[100].mxu1 %v3477_v42 }
 0x3e3   :  { %4235 = vperm.xlu1 %5560, %v3927_v18   ;;  %5320 = vmatprep.mubr.bf16.mxu1 %v3478_v7 }
 0x3e4   :  { %4260 = vperm.xlu0 %5566, %v3932_v0  }
 0x3e7   :  { %4245 = vperm.xlu1 %5560, %v3929_v52  }
 0x3e8   :  { %4270 = vperm.xlu0 %5566, %v3934_v39  }
 0x3ea   :  { %5321 = vmatmul.mubr.bf16.gmra.mrb[104].mxu1 %v3479_v40 }
 0x3eb   :  { %4255 = vperm.xlu1 %5560, %v3931_v33   ;;  %5324 = vmatprep.mubr.bf16.mxu1 %v3480_v24  ;;  %v3956_v16 = vpop.permute.xlu0 %3955 }
 0x3ec   :  { %4280 = vperm.xlu0 %5566, %v3936_v14  }
 0x3ee   :  { %v5563_v2 = vpop.permute.xlu1 %5562 }
 0x3ef   :  { %4265 = vperm.xlu1 %5560, %v3933_v36   ;;  %v3971_v63 = vpop.permute.xlu0 %3970  ;;  %v5564_v27 = vunpack.i.l.bf16 %v5563_v2  ;;  %v5565_v37 = vunpack.i.h.bf16 %v5563_v2 }
 0x3f0   :  { %4290 = vperm.xlu0 %5566, %v3938_v50  }
 0x3f2   :  { %5325 = vmatmul.mubr.bf16.gmra.mrb[108].mxu1 %v3481_v58  ;;  %v3961_v10 = vpop.permute.xlu1 %3960 }
 0x3f3   :  { %4275 = vperm.xlu1 %5560, %v3935_v31   ;;  %5328 = vmatprep.mubr.bf16.mxu1 %v3482_v60  ;;  %v3981_v15 = vpop.permute.xlu0 %3980 }
 0x3f4   :  { %4300 = vperm.xlu0 %5566, %v3940_v21  }
 0x3f6   :  { %v3966_v26 = vpop.permute.xlu1 %3965 }
 0x3f7   :  { %4285 = vperm.xlu1 %5560, %v3937_v44   ;;  %v8568_v38 = vpop.permute.xlu0 %3990 }
 0x3fa   :  { %5329 = vmatmul.mubr.bf16.gmra.mrb[112].mxu1 %v3483_v47  ;;  %v3976_v57 = vpop.permute.xlu1 %3975 }
 0x3fb   :  { %4295 = vperm.xlu1 %5560, %v3939_v13   ;;  %v8572_v22 = vpop.permute.xlu0 %4000 }
 0x3fe   :  { %v8566_v62 = vpop.permute.xlu1 %3985 }
 0x3ff   :  { %v8576_v29 = vpop.permute.xlu0 %4010 }
 0x402   :  { %v8570_v17 = vpop.permute.xlu1 %3995 }
 0x403   :  { %v8580_v25 = vpop.permute.xlu0 %4020 }
 0x406   :  { %v8574_v55 = vpop.permute.xlu1 %4005 }
 0x407   :  { %v8584_v56 = vpop.permute.xlu0 %4030 }
 0x40a   :  { %v8578_v54 = vpop.permute.xlu1 %4015 }
 0x40b   :  { %v8588_v51 = vpop.permute.xlu0 %4040 }
 0x40e   :  { %v8582_v49 = vpop.permute.xlu1 %4025 }
 0x40f   :  { %v8592_v8 = vpop.permute.xlu0 %4050 }
 0x412   :  { %v8586_v46 = vpop.permute.xlu1 %4035 }
 0x413   :  { %v8596_v43 = vpop.permute.xlu0 %4060 }
 0x416   :  { %v8590_v32 = vpop.permute.xlu1 %4045 }
 0x417   :  { %v8607_v48 = vpop.permute.xlu0 %4070 }
 0x41a   :  { %v8594_v11 = vpop.permute.xlu1 %4055 }
 0x41b   :  { %v8621_v6 = vpop.permute.xlu0 %4080 }
 0x41e   :  { %v8598_v19 = vpop.permute.xlu1 %4065 }
 0x41f   :  { %v8638_v21 = vpop.permute.xlu0 %4090 }
 0x422   :  { %v8613_v41 = vpop.permute.xlu1 %4075 }
 0x426   :  { %v8632_v39 = vpop.permute.xlu1 %4085 }
 0x445   :  { %v8600_v61 = vpop.f32.mrb[44].mxu1 }
 0x446   :  { %v8602_v45 = vpop.f32.mrb[45].mxu1  ;;  %v4305_v1 = vmul.f32 %v8600_v61, %v3956_v16 }
 0x447   :  { %v4303_v12 = vmul.f32 %v5564_v27, %v8602_v45  ;;  %v8605_v28 = vpop.f32.mrb[46].mxu1 }
 0x448   :  { %v8609_v30 = vpop.f32.mrb[47].mxu1  ;;  %v4306_v34 = vmul.f32 %v8605_v28, %v3961_v10  ;;  %v4454_v20 = vmul.f32 %v8600_v61, %v4305_v1 }
 0x449   :  { %v4304_v23 = vmul.f32 %v5565_v37, %v8609_v30  ;;  %v4452_v59 = vmul.f32 %v4303_v12, %v8602_v45 }
 0x44a   :  { %v4455_v53 = vmul.f32 %v8605_v28, %v4306_v34 }
 0x44b   :  { %v4375_v9 = vadd.f32 %v4304_v23, %v4303_v12  ;;  %v4453_v5 = vmul.f32 %v4304_v23, %v8609_v30 }
 0x44d   :  { %v4376_v4 = vadd.f32 %v4375_v9, %v4305_v1  ;;  %v4524_v42 = vadd.f32 %v4453_v5, %v4452_v59  ;;  %v8619_v35 = vpop.f32.mrb[48].mxu1  ;;  %v8659_v5 = vpop.permute.xlu0 %4100 }
 0x44e   :  { %v8623_v7 = vpop.f32.mrb[49].mxu1  ;;  %v4309_v24 = vmul.f32 %v8619_v35, %v3976_v57 }
 0x44f   :  { %v4377_v3 = vadd.f32 %v4376_v4, %v4306_v34  ;;  %v4525_v40 = vadd.f32 %v4524_v42, %v4454_v20  ;;  %v4307_v18 = vmul.f32 %v3966_v26, %v8623_v7  ;;  %v8627_v0 = vpop.f32.mrb[50].mxu1  ;;  %v8645_v26 = vpop.permute.xlu1 %4095 }
 0x450   :  { %v8630_v52 = vpop.f32.mrb[51].mxu1  ;;  %v4310_v50 = vmul.f32 %v8627_v0, %v3981_v15  ;;  %v4458_v44 = vmul.f32 %v8619_v35, %v4309_v24 }
 0x451   :  { %v4526_v58 = vadd.f32 %v4525_v40, %v4455_v53  ;;  %v4378_v33 = vadd.f32 %v4377_v3, %v4307_v18  ;;  %v4456_v14 = vmul.f32 %v4307_v18, %v8623_v7  ;;  %v4308_v60 = vmul.f32 %v3971_v63, %v8630_v52 }
 0x452   :  { %v4459_v63 = vmul.f32 %v8627_v0, %v4310_v50 }
 0x453   :  { %v4527_v36 = vadd.f32 %v4526_v58, %v4456_v14  ;;  %v4379_v47 = vadd.f32 %v4378_v33, %v4308_v60  ;;  %v4457_v31 = vmul.f32 %v4308_v60, %v8630_v52  ;;  %v8664_v53 = vpop.permute.xlu1 %4105  ;;  %v8676_v60 = vpop.permute.xlu0 %4110 }
 0x455   :  { %v4380_v13 = vadd.f32 %v4379_v47, %v4309_v24  ;;  %v4528_v2 = vadd.f32 %v4527_v36, %v4457_v31  ;;  %v8641_v10 = vpop.f32.mrb[52].mxu1 }
 0x456   :  { %v8643_v16 = vpop.f32.mrb[53].mxu1  ;;  %v4313_v12 = vmul.f32 %v8641_v10, %v8570_v17 }
 0x457   :  { %v4381_v57 = vadd.f32 %v4380_v13, %v4310_v50  ;;  %v4529_v27 = vadd.f32 %v4528_v2, %v4458_v44  ;;  %v4311_v15 = vmul.f32 %v8566_v62, %v8643_v16  ;;  %v8650_v37 = vpop.f32.mrb[54].mxu1  ;;  %v8685_v2 = vpop.permute.xlu1 %4115 }
 0x458   :  { %v8654_v1 = vpop.f32.mrb[55].mxu1  ;;  %v4314_v62 = vmul.f32 %v8650_v37, %v8572_v22  ;;  %v4462_v17 = vmul.f32 %v8641_v10, %v4313_v12 }
 0x459   :  { %v4530_v23 = vadd.f32 %v4529_v27, %v4459_v63  ;;  %v4382_v59 = vadd.f32 %v4381_v57, %v4311_v15  ;;  %v4460_v34 = vmul.f32 %v4311_v15, %v8643_v16  ;;  %v4312_v9 = vmul.f32 %v8568_v38, %v8654_v1 }
 0x45a   :  { %v4463_v38 = vmul.f32 %v8650_v37, %v4314_v62 }
 0x45b   :  { %v4531_v20 = vadd.f32 %v4530_v23, %v4460_v34  ;;  %v4383_v4 = vadd.f32 %v4382_v59, %v4312_v9  ;;  %v4461_v42 = vmul.f32 %v4312_v9, %v8654_v1  ;;  %v8693_v59 = vpop.permute.xlu0 %4120 }
 0x45d   :  { %v4384_v3 = vadd.f32 %v4383_v4, %v4313_v12  ;;  %v4532_v40 = vadd.f32 %v4531_v20, %v4461_v42  ;;  %v8667_v18 = vpop.f32.mrb[56].mxu1 }
 0x45e   :  { %v8669_v24 = vpop.f32.mrb[57].mxu1  ;;  %v4317_v36 = vmul.f32 %v8667_v18, %v8578_v54 }
 0x45f   :  { %v4385_v58 = vadd.f32 %v4384_v3, %v4314_v62  ;;  %v4533_v33 = vadd.f32 %v4532_v40, %v4462_v17  ;;  %v4315_v22 = vmul.f32 %v8574_v55, %v8669_v24  ;;  %v8674_v14 = vpop.f32.mrb[58].mxu1  ;;  %v8706_v17 = vpop.permute.xlu1 %4125 }
 0x460   :  { %v8680_v50 = vpop.f32.mrb[59].mxu1  ;;  %v4318_v55 = vmul.f32 %v8674_v14, %v8580_v25  ;;  %v4466_v54 = vmul.f32 %v8667_v18, %v4317_v36 }
 0x461   :  { %v4386_v47 = vadd.f32 %v4385_v58, %v4315_v22  ;;  %v4464_v31 = vmul.f32 %v4315_v22, %v8669_v24  ;;  %v4534_v44 = vadd.f32 %v4533_v33, %v4463_v38  ;;  %v4316_v13 = vmul.f32 %v8576_v29, %v8680_v50 }
 0x462   :  { %v4467_v29 = vmul.f32 %v8674_v14, %v4318_v55 }
 0x463   :  { %v4535_v63 = vadd.f32 %v4534_v44, %v4464_v31  ;;  %v4387_v57 = vadd.f32 %v4386_v47, %v4316_v13  ;;  %v4465_v27 = vmul.f32 %v4316_v13, %v8680_v50  ;;  %v8714_v47 = vpop.permute.xlu0 %4130 }
 0x465   :  { %v4388_v15 = vadd.f32 %v4387_v57, %v4317_v36  ;;  %v4536_v12 = vadd.f32 %v4535_v63, %v4465_v27  ;;  %v8691_v23 = vpop.f32.mrb[60].mxu1 }
 0x466   :  { %v8695_v34 = vpop.f32.mrb[61].mxu1  ;;  %v4321_v4 = vmul.f32 %v8691_v23, %v8586_v46 }
 0x467   :  { %v4537_v9 = vadd.f32 %v4536_v12, %v4466_v54  ;;  %v4319_v20 = vmul.f32 %v8582_v49, %v8695_v34  ;;  %v4389_v25 = vadd.f32 %v4388_v15, %v4318_v55  ;;  %v8700_v62 = vpop.f32.mrb[62].mxu1  ;;  %v8721_v55 = vpop.permute.xlu1 %4135 }
 0x468   :  { %v8704_v42 = vpop.f32.mrb[63].mxu1  ;;  %v4322_v49 = vmul.f32 %v8700_v62, %v8588_v51  ;;  %v4470_v46 = vmul.f32 %v8691_v23, %v4321_v4 }
 0x469   :  { %v4390_v3 = vadd.f32 %v4389_v25, %v4319_v20  ;;  %v4468_v40 = vmul.f32 %v4319_v20, %v8695_v34  ;;  %v4538_v38 = vadd.f32 %v4537_v9, %v4467_v29  ;;  %v4320_v58 = vmul.f32 %v8584_v56, %v8704_v42 }
 0x46a   :  { %v4471_v56 = vmul.f32 %v8700_v62, %v4322_v49 }
 0x46b   :  { %v4539_v33 = vadd.f32 %v4538_v38, %v4468_v40  ;;  %v4391_v22 = vadd.f32 %v4390_v3, %v4320_v58  ;;  %v4469_v36 = vmul.f32 %v4320_v58, %v8704_v42  ;;  %v8740_v58 = vpop.permute.xlu1 %4145 }
 0x46d   :  { %v4392_v31 = vadd.f32 %v4391_v22, %v4321_v4  ;;  %v4540_v44 = vadd.f32 %v4539_v33, %v4469_v36  ;;  %v8717_v13 = vpop.f32.mrb[64].mxu1  ;;  %v8735_v4 = vpop.permute.xlu0 %4140 }
 0x46e   :  { %v8719_v63 = vpop.f32.mrb[65].mxu1  ;;  %v4325_v15 = vmul.f32 %v8717_v13, %v8594_v11 }
 0x46f   :  { %v4541_v57 = vadd.f32 %v4540_v44, %v4470_v46  ;;  %v4323_v51 = vmul.f32 %v8590_v32, %v8719_v63  ;;  %v4393_v27 = vadd.f32 %v4392_v31, %v4322_v49  ;;  %v8726_v54 = vpop.f32.mrb[66].mxu1 }
 0x470   :  { %v8730_v12 = vpop.f32.mrb[67].mxu1  ;;  %v4326_v32 = vmul.f32 %v8726_v54, %v8596_v43  ;;  %v4474_v11 = vmul.f32 %v8717_v13, %v4325_v15 }
 0x471   :  { %v4394_v29 = vadd.f32 %v4393_v27, %v4323_v51  ;;  %v4472_v9 = vmul.f32 %v4323_v51, %v8719_v63  ;;  %v4542_v20 = vadd.f32 %v4541_v57, %v4471_v56  ;;  %v4324_v25 = vmul.f32 %v8592_v8, %v8730_v12  ;;  %v8752_v56 = vpop.permute.xlu0 %4150 }
 0x472   :  { %v4475_v8 = vmul.f32 %v8726_v54, %v4326_v32 }
 0x473   :  { %v4543_v3 = vadd.f32 %v4542_v20, %v4472_v9  ;;  %v4395_v40 = vadd.f32 %v4394_v29, %v4324_v25  ;;  %v4473_v38 = vmul.f32 %v4324_v25, %v8730_v12  ;;  %v8761_v20 = vpop.permute.xlu1 %4155 }
 0x475   :  { %v4396_v33 = vadd.f32 %v4395_v40, %v4325_v15  ;;  %v4544_v49 = vadd.f32 %v4543_v3, %v4473_v38  ;;  %v8743_v22 = vpop.f32.mrb[68].mxu1 }
 0x476   :  { %v8745_v36 = vpop.f32.mrb[69].mxu1  ;;  %v4329_v57 = vmul.f32 %v8743_v22, %v8613_v41 }
 0x477   :  { %v4545_v46 = vadd.f32 %v4544_v49, %v4474_v11  ;;  %v4327_v31 = vmul.f32 %v8598_v19, %v8745_v36  ;;  %v4397_v43 = vadd.f32 %v4396_v33, %v4326_v32  ;;  %v8750_v44 = vpop.f32.mrb[70].mxu1  ;;  %v8769_v33 = vpop.permute.xlu0 %4160 }
 0x478   :  { %v8756_v51 = vpop.f32.mrb[71].mxu1  ;;  %v4330_v25 = vmul.f32 %v8750_v44, %v8621_v6  ;;  %v4478_v41 = vmul.f32 %v8743_v22, %v4329_v57 }
 0x479   :  { %v4398_v27 = vadd.f32 %v4397_v43, %v4327_v31  ;;  %v4476_v15 = vmul.f32 %v4327_v31, %v8745_v36  ;;  %v4546_v29 = vadd.f32 %v4545_v46, %v4475_v8  ;;  %v4328_v9 = vmul.f32 %v8607_v48, %v8756_v51 }
 0x47a   :  { %v4479_v48 = vmul.f32 %v8750_v44, %v4330_v25 }
 0x47b   :  { %v4547_v19 = vadd.f32 %v4546_v29, %v4476_v15  ;;  %v4399_v3 = vadd.f32 %v4398_v27, %v4328_v9  ;;  %v4477_v32 = vmul.f32 %v4328_v9, %v8756_v51  ;;  %v8782_v27 = vpop.permute.xlu1 %4165 }
 0x47d   :  { %v4400_v40 = vadd.f32 %v4399_v3, %v4329_v57  ;;  %v4548_v38 = vadd.f32 %v4547_v19, %v4477_v32  ;;  %v8767_v11 = vpop.f32.mrb[72].mxu1 }
 0x47e   :  { %10409 = vst [vmem:[#allocation45_spill] sm:$0xff] %v8767_v11  ;;  %v8771_v49 = vpop.f32.mrb[73].mxu1  ;;  %v4333_v43 = vmul.f32 %v8767_v11, %v8645_v26 }
 0x47f   :  { %v4549_v8 = vadd.f32 %v4548_v38, %v4478_v41  ;;  %v4331_v46 = vmul.f32 %v8632_v39, %v8771_v49  ;;  %v4401_v6 = vadd.f32 %v4400_v40, %v4330_v25  ;;  %v8776_v31 = vpop.f32.mrb[74].mxu1  ;;  %v8790_v41 = vpop.permute.xlu0 %4170 }
 0x480   :  { %10410 = vst [vmem:[#allocation46_spill] sm:$0xff] %v8776_v31  ;;  %v8780_v57 = vpop.f32.mrb[75].mxu1  ;;  %v4334_v39 = vmul.f32 %v8776_v31, %v8659_v5  ;;  %v4482_v26 = vmul.f32 %v8767_v11, %v4333_v43 }
 0x481   :  { %v4402_v15 = vadd.f32 %v4401_v6, %v4331_v46  ;;  %v4480_v29 = vmul.f32 %v4331_v46, %v8771_v49  ;;  %v4550_v9 = vadd.f32 %v4549_v8, %v4479_v48  ;;  %v4332_v19 = vmul.f32 %v8638_v21, %v8780_v57  ;;  %v8797_v48 = vpop.permute.xlu1 %4175 }
 0x482   :  { %v4483_v21 = vmul.f32 %v8776_v31, %v4334_v39 }
 0x483   :  { %v4551_v3 = vadd.f32 %v4550_v9, %v4480_v29  ;;  %v4403_v25 = vadd.f32 %v4402_v15, %v4332_v19  ;;  %v4481_v32 = vmul.f32 %v4332_v19, %v8780_v57  ;;  %v8811_v31 = vpop.permute.xlu0 %4180 }
 0x485   :  { %v4404_v40 = vadd.f32 %v4403_v25, %v4333_v43  ;;  %v4552_v38 = vadd.f32 %v4551_v3, %v4481_v32  ;;  %v8793_v6 = vpop.f32.mrb[76].mxu1 }
 0x486   :  { %10411 = vst [vmem:[#allocation55_spill] sm:$0xff] %v8793_v6  ;;  %v8795_v46 = vpop.f32.mrb[77].mxu1  ;;  %v4337_v9 = vmul.f32 %v8793_v6, %v8685_v2 }
 0x487   :  { %10412 = vst [vmem:[#allocation56_spill] sm:$0xff] %v8795_v46  ;;  %v4553_v8 = vadd.f32 %v4552_v38, %v4482_v26  ;;  %v4335_v5 = vmul.f32 %v8664_v53, %v8795_v46  ;;  %v4405_v15 = vadd.f32 %v4404_v40, %v4334_v39  ;;  %v8802_v29 = vpop.f32.mrb[78].mxu1  ;;  %v8816_v38 = vpop.permute.xlu1 %4185 }
 0x488   :  { %10413 = vst [vmem:[#allocation57_spill] sm:$0xff] %v8802_v29  ;;  %v8806_v43 = vpop.f32.mrb[79].mxu1  ;;  %v4338_v53 = vmul.f32 %v8802_v29, %v8693_v59  ;;  %v4486_v2 = vmul.f32 %v8793_v6, %v4337_v9 }
 0x489   :  { %10414 = vst [vmem:[#allocation59_spill] sm:$0xff] %v8806_v43  ;;  %v4406_v19 = vadd.f32 %v4405_v15, %v4335_v5  ;;  %v4484_v3 = vmul.f32 %v4335_v5, %v8795_v46  ;;  %v4554_v25 = vadd.f32 %v4553_v8, %v4483_v21  ;;  %v4336_v32 = vmul.f32 %v8676_v60, %v8806_v43 }
 0x48a   :  { %v4487_v60 = vmul.f32 %v8802_v29, %v4338_v53 }
 0x48b   :  { %v4555_v26 = vadd.f32 %v4554_v25, %v4484_v3  ;;  %v4407_v39 = vadd.f32 %v4406_v19, %v4336_v32  ;;  %v4485_v40 = vmul.f32 %v4336_v32, %v8806_v43  ;;  %v8828_v25 = vpop.permute.xlu0 %4190 }
 0x48d   :  { %v4408_v15 = vadd.f32 %v4407_v39, %v4337_v9  ;;  %v4556_v11 = vadd.f32 %v4555_v26, %v4485_v40  ;;  %v8819_v5 = vpop.f32.mrb[80].mxu1 }
 0x48e   :  { %10415 = vst [vmem:[#allocation58_spill] sm:$0xff] %v8819_v5  ;;  %v8821_v21 = vpop.f32.mrb[81].mxu1  ;;  %v4341_v32 = vmul.f32 %v8819_v5, %v8721_v55 }
 0x48f   :  { %v4557_v8 = vadd.f32 %v4556_v11, %v4486_v2  ;;  %v4339_v3 = vmul.f32 %v8706_v17, %v8821_v21  ;;  %v4409_v59 = vadd.f32 %v4408_v15, %v4338_v53  ;;  %v8826_v19 = vpop.f32.mrb[82].mxu1  ;;  %v4196_v2 = vpop.permute.xlu1 %4195 }
 0x490   :  { %10416 = vst [vmem:[#allocation61_spill] sm:$0xff] %v8826_v19  ;;  %v8832_v9 = vpop.f32.mrb[83].mxu1  ;;  %v4342_v17 = vmul.f32 %v8826_v19, %v8735_v4  ;;  %v4490_v6 = vmul.f32 %v8819_v5, %v4341_v32 }
 0x491   :  { %v4410_v26 = vadd.f32 %v4409_v59, %v4339_v3  ;;  %v4488_v39 = vmul.f32 %v4339_v3, %v8821_v21  ;;  %v4558_v40 = vadd.f32 %v4557_v8, %v4487_v60  ;;  %v4340_v11 = vmul.f32 %v8714_v47, %v8832_v9  ;;  %v4201_v59 = vpop.permute.xlu0 %4200 }
 0x492   :  { %v4491_v60 = vmul.f32 %v8826_v19, %v4342_v17 }
 0x493   :  { %v4559_v29 = vadd.f32 %v4558_v40, %v4488_v39  ;;  %v4411_v53 = vadd.f32 %v4410_v26, %v4340_v11  ;;  %v4489_v15 = vmul.f32 %v4340_v11, %v8832_v9 }
 0x495   :  { %v4412_v55 = vadd.f32 %v4411_v53, %v4341_v32  ;;  %v4560_v43 = vadd.f32 %v4559_v29, %v4489_v15  ;;  %v8841_v46 = vpop.f32.mrb[84].mxu1  ;;  %v8854_v29 = vpop.permute.xlu1 %4205 }
 0x496   :  { %10417 = vst [vmem:[#allocation60_spill] sm:$0xff] %v8841_v46  ;;  %v8843_v3 = vpop.f32.mrb[85].mxu1  ;;  %v4345_v26 = vmul.f32 %v8841_v46, %v8761_v20 }
 0x497   :  { %v4561_v47 = vadd.f32 %v4560_v43, %v4490_v6  ;;  %v4343_v8 = vmul.f32 %v8740_v58, %v8843_v3  ;;  %v4413_v39 = vadd.f32 %v4412_v55, %v4342_v17  ;;  %v8848_v4 = vpop.f32.mrb[86].mxu1  ;;  %v8862_v55 = vpop.permute.xlu0 %4210 }
 0x498   :  { %10418 = vst [vmem:[#allocation63_spill] sm:$0xff] %v8848_v4  ;;  %v8852_v40 = vpop.f32.mrb[87].mxu1  ;;  %v4346_v58 = vmul.f32 %v8848_v4, %v8769_v33  ;;  %v4494_v20 = vmul.f32 %v8841_v46, %v4345_v26 }
 0x499   :  { %10419 = vst [vmem:[#allocation62_spill] sm:$0xff] %v8852_v40  ;;  %v4414_v32 = vadd.f32 %v4413_v39, %v4343_v8  ;;  %v4492_v11 = vmul.f32 %v4343_v8, %v8843_v3  ;;  %v4562_v53 = vadd.f32 %v4561_v47, %v4491_v60  ;;  %v4344_v6 = vmul.f32 %v8752_v56, %v8852_v40  ;;  %v4216_v60 = vpop.permute.xlu1 %4215 }
 0x49a   :  { %v4495_v56 = vmul.f32 %v8848_v4, %v4346_v58 }
 0x49b   :  { %v4563_v43 = vadd.f32 %v4562_v53, %v4492_v11  ;;  %v4415_v17 = vadd.f32 %v4414_v32, %v4344_v6  ;;  %v4493_v15 = vmul.f32 %v4344_v6, %v8852_v40  ;;  %v4221_v4 = vpop.permute.xlu0 %4220 }
 0x49d   :  { %v4416_v19 = vadd.f32 %v4415_v17, %v4345_v26  ;;  %v4564_v5 = vadd.f32 %v4563_v43, %v4493_v15  ;;  %v8865_v39 = vpop.f32.mrb[88].mxu1 }
 0x49e   :  { %10420 = vst [vmem:[#allocation65_spill] sm:$0xff] %v8865_v39  ;;  %v8867_v8 = vpop.f32.mrb[89].mxu1  ;;  %v4349_v53 = vmul.f32 %v8865_v39, %v8797_v48 }
 0x49f   :  { %10421 = vst [vmem:[#allocation64_spill] sm:$0xff] %v8867_v8  ;;  %v4565_v47 = vadd.f32 %v4564_v5, %v4494_v20  ;;  %v4347_v33 = vmul.f32 %v8782_v27, %v8867_v8  ;;  %v4417_v32 = vadd.f32 %v4416_v19, %v4346_v58  ;;  %v8872_v11 = vpop.f32.mrb[90].mxu1  ;;  %v4226_v20 = vpop.permute.xlu1 %4225 }
 0x4a0   :  { %10422 = vst [vmem:[#allocation67_spill] sm:$0xff] %v8872_v11  ;;  %v8876_v6 = vpop.f32.mrb[91].mxu1  ;;  %v4350_v27 = vmul.f32 %v8872_v11, %v8811_v31  ;;  %v4498_v48 = vmul.f32 %v8865_v39, %v4349_v53 }
 0x4a1   :  { %10423 = vst [vmem:[#allocation66_spill] sm:$0xff] %v8876_v6  ;;  %v4418_v26 = vadd.f32 %v4417_v32, %v4347_v33  ;;  %v4496_v43 = vmul.f32 %v4347_v33, %v8867_v8  ;;  %v4566_v17 = vadd.f32 %v4565_v47, %v4495_v56  ;;  %v4348_v15 = vmul.f32 %v8790_v41, %v8876_v6 }
 0x4a2   :  { %v4499_v56 = vmul.f32 %v8872_v11, %v4350_v27 }
 0x4a3   :  { %v4567_v5 = vadd.f32 %v4566_v17, %v4496_v43  ;;  %v4419_v19 = vadd.f32 %v4418_v26, %v4348_v15  ;;  %v4497_v58 = vmul.f32 %v4348_v15, %v8876_v6  ;;  %v4231_v26 = vpop.permute.xlu0 %4230  ;;  %v4236_v11 = vpop.permute.xlu1 %4235 }
 0x4a5   :  { %v4420_v46 = vadd.f32 %v4419_v19, %v4349_v53  ;;  %v4568_v40 = vadd.f32 %v4567_v5, %v4497_v58  ;;  %v8885_v32 = vpop.f32.mrb[92].mxu1 }
 0x4a6   :  { %10424 = vst [vmem:[#allocation69_spill] sm:$0xff] %v8885_v32  ;;  %v8887_v33 = vpop.f32.mrb[93].mxu1  ;;  %v4353_v17 = vmul.f32 %v8885_v32, %v4196_v2 }
 0x4a7   :  { %v4569_v41 = vadd.f32 %v4568_v40, %v4498_v48  ;;  %v4351_v47 = vmul.f32 %v8816_v38, %v8887_v33  ;;  %v4421_v43 = vadd.f32 %v4420_v46, %v4350_v27  ;;  %v8892_v31 = vpop.f32.mrb[94].mxu1 }
 0x4a8   :  { %10425 = vst [vmem:[#allocation68_spill] sm:$0xff] %v8892_v31  ;;  %v8895_v15 = vpop.f32.mrb[95].mxu1  ;;  %v4354_v48 = vmul.f32 %v8892_v31, %v4201_v59  ;;  %v4502_v27 = vmul.f32 %v8885_v32, %v4353_v17 }
 0x4a9   :  { %v4422_v53 = vadd.f32 %v4421_v43, %v4351_v47  ;;  %v4500_v5 = vmul.f32 %v4351_v47, %v8887_v33  ;;  %v4570_v19 = vadd.f32 %v4569_v41, %v4499_v56  ;;  %v4352_v58 = vmul.f32 %v8828_v25, %v8895_v15  ;;  %v4241_v43 = vpop.permute.xlu0 %4240 }
 0x4aa   :  { %v4503_v56 = vmul.f32 %v8892_v31, %v4354_v48 }
 0x4ab   :  { %v4571_v40 = vadd.f32 %v4570_v19, %v4500_v5  ;;  %v4423_v38 = vadd.f32 %v4422_v53, %v4352_v58  ;;  %v4501_v46 = vmul.f32 %v4352_v58, %v8895_v15 }
 0x4ad   :  { %v4424_v39 = vadd.f32 %v4423_v38, %v4353_v17  ;;  %v4572_v2 = vadd.f32 %v4571_v40, %v4501_v46  ;;  %v8903_v6 = vpop.f32.mrb[96].mxu1  ;;  %v4246_v17 = vpop.permute.xlu1 %4245 }
 0x4ae   :  { %10426 = vst [vmem:[#allocation71_spill] sm:$0xff] %v8903_v6  ;;  %v8905_v8 = vpop.f32.mrb[97].mxu1  ;;  %v4357_v53 = vmul.f32 %v8903_v6, %v4216_v60 }
 0x4af   :  { %v4573_v41 = vadd.f32 %v4572_v2, %v4502_v27  ;;  %v4355_v25 = vmul.f32 %v8854_v29, %v8905_v8  ;;  %v4425_v47 = vadd.f32 %v4424_v39, %v4354_v48  ;;  %v8910_v59 = vpop.f32.mrb[98].mxu1  ;;  %v4251_v39 = vpop.permute.xlu0 %4250 }
 0x4b0   :  { %10427 = vst [vmem:[#allocation70_spill] sm:$0xff] %v8910_v59  ;;  %v8913_v5 = vpop.f32.mrb[99].mxu1  ;;  %v4358_v27 = vmul.f32 %v8910_v59, %v4221_v4  ;;  %v4506_v48 = vmul.f32 %v8903_v6, %v4357_v53 }
 0x4b1   :  { %10428 = vst [vmem:[#allocation72_spill] sm:$0xff] %v8913_v5  ;;  %v4426_v19 = vadd.f32 %v4425_v47, %v4355_v25  ;;  %v4504_v58 = vmul.f32 %v4355_v25, %v8905_v8  ;;  %v4574_v40 = vadd.f32 %v4573_v41, %v4503_v56  ;;  %v4356_v38 = vmul.f32 %v8862_v55, %v8913_v5  ;;  %v4256_v25 = vpop.permute.xlu1 %4255 }
 0x4b2   :  { %v4507_v56 = vmul.f32 %v8910_v59, %v4358_v27 }
 0x4b3   :  { %v4575_v46 = vadd.f32 %v4574_v40, %v4504_v58  ;;  %v4427_v2 = vadd.f32 %v4426_v19, %v4356_v38  ;;  %v4505_v29 = vmul.f32 %v4356_v38, %v8913_v5 }
 0x4b5   :  { %v4428_v60 = vadd.f32 %v4427_v2, %v4357_v53  ;;  %v4576_v31 = vadd.f32 %v4575_v46, %v4505_v29  ;;  %v8921_v32 = vpop.f32.mrb[100].mxu1  ;;  %v4261_v29 = vpop.permute.xlu0 %4260 }
 0x4b6   :  { %10429 = vst [vmem:[#allocation73_spill] sm:$0xff] %v8921_v32  ;;  %v8923_v47 = vpop.f32.mrb[101].mxu1  ;;  %v4361_v19 = vmul.f32 %v8921_v32, %v4236_v11 }
 0x4b7   :  { %v4577_v41 = vadd.f32 %v4576_v31, %v4506_v48  ;;  %v4359_v55 = vmul.f32 %v4226_v20, %v8923_v47  ;;  %v4429_v58 = vadd.f32 %v4428_v60, %v4358_v27  ;;  %v8927_v4 = vpop.f32.mrb[102].mxu1  ;;  %v4266_v27 = vpop.permute.xlu1 %4265 }
 0x4b8   :  { %10430 = vst [vmem:[#allocation74_spill] sm:$0xff] %v8927_v4  ;;  %v8930_v40 = vpop.f32.mrb[103].mxu1  ;;  %v4362_v59 = vmul.f32 %v8927_v4, %v4241_v43  ;;  %v4510_v48 = vmul.f32 %v8921_v32, %v4361_v19 }
 0x4b9   :  { %10431 = vst [vmem:[#allocation75_spill] sm:$0xff] %v8930_v40  ;;  %v4430_v38 = vadd.f32 %v4429_v58, %v4359_v55  ;;  %v4508_v53 = vmul.f32 %v4359_v55, %v8923_v47  ;;  %v4578_v46 = vadd.f32 %v4577_v41, %v4507_v56  ;;  %v4360_v2 = vmul.f32 %v4231_v26, %v8930_v40  ;;  %v4271_v43 = vpop.permute.xlu0 %4270 }
 0x4ba   :  { %v4511_v56 = vmul.f32 %v8927_v4, %v4362_v59 }
 0x4bb   :  { %v4579_v6 = vadd.f32 %v4578_v46, %v4508_v53  ;;  %v4431_v31 = vadd.f32 %v4430_v38, %v4360_v2  ;;  %v4509_v20 = vmul.f32 %v4360_v2, %v8930_v40 }
 0x4bd   :  { %v4432_v60 = vadd.f32 %v4431_v31, %v4361_v19  ;;  %v4580_v11 = vadd.f32 %v4579_v6, %v4509_v20  ;;  %v8937_v5 = vpop.f32.mrb[104].mxu1  ;;  %v4276_v20 = vpop.permute.xlu1 %4275 }
 0x4be   :  { %10432 = vst [vmem:[#allocation49_spill] sm:$0xff] %v8937_v5  ;;  %v8939_v58 = vpop.f32.mrb[105].mxu1  ;;  %v4365_v38 = vmul.f32 %v8937_v5, %v4256_v25  ;;  %v4281_v40 = vpop.permute.xlu0 %4280 }
 0x4bf   :  { %v4581_v41 = vadd.f32 %v4580_v11, %v4510_v48  ;;  %v4363_v26 = vmul.f32 %v4246_v17, %v8939_v58  ;;  %v4433_v55 = vadd.f32 %v4432_v60, %v4362_v59  ;;  %v8943_v53 = vpop.f32.mrb[106].mxu1 }
 0x4c0   :  { %10433 = vst [vmem:[#allocation47_spill] sm:$0xff] %v8943_v53  ;;  %v8946_v46 = vpop.f32.mrb[107].mxu1  ;;  %v4366_v48 = vmul.f32 %v8943_v53, %v4261_v29  ;;  %v4514_v17 = vmul.f32 %v8937_v5, %v4365_v38 }
 0x4c1   :  { %10434 = vst [vmem:[#allocation76_spill] sm:$0xff] %v8946_v46  ;;  %v4434_v2 = vadd.f32 %v4433_v55, %v4363_v26  ;;  %v4512_v6 = vmul.f32 %v4363_v26, %v8939_v58  ;;  %v4582_v19 = vadd.f32 %v4581_v41, %v4511_v56  ;;  %v4364_v31 = vmul.f32 %v4251_v39, %v8946_v46 }
 0x4c2   :  { %v4515_v56 = vmul.f32 %v8943_v53, %v4366_v48 }
 0x4c3   :  { %v4583_v32 = vadd.f32 %v4582_v19, %v4512_v6  ;;  %v4435_v11 = vadd.f32 %v4434_v2, %v4364_v31  ;;  %v4513_v59 = vmul.f32 %v4364_v31, %v8946_v46  ;;  %v4286_v19 = vpop.permute.xlu1 %4285 }
 0x4c5   :  { %v4436_v60 = vadd.f32 %v4435_v11, %v4365_v38  ;;  %v4584_v4 = vadd.f32 %v4583_v32, %v4513_v59  ;;  %v8953_v25 = vpop.f32.mrb[108].mxu1 }
 0x4c6   :  { %10435 = vst [vmem:[#allocation48_spill] sm:$0xff] %v8953_v25  ;;  %v8955_v55 = vpop.f32.mrb[109].mxu1  ;;  %v4369_v29 = vmul.f32 %v8953_v25, %v4276_v20 }
 0x4c7   :  { %10436 = vst [vmem:[#allocation77_spill] sm:$0xff] %v8955_v55  ;;  %v4585_v41 = vadd.f32 %v4584_v4, %v4514_v17  ;;  %v4367_v39 = vmul.f32 %v4266_v27, %v8955_v55  ;;  %v4437_v26 = vadd.f32 %v4436_v60, %v4366_v48  ;;  %v8959_v6 = vpop.f32.mrb[110].mxu1  ;;  %v4291_v48 = vpop.permute.xlu0 %4290 }
 0x4c8   :  { %10437 = vst [vmem:[#allocation52_spill] sm:$0xff] %v8959_v6  ;;  %v8962_v2 = vpop.f32.mrb[111].mxu1  ;;  %v4370_v53 = vmul.f32 %v8959_v6, %v4281_v40  ;;  %v4518_v17 = vmul.f32 %v8953_v25, %v4369_v29 }
 0x4c9   :  { %10438 = vst [vmem:[#allocation50_spill] sm:$0xff] %v8962_v2  ;;  %v4438_v38 = vadd.f32 %v4437_v26, %v4367_v39  ;;  %v4516_v32 = vmul.f32 %v4367_v39, %v8955_v55  ;;  %v4586_v31 = vadd.f32 %v4585_v41, %v4515_v56  ;;  %v4368_v11 = vmul.f32 %v4271_v43, %v8962_v2  ;;  %v4296_v26 = vpop.permute.xlu1 %4295 }
 0x4ca   :  { %v4519_v56 = vmul.f32 %v8959_v6, %v4370_v53 }
 0x4cb   :  { %v4587_v59 = vadd.f32 %v4586_v31, %v4516_v32  ;;  %v4439_v4 = vadd.f32 %v4438_v38, %v4368_v11  ;;  %v4517_v27 = vmul.f32 %v4368_v11, %v8962_v2 }
 0x4cd   :  { %v4440_v60 = vadd.f32 %v4439_v4, %v4369_v29  ;;  %v4588_v20 = vadd.f32 %v4587_v59, %v4517_v27  ;;  %v8969_v5 = vpop.f32.mrb[112].mxu1  ;;  %v4301_v4 = vpop.permute.xlu0 %4300 }
 0x4ce   :  { %10439 = vst [vmem:[#allocation79_spill] sm:$0xff] %v8969_v5  ;;  %v8971_v46 = vpop.f32.mrb[113].mxu1  ;;  %v4373_v38 = vmul.f32 %v8969_v5, %v4296_v26 }
 0x4cf   :  { %10440 = vst [vmem:[#allocation51_spill] sm:$0xff] %v8971_v46  ;;  %v4589_v41 = vadd.f32 %v4588_v20, %v4518_v17  ;;  %v4371_v43 = vmul.f32 %v4286_v19, %v8971_v46  ;;  %v4441_v39 = vadd.f32 %v4440_v60, %v4370_v53  ;;  %v8975_v40 = vpop.f32.mrb[114].mxu1 }
 0x4d0   :  { %v8978_v32 = vpop.f32.mrb[115].mxu1  ;;  %v4374_v6 = vmul.f32 %v8975_v40, %v4301_v4  ;;  %v4522_v53 = vmul.f32 %v8969_v5, %v4373_v38 }
 0x4d1   :  { %10441 = vst [vmem:[#allocation80_spill] sm:$0xff] %v8978_v32  ;;  %v4442_v31 = vadd.f32 %v4441_v39, %v4371_v43  ;;  %v4520_v29 = vmul.f32 %v4371_v43, %v8971_v46  ;;  %v4590_v11 = vadd.f32 %v4589_v41, %v4519_v56  ;;  %v4372_v59 = vmul.f32 %v4291_v48, %v8978_v32 }
 0x4d2   :  { %v4523_v26 = vmul.f32 %v8975_v40, %v4374_v6 }
 0x4d3   :  { %v4591_v27 = vadd.f32 %v4590_v11, %v4520_v29  ;;  %v4443_v17 = vadd.f32 %v4442_v31, %v4372_v59  ;;  %v4521_v19 = vmul.f32 %v4372_v59, %v8978_v32 }
 0x4d5   :  { %v4444_v60 = vadd.f32 %v4443_v17, %v4373_v38  ;;  %v4592_v20 = vadd.f32 %v4591_v27, %v4521_v19 }
 0x4d7   :  { %v4445_v25 = vadd.f32 %v4444_v60, %v4374_v6  ;;  %v4593_v39 = vadd.f32 %v4592_v20, %v4522_v53  ;;  %v8992_v53 = vld [vmem:[%s9877_s6] sm:$0x1] }
 0x4d8   :  { %v10442_v60 = vld [vmem:[#allocation78_spill] sm:$0xff] }
 0x4d9   :  { %v4446_v2 = vrot.slane %v4445_v25, 4  ;;  %v4594_v43 = vadd.f32 %v4593_v39, %v4523_v26 }
 0x4db   :  { %v4447_v56 = vadd.f32 %v4446_v2, %v4445_v25  ;;  %v4595_v41 = vrot.slane %v4594_v43, 4  ;;  %v3941_v25 = vld [vmem:[%s9876_s5] sm:$0x1] }
 0x4dd   :  { %v4448_v48 = vrot.slane %v4447_v56, 2  ;;  %v4596_v46 = vadd.f32 %v4595_v41, %v4594_v43  ;;  %v10444_v41 = vld [vmem:[#allocation46_spill] sm:$0xff] }
 0x4df   :  { %v4449_v29 = vadd.f32 %v4448_v48, %v4447_v56  ;;  %v4597_v11 = vrot.slane %v4596_v46, 2  ;;  %v10443_v56 = vld [vmem:[#allocation45_spill] sm:$0xff]  ;;  %v10445_v48 = vld [vmem:[#allocation56_spill] sm:$0xff] }
 0x4e1   :  { %v4450_v4 = vrot.slane %v4449_v29, 1  ;;  %v4598_v31 = vadd.f32 %v4597_v11, %v4596_v46  ;;  %v10447_v11 = vld [vmem:[#allocation55_spill] sm:$0xff] }
 0x4e3   :  { %v4451_v55 = vadd.f32 %v4450_v4, %v4449_v29  ;;  %v4599_v59 = vrot.slane %v4598_v31, 1  ;;  %v10446_v29 = vld [vmem:[#allocation59_spill] sm:$0xff]  ;;  %v10448_v4 = vld [vmem:[#allocation57_spill] sm:$0xff] }
 0x4e5   :  { %v4600_v32 = vadd.f32 %v4599_v59, %v4598_v31  ;;  %v4601_v5 = vmul.f32 0.001953125, %v4451_v55 }
 0x4e7   :  { %v4602_v38 = vmul.f32 0.001953125, %v4600_v32  ;;  %v4603_v27 = vmul.f32 %v4601_v5, %v4601_v5  ;;  %v10462_v32 = vld [vmem:[#allocation69_spill] sm:$0xff] }
 0x4e9   :  { %v4604_v17 = vsub.f32 %v4602_v38, %v4603_v27  ;;  %v10449_v27 = vld [vmem:[#allocation58_spill] sm:$0xff] }
 0x4eb   :  { %v4605_v19 = vadd.f32 1e-05, %v4604_v17 }
 0x4ed   :  { %5667 = vrsqrt.f32 %v4605_v19  ;;  %v10450_v19 = vld [vmem:[#allocation61_spill] sm:$0xff] }
 0x4f7   :  { %v5668_v6 = vpop.eup %5667 }
 0x4f8   :  { %v4607_v2 = vmul.f32 %v5668_v6, %v3941_v25 }
 0x4fa   :  { %v8994_v46 = vmul.f32 %v4607_v2, %v4601_v5  ;;  %v8997_v55 = vrot.slane %v4607_v2, %v10442_v60  ;;  %v10451_v2 = vld [vmem:[#allocation62_spill] sm:$0xff] }
 0x4fc   :  { %v9003_v20 = vmul.f32 %v8997_v55, %v8602_v45  ;;  %v9007_v26 = vmul.f32 %v8997_v55, %v8609_v30  ;;  %v9011_v39 = vmul.f32 %v8600_v61, %v8997_v55  ;;  %v9015_v5 = vmul.f32 %v8605_v28, %v8997_v55 }
 0x4fd   :  { %v9019_v43 = vmul.f32 %v8997_v55, %v8623_v7  ;;  %v9023_v45 = vmul.f32 %v8997_v55, %v8630_v52  ;;  %v9027_v30 = vmul.f32 %v8619_v35, %v8997_v55  ;;  %v9031_v61 = vmul.f32 %v8627_v0, %v8997_v55 }
 0x4fe   :  { %v9035_v28 = vmul.f32 %v8997_v55, %v8643_v16  ;;  %v9039_v7 = vmul.f32 %v8997_v55, %v8654_v1  ;;  %v9043_v52 = vmul.f32 %v8641_v10, %v8997_v55  ;;  %v9047_v35 = vmul.f32 %v8650_v37, %v8997_v55 }
 0x4ff   :  { %v9051_v0 = vmul.f32 %v8997_v55, %v8669_v24  ;;  %v9055_v16 = vmul.f32 %v8997_v55, %v8680_v50  ;;  %v9059_v1 = vmul.f32 %v8667_v18, %v8997_v55  ;;  %v9063_v10 = vmul.f32 %v8674_v14, %v8997_v55 }
 0x500   :  { %v9067_v37 = vmul.f32 %v8997_v55, %v8695_v34  ;;  %v9071_v24 = vmul.f32 %v8997_v55, %v8704_v42  ;;  %v9075_v50 = vmul.f32 %v8691_v23, %v8997_v55  ;;  %v9079_v18 = vmul.f32 %v8700_v62, %v8997_v55 }
 0x501   :  { %v9083_v14 = vmul.f32 %v8997_v55, %v8719_v63  ;;  %v9087_v34 = vmul.f32 %v8997_v55, %v8730_v12  ;;  %v9091_v42 = vmul.f32 %v8717_v13, %v8997_v55  ;;  %v9095_v23 = vmul.f32 %v8726_v54, %v8997_v55 }
 0x502   :  { %v9099_v62 = vmul.f32 %v8997_v55, %v8745_v36  ;;  %v9103_v63 = vmul.f32 %v8997_v55, %v8756_v51  ;;  %v9107_v12 = vmul.f32 %v8743_v22, %v8997_v55  ;;  %v9111_v13 = vmul.f32 %v8750_v44, %v8997_v55 }
 0x503   :  { %v9115_v54 = vmul.f32 %v8997_v55, %v8771_v49  ;;  %v9119_v36 = vmul.f32 %v8997_v55, %v8780_v57  ;;  %v9123_v51 = vmul.f32 %v10443_v56, %v8997_v55  ;;  %v9127_v22 = vmul.f32 %v10444_v41, %v8997_v55  ;;  %v10452_v56 = vld [vmem:[#allocation60_spill] sm:$0xff]  ;;  %v10453_v41 = vld [vmem:[#allocation63_spill] sm:$0xff] }
 0x504   :  { %v9131_v44 = vmul.f32 %v8997_v55, %v10445_v48  ;;  %v9135_v49 = vmul.f32 %v8997_v55, %v10446_v29  ;;  %v9139_v57 = vmul.f32 %v10447_v11, %v8997_v55  ;;  %v9143_v31 = vmul.f32 %v10448_v4, %v8997_v55  ;;  %v10454_v29 = vld [vmem:[#allocation64_spill] sm:$0xff]  ;;  %v10455_v4 = vld [vmem:[#allocation66_spill] sm:$0xff] }
 0x505   :  { %v9147_v59 = vmul.f32 %v8997_v55, %v8821_v21  ;;  %v9151_v38 = vmul.f32 %v8997_v55, %v8832_v9  ;;  %v9155_v17 = vmul.f32 %v10449_v27, %v8997_v55  ;;  %v9159_v25 = vmul.f32 %v10450_v19, %v8997_v55  ;;  %v10457_v27 = vld [vmem:[#allocation65_spill] sm:$0xff] }
 0x506   :  { %v9163_v6 = vmul.f32 %v8997_v55, %v8843_v3  ;;  %v9167_v21 = vmul.f32 %v8997_v55, %v10451_v2  ;;  %v9171_v9 = vmul.f32 %v10452_v56, %v8997_v55  ;;  %v9175_v48 = vmul.f32 %v10453_v41, %v8997_v55  ;;  %v10458_v2 = vld [vmem:[#allocation67_spill] sm:$0xff] }
 0x507   :  { %v9179_v11 = vmul.f32 %v8997_v55, %v10454_v29  ;;  %v9183_v3 = vmul.f32 %v8997_v55, %v10455_v4  ;;  %v9187_v19 = vmul.f32 %v10457_v27, %v8997_v55  ;;  %v9191_v56 = vmul.f32 %v10458_v2, %v8997_v55 }
 0x508   :  { %v9195_v41 = vmul.f32 %v8997_v55, %v8887_v33  ;;  %v9199_v29 = vmul.f32 %v8997_v55, %v8895_v15  ;;  %v9203_v4 = vmul.f32 %v10462_v32, %v8997_v55  ;;  %v9211_v2 = vmul.f32 %v8997_v55, %v8905_v8 }
 0x509   :  { %10456 = vst [vmem:[#allocation53_spill] sm:$0xff] %v9183_v3  ;;  %10459 = vst [vmem:[#allocation54_spill] sm:$0xff] %v9191_v56  ;;  %v10463_v3 = vld [vmem:[#allocation68_spill] sm:$0xff] }
 0x50a   :  { %10460 = vst [vmem:[#allocation6_spill] sm:$0xff] %v9195_v41  ;;  %10461 = vst [vmem:[#allocation7_spill] sm:$0xff] %v9199_v29  ;;  %v9207_v27 = vmul.f32 %v10463_v3, %v8997_v55  ;;  %v10466_v56 = vld [vmem:[#allocation72_spill] sm:$0xff]  ;;  %v10468_v41 = vld [vmem:[#allocation71_spill] sm:$0xff]  ;;  %v9227_v3 = vmul.f32 %v8997_v55, %v8923_v47 }
 0x50b   :  { %10465 = vst [vmem:[#allocation5_spill] sm:$0xff] %v9211_v2  ;;  %v9215_v33 = vmul.f32 %v8997_v55, %v10466_v56  ;;  %v9219_v15 = vmul.f32 %v10468_v41, %v8997_v55  ;;  %v10469_v29 = vld [vmem:[#allocation70_spill] sm:$0xff]  ;;  %v10474_v2 = vld [vmem:[#allocation73_spill] sm:$0xff] }
 0x50c   :  { %10464 = vst [vmem:[#allocation4_spill] sm:$0xff] %v9207_v27  ;;  %v9223_v32 = vmul.f32 %v10469_v29, %v8997_v55  ;;  %10471 = vst [vmem:[#allocation8_spill] sm:$0xff] %v9227_v3  ;;  %v10472_v27 = vld [vmem:[#allocation75_spill] sm:$0xff]  ;;  %v9235_v56 = vmul.f32 %v10474_v2, %v8997_v55  ;;  %v9243_v29 = vmul.f32 %v8997_v55, %v8939_v58  ;;  %v10481_v3 = vld [vmem:[#allocation49_spill] sm:$0xff] }
 0x50d   :  { %10467 = vst [vmem:[#allocation10_spill] sm:$0xff] %v9215_v33  ;;  %v9231_v8 = vmul.f32 %v8997_v55, %v10472_v27  ;;  %v10476_v33 = vld [vmem:[#allocation74_spill] sm:$0xff]  ;;  %v9251_v27 = vmul.f32 %v10481_v3, %v8997_v55 }
 0x50e   :  { %10470 = vst [vmem:[#allocation11_spill] sm:$0xff] %v9223_v32  ;;  %10475 = vst [vmem:[#allocation16_spill] sm:$0xff] %v9235_v56  ;;  %v9239_v41 = vmul.f32 %v10476_v33, %v8997_v55  ;;  %v10479_v32 = vld [vmem:[#allocation76_spill] sm:$0xff]  ;;  %v10485_v56 = vld [vmem:[#allocation77_spill] sm:$0xff] }
 0x50f   :  { %10473 = vst [vmem:[#allocation9_spill] sm:$0xff] %v9231_v8  ;;  %10478 = vst [vmem:[#allocation12_spill] sm:$0xff] %v9243_v29  ;;  %v9247_v47 = vmul.f32 %v8997_v55, %v10479_v32  ;;  %v10483_v8 = vld [vmem:[#allocation47_spill] sm:$0xff]  ;;  %v9259_v33 = vmul.f32 %v8997_v55, %v10485_v56  ;;  %v10488_v29 = vld [vmem:[#allocation48_spill] sm:$0xff] }
 0x510   :  { %10477 = vst [vmem:[#allocation18_spill] sm:$0xff] %v9239_v41  ;;  %10482 = vst [vmem:[#allocation24_spill] sm:$0xff] %v9251_v27  ;;  %v9255_v2 = vmul.f32 %v10483_v8, %v8997_v55  ;;  %v10487_v41 = vld [vmem:[#allocation50_spill] sm:$0xff]  ;;  %v9267_v32 = vmul.f32 %v10488_v29, %v8997_v55  ;;  %v10491_v27 = vld [vmem:[#allocation51_spill] sm:$0xff]  ;;  %v9287_v29 = vmul.f32 %v8975_v40, %v8997_v55 }
 0x511   :  { %10480 = vst [vmem:[#allocation14_spill] sm:$0xff] %v9247_v47  ;;  %10486 = vst [vmem:[#allocation22_spill] sm:$0xff] %v9259_v33  ;;  %v9263_v58 = vmul.f32 %v8997_v55, %v10487_v41  ;;  %v10489_v47 = vld [vmem:[#allocation52_spill] sm:$0xff]  ;;  %v9275_v8 = vmul.f32 %v8997_v55, %v10491_v27  ;;  %v10493_v33 = vld [vmem:[#allocation79_spill] sm:$0xff] }
 0x512   :  { %10484 = vst [vmem:[#allocation20_spill] sm:$0xff] %v9255_v2  ;;  %v9271_v3 = vmul.f32 %v10489_v47, %v8997_v55  ;;  %v10492_v2 = vld [vmem:[#allocation80_spill] sm:$0xff]  ;;  %v9283_v41 = vmul.f32 %v10493_v33, %v8997_v55  ;;  %v10494_v47 = vsub.f32 %v8992_v53, %v8994_v46 }
 0x513   :  { %v9279_v56 = vmul.f32 %v8997_v55, %v10492_v2 }
 0x514   :  { %10490 = vst [vmem:[#allocation26_spill] sm:$0xff] %v9271_v3  ;;  %v9293_v3 = vrot.slane %v10494_v47, %v10442_v60  ;;  %v10501_v47 = vld [vmem:[#allocation7_spill] sm:$0xff] }
 0x516   :  { %v9297_v27 = vadd.f32 %v9293_v3, %v9003_v20  ;;  %v9301_v2 = vadd.f32 %v9293_v3, %v9007_v26  ;;  %v9305_v33 = vadd.f32 %v9293_v3, %v9011_v39  ;;  %v9309_v40 = vadd.f32 %v9293_v3, %v9015_v5 }
 0x517   :  { %v9313_v53 = vadd.f32 %v9293_v3, %v9019_v43  ;;  %v9317_v46 = vadd.f32 %v9293_v3, %v9023_v45  ;;  %v9321_v60 = vadd.f32 %v9293_v3, %v9027_v30  ;;  %v9325_v55 = vadd.f32 %v9293_v3, %v9031_v61 }
 0x518   :  { %v9329_v20 = vadd.f32 %v9293_v3, %v9035_v28  ;;  %v9333_v26 = vadd.f32 %v9293_v3, %v9039_v7  ;;  %v9337_v39 = vadd.f32 %v9293_v3, %v9043_v52  ;;  %v9341_v5 = vadd.f32 %v9293_v3, %v9047_v35 }
 0x519   :  { %v9345_v43 = vadd.f32 %v9293_v3, %v9051_v0  ;;  %v9349_v45 = vadd.f32 %v9293_v3, %v9055_v16  ;;  %v9353_v30 = vadd.f32 %v9293_v3, %v9059_v1  ;;  %v9357_v61 = vadd.f32 %v9293_v3, %v9063_v10 }
 0x51a   :  { %v9361_v28 = vadd.f32 %v9293_v3, %v9067_v37  ;;  %v9365_v7 = vadd.f32 %v9293_v3, %v9071_v24  ;;  %v9369_v52 = vadd.f32 %v9293_v3, %v9075_v50  ;;  %v9373_v35 = vadd.f32 %v9293_v3, %v9079_v18 }
 0x51b   :  { %v9377_v0 = vadd.f32 %v9293_v3, %v9083_v14  ;;  %v9381_v16 = vadd.f32 %v9293_v3, %v9087_v34  ;;  %v9385_v1 = vadd.f32 %v9293_v3, %v9091_v42  ;;  %v9389_v10 = vadd.f32 %v9293_v3, %v9095_v23 }
 0x51c   :  { %v9393_v37 = vadd.f32 %v9293_v3, %v9099_v62  ;;  %v9397_v24 = vadd.f32 %v9293_v3, %v9103_v63  ;;  %v9401_v50 = vadd.f32 %v9293_v3, %v9107_v12  ;;  %v9405_v18 = vadd.f32 %v9293_v3, %v9111_v13 }
 0x51d   :  { %v9409_v14 = vadd.f32 %v9293_v3, %v9115_v54  ;;  %v9413_v34 = vadd.f32 %v9293_v3, %v9119_v36  ;;  %v9417_v42 = vadd.f32 %v9293_v3, %v9123_v51  ;;  %v9421_v23 = vadd.f32 %v9293_v3, %v9127_v22 }
 0x51e   :  { %v9425_v62 = vadd.f32 %v9293_v3, %v9131_v44  ;;  %v9429_v63 = vadd.f32 %v9293_v3, %v9135_v49  ;;  %v9433_v12 = vadd.f32 %v9293_v3, %v9139_v57  ;;  %v9437_v13 = vadd.f32 %v9293_v3, %v9143_v31 }
 0x51f   :  { %v9441_v54 = vadd.f32 %v9293_v3, %v9147_v59  ;;  %v9445_v36 = vadd.f32 %v9293_v3, %v9151_v38  ;;  %v9449_v51 = vadd.f32 %v9293_v3, %v9155_v17  ;;  %v9453_v22 = vadd.f32 %v9293_v3, %v9159_v25  ;;  %v10495_v38 = vld [vmem:[#allocation53_spill] sm:$0xff] }
 0x520   :  { %v9457_v44 = vadd.f32 %v9293_v3, %v9163_v6  ;;  %v9461_v49 = vadd.f32 %v9293_v3, %v9167_v21  ;;  %v9465_v57 = vadd.f32 %v9293_v3, %v9171_v9  ;;  %v9469_v31 = vadd.f32 %v9293_v3, %v9175_v48  ;;  %v10498_v6 = vld [vmem:[#allocation54_spill] sm:$0xff] }
 0x521   :  { %v9473_v59 = vadd.f32 %v9293_v3, %v9179_v11  ;;  %v9477_v17 = vadd.f32 %v9293_v3, %v10495_v38  ;;  %v9481_v25 = vadd.f32 %v9293_v3, %v9187_v19  ;;  %v9485_v21 = vadd.f32 %v9293_v3, %v10498_v6  ;;  %v10500_v9 = vld [vmem:[#allocation6_spill] sm:$0xff] }
 0x522   :  { %v9489_v48 = vadd.f32 %v9293_v3, %v10500_v9  ;;  %v9493_v11 = vadd.f32 %v9293_v3, %v10501_v47  ;;  %v9497_v38 = vadd.f32 %v9293_v3, %v9203_v4  ;;  %v9513_v47 = vadd.f32 %v9293_v3, %v9219_v15 }
 0x523   :  { %10496 = vst [vmem:[#allocation28_spill] sm:$0xff] %v9477_v17  ;;  %10497 = vst [vmem:[#allocation13_spill] sm:$0xff] %v9481_v25  ;;  %v10504_v17 = vld [vmem:[#allocation4_spill] sm:$0xff]  ;;  %v10506_v25 = vld [vmem:[#allocation5_spill] sm:$0xff] }
 0x524   :  { %10499 = vst [vmem:[#allocation15_spill] sm:$0xff] %v9485_v21  ;;  %10502 = vst [vmem:[#allocation30_spill] sm:$0xff] %v9493_v11  ;;  %v9501_v19 = vadd.f32 %v9293_v3, %v10504_v17  ;;  %v9505_v6 = vadd.f32 %v9293_v3, %v10506_v25  ;;  %v10508_v21 = vld [vmem:[#allocation10_spill] sm:$0xff]  ;;  %v10511_v11 = vld [vmem:[#allocation11_spill] sm:$0xff] }
 0x525   :  { %10503 = vst [vmem:[#allocation32_spill] sm:$0xff] %v9497_v38  ;;  %v9509_v9 = vadd.f32 %v9293_v3, %v10508_v21  ;;  %10510 = vst [vmem:[#allocation19_spill] sm:$0xff] %v9513_v47  ;;  %v9517_v4 = vadd.f32 %v9293_v3, %v10511_v11  ;;  %v10513_v38 = vld [vmem:[#allocation8_spill] sm:$0xff] }
 0x526   :  { %10505 = vst [vmem:[#allocation21_spill] sm:$0xff] %v9501_v19  ;;  %10507 = vst [vmem:[#allocation81_spill] sm:$0xff] %v9505_v6  ;;  %v9521_v17 = vadd.f32 %v9293_v3, %v10513_v38  ;;  %v10515_v19 = vld [vmem:[#allocation9_spill] sm:$0xff]  ;;  %v10517_v6 = vld [vmem:[#allocation16_spill] sm:$0xff] }
 0x527   :  { %10509 = vst [vmem:[#allocation17_spill] sm:$0xff] %v9509_v9  ;;  %10512 = vst [vmem:[#allocation44_spill] sm:$0xff] %v9517_v4  ;;  %v9525_v25 = vadd.f32 %v9293_v3, %v10515_v19  ;;  %v9529_v21 = vadd.f32 %v9293_v3, %v10517_v6  ;;  %v10519_v9 = vld [vmem:[#allocation18_spill] sm:$0xff]  ;;  %v10520_v47 = vld [vmem:[#allocation12_spill] sm:$0xff] }
 0x528   :  { %10514 = vst [vmem:[#allocation43_spill] sm:$0xff] %v9521_v17  ;;  %v9533_v15 = vadd.f32 %v9293_v3, %v10519_v9  ;;  %v9537_v11 = vadd.f32 %v9293_v3, %v10520_v47  ;;  %v10521_v4 = vld [vmem:[#allocation14_spill] sm:$0xff]  ;;  %v10523_v17 = vld [vmem:[#allocation24_spill] sm:$0xff]  ;;  %v9557_v47 = vadd.f32 %v9293_v3, %v9263_v58  ;;  %v9577_v58 = vadd.f32 %v9293_v3, %v9283_v41 }
 0x529   :  { %10516 = vst [vmem:[#allocation23_spill] sm:$0xff] %v9525_v25  ;;  %10518 = vst [vmem:[#allocation25_spill] sm:$0xff] %v9529_v21  ;;  %v9541_v38 = vadd.f32 %v9293_v3, %v10521_v4  ;;  %v9545_v19 = vadd.f32 %v9293_v3, %v10523_v17  ;;  %v10524_v25 = vld [vmem:[#allocation20_spill] sm:$0xff]  ;;  %v10525_v21 = vld [vmem:[#allocation22_spill] sm:$0xff]  ;;  %v9561_v4 = vadd.f32 %v9293_v3, %v9267_v32  ;;  %v4773_v41 = vmax.f32 %v9325_v55, 0.0 }
 0x52a   :  { %v9549_v6 = vadd.f32 %v9293_v3, %v10524_v25  ;;  %v9553_v9 = vadd.f32 %v9293_v3, %v10525_v21  ;;  %v9569_v25 = vadd.f32 %v9293_v3, %v9275_v8  ;;  %v9573_v21 = vadd.f32 %v9293_v3, %v9279_v56  ;;  %10531 = vst [vmem:[#allocation34_spill] sm:$0xff] %v9577_v58 }
 0x52b   :  { %10522 = vst [vmem:[#allocation27_spill] sm:$0xff] %v9541_v38  ;;  %10526 = vst [vmem:[#allocation29_spill] sm:$0xff] %v9561_v4  ;;  %v10527_v38 = vld [vmem:[#allocation26_spill] sm:$0xff]  ;;  %v9581_v32 = vadd.f32 %v9293_v3, %v9287_v29  ;;  %v4766_v4 = vmax.f32 %v9297_v27, 0.0  ;;  %v4769_v8 = vmax.f32 %v9309_v40, 0.0  ;;  %v4771_v56 = vmax.f32 %v9317_v46, 0.0 }
 0x52c   :  { %v9565_v17 = vadd.f32 %v9293_v3, %v10527_v38  ;;  %10529 = vst [vmem:[#allocation31_spill] sm:$0xff] %v9569_v25  ;;  %10530 = vst [vmem:[#allocation33_spill] sm:$0xff] %v9573_v21  ;;  %v4767_v38 = vmax.f32 %v9301_v2, 0.0  ;;  %v4770_v25 = vmax.f32 %v9313_v53, 0.0  ;;  %v4772_v21 = vmax.f32 %v9321_v60, 0.0 }
 0x52d   :  { %v4774_v58 = vmax.f32 %v9329_v20, 0.0  ;;  %v4775_v3 = vmax.f32 %v9333_v26, 0.0  ;;  %v4776_v29 = vmax.f32 %v9337_v39, 0.0  ;;  %v4777_v27 = vmax.f32 %v9341_v5, 0.0  ;;  %4838 = vst [vmem:[%s9878_s7] sm:$0xff] %v4766_v4  ;;  %4841 = vst [vmem:[%s9878_s7 + $0x18] sm:$0xff] %v4769_v8  ;;  %v10537_v4 = vld [vmem:[#allocation21_spill] sm:$0xff] }
 0x52e   :  { %10528 = vst [vmem:[#allocation41_spill] sm:$0xff] %v9565_v17  ;;  %v4768_v17 = vmax.f32 %v9305_v33, 0.0  ;;  %4839 = vst [vmem:[%s9878_s7 + $0x8] sm:$0xff] %v4767_v38  ;;  %v4778_v2 = vmax.f32 %v9345_v43, 0.0  ;;  %v4779_v33 = vmax.f32 %v9349_v45, 0.0  ;;  %v4780_v40 = vmax.f32 %v9353_v30, 0.0 }
 0x52f   :  { %v4781_v53 = vmax.f32 %v9357_v61, 0.0  ;;  %4842 = vst [vmem:[%s9878_s7 + $0x20] sm:$0xff] %v4770_v25  ;;  %4843 = vst [vmem:[%s9878_s7 + $0x28] sm:$0xff] %v4771_v56  ;;  %v4782_v46 = vmax.f32 %v9361_v28, 0.0  ;;  %v4783_v60 = vmax.f32 %v9365_v7, 0.0  ;;  %v4784_v55 = vmax.f32 %v9369_v52, 0.0 }
 0x530   :  { %4840 = vst [vmem:[%s9878_s7 + $0x10] sm:$0xff] %v4768_v17  ;;  %4844 = vst [vmem:[%s9878_s7 + $0x30] sm:$0xff] %v4772_v21  ;;  %v4785_v20 = vmax.f32 %v9373_v35, 0.0  ;;  %v4786_v26 = vmax.f32 %v9377_v0, 0.0  ;;  %v4787_v39 = vmax.f32 %v9381_v16, 0.0  ;;  %v4788_v5 = vmax.f32 %v9385_v1, 0.0 }
 0x531   :  { %4845 = vst [vmem:[%s9878_s7 + $0x38] sm:$0xff] %v4773_v41  ;;  %4846 = vst [vmem:[%s9878_s7 + $0x40] sm:$0xff] %v4774_v58  ;;  %v4789_v43 = vmax.f32 %v9389_v10, 0.0  ;;  %v4790_v45 = vmax.f32 %v9393_v37, 0.0  ;;  %v4791_v30 = vmax.f32 %v9397_v24, 0.0  ;;  %v4792_v61 = vmax.f32 %v9401_v50, 0.0 }
 0x532   :  { %4847 = vst [vmem:[%s9878_s7 + $0x48] sm:$0xff] %v4775_v3  ;;  %4848 = vst [vmem:[%s9878_s7 + $0x50] sm:$0xff] %v4776_v29  ;;  %v4793_v28 = vmax.f32 %v9405_v18, 0.0  ;;  %v4794_v7 = vmax.f32 %v9409_v14, 0.0  ;;  %v4795_v52 = vmax.f32 %v9413_v34, 0.0  ;;  %v4796_v35 = vmax.f32 %v9417_v42, 0.0 }
 0x533   :  { %4849 = vst [vmem:[%s9878_s7 + $0x58] sm:$0xff] %v4777_v27  ;;  %4850 = vst [vmem:[%s9878_s7 + $0x60] sm:$0xff] %v4778_v2  ;;  %v4797_v0 = vmax.f32 %v9421_v23, 0.0  ;;  %v4798_v16 = vmax.f32 %v9425_v62, 0.0  ;;  %v4799_v1 = vmax.f32 %v9429_v63, 0.0  ;;  %v4800_v10 = vmax.f32 %v9433_v12, 0.0 }
 0x534   :  { %4851 = vst [vmem:[%s9878_s7 + $0x68] sm:$0xff] %v4779_v33  ;;  %4852 = vst [vmem:[%s9878_s7 + $0x70] sm:$0xff] %v4780_v40  ;;  %v4801_v37 = vmax.f32 %v9437_v13, 0.0  ;;  %v4802_v24 = vmax.f32 %v9441_v54, 0.0  ;;  %v4803_v50 = vmax.f32 %v9445_v36, 0.0  ;;  %v4804_v18 = vmax.f32 %v9449_v51, 0.0 }
 0x535   :  { %4853 = vst [vmem:[%s9878_s7 + $0x78] sm:$0xff] %v4781_v53  ;;  %4854 = vst [vmem:[%s9878_s7 + $0x80] sm:$0xff] %v4782_v46  ;;  %v4805_v14 = vmax.f32 %v9453_v22, 0.0  ;;  %v4806_v34 = vmax.f32 %v9457_v44, 0.0  ;;  %v4807_v42 = vmax.f32 %v9461_v49, 0.0  ;;  %v4808_v23 = vmax.f32 %v9465_v57, 0.0 }
 0x536   :  { %4855 = vst [vmem:[%s9878_s7 + $0x88] sm:$0xff] %v4783_v60  ;;  %4856 = vst [vmem:[%s9878_s7 + $0x90] sm:$0xff] %v4784_v55  ;;  %v4809_v62 = vmax.f32 %v9469_v31, 0.0  ;;  %v4810_v63 = vmax.f32 %v9473_v59, 0.0  ;;  %v10532_v12 = vld [vmem:[#allocation28_spill] sm:$0xff]  ;;  %v10533_v54 = vld [vmem:[#allocation13_spill] sm:$0xff] }
 0x537   :  { %4857 = vst [vmem:[%s9878_s7 + $0x98] sm:$0xff] %v4785_v20  ;;  %4858 = vst [vmem:[%s9878_s7 + $0xa0] sm:$0xff] %v4786_v26  ;;  %v4811_v13 = vmax.f32 %v10532_v12, 0.0  ;;  %v4812_v36 = vmax.f32 %v10533_v54, 0.0  ;;  %v10534_v51 = vld [vmem:[#allocation15_spill] sm:$0xff]  ;;  %v4814_v44 = vmax.f32 %v9489_v48, 0.0 }
 0x538   :  { %4859 = vst [vmem:[%s9878_s7 + $0xa8] sm:$0xff] %v4787_v39  ;;  %4860 = vst [vmem:[%s9878_s7 + $0xb0] sm:$0xff] %v4788_v5  ;;  %v4813_v22 = vmax.f32 %v10534_v51, 0.0  ;;  %v10535_v49 = vld [vmem:[#allocation30_spill] sm:$0xff]  ;;  %v10536_v31 = vld [vmem:[#allocation32_spill] sm:$0xff]  ;;  %v4817_v17 = vmax.f32 %v10537_v4, 0.0 }
 0x539   :  { %4861 = vst [vmem:[%s9878_s7 + $0xb8] sm:$0xff] %v4789_v43  ;;  %4862 = vst [vmem:[%s9878_s7 + $0xc0] sm:$0xff] %v4790_v45  ;;  %v4815_v57 = vmax.f32 %v10535_v49, 0.0  ;;  %v4816_v59 = vmax.f32 %v10536_v31, 0.0  ;;  %v10538_v48 = vld [vmem:[#allocation81_spill] sm:$0xff]  ;;  %v10540_v38 = vld [vmem:[#allocation19_spill] sm:$0xff] }
 0x53a   :  { %4863 = vst [vmem:[%s9878_s7 + $0xc8] sm:$0xff] %v4791_v30  ;;  %4864 = vst [vmem:[%s9878_s7 + $0xd0] sm:$0xff] %v4792_v61  ;;  %v4818_v25 = vmax.f32 %v10538_v48, 0.0  ;;  %v10539_v21 = vld [vmem:[#allocation17_spill] sm:$0xff]  ;;  %v4820_v8 = vmax.f32 %v10540_v38, 0.0  ;;  %v10541_v56 = vld [vmem:[#allocation44_spill] sm:$0xff] }
 0x53b   :  { %4865 = vst [vmem:[%s9878_s7 + $0xd8] sm:$0xff] %v4793_v28  ;;  %4866 = vst [vmem:[%s9878_s7 + $0xe0] sm:$0xff] %v4794_v7  ;;  %v4819_v58 = vmax.f32 %v10539_v21, 0.0  ;;  %v4821_v41 = vmax.f32 %v10541_v56, 0.0  ;;  %v10542_v3 = vld [vmem:[#allocation43_spill] sm:$0xff]  ;;  %v10544_v33 = vld [vmem:[#allocation25_spill] sm:$0xff] }
 0x53c   :  { %4867 = vst [vmem:[%s9878_s7 + $0xe8] sm:$0xff] %v4795_v52  ;;  %4868 = vst [vmem:[%s9878_s7 + $0xf0] sm:$0xff] %v4796_v35  ;;  %v4822_v29 = vmax.f32 %v10542_v3, 0.0  ;;  %v10543_v27 = vld [vmem:[#allocation23_spill] sm:$0xff]  ;;  %v4824_v40 = vmax.f32 %v10544_v33, 0.0  ;;  %v4825_v53 = vmax.f32 %v9533_v15, 0.0 }
 0x53d   :  { %4869 = vst [vmem:[%s9878_s7 + $0xf8] sm:$0xff] %v4797_v0  ;;  %4870 = vst [vmem:[%s9878_s7 + $0x100] sm:$0xff] %v4798_v16  ;;  %v4823_v2 = vmax.f32 %v10543_v27, 0.0  ;;  %v4826_v46 = vmax.f32 %v9537_v11, 0.0  ;;  %v10545_v60 = vld [vmem:[#allocation27_spill] sm:$0xff]  ;;  %v4828_v55 = vmax.f32 %v9545_v19, 0.0 }
 0x53e   :  { %4871 = vst [vmem:[%s9878_s7 + $0x108] sm:$0xff] %v4799_v1  ;;  %4872 = vst [vmem:[%s9878_s7 + $0x110] sm:$0xff] %v4800_v10  ;;  %v4827_v15 = vmax.f32 %v10545_v60, 0.0  ;;  %v4829_v20 = vmax.f32 %v9549_v6, 0.0  ;;  %v4830_v11 = vmax.f32 %v9553_v9, 0.0  ;;  %v4831_v19 = vmax.f32 %v9557_v47, 0.0 }
 0x53f   :  { %4873 = vst [vmem:[%s9878_s7 + $0x118] sm:$0xff] %v4801_v37  ;;  %4874 = vst [vmem:[%s9878_s7 + $0x120] sm:$0xff] %v4802_v24  ;;  %v10546_v6 = vld [vmem:[#allocation29_spill] sm:$0xff]  ;;  %v10548_v9 = vld [vmem:[#allocation31_spill] sm:$0xff]  ;;  %v4837_v28 = vmax.f32 %v9581_v32, 0.0 }
 0x540   :  { %4875 = vst [vmem:[%s9878_s7 + $0x128] sm:$0xff] %v4803_v50  ;;  %4876 = vst [vmem:[%s9878_s7 + $0x130] sm:$0xff] %v4804_v18  ;;  %v4832_v26 = vmax.f32 %v10546_v6, 0.0  ;;  %v10547_v39 = vld [vmem:[#allocation41_spill] sm:$0xff]  ;;  %v4834_v47 = vmax.f32 %v10548_v9, 0.0  ;;  %v10550_v30 = vld [vmem:[#allocation34_spill] sm:$0xff] }
 0x541   :  { %4877 = vst [vmem:[%s9878_s7 + $0x138] sm:$0xff] %v4805_v14  ;;  %4878 = vst [vmem:[%s9878_s7 + $0x140] sm:$0xff] %v4806_v34  ;;  %v4833_v5 = vmax.f32 %v10547_v39, 0.0  ;;  %v10549_v43 = vld [vmem:[#allocation33_spill] sm:$0xff]  ;;  %v4836_v61 = vmax.f32 %v10550_v30, 0.0 }
 0x542   :  { %4879 = vst [vmem:[%s9878_s7 + $0x148] sm:$0xff] %v4807_v42  ;;  %4880 = vst [vmem:[%s9878_s7 + $0x150] sm:$0xff] %v4808_v23  ;;  %v4835_v45 = vmax.f32 %v10549_v43, 0.0 }
 0x543   :  { %4881 = vst [vmem:[%s9878_s7 + $0x158] sm:$0xff] %v4809_v62  ;;  %4882 = vst [vmem:[%s9878_s7 + $0x160] sm:$0xff] %v4810_v63 }
 0x544   :  { %4883 = vst [vmem:[%s9878_s7 + $0x168] sm:$0xff] %v4811_v13  ;;  %4884 = vst [vmem:[%s9878_s7 + $0x170] sm:$0xff] %v4812_v36 }
 0x545   :  { %4885 = vst [vmem:[%s9878_s7 + $0x178] sm:$0xff] %v4813_v22  ;;  %4886 = vst [vmem:[%s9878_s7 + $0x180] sm:$0xff] %v4814_v44 }
 0x546   :  { %4887 = vst [vmem:[%s9878_s7 + $0x188] sm:$0xff] %v4815_v57  ;;  %4888 = vst [vmem:[%s9878_s7 + $0x190] sm:$0xff] %v4816_v59 }
 0x547   :  { %4889 = vst [vmem:[%s9878_s7 + $0x198] sm:$0xff] %v4817_v17  ;;  %4890 = vst [vmem:[%s9878_s7 + $0x1a0] sm:$0xff] %v4818_v25 }
 0x548   :  { %4891 = vst [vmem:[%s9878_s7 + $0x1a8] sm:$0xff] %v4819_v58  ;;  %4892 = vst [vmem:[%s9878_s7 + $0x1b0] sm:$0xff] %v4820_v8 }
 0x549   :  { %4893 = vst [vmem:[%s9878_s7 + $0x1b8] sm:$0xff] %v4821_v41  ;;  %4894 = vst [vmem:[%s9878_s7 + $0x1c0] sm:$0xff] %v4822_v29 }
 0x54a   :  { %4895 = vst [vmem:[%s9878_s7 + $0x1c8] sm:$0xff] %v4823_v2  ;;  %4896 = vst [vmem:[%s9878_s7 + $0x1d0] sm:$0xff] %v4824_v40 }
 0x54b   :  { %4897 = vst [vmem:[%s9878_s7 + $0x1d8] sm:$0xff] %v4825_v53  ;;  %4898 = vst [vmem:[%s9878_s7 + $0x1e0] sm:$0xff] %v4826_v46 }
 0x54c   :  { %4899 = vst [vmem:[%s9878_s7 + $0x1e8] sm:$0xff] %v4827_v15  ;;  %4900 = vst [vmem:[%s9878_s7 + $0x1f0] sm:$0xff] %v4828_v55 }
 0x54d   :  { %4901 = vst [vmem:[%s9878_s7 + $0x1f8] sm:$0xff] %v4829_v20  ;;  %4902 = vst [vmem:[%s9878_s7 + $0x200] sm:$0xff] %v4830_v11 }
 0x54e   :  { %4903 = vst [vmem:[%s9878_s7 + $0x208] sm:$0xff] %v4831_v19  ;;  %4904 = vst [vmem:[%s9878_s7 + $0x210] sm:$0xff] %v4832_v26 }
 0x54f   :  { %4905 = vst [vmem:[%s9878_s7 + $0x218] sm:$0xff] %v4833_v5  ;;  %4906 = vst [vmem:[%s9878_s7 + $0x220] sm:$0xff] %v4834_v47 }
 0x550   :  { %4907 = vst [vmem:[%s9878_s7 + $0x228] sm:$0xff] %v4835_v45  ;;  %4908 = vst [vmem:[%s9878_s7 + $0x230] sm:$0xff] %v4836_v61 }
 0x551   :  { %4909 = vst [vmem:[%s9878_s7 + $0x238] sm:$0xff] %v4837_v28 }

</bundles_post_ra>
